<compile_context>
chip_gen: v7x
topology: tpu7x:2x2x1
jax: 0.10.0
libtpu: 0.0.40
codegen_flags: <defaults>
</compile_context>

<pallas_src>
import functools

import jax
import jax.numpy as jnp
from jax.experimental import pallas as pl
from jax.experimental.pallas import tpu as pltpu

D_MODEL = 416          # transformer d_model (from the module)
N_HEADS = 8
HEAD_DIM = D_MODEL // N_HEADS   # 52 (true head dim; used for the softmax scale)
DH_PAD = 64                     # zero-padded head dim for lane alignment
FFN_DIM = 2048                  # PyTorch TransformerEncoderLayer default
N_LAYERS = 4
LN_EPS = 1e-5


def _pick_tile(m, cap=512):
    """Largest power-of-two row tile <= cap that divides m (else the full dim)."""
    for t in (512, 256, 128, 64, 32, 16, 8):
        if t <= cap and m % t == 0:
            return t
    return m


def _layernorm(x, g, b):
    mu = jnp.mean(x, axis=-1, keepdims=True)
    xc = x - mu
    var = jnp.mean(xc * xc, axis=-1, keepdims=True)
    return xc * jax.lax.rsqrt(var + LN_EPS) * g + b


# --------------------------------------------------------------------------
# Kernel 1: tiled matmul + bias (+ ReLU) — conv-as-im2col path
# --------------------------------------------------------------------------
def _matmul_bias_kernel(x_ref, w_ref, b_ref, o_ref, *, activation):
    acc = jnp.dot(x_ref[...].astype(jnp.bfloat16), w_ref[...],
                  preferred_element_type=jnp.float32)
    acc = acc + b_ref[...]
    if activation == "relu":
        acc = jnp.maximum(acc, 0.0)
    o_ref[...] = acc.astype(o_ref.dtype)


def pallas_linear(x, w, b, activation=None, block_m=512):
    """act(x @ w + b): x (M,K); w cast to bf16; f32 accumulation; M tiled."""
    M, K = x.shape
    N = w.shape[1]
    tm = _pick_tile(M, block_m)
    return pl.pallas_call(
        functools.partial(_matmul_bias_kernel, activation=activation),
        out_shape=jax.ShapeDtypeStruct((M, N), jnp.float32),
        grid=(M // tm,),
        in_specs=[pl.BlockSpec((tm, K), lambda i: (i, 0)),
                  pl.BlockSpec((K, N), lambda i: (0, 0)),      # resident weights
                  pl.BlockSpec((1, N), lambda i: (0, 0))],
        out_specs=pl.BlockSpec((tm, N), lambda i: (i, 0)),
        compiler_params=pltpu.CompilerParams(
            dimension_semantics=("parallel",)),
    )(x, w.astype(jnp.bfloat16), b.reshape(1, N).astype(jnp.float32))


# --------------------------------------------------------------------------
# Kernel 2: fused global-average-pool + classifier linear
# --------------------------------------------------------------------------
def _gap_classifier_kernel(x_ref, w_ref, b_ref, o_ref):
    pooled = jnp.mean(x_ref[...], axis=-1)                      # (tb, C) f32
    o_ref[...] = (jnp.dot(pooled.astype(jnp.bfloat16), w_ref[...],
                          preferred_element_type=jnp.float32) + b_ref[...])


def pallas_gap_classifier(x, w_bf16, b):
    Bt, C, HW = x.shape
    N = w_bf16.shape[1]
    tb = _pick_tile(Bt, 256)
    return pl.pallas_call(
        _gap_classifier_kernel,
        out_shape=jax.ShapeDtypeStruct((Bt, N), jnp.float32),
        grid=(Bt // tb,),
        in_specs=[pl.BlockSpec((tb, C, HW), lambda i: (i, 0, 0)),
                  pl.BlockSpec((C, N), lambda i: (0, 0)),
                  pl.BlockSpec((1, N), lambda i: (0, 0))],
        out_specs=pl.BlockSpec((tb, N), lambda i: (i, 0)),
        compiler_params=pltpu.CompilerParams(
            dimension_semantics=("parallel",)),
    )(x, w_bf16, b.reshape(1, N).astype(jnp.float32))


# --------------------------------------------------------------------------
# Kernel 3: fused transformer encoder layer
#   x block: (1, S, D) where S = B (sequence axis of batch_first=False) and
#   the grid runs over N = _T (the attention batch) — each block is fully
#   independent, so the grid axis is "parallel".
# --------------------------------------------------------------------------
def _encoder_layer_kernel(x_ref,
                          wq_ref, bq_ref, wk_ref, bk_ref, wv_ref, bv_ref,
                          wo_ref, bo_ref, ln1g_ref, ln1b_ref,
                          w1_ref, b1_ref, w2_ref, b2_ref, ln2g_ref, ln2b_ref,
                          o_ref, *, scale):
    x = x_ref[0]                                   # (S, D) f32 residual stream
    xb = x.astype(jnp.bfloat16)

    # ---- multi-head self-attention (heads unrolled; Dh zero-padded 52->64) ----
    attn = jnp.zeros_like(x)                       # f32 accumulator (S, D)
    for h in range(N_HEADS):
        q = jnp.dot(xb, wq_ref[h], preferred_element_type=jnp.float32) + bq_ref[h]
        k = jnp.dot(xb, wk_ref[h], preferred_element_type=jnp.float32) + bk_ref[h]
        v = jnp.dot(xb, wv_ref[h], preferred_element_type=jnp.float32) + bv_ref[h]
        s = jax.lax.dot_general(
            q.astype(jnp.bfloat16), k.astype(jnp.bfloat16),
            dimension_numbers=(((1,), (1,)), ((), ())),
            preferred_element_type=jnp.float32) * scale        # (S, S) f32
        s = s - jnp.max(s, axis=-1, keepdims=True)
        p = jnp.exp(s)                                          # f32 softmax
        p = p * pl.reciprocal(jnp.sum(p, axis=-1, keepdims=True), approx=True)
        ah = jnp.dot(p.astype(jnp.bfloat16), v.astype(jnp.bfloat16),
                     preferred_element_type=jnp.float32)        # (S, 64)
        attn = attn + jnp.dot(ah.astype(jnp.bfloat16), wo_ref[h],
                              preferred_element_type=jnp.float32)
    attn = attn + bo_ref[...]
    y = _layernorm(x + attn, ln1g_ref[...], ln1b_ref[...])      # post-norm, f32

    # ---- feed-forward block (ReLU) ----
    hmid = jnp.dot(y.astype(jnp.bfloat16), w1_ref[...],
                   preferred_element_type=jnp.float32) + b1_ref[...]
    hmid = jnp.maximum(hmid, 0.0)
    y2 = jnp.dot(hmid.astype(jnp.bfloat16), w2_ref[...],
                 preferred_element_type=jnp.float32) + b2_ref[...]
    o_ref[0] = _layernorm(y + y2, ln2g_ref[...], ln2b_ref[...])


def pallas_encoder_layer(x_nsd, p):
    """x_nsd: (N=_T, S=B, D).  One fused kernel per layer, grid over N."""
    N, S, D = x_nsd.shape
    ins = [p["wq"], p["bq"], p["wk"], p["bk"], p["wv"], p["bv"],
           p["wo"], p["bo"], p["ln1_g"], p["ln1_b"],
           p["w1"], p["b1"], p["w2"], p["b2"], p["ln2_g"], p["ln2_b"]]

    def resident(a):
        nd = a.ndim
        return pl.BlockSpec(a.shape, lambda n, _nd=nd: (0,) * _nd)

    return pl.pallas_call(
        functools.partial(_encoder_layer_kernel, scale=1.0 / (HEAD_DIM ** 0.5)),
        out_shape=jax.ShapeDtypeStruct((N, S, D), jnp.float32),
        grid=(N,),
        in_specs=[pl.BlockSpec((1, S, D), lambda n: (n, 0, 0))]
                 + [resident(a) for a in ins],
        out_specs=pl.BlockSpec((1, S, D), lambda n: (n, 0, 0)),
        compiler_params=pltpu.CompilerParams(
            dimension_semantics=("parallel",),
            vmem_limit_bytes=48 * 1024 * 1024),   # fits v7x's 64 MiB with headroom
    )(x_nsd, *ins)


# --------------------------------------------------------------------------
# Glue (reshapes / im2col) around the Pallas kernels
# --------------------------------------------------------------------------
def conv2d(x, w, b, *, stride, pad, activation="relu"):
    """NCHW conv via im2col + Pallas matmul. w: (Cout, Cin, k, k)."""
    # TODO(synk): replace im2col (9x input duplication) with a direct Pallas conv.
    B, Cin, H, W = x.shape
    Cout, _, k, _ = w.shape
    xp = jnp.pad(x, ((0, 0), (0, 0), (pad, pad), (pad, pad)))
    Ho = (H + 2 * pad - k) // stride + 1
    Wo = (W + 2 * pad - k) // stride + 1
    cols = []
    for dy in range(k):
        for dx in range(k):
            cols.append(xp[:, :,
                           dy: dy + stride * (Ho - 1) + 1: stride,
                           dx: dx + stride * (Wo - 1) + 1: stride])
    patches = jnp.stack(cols, axis=2)                     # (B, Cin, k*k, Ho, Wo)
    patches = patches.transpose(0, 3, 4, 1, 2).reshape(B * Ho * Wo, Cin * k * k)
    w_mat = w.reshape(Cout, Cin * k * k).T                # (Cin*k*k, Cout)
    out = pallas_linear(patches.astype(jnp.bfloat16), w_mat, b,
                        activation=activation)
    return out.reshape(B, Ho, Wo, Cout).transpose(0, 3, 1, 2)


def frame_conformer_forward(params, x, *, frame_length):
    """x: (B, C=1, Freq, T) NCHW, T divisible by frame_length."""
    B, C, Freq, T = x.shape
    _T = T // frame_length
    # == torch .view(B*_T, 1, Freq, frame_length) on a contiguous tensor
    x = x.reshape(B * _T, 1, Freq, frame_length)

    # ---- backbone.features (synthetic MobileNet-style conv stack) ----
    h = conv2d(x, params["conv1_w"], params["conv1_b"], stride=2, pad=1)
    h = conv2d(h, params["conv2_w"], params["conv2_b"], stride=2, pad=1)
    features = h                                            # (B*_T, 32, F/4, fl/4)

    # ---- backbone.classifier: fused GAP + Linear(-> 416) ----
    Bt, Cf, Hf, Wf = h.shape
    tokens = pallas_gap_classifier(h.reshape(Bt, Cf, Hf * Wf),
                                   params["cls_w"], params["cls_b"])  # (B*_T, 416)

    # ---- transformer encoder (seq axis = B, batch axis = _T, as in PyTorch) ----
    z = tokens.reshape(B, _T, D_MODEL)         # (S=B, N=_T, D)
    z = z.transpose(1, 0, 2)                   # (N, S, D): attention batches leading
    for layer_params in params["layers"]:
        z = pallas_encoder_layer(z, layer_params)
    z = z.transpose(1, 0, 2).reshape(B, _T, D_MODEL)

    # TODO(synk): vision-conditioning branch (repeat_interleave + concat +
    # condition_classifier) is only exercised when `vision is not None`;
    # the default vision=None path is implemented here.
    return z, features


# --------------------------------------------------------------------------
# Deterministic parameter initialization (synthetic, no checkpoint) + packing
# --------------------------------------------------------------------------
def init_params(key):
    keys = iter(jax.random.split(key, 64))

    def rnd(shape, scale):
        return jax.random.normal(next(keys), shape, jnp.float32) * scale

    params = {
        "conv1_w": rnd((16, 1, 3, 3), 0.1),  "conv1_b": jnp.zeros((16,), jnp.float32),
        "conv2_w": rnd((32, 16, 3, 3), 0.1), "conv2_b": jnp.zeros((32,), jnp.float32),
        "cls_w":   rnd((32, D_MODEL), 0.05), "cls_b":   jnp.zeros((D_MODEL,), jnp.float32),
        "layers": [],
        # condition_classifier (416 + 512 -> 416), used only in the vision branch
        "cond_w": rnd((D_MODEL + 512, D_MODEL), 0.02),
        "cond_b": jnp.zeros((D_MODEL,), jnp.float32),
    }
    for _ in range(N_LAYERS):
        params["layers"].append({
            "w_qkv": rnd((D_MODEL, 3 * D_MODEL), 0.02),
            "b_qkv": jnp.zeros((3 * D_MODEL,), jnp.float32),
            "w_out": rnd((D_MODEL, D_MODEL), 0.02),
            "b_out": jnp.zeros((D_MODEL,), jnp.float32),
            "w_ff1": rnd((D_MODEL, FFN_DIM), 0.02),
            "b_ff1": jnp.zeros((FFN_DIM,), jnp.float32),
            "w_ff2": rnd((FFN_DIM, D_MODEL), 0.02),
            "b_ff2": jnp.zeros((D_MODEL,), jnp.float32),
            "ln1_g": jnp.ones((D_MODEL,), jnp.float32),
            "ln1_b": jnp.zeros((D_MODEL,), jnp.float32),
            "ln2_g": jnp.ones((D_MODEL,), jnp.float32),
            "ln2_b": jnp.zeros((D_MODEL,), jnp.float32),
        })
    return params


def prepare_params(raw):
    """Pack checkpoint-layout f32 params into the kernel layout:
    bf16 MXU weights, head-stacked q/k/v/out with Dh zero-padded 52 -> 64."""
    prep = {
        "conv1_w": raw["conv1_w"], "conv1_b": raw["conv1_b"],
        "conv2_w": raw["conv2_w"], "conv2_b": raw["conv2_b"],
        "cls_w": raw["cls_w"].astype(jnp.bfloat16),
        "cls_b": raw["cls_b"],
        "layers": [],
    }
    pad = DH_PAD - HEAD_DIM

    def pack_w(w):   # (D, D) -> (H, D, DH_PAD) bf16, zero-padded head dim
        w = w.reshape(D_MODEL, N_HEADS, HEAD_DIM).transpose(1, 0, 2)
        return jnp.pad(w, ((0, 0), (0, 0), (0, pad))).astype(jnp.bfloat16)

    def pack_b(b):   # (D,) -> (H, 1, DH_PAD) f32, zero-padded
        b = b.reshape(N_HEADS, 1, HEAD_DIM)
        return jnp.pad(b, ((0, 0), (0, 0), (0, pad))).astype(jnp.float32)

    for lp in raw["layers"]:
        wq, wk, wv = jnp.split(lp["w_qkv"], 3, axis=1)       # each (D, D)
        bq, bk, bv = jnp.split(lp["b_qkv"], 3)
        wo = lp["w_out"].reshape(N_HEADS, HEAD_DIM, D_MODEL)
        wo = jnp.pad(wo, ((0, 0), (0, pad), (0, 0))).astype(jnp.bfloat16)
        prep["layers"].append({
            "wq": pack_w(wq), "bq": pack_b(bq),
            "wk": pack_w(wk), "bk": pack_b(bk),
            "wv": pack_w(wv), "bv": pack_b(bv),
            "wo": wo,
            "bo": lp["b_out"].reshape(1, D_MODEL),
            "ln1_g": lp["ln1_g"].reshape(1, D_MODEL),
            "ln1_b": lp["ln1_b"].reshape(1, D_MODEL),
            "w1": lp["w_ff1"].astype(jnp.bfloat16),
            "b1": lp["b_ff1"].reshape(1, FFN_DIM),
            "w2": lp["w_ff2"].astype(jnp.bfloat16),
            "b2": lp["b_ff2"].reshape(1, D_MODEL),
            "ln2_g": lp["ln2_g"].reshape(1, D_MODEL),
            "ln2_b": lp["ln2_b"].reshape(1, D_MODEL),
        })
    return prep


if __name__ == "__main__":
    key = jax.random.PRNGKey(0)
    pkey, xkey = jax.random.split(key)
    raw_params = init_params(pkey)
    params = prepare_params(raw_params)

    # Small shapes consistent with the module's forward: (B, C=1, Freq, T)
    frame_length = 8
    B, C, Freq, T = 2, 1, 16, 32          # _T = T // frame_length = 4
    x = jax.random.normal(xkey, (B, C, Freq, T), jnp.float32)

    fwd = jax.jit(functools.partial(frame_conformer_forward,
                                    frame_length=frame_length))
    out, feats = fwd(params, x)
    jax.block_until_ready((out, feats))

    assert out.shape == (B, T // frame_length, D_MODEL)
    assert feats.shape == (B * (T // frame_length), 32, Freq // 4, frame_length // 4)
    print("KERNEL_OK")
</pallas_src>

<mosaic_0001>
module attributes {stable_mosaic.version = 11 : i64} {
  func.func @_matmul_bias_kernel(%arg0: i32, %arg1: memref<256x9xbf16, #tpu.memory_space<vmem>>, %arg2: memref<9x16xbf16, #tpu.memory_space<vmem>>, %arg3: memref<1x16xf32, #tpu.memory_space<vmem>>, %arg4: memref<256x16xf32, #tpu.memory_space<vmem>>) attributes {dimension_semantics = [#tpu.dimension_semantics<parallel>], iteration_bounds = array<i64: 1>, scalar_prefetch = 0 : i64, scratch_operands = 0 : i64, tpu.core_type = #tpu.core_type<tc>, window_params = [{transform_indices = @transform_0, window_bounds = array<i64: 256, 9>}, {pipeline_mode = #tpu.pipeline_mode<synchronous>, transform_indices = @transform_1, window_bounds = array<i64: 9, 16>}, {pipeline_mode = #tpu.pipeline_mode<synchronous>, transform_indices = @transform_2, window_bounds = array<i64: 1, 16>}, {transform_indices = @transform_3, window_bounds = array<i64: 256, 16>}]} {
    %c0 = arith.constant 0 : index
    %c0_0 = arith.constant 0 : index
    %0 = vector.load %arg1[%c0, %c0_0] : memref<256x9xbf16, #tpu.memory_space<vmem>>, vector<256x9xbf16>
    %c0_1 = arith.constant 0 : index
    %c0_2 = arith.constant 0 : index
    %1 = vector.load %arg2[%c0_1, %c0_2] : memref<9x16xbf16, #tpu.memory_space<vmem>>, vector<9x16xbf16>
    %cst = arith.constant dense<0.000000e+00> : vector<256x16xf32>
    %2 = tpu.matmul %0, %1, %cst {dimension_numbers = #tpu.dot_dimension_numbers<[1], [0], [0], [1], [0, 0, 1, 1], [], []>} : vector<256x9xbf16>, vector<9x16xbf16>, vector<256x16xf32> -> vector<256x16xf32>
    %c0_3 = arith.constant 0 : index
    %c0_4 = arith.constant 0 : index
    %3 = vector.load %arg3[%c0_3, %c0_4] : memref<1x16xf32, #tpu.memory_space<vmem>>, vector<1x16xf32>
    %4 = vector.broadcast %3 : vector<1x16xf32> to vector<256x16xf32>
    %5 = arith.addf %2, %4 : vector<256x16xf32>
    %cst_5 = arith.constant 0.000000e+00 : f32
    %6 = vector.broadcast %cst_5 : f32 to vector<256x16xf32>
    %7 = arith.maximumf %5, %6 : vector<256x16xf32>
    %c0_6 = arith.constant 0 : index
    %c0_7 = arith.constant 0 : index
    %8 = vector.load %arg4[%c0_6, %c0_7] : memref<256x16xf32, #tpu.memory_space<vmem>>, vector<256x16xf32>
    tpu.vector_store %arg4[%c0_6, %c0_7], %7 {strides = array<i32>} : memref<256x16xf32, #tpu.memory_space<vmem>>, vector<256x16xf32>,
    return
  }
  func.func @transform_0(%arg0: i32) -> (i32, i32) {
    %c0_i32 = arith.constant 0 : i32
    %c0_i32_0 = arith.constant 0 : i32
    return %arg0, %c0_i32 : i32, i32
  }
  func.func @transform_1(%arg0: i32) -> (i32, i32) {
    %c0_i32 = arith.constant 0 : i32
    %c0_i32_0 = arith.constant 0 : i32
    %c0_i32_1 = arith.constant 0 : i32
    return %c0_i32, %c0_i32_0 : i32, i32
  }
  func.func @transform_2(%arg0: i32) -> (i32, i32) {
    %c0_i32 = arith.constant 0 : i32
    %c0_i32_0 = arith.constant 0 : i32
    %c0_i32_1 = arith.constant 0 : i32
    return %c0_i32, %c0_i32_0 : i32, i32
  }
  func.func @transform_3(%arg0: i32) -> (i32, i32) {
    %c0_i32 = arith.constant 0 : i32
    %c0_i32_0 = arith.constant 0 : i32
    return %arg0, %c0_i32 : i32, i32
  }
}

module attributes {stable_mosaic.version = 11 : i64} {
  func.func @_matmul_bias_kernel(%arg0: i32, %arg1: memref<64x144xbf16, #tpu.memory_space<vmem>>, %arg2: memref<144x32xbf16, #tpu.memory_space<vmem>>, %arg3: memref<1x32xf32, #tpu.memory_space<vmem>>, %arg4: memref<64x32xf32, #tpu.memory_space<vmem>>) attributes {dimension_semantics = [#tpu.dimension_semantics<parallel>], iteration_bounds = array<i64: 1>, scalar_prefetch = 0 : i64, scratch_operands = 0 : i64, tpu.core_type = #tpu.core_type<tc>, window_params = [{transform_indices = @transform_0, window_bounds = array<i64: 64, 144>}, {pipeline_mode = #tpu.pipeline_mode<synchronous>, transform_indices = @transform_1, window_bounds = array<i64: 144, 32>}, {pipeline_mode = #tpu.pipeline_mode<synchronous>, transform_indices = @transform_2, window_bounds = array<i64: 1, 32>}, {transform_indices = @transform_3, window_bounds = array<i64: 64, 32>}]} {
    %c0 = arith.constant 0 : index
    %c0_0 = arith.constant 0 : index
    %0 = vector.load %arg1[%c0, %c0_0] : memref<64x144xbf16, #tpu.memory_space<vmem>>, vector<64x144xbf16>
    %c0_1 = arith.constant 0 : index
    %c0_2 = arith.constant 0 : index
    %1 = vector.load %arg2[%c0_1, %c0_2] : memref<144x32xbf16, #tpu.memory_space<vmem>>, vector<144x32xbf16>
    %cst = arith.constant dense<0.000000e+00> : vector<64x32xf32>
    %2 = tpu.matmul %0, %1, %cst {dimension_numbers = #tpu.dot_dimension_numbers<[1], [0], [0], [1], [0, 0, 1, 1], [], []>} : vector<64x144xbf16>, vector<144x32xbf16>, vector<64x32xf32> -> vector<64x32xf32>
    %c0_3 = arith.constant 0 : index
    %c0_4 = arith.constant 0 : index
    %3 = vector.load %arg3[%c0_3, %c0_4] : memref<1x32xf32, #tpu.memory_space<vmem>>, vector<1x32xf32>
    %4 = vector.broadcast %3 : vector<1x32xf32> to vector<64x32xf32>
    %5 = arith.addf %2, %4 : vector<64x32xf32>
    %cst_5 = arith.constant 0.000000e+00 : f32
    %6 = vector.broadcast %cst_5 : f32 to vector<64x32xf32>
    %7 = arith.maximumf %5, %6 : vector<64x32xf32>
    %c0_6 = arith.constant 0 : index
    %c0_7 = arith.constant 0 : index
    %8 = vector.load %arg4[%c0_6, %c0_7] : memref<64x32xf32, #tpu.memory_space<vmem>>, vector<64x32xf32>
    tpu.vector_store %arg4[%c0_6, %c0_7], %7 {strides = array<i32>} : memref<64x32xf32, #tpu.memory_space<vmem>>, vector<64x32xf32>,
    return
  }
  func.func @transform_0(%arg0: i32) -> (i32, i32) {
    %c0_i32 = arith.constant 0 : i32
    %c0_i32_0 = arith.constant 0 : i32
    return %arg0, %c0_i32 : i32, i32
  }
  func.func @transform_1(%arg0: i32) -> (i32, i32) {
    %c0_i32 = arith.constant 0 : i32
    %c0_i32_0 = arith.constant 0 : i32
    %c0_i32_1 = arith.constant 0 : i32
    return %c0_i32, %c0_i32_0 : i32, i32
  }
  func.func @transform_2(%arg0: i32) -> (i32, i32) {
    %c0_i32 = arith.constant 0 : i32
    %c0_i32_0 = arith.constant 0 : i32
    %c0_i32_1 = arith.constant 0 : i32
    return %c0_i32, %c0_i32_0 : i32, i32
  }
  func.func @transform_3(%arg0: i32) -> (i32, i32) {
    %c0_i32 = arith.constant 0 : i32
    %c0_i32_0 = arith.constant 0 : i32
    return %arg0, %c0_i32 : i32, i32
  }
}

module attributes {stable_mosaic.version = 11 : i64} {
  func.func @_gap_classifier_kernel(%arg0: i32, %arg1: memref<8x32x8xf32, #tpu.memory_space<vmem>>, %arg2: memref<32x416xbf16, #tpu.memory_space<vmem>>, %arg3: memref<1x416xf32, #tpu.memory_space<vmem>>, %arg4: memref<8x416xf32, #tpu.memory_space<vmem>>) attributes {dimension_semantics = [#tpu.dimension_semantics<parallel>], iteration_bounds = array<i64: 1>, scalar_prefetch = 0 : i64, scratch_operands = 0 : i64, tpu.core_type = #tpu.core_type<tc>, window_params = [{transform_indices = @transform_0, window_bounds = array<i64: 8, 32, 8>}, {pipeline_mode = #tpu.pipeline_mode<synchronous>, transform_indices = @transform_1, window_bounds = array<i64: 32, 416>}, {pipeline_mode = #tpu.pipeline_mode<synchronous>, transform_indices = @transform_2, window_bounds = array<i64: 1, 416>}, {transform_indices = @transform_3, window_bounds = array<i64: 8, 416>}]} {
    %c0 = arith.constant 0 : index
    %c0_0 = arith.constant 0 : index
    %c0_1 = arith.constant 0 : index
    %0 = vector.load %arg1[%c0, %c0_0, %c0_1] : memref<8x32x8xf32, #tpu.memory_space<vmem>>, vector<8x32x8xf32>
    %cst = arith.constant dense<0.000000e+00> : vector<8x32xf32>
    %1 = vector.multi_reduction <add>, %0, %cst [2] : vector<8x32x8xf32> to vector<8x32xf32>
    %cst_2 = arith.constant 8.000000e+00 : f32
    %2 = vector.broadcast %cst_2 : f32 to vector<8x32xf32>
    %3 = arith.divf %1, %2 : vector<8x32xf32>
    %4 = arith.truncf %3 : vector<8x32xf32> to vector<8x32xbf16>
    %c0_3 = arith.constant 0 : index
    %c0_4 = arith.constant 0 : index
    %5 = vector.load %arg2[%c0_3, %c0_4] : memref<32x416xbf16, #tpu.memory_space<vmem>>, vector<32x416xbf16>
    %cst_5 = arith.constant dense<0.000000e+00> : vector<8x416xf32>
    %6 = tpu.matmul %4, %5, %cst_5 {dimension_numbers = #tpu.dot_dimension_numbers<[1], [0], [0], [1], [0, 0, 1, 1], [], []>} : vector<8x32xbf16>, vector<32x416xbf16>, vector<8x416xf32> -> vector<8x416xf32>
    %c0_6 = arith.constant 0 : index
    %c0_7 = arith.constant 0 : index
    %7 = vector.load %arg3[%c0_6, %c0_7] : memref<1x416xf32, #tpu.memory_space<vmem>>, vector<1x416xf32>
    %8 = vector.broadcast %7 : vector<1x416xf32> to vector<8x416xf32>
    %9 = arith.addf %6, %8 : vector<8x416xf32>
    %c0_8 = arith.constant 0 : index
    %c0_9 = arith.constant 0 : index
    %10 = vector.load %arg4[%c0_8, %c0_9] : memref<8x416xf32, #tpu.memory_space<vmem>>, vector<8x416xf32>
    tpu.vector_store %arg4[%c0_8, %c0_9], %9 {strides = array<i32>} : memref<8x416xf32, #tpu.memory_space<vmem>>, vector<8x416xf32>,
    return
  }
  func.func @transform_0(%arg0: i32) -> (i32, i32, i32) {
    %c0_i32 = arith.constant 0 : i32
    %c0_i32_0 = arith.constant 0 : i32
    %c0_i32_1 = arith.constant 0 : i32
    return %arg0, %c0_i32, %c0_i32_0 : i32, i32, i32
  }
  func.func @transform_1(%arg0: i32) -> (i32, i32) {
    %c0_i32 = arith.constant 0 : i32
    %c0_i32_0 = arith.constant 0 : i32
    %c0_i32_1 = arith.constant 0 : i32
    return %c0_i32, %c0_i32_0 : i32, i32
  }
  func.func @transform_2(%arg0: i32) -> (i32, i32) {
    %c0_i32 = arith.constant 0 : i32
    %c0_i32_0 = arith.constant 0 : i32
    %c0_i32_1 = arith.constant 0 : i32
    return %c0_i32, %c0_i32_0 : i32, i32
  }
  func.func @transform_3(%arg0: i32) -> (i32, i32) {
    %c0_i32 = arith.constant 0 : i32
    %c0_i32_0 = arith.constant 0 : i32
    return %arg0, %c0_i32 : i32, i32
  }
}

module attributes {stable_mosaic.version = 11 : i64} {
  func.func @_encoder_layer_kernel(%arg0: i32, %arg1: memref<1x2x416xf32, #tpu.memory_space<vmem>>, %arg2: memref<8x416x64xbf16, #tpu.memory_space<vmem>>, %arg3: memref<8x1x64xf32, #tpu.memory_space<vmem>>, %arg4: memref<8x416x64xbf16, #tpu.memory_space<vmem>>, %arg5: memref<8x1x64xf32, #tpu.memory_space<vmem>>, %arg6: memref<8x416x64xbf16, #tpu.memory_space<vmem>>, %arg7: memref<8x1x64xf32, #tpu.memory_space<vmem>>, %arg8: memref<8x64x416xbf16, #tpu.memory_space<vmem>>, %arg9: memref<1x416xf32, #tpu.memory_space<vmem>>, %arg10: memref<1x416xf32, #tpu.memory_space<vmem>>, %arg11: memref<1x416xf32, #tpu.memory_space<vmem>>, %arg12: memref<416x2048xbf16, #tpu.memory_space<vmem>>, %arg13: memref<1x2048xf32, #tpu.memory_space<vmem>>, %arg14: memref<2048x416xbf16, #tpu.memory_space<vmem>>, %arg15: memref<1x416xf32, #tpu.memory_space<vmem>>, %arg16: memref<1x416xf32, #tpu.memory_space<vmem>>, %arg17: memref<1x416xf32, #tpu.memory_space<vmem>>, %arg18: memref<1x2x416xf32, #tpu.memory_space<vmem>>) attributes {dimension_semantics = [#tpu.dimension_semantics<parallel>], iteration_bounds = array<i64: 4>, scalar_prefetch = 0 : i64, scratch_operands = 0 : i64, tpu.core_type = #tpu.core_type<tc>, window_params = [{transform_indices = @transform_0, window_bounds = array<i64: 1, 2, 416>}, {pipeline_mode = #tpu.pipeline_mode<synchronous>, transform_indices = @transform_1, window_bounds = array<i64: 8, 416, 64>}, {pipeline_mode = #tpu.pipeline_mode<synchronous>, transform_indices = @transform_2, window_bounds = array<i64: 8, 1, 64>}, {pipeline_mode = #tpu.pipeline_mode<synchronous>, transform_indices = @transform_3, window_bounds = array<i64: 8, 416, 64>}, {pipeline_mode = #tpu.pipeline_mode<synchronous>, transform_indices = @transform_4, window_bounds = array<i64: 8, 1, 64>}, {pipeline_mode = #tpu.pipeline_mode<synchronous>, transform_indices = @transform_5, window_bounds = array<i64: 8, 416, 64>}, {pipeline_mode = #tpu.pipeline_mode<synchronous>, transform_indices = @transform_6, window_bounds = array<i64: 8, 1, 64>}, {pipeline_mode = #tpu.pipeline_mode<synchronous>, transform_indices = @transform_7, window_bounds = array<i64: 8, 64, 416>}, {pipeline_mode = #tpu.pipeline_mode<synchronous>, transform_indices = @transform_8, window_bounds = array<i64: 1, 416>}, {pipeline_mode = #tpu.pipeline_mode<synchronous>, transform_indices = @transform_9, window_bounds = array<i64: 1, 416>}, {pipeline_mode = #tpu.pipeline_mode<synchronous>, transform_indices = @transform_10, window_bounds = array<i64: 1, 416>}, {pipeline_mode = #tpu.pipeline_mode<synchronous>, transform_indices = @transform_11, window_bounds = array<i64: 416, 2048>}, {pipeline_mode = #tpu.pipeline_mode<synchronous>, transform_indices = @transform_12, window_bounds = array<i64: 1, 2048>}, {pipeline_mode = #tpu.pipeline_mode<synchronous>, transform_indices = @transform_13, window_bounds = array<i64: 2048, 416>}, {pipeline_mode = #tpu.pipeline_mode<synchronous>, transform_indices = @transform_14, window_bounds = array<i64: 1, 416>}, {pipeline_mode = #tpu.pipeline_mode<synchronous>, transform_indices = @transform_15, window_bounds = array<i64: 1, 416>}, {pipeline_mode = #tpu.pipeline_mode<synchronous>, transform_indices = @transform_16, window_bounds = array<i64: 1, 416>}, {transform_indices = @transform_17, window_bounds = array<i64: 1, 2, 416>}]} {
    %c0 = arith.constant 0 : index
    %c0_0 = arith.constant 0 : index
    %c0_1 = arith.constant 0 : index
    %0 = vector.load %arg1[%c0, %c0_0, %c0_1] : memref<1x2x416xf32, #tpu.memory_space<vmem>>, vector<1x2x416xf32>
    %1 = vector.shape_cast %0 : vector<1x2x416xf32> to vector<2x416xf32>
    %2 = arith.truncf %1 : vector<2x416xf32> to vector<2x416xbf16>
    %cst = arith.constant 0.000000e+00 : f32
    %3 = vector.broadcast %cst : f32 to vector<2x416xf32>
    %c0_2 = arith.constant 0 : index
    %c0_3 = arith.constant 0 : index
    %c0_4 = arith.constant 0 : index
    %4 = vector.load %arg2[%c0_2, %c0_3, %c0_4] : memref<8x416x64xbf16, #tpu.memory_space<vmem>>, vector<1x416x64xbf16>
    %5 = vector.shape_cast %4 : vector<1x416x64xbf16> to vector<416x64xbf16>
    %cst_5 = arith.constant dense<0.000000e+00> : vector<2x64xf32>
    %6 = tpu.matmul %2, %5, %cst_5 {dimension_numbers = #tpu.dot_dimension_numbers<[1], [0], [0], [1], [0, 0, 1, 1], [], []>} : vector<2x416xbf16>, vector<416x64xbf16>, vector<2x64xf32> -> vector<2x64xf32>
    %c0_6 = arith.constant 0 : index
    %c0_7 = arith.constant 0 : index
    %c0_8 = arith.constant 0 : index
    %7 = vector.load %arg3[%c0_6, %c0_7, %c0_8] : memref<8x1x64xf32, #tpu.memory_space<vmem>>, vector<1x1x64xf32>
    %8 = vector.shape_cast %7 : vector<1x1x64xf32> to vector<1x64xf32>
    %9 = vector.broadcast %8 : vector<1x64xf32> to vector<2x64xf32>
    %10 = arith.addf %6, %9 : vector<2x64xf32>
    %c0_9 = arith.constant 0 : index
    %c0_10 = arith.constant 0 : index
    %c0_11 = arith.constant 0 : index
    %11 = vector.load %arg4[%c0_9, %c0_10, %c0_11] : memref<8x416x64xbf16, #tpu.memory_space<vmem>>, vector<1x416x64xbf16>
    %12 = vector.shape_cast %11 : vector<1x416x64xbf16> to vector<416x64xbf16>
    %cst_12 = arith.constant dense<0.000000e+00> : vector<2x64xf32>
    %13 = tpu.matmul %2, %12, %cst_12 {dimension_numbers = #tpu.dot_dimension_numbers<[1], [0], [0], [1], [0, 0, 1, 1], [], []>} : vector<2x416xbf16>, vector<416x64xbf16>, vector<2x64xf32> -> vector<2x64xf32>
    %c0_13 = arith.constant 0 : index
    %c0_14 = arith.constant 0 : index
    %c0_15 = arith.constant 0 : index
    %14 = vector.load %arg5[%c0_13, %c0_14, %c0_15] : memref<8x1x64xf32, #tpu.memory_space<vmem>>, vector<1x1x64xf32>
    %15 = vector.shape_cast %14 : vector<1x1x64xf32> to vector<1x64xf32>
    %16 = vector.broadcast %15 : vector<1x64xf32> to vector<2x64xf32>
    %17 = arith.addf %13, %16 : vector<2x64xf32>
    %c0_16 = arith.constant 0 : index
    %c0_17 = arith.constant 0 : index
    %c0_18 = arith.constant 0 : index
    %18 = vector.load %arg6[%c0_16, %c0_17, %c0_18] : memref<8x416x64xbf16, #tpu.memory_space<vmem>>, vector<1x416x64xbf16>
    %19 = vector.shape_cast %18 : vector<1x416x64xbf16> to vector<416x64xbf16>
    %cst_19 = arith.constant dense<0.000000e+00> : vector<2x64xf32>
    %20 = tpu.matmul %2, %19, %cst_19 {dimension_numbers = #tpu.dot_dimension_numbers<[1], [0], [0], [1], [0, 0, 1, 1], [], []>} : vector<2x416xbf16>, vector<416x64xbf16>, vector<2x64xf32> -> vector<2x64xf32>
    %c0_20 = arith.constant 0 : index
    %c0_21 = arith.constant 0 : index
    %c0_22 = arith.constant 0 : index
    %21 = vector.load %arg7[%c0_20, %c0_21, %c0_22] : memref<8x1x64xf32, #tpu.memory_space<vmem>>, vector<1x1x64xf32>
    %22 = vector.shape_cast %21 : vector<1x1x64xf32> to vector<1x64xf32>
    %23 = vector.broadcast %22 : vector<1x64xf32> to vector<2x64xf32>
    %24 = arith.addf %20, %23 : vector<2x64xf32>
    %25 = arith.truncf %10 : vector<2x64xf32> to vector<2x64xbf16>
    %26 = arith.truncf %17 : vector<2x64xf32> to vector<2x64xbf16>
    %cst_23 = arith.constant dense<0.000000e+00> : vector<2x2xf32>
    %27 = tpu.matmul %25, %26, %cst_23 {dimension_numbers = #tpu.dot_dimension_numbers<[1], [1], [0], [0], [0, 0, 1, 0], [], []>} : vector<2x64xbf16>, vector<2x64xbf16>, vector<2x2xf32> -> vector<2x2xf32>
    %cst_24 = arith.constant 0.138675049 : f32
    %28 = vector.broadcast %cst_24 : f32 to vector<2x2xf32>
    %29 = arith.mulf %27, %28 : vector<2x2xf32>
    %cst_25 = arith.constant dense<0xFF800000> : vector<2xf32>
    %30 = vector.multi_reduction <maximumf>, %29, %cst_25 [1] : vector<2x2xf32> to vector<2xf32>
    %31 = vector.shape_cast %30 : vector<2xf32> to vector<2x1xf32>
    %32 = vector.broadcast %31 : vector<2x1xf32> to vector<2x2xf32>
    %33 = arith.subf %29, %32 : vector<2x2xf32>
    %34 = math.exp %33 : vector<2x2xf32>
    %cst_26 = arith.constant dense<0.000000e+00> : vector<2xf32>
    %35 = vector.multi_reduction <add>, %34, %cst_26 [1] : vector<2x2xf32> to vector<2xf32>
    %36 = vector.shape_cast %35 : vector<2xf32> to vector<2x1xf32>
    %37 = tpu.reciprocal %36 {approx = true} : vector<2x1xf32> -> vector<2x1xf32>
    %38 = vector.broadcast %37 : vector<2x1xf32> to vector<2x2xf32>
    %39 = arith.mulf %34, %38 : vector<2x2xf32>
    %40 = arith.truncf %39 : vector<2x2xf32> to vector<2x2xbf16>
    %41 = arith.truncf %24 : vector<2x64xf32> to vector<2x64xbf16>
    %cst_27 = arith.constant dense<0.000000e+00> : vector<2x64xf32>
    %42 = tpu.matmul %40, %41, %cst_27 {dimension_numbers = #tpu.dot_dimension_numbers<[1], [0], [0], [1], [0, 0, 1, 1], [], []>} : vector<2x2xbf16>, vector<2x64xbf16>, vector<2x64xf32> -> vector<2x64xf32>
    %43 = arith.truncf %42 : vector<2x64xf32> to vector<2x64xbf16>
    %c0_28 = arith.constant 0 : index
    %c0_29 = arith.constant 0 : index
    %c0_30 = arith.constant 0 : index
    %44 = vector.load %arg8[%c0_28, %c0_29, %c0_30] : memref<8x64x416xbf16, #tpu.memory_space<vmem>>, vector<1x64x416xbf16>
    %45 = vector.shape_cast %44 : vector<1x64x416xbf16> to vector<64x416xbf16>
    %cst_31 = arith.constant dense<0.000000e+00> : vector<2x416xf32>
    %46 = tpu.matmul %43, %45, %cst_31 {dimension_numbers = #tpu.dot_dimension_numbers<[1], [0], [0], [1], [0, 0, 1, 1], [], []>} : vector<2x64xbf16>, vector<64x416xbf16>, vector<2x416xf32> -> vector<2x416xf32>
    %47 = arith.addf %3, %46 : vector<2x416xf32>
    %c1 = arith.constant 1 : index
    %c0_32 = arith.constant 0 : index
    %c0_33 = arith.constant 0 : index
    %48 = vector.load %arg2[%c1, %c0_32, %c0_33] : memref<8x416x64xbf16, #tpu.memory_space<vmem>>, vector<1x416x64xbf16>
    %49 = vector.shape_cast %48 : vector<1x416x64xbf16> to vector<416x64xbf16>
    %cst_34 = arith.constant dense<0.000000e+00> : vector<2x64xf32>
    %50 = tpu.matmul %2, %49, %cst_34 {dimension_numbers = #tpu.dot_dimension_numbers<[1], [0], [0], [1], [0, 0, 1, 1], [], []>} : vector<2x416xbf16>, vector<416x64xbf16>, vector<2x64xf32> -> vector<2x64xf32>
    %c1_35 = arith.constant 1 : index
    %c0_36 = arith.constant 0 : index
    %c0_37 = arith.constant 0 : index
    %51 = vector.load %arg3[%c1_35, %c0_36, %c0_37] : memref<8x1x64xf32, #tpu.memory_space<vmem>>, vector<1x1x64xf32>
    %52 = vector.shape_cast %51 : vector<1x1x64xf32> to vector<1x64xf32>
    %53 = vector.broadcast %52 : vector<1x64xf32> to vector<2x64xf32>
    %54 = arith.addf %50, %53 : vector<2x64xf32>
    %c1_38 = arith.constant 1 : index
    %c0_39 = arith.constant 0 : index
    %c0_40 = arith.constant 0 : index
    %55 = vector.load %arg4[%c1_38, %c0_39, %c0_40] : memref<8x416x64xbf16, #tpu.memory_space<vmem>>, vector<1x416x64xbf16>
    %56 = vector.shape_cast %55 : vector<1x416x64xbf16> to vector<416x64xbf16>
    %cst_41 = arith.constant dense<0.000000e+00> : vector<2x64xf32>
    %57 = tpu.matmul %2, %56, %cst_41 {dimension_numbers = #tpu.dot_dimension_numbers<[1], [0], [0], [1], [0, 0, 1, 1], [], []>} : vector<2x416xbf16>, vector<416x64xbf16>, vector<2x64xf32> -> vector<2x64xf32>
    %c1_42 = arith.constant 1 : index
    %c0_43 = arith.constant 0 : index
    %c0_44 = arith.constant 0 : index
    %58 = vector.load %arg5[%c1_42, %c0_43, %c0_44] : memref<8x1x64xf32, #tpu.memory_space<vmem>>, vector<1x1x64xf32>
    %59 = vector.shape_cast %58 : vector<1x1x64xf32> to vector<1x64xf32>
    %60 = vector.broadcast %59 : vector<1x64xf32> to vector<2x64xf32>
    %61 = arith.addf %57, %60 : vector<2x64xf32>
    %c1_45 = arith.constant 1 : index
    %c0_46 = arith.constant 0 : index
    %c0_47 = arith.constant 0 : index
    %62 = vector.load %arg6[%c1_45, %c0_46, %c0_47] : memref<8x416x64xbf16, #tpu.memory_space<vmem>>, vector<1x416x64xbf16>
    %63 = vector.shape_cast %62 : vector<1x416x64xbf16> to vector<416x64xbf16>
    %cst_48 = arith.constant dense<0.000000e+00> : vector<2x64xf32>
    %64 = tpu.matmul %2, %63, %cst_48 {dimension_numbers = #tpu.dot_dimension_numbers<[1], [0], [0], [1], [0, 0, 1, 1], [], []>} : vector<2x416xbf16>, vector<416x64xbf16>, vector<2x64xf32> -> vector<2x64xf32>
    %c1_49 = arith.constant 1 : index
    %c0_50 = arith.constant 0 : index
    %c0_51 = arith.constant 0 : index
    %65 = vector.load %arg7[%c1_49, %c0_50, %c0_51] : memref<8x1x64xf32, #tpu.memory_space<vmem>>, vector<1x1x64xf32>
    %66 = vector.shape_cast %65 : vector<1x1x64xf32> to vector<1x64xf32>
    %67 = vector.broadcast %66 : vector<1x64xf32> to vector<2x64xf32>
    %68 = arith.addf %64, %67 : vector<2x64xf32>
    %69 = arith.truncf %54 : vector<2x64xf32> to vector<2x64xbf16>
    %70 = arith.truncf %61 : vector<2x64xf32> to vector<2x64xbf16>
    %cst_52 = arith.constant dense<0.000000e+00> : vector<2x2xf32>
    %71 = tpu.matmul %69, %70, %cst_52 {dimension_numbers = #tpu.dot_dimension_numbers<[1], [1], [0], [0], [0, 0, 1, 0], [], []>} : vector<2x64xbf16>, vector<2x64xbf16>, vector<2x2xf32> -> vector<2x2xf32>
    %cst_53 = arith.constant 0.138675049 : f32
    %72 = vector.broadcast %cst_53 : f32 to vector<2x2xf32>
    %73 = arith.mulf %71, %72 : vector<2x2xf32>
    %cst_54 = arith.constant dense<0xFF800000> : vector<2xf32>
    %74 = vector.multi_reduction <maximumf>, %73, %cst_54 [1] : vector<2x2xf32> to vector<2xf32>
    %75 = vector.shape_cast %74 : vector<2xf32> to vector<2x1xf32>
    %76 = vector.broadcast %75 : vector<2x1xf32> to vector<2x2xf32>
    %77 = arith.subf %73, %76 : vector<2x2xf32>
    %78 = math.exp %77 : vector<2x2xf32>
    %cst_55 = arith.constant dense<0.000000e+00> : vector<2xf32>
    %79 = vector.multi_reduction <add>, %78, %cst_55 [1] : vector<2x2xf32> to vector<2xf32>
    %80 = vector.shape_cast %79 : vector<2xf32> to vector<2x1xf32>
    %81 = tpu.reciprocal %80 {approx = true} : vector<2x1xf32> -> vector<2x1xf32>
    %82 = vector.broadcast %81 : vector<2x1xf32> to vector<2x2xf32>
    %83 = arith.mulf %78, %82 : vector<2x2xf32>
    %84 = arith.truncf %83 : vector<2x2xf32> to vector<2x2xbf16>
    %85 = arith.truncf %68 : vector<2x64xf32> to vector<2x64xbf16>
    %cst_56 = arith.constant dense<0.000000e+00> : vector<2x64xf32>
    %86 = tpu.matmul %84, %85, %cst_56 {dimension_numbers = #tpu.dot_dimension_numbers<[1], [0], [0], [1], [0, 0, 1, 1], [], []>} : vector<2x2xbf16>, vector<2x64xbf16>, vector<2x64xf32> -> vector<2x64xf32>
    %87 = arith.truncf %86 : vector<2x64xf32> to vector<2x64xbf16>
    %c1_57 = arith.constant 1 : index
    %c0_58 = arith.constant 0 : index
    %c0_59 = arith.constant 0 : index
    %88 = vector.load %arg8[%c1_57, %c0_58, %c0_59] : memref<8x64x416xbf16, #tpu.memory_space<vmem>>, vector<1x64x416xbf16>
    %89 = vector.shape_cast %88 : vector<1x64x416xbf16> to vector<64x416xbf16>
    %cst_60 = arith.constant dense<0.000000e+00> : vector<2x416xf32>
    %90 = tpu.matmul %87, %89, %cst_60 {dimension_numbers = #tpu.dot_dimension_numbers<[1], [0], [0], [1], [0, 0, 1, 1], [], []>} : vector<2x64xbf16>, vector<64x416xbf16>, vector<2x416xf32> -> vector<2x416xf32>
    %91 = arith.addf %47, %90 : vector<2x416xf32>
    %c2 = arith.constant 2 : index
    %c0_61 = arith.constant 0 : index
    %c0_62 = arith.constant 0 : index
    %92 = vector.load %arg2[%c2, %c0_61, %c0_62] : memref<8x416x64xbf16, #tpu.memory_space<vmem>>, vector<1x416x64xbf16>
    %93 = vector.shape_cast %92 : vector<1x416x64xbf16> to vector<416x64xbf16>
    %cst_63 = arith.constant dense<0.000000e+00> : vector<2x64xf32>
    %94 = tpu.matmul %2, %93, %cst_63 {dimension_numbers = #tpu.dot_dimension_numbers<[1], [0], [0], [1], [0, 0, 1, 1], [], []>} : vector<2x416xbf16>, vector<416x64xbf16>, vector<2x64xf32> -> vector<2x64xf32>
    %c2_64 = arith.constant 2 : index
    %c0_65 = arith.constant 0 : index
    %c0_66 = arith.constant 0 : index
    %95 = vector.load %arg3[%c2_64, %c0_65, %c0_66] : memref<8x1x64xf32, #tpu.memory_space<vmem>>, vector<1x1x64xf32>
    %96 = vector.shape_cast %95 : vector<1x1x64xf32> to vector<1x64xf32>
    %97 = vector.broadcast %96 : vector<1x64xf32> to vector<2x64xf32>
    %98 = arith.addf %94, %97 : vector<2x64xf32>
    %c2_67 = arith.constant 2 : index
    %c0_68 = arith.constant 0 : index
    %c0_69 = arith.constant 0 : index
    %99 = vector.load %arg4[%c2_67, %c0_68, %c0_69] : memref<8x416x64xbf16, #tpu.memory_space<vmem>>, vector<1x416x64xbf16>
    %100 = vector.shape_cast %99 : vector<1x416x64xbf16> to vector<416x64xbf16>
    %cst_70 = arith.constant dense<0.000000e+00> : vector<2x64xf32>
    %101 = tpu.matmul %2, %100, %cst_70 {dimension_numbers = #tpu.dot_dimension_numbers<[1], [0], [0], [1], [0, 0, 1, 1], [], []>} : vector<2x416xbf16>, vector<416x64xbf16>, vector<2x64xf32> -> vector<2x64xf32>
    %c2_71 = arith.constant 2 : index
    %c0_72 = arith.constant 0 : index
    %c0_73 = arith.constant 0 : index
    %102 = vector.load %arg5[%c2_71, %c0_72, %c0_73] : memref<8x1x64xf32, #tpu.memory_space<vmem>>, vector<1x1x64xf32>
    %103 = vector.shape_cast %102 : vector<1x1x64xf32> to vector<1x64xf32>
    %104 = vector.broadcast %103 : vector<1x64xf32> to vector<2x64xf32>
    %105 = arith.addf %101, %104 : vector<2x64xf32>
    %c2_74 = arith.constant 2 : index
    %c0_75 = arith.constant 0 : index
    %c0_76 = arith.constant 0 : index
    %106 = vector.load %arg6[%c2_74, %c0_75, %c0_76] : memref<8x416x64xbf16, #tpu.memory_space<vmem>>, vector<1x416x64xbf16>
    %107 = vector.shape_cast %106 : vector<1x416x64xbf16> to vector<416x64xbf16>
    %cst_77 = arith.constant dense<0.000000e+00> : vector<2x64xf32>
    %108 = tpu.matmul %2, %107, %cst_77 {dimension_numbers = #tpu.dot_dimension_numbers<[1], [0], [0], [1], [0, 0, 1, 1], [], []>} : vector<2x416xbf16>, vector<416x64xbf16>, vector<2x64xf32> -> vector<2x64xf32>
    %c2_78 = arith.constant 2 : index
    %c0_79 = arith.constant 0 : index
    %c0_80 = arith.constant 0 : index
    %109 = vector.load %arg7[%c2_78, %c0_79, %c0_80] : memref<8x1x64xf32, #tpu.memory_space<vmem>>, vector<1x1x64xf32>
    %110 = vector.shape_cast %109 : vector<1x1x64xf32> to vector<1x64xf32>
    %111 = vector.broadcast %110 : vector<1x64xf32> to vector<2x64xf32>
    %112 = arith.addf %108, %111 : vector<2x64xf32>
    %113 = arith.truncf %98 : vector<2x64xf32> to vector<2x64xbf16>
    %114 = arith.truncf %105 : vector<2x64xf32> to vector<2x64xbf16>
    %cst_81 = arith.constant dense<0.000000e+00> : vector<2x2xf32>
    %115 = tpu.matmul %113, %114, %cst_81 {dimension_numbers = #tpu.dot_dimension_numbers<[1], [1], [0], [0], [0, 0, 1, 0], [], []>} : vector<2x64xbf16>, vector<2x64xbf16>, vector<2x2xf32> -> vector<2x2xf32>
    %cst_82 = arith.constant 0.138675049 : f32
    %116 = vector.broadcast %cst_82 : f32 to vector<2x2xf32>
    %117 = arith.mulf %115, %116 : vector<2x2xf32>
    %cst_83 = arith.constant dense<0xFF800000> : vector<2xf32>
    %118 = vector.multi_reduction <maximumf>, %117, %cst_83 [1] : vector<2x2xf32> to vector<2xf32>
    %119 = vector.shape_cast %118 : vector<2xf32> to vector<2x1xf32>
    %120 = vector.broadcast %119 : vector<2x1xf32> to vector<2x2xf32>
    %121 = arith.subf %117, %120 : vector<2x2xf32>
    %122 = math.exp %121 : vector<2x2xf32>
    %cst_84 = arith.constant dense<0.000000e+00> : vector<2xf32>
    %123 = vector.multi_reduction <add>, %122, %cst_84 [1] : vector<2x2xf32> to vector<2xf32>
    %124 = vector.shape_cast %123 : vector<2xf32> to vector<2x1xf32>
    %125 = tpu.reciprocal %124 {approx = true} : vector<2x1xf32> -> vector<2x1xf32>
    %126 = vector.broadcast %125 : vector<2x1xf32> to vector<2x2xf32>
    %127 = arith.mulf %122, %126 : vector<2x2xf32>
    %128 = arith.truncf %127 : vector<2x2xf32> to vector<2x2xbf16>
    %129 = arith.truncf %112 : vector<2x64xf32> to vector<2x64xbf16>
    %cst_85 = arith.constant dense<0.000000e+00> : vector<2x64xf32>
    %130 = tpu.matmul %128, %129, %cst_85 {dimension_numbers = #tpu.dot_dimension_numbers<[1], [0], [0], [1], [0, 0, 1, 1], [], []>} : vector<2x2xbf16>, vector<2x64xbf16>, vector<2x64xf32> -> vector<2x64xf32>
    %131 = arith.truncf %130 : vector<2x64xf32> to vector<2x64xbf16>
    %c2_86 = arith.constant 2 : index
    %c0_87 = arith.constant 0 : index
    %c0_88 = arith.constant 0 : index
    %132 = vector.load %arg8[%c2_86, %c0_87, %c0_88] : memref<8x64x416xbf16, #tpu.memory_space<vmem>>, vector<1x64x416xbf16>
    %133 = vector.shape_cast %132 : vector<1x64x416xbf16> to vector<64x416xbf16>
    %cst_89 = arith.constant dense<0.000000e+00> : vector<2x416xf32>
    %134 = tpu.matmul %131, %133, %cst_89 {dimension_numbers = #tpu.dot_dimension_numbers<[1], [0], [0], [1], [0, 0, 1, 1], [], []>} : vector<2x64xbf16>, vector<64x416xbf16>, vector<2x416xf32> -> vector<2x416xf32>
    %135 = arith.addf %91, %134 : vector<2x416xf32>
    %c3 = arith.constant 3 : index
    %c0_90 = arith.constant 0 : index
    %c0_91 = arith.constant 0 : index
    %136 = vector.load %arg2[%c3, %c0_90, %c0_91] : memref<8x416x64xbf16, #tpu.memory_space<vmem>>, vector<1x416x64xbf16>
    %137 = vector.shape_cast %136 : vector<1x416x64xbf16> to vector<416x64xbf16>
    %cst_92 = arith.constant dense<0.000000e+00> : vector<2x64xf32>
    %138 = tpu.matmul %2, %137, %cst_92 {dimension_numbers = #tpu.dot_dimension_numbers<[1], [0], [0], [1], [0, 0, 1, 1], [], []>} : vector<2x416xbf16>, vector<416x64xbf16>, vector<2x64xf32> -> vector<2x64xf32>
    %c3_93 = arith.constant 3 : index
    %c0_94 = arith.constant 0 : index
    %c0_95 = arith.constant 0 : index
    %139 = vector.load %arg3[%c3_93, %c0_94, %c0_95] : memref<8x1x64xf32, #tpu.memory_space<vmem>>, vector<1x1x64xf32>
    %140 = vector.shape_cast %139 : vector<1x1x64xf32> to vector<1x64xf32>
    %141 = vector.broadcast %140 : vector<1x64xf32> to vector<2x64xf32>
    %142 = arith.addf %138, %141 : vector<2x64xf32>
    %c3_96 = arith.constant 3 : index
    %c0_97 = arith.constant 0 : index
    %c0_98 = arith.constant 0 : index
    %143 = vector.load %arg4[%c3_96, %c0_97, %c0_98] : memref<8x416x64xbf16, #tpu.memory_space<vmem>>, vector<1x416x64xbf16>
    %144 = vector.shape_cast %143 : vector<1x416x64xbf16> to vector<416x64xbf16>
    %cst_99 = arith.constant dense<0.000000e+00> : vector<2x64xf32>
    %145 = tpu.matmul %2, %144, %cst_99 {dimension_numbers = #tpu.dot_dimension_numbers<[1], [0], [0], [1], [0, 0, 1, 1], [], []>} : vector<2x416xbf16>, vector<416x64xbf16>, vector<2x64xf32> -> vector<2x64xf32>
    %c3_100 = arith.constant 3 : index
    %c0_101 = arith.constant 0 : index
    %c0_102 = arith.constant 0 : index
    %146 = vector.load %arg5[%c3_100, %c0_101, %c0_102] : memref<8x1x64xf32, #tpu.memory_space<vmem>>, vector<1x1x64xf32>
    %147 = vector.shape_cast %146 : vector<1x1x64xf32> to vector<1x64xf32>
    %148 = vector.broadcast %147 : vector<1x64xf32> to vector<2x64xf32>
    %149 = arith.addf %145, %148 : vector<2x64xf32>
    %c3_103 = arith.constant 3 : index
    %c0_104 = arith.constant 0 : index
    %c0_105 = arith.constant 0 : index
    %150 = vector.load %arg6[%c3_103, %c0_104, %c0_105] : memref<8x416x64xbf16, #tpu.memory_space<vmem>>, vector<1x416x64xbf16>
    %151 = vector.shape_cast %150 : vector<1x416x64xbf16> to vector<416x64xbf16>
    %cst_106 = arith.constant dense<0.000000e+00> : vector<2x64xf32>
    %152 = tpu.matmul %2, %151, %cst_106 {dimension_numbers = #tpu.dot_dimension_numbers<[1], [0], [0], [1], [0, 0, 1, 1], [], []>} : vector<2x416xbf16>, vector<416x64xbf16>, vector<2x64xf32> -> vector<2x64xf32>
    %c3_107 = arith.constant 3 : index
    %c0_108 = arith.constant 0 : index
    %c0_109 = arith.constant 0 : index
    %153 = vector.load %arg7[%c3_107, %c0_108, %c0_109] : memref<8x1x64xf32, #tpu.memory_space<vmem>>, vector<1x1x64xf32>
    %154 = vector.shape_cast %153 : vector<1x1x64xf32> to vector<1x64xf32>
    %155 = vector.broadcast %154 : vector<1x64xf32> to vector<2x64xf32>
    %156 = arith.addf %152, %155 : vector<2x64xf32>
    %157 = arith.truncf %142 : vector<2x64xf32> to vector<2x64xbf16>
    %158 = arith.truncf %149 : vector<2x64xf32> to vector<2x64xbf16>
    %cst_110 = arith.constant dense<0.000000e+00> : vector<2x2xf32>
    %159 = tpu.matmul %157, %158, %cst_110 {dimension_numbers = #tpu.dot_dimension_numbers<[1], [1], [0], [0], [0, 0, 1, 0], [], []>} : vector<2x64xbf16>, vector<2x64xbf16>, vector<2x2xf32> -> vector<2x2xf32>
    %cst_111 = arith.constant 0.138675049 : f32
    %160 = vector.broadcast %cst_111 : f32 to vector<2x2xf32>
    %161 = arith.mulf %159, %160 : vector<2x2xf32>
    %cst_112 = arith.constant dense<0xFF800000> : vector<2xf32>
    %162 = vector.multi_reduction <maximumf>, %161, %cst_112 [1] : vector<2x2xf32> to vector<2xf32>
    %163 = vector.shape_cast %162 : vector<2xf32> to vector<2x1xf32>
    %164 = vector.broadcast %163 : vector<2x1xf32> to vector<2x2xf32>
    %165 = arith.subf %161, %164 : vector<2x2xf32>
    %166 = math.exp %165 : vector<2x2xf32>
    %cst_113 = arith.constant dense<0.000000e+00> : vector<2xf32>
    %167 = vector.multi_reduction <add>, %166, %cst_113 [1] : vector<2x2xf32> to vector<2xf32>
    %168 = vector.shape_cast %167 : vector<2xf32> to vector<2x1xf32>
    %169 = tpu.reciprocal %168 {approx = true} : vector<2x1xf32> -> vector<2x1xf32>
    %170 = vector.broadcast %169 : vector<2x1xf32> to vector<2x2xf32>
    %171 = arith.mulf %166, %170 : vector<2x2xf32>
    %172 = arith.truncf %171 : vector<2x2xf32> to vector<2x2xbf16>
    %173 = arith.truncf %156 : vector<2x64xf32> to vector<2x64xbf16>
    %cst_114 = arith.constant dense<0.000000e+00> : vector<2x64xf32>
    %174 = tpu.matmul %172, %173, %cst_114 {dimension_numbers = #tpu.dot_dimension_numbers<[1], [0], [0], [1], [0, 0, 1, 1], [], []>} : vector<2x2xbf16>, vector<2x64xbf16>, vector<2x64xf32> -> vector<2x64xf32>
    %175 = arith.truncf %174 : vector<2x64xf32> to vector<2x64xbf16>
    %c3_115 = arith.constant 3 : index
    %c0_116 = arith.constant 0 : index
    %c0_117 = arith.constant 0 : index
    %176 = vector.load %arg8[%c3_115, %c0_116, %c0_117] : memref<8x64x416xbf16, #tpu.memory_space<vmem>>, vector<1x64x416xbf16>
    %177 = vector.shape_cast %176 : vector<1x64x416xbf16> to vector<64x416xbf16>
    %cst_118 = arith.constant dense<0.000000e+00> : vector<2x416xf32>
    %178 = tpu.matmul %175, %177, %cst_118 {dimension_numbers = #tpu.dot_dimension_numbers<[1], [0], [0], [1], [0, 0, 1, 1], [], []>} : vector<2x64xbf16>, vector<64x416xbf16>, vector<2x416xf32> -> vector<2x416xf32>
    %179 = arith.addf %135, %178 : vector<2x416xf32>
    %c4 = arith.constant 4 : index
    %c0_119 = arith.constant 0 : index
    %c0_120 = arith.constant 0 : index
    %180 = vector.load %arg2[%c4, %c0_119, %c0_120] : memref<8x416x64xbf16, #tpu.memory_space<vmem>>, vector<1x416x64xbf16>
    %181 = vector.shape_cast %180 : vector<1x416x64xbf16> to vector<416x64xbf16>
    %cst_121 = arith.constant dense<0.000000e+00> : vector<2x64xf32>
    %182 = tpu.matmul %2, %181, %cst_121 {dimension_numbers = #tpu.dot_dimension_numbers<[1], [0], [0], [1], [0, 0, 1, 1], [], []>} : vector<2x416xbf16>, vector<416x64xbf16>, vector<2x64xf32> -> vector<2x64xf32>
    %c4_122 = arith.constant 4 : index
    %c0_123 = arith.constant 0 : index
    %c0_124 = arith.constant 0 : index
    %183 = vector.load %arg3[%c4_122, %c0_123, %c0_124] : memref<8x1x64xf32, #tpu.memory_space<vmem>>, vector<1x1x64xf32>
    %184 = vector.shape_cast %183 : vector<1x1x64xf32> to vector<1x64xf32>
    %185 = vector.broadcast %184 : vector<1x64xf32> to vector<2x64xf32>
    %186 = arith.addf %182, %185 : vector<2x64xf32>
    %c4_125 = arith.constant 4 : index
    %c0_126 = arith.constant 0 : index
    %c0_127 = arith.constant 0 : index
    %187 = vector.load %arg4[%c4_125, %c0_126, %c0_127] : memref<8x416x64xbf16, #tpu.memory_space<vmem>>, vector<1x416x64xbf16>
    %188 = vector.shape_cast %187 : vector<1x416x64xbf16> to vector<416x64xbf16>
    %cst_128 = arith.constant dense<0.000000e+00> : vector<2x64xf32>
    %189 = tpu.matmul %2, %188, %cst_128 {dimension_numbers = #tpu.dot_dimension_numbers<[1], [0], [0], [1], [0, 0, 1, 1], [], []>} : vector<2x416xbf16>, vector<416x64xbf16>, vector<2x64xf32> -> vector<2x64xf32>
    %c4_129 = arith.constant 4 : index
    %c0_130 = arith.constant 0 : index
    %c0_131 = arith.constant 0 : index
    %190 = vector.load %arg5[%c4_129, %c0_130, %c0_131] : memref<8x1x64xf32, #tpu.memory_space<vmem>>, vector<1x1x64xf32>
    %191 = vector.shape_cast %190 : vector<1x1x64xf32> to vector<1x64xf32>
    %192 = vector.broadcast %191 : vector<1x64xf32> to vector<2x64xf32>
    %193 = arith.addf %189, %192 : vector<2x64xf32>
    %c4_132 = arith.constant 4 : index
    %c0_133 = arith.constant 0 : index
    %c0_134 = arith.constant 0 : index
    %194 = vector.load %arg6[%c4_132, %c0_133, %c0_134] : memref<8x416x64xbf16, #tpu.memory_space<vmem>>, vector<1x416x64xbf16>
    %195 = vector.shape_cast %194 : vector<1x416x64xbf16> to vector<416x64xbf16>
    %cst_135 = arith.constant dense<0.000000e+00> : vector<2x64xf32>
    %196 = tpu.matmul %2, %195, %cst_135 {dimension_numbers = #tpu.dot_dimension_numbers<[1], [0], [0], [1], [0, 0, 1, 1], [], []>} : vector<2x416xbf16>, vector<416x64xbf16>, vector<2x64xf32> -> vector<2x64xf32>
    %c4_136 = arith.constant 4 : index
    %c0_137 = arith.constant 0 : index
    %c0_138 = arith.constant 0 : index
    %197 = vector.load %arg7[%c4_136, %c0_137, %c0_138] : memref<8x1x64xf32, #tpu.memory_space<vmem>>, vector<1x1x64xf32>
    %198 = vector.shape_cast %197 : vector<1x1x64xf32> to vector<1x64xf32>
    %199 = vector.broadcast %198 : vector<1x64xf32> to vector<2x64xf32>
    %200 = arith.addf %196, %199 : vector<2x64xf32>
    %201 = arith.truncf %186 : vector<2x64xf32> to vector<2x64xbf16>
    %202 = arith.truncf %193 : vector<2x64xf32> to vector<2x64xbf16>
    %cst_139 = arith.constant dense<0.000000e+00> : vector<2x2xf32>
    %203 = tpu.matmul %201, %202, %cst_139 {dimension_numbers = #tpu.dot_dimension_numbers<[1], [1], [0], [0], [0, 0, 1, 0], [], []>} : vector<2x64xbf16>, vector<2x64xbf16>, vector<2x2xf32> -> vector<2x2xf32>
    %cst_140 = arith.constant 0.138675049 : f32
    %204 = vector.broadcast %cst_140 : f32 to vector<2x2xf32>
    %205 = arith.mulf %203, %204 : vector<2x2xf32>
    %cst_141 = arith.constant dense<0xFF800000> : vector<2xf32>
    %206 = vector.multi_reduction <maximumf>, %205, %cst_141 [1] : vector<2x2xf32> to vector<2xf32>
    %207 = vector.shape_cast %206 : vector<2xf32> to vector<2x1xf32>
    %208 = vector.broadcast %207 : vector<2x1xf32> to vector<2x2xf32>
    %209 = arith.subf %205, %208 : vector<2x2xf32>
    %210 = math.exp %209 : vector<2x2xf32>
    %cst_142 = arith.constant dense<0.000000e+00> : vector<2xf32>
    %211 = vector.multi_reduction <add>, %210, %cst_142 [1] : vector<2x2xf32> to vector<2xf32>
    %212 = vector.shape_cast %211 : vector<2xf32> to vector<2x1xf32>
    %213 = tpu.reciprocal %212 {approx = true} : vector<2x1xf32> -> vector<2x1xf32>
    %214 = vector.broadcast %213 : vector<2x1xf32> to vector<2x2xf32>
    %215 = arith.mulf %210, %214 : vector<2x2xf32>
    %216 = arith.truncf %215 : vector<2x2xf32> to vector<2x2xbf16>
    %217 = arith.truncf %200 : vector<2x64xf32> to vector<2x64xbf16>
    %cst_143 = arith.constant dense<0.000000e+00> : vector<2x64xf32>
    %218 = tpu.matmul %216, %217, %cst_143 {dimension_numbers = #tpu.dot_dimension_numbers<[1], [0], [0], [1], [0, 0, 1, 1], [], []>} : vector<2x2xbf16>, vector<2x64xbf16>, vector<2x64xf32> -> vector<2x64xf32>
    %219 = arith.truncf %218 : vector<2x64xf32> to vector<2x64xbf16>
    %c4_144 = arith.constant 4 : index
    %c0_145 = arith.constant 0 : index
    %c0_146 = arith.constant 0 : index
    %220 = vector.load %arg8[%c4_144, %c0_145, %c0_146] : memref<8x64x416xbf16, #tpu.memory_space<vmem>>, vector<1x64x416xbf16>
    %221 = vector.shape_cast %220 : vector<1x64x416xbf16> to vector<64x416xbf16>
    %cst_147 = arith.constant dense<0.000000e+00> : vector<2x416xf32>
    %222 = tpu.matmul %219, %221, %cst_147 {dimension_numbers = #tpu.dot_dimension_numbers<[1], [0], [0], [1], [0, 0, 1, 1], [], []>} : vector<2x64xbf16>, vector<64x416xbf16>, vector<2x416xf32> -> vector<2x416xf32>
    %223 = arith.addf %179, %222 : vector<2x416xf32>
    %c5 = arith.constant 5 : index
    %c0_148 = arith.constant 0 : index
    %c0_149 = arith.constant 0 : index
    %224 = vector.load %arg2[%c5, %c0_148, %c0_149] : memref<8x416x64xbf16, #tpu.memory_space<vmem>>, vector<1x416x64xbf16>
    %225 = vector.shape_cast %224 : vector<1x416x64xbf16> to vector<416x64xbf16>
    %cst_150 = arith.constant dense<0.000000e+00> : vector<2x64xf32>
    %226 = tpu.matmul %2, %225, %cst_150 {dimension_numbers = #tpu.dot_dimension_numbers<[1], [0], [0], [1], [0, 0, 1, 1], [], []>} : vector<2x416xbf16>, vector<416x64xbf16>, vector<2x64xf32> -> vector<2x64xf32>
    %c5_151 = arith.constant 5 : index
    %c0_152 = arith.constant 0 : index
    %c0_153 = arith.constant 0 : index
    %227 = vector.load %arg3[%c5_151, %c0_152, %c0_153] : memref<8x1x64xf32, #tpu.memory_space<vmem>>, vector<1x1x64xf32>
    %228 = vector.shape_cast %227 : vector<1x1x64xf32> to vector<1x64xf32>
    %229 = vector.broadcast %228 : vector<1x64xf32> to vector<2x64xf32>
    %230 = arith.addf %226, %229 : vector<2x64xf32>
    %c5_154 = arith.constant 5 : index
    %c0_155 = arith.constant 0 : index
    %c0_156 = arith.constant 0 : index
    %231 = vector.load %arg4[%c5_154, %c0_155, %c0_156] : memref<8x416x64xbf16, #tpu.memory_space<vmem>>, vector<1x416x64xbf16>
    %232 = vector.shape_cast %231 : vector<1x416x64xbf16> to vector<416x64xbf16>
    %cst_157 = arith.constant dense<0.000000e+00> : vector<2x64xf32>
    %233 = tpu.matmul %2, %232, %cst_157 {dimension_numbers = #tpu.dot_dimension_numbers<[1], [0], [0], [1], [0, 0, 1, 1], [], []>} : vector<2x416xbf16>, vector<416x64xbf16>, vector<2x64xf32> -> vector<2x64xf32>
    %c5_158 = arith.constant 5 : index
    %c0_159 = arith.constant 0 : index
    %c0_160 = arith.constant 0 : index
    %234 = vector.load %arg5[%c5_158, %c0_159, %c0_160] : memref<8x1x64xf32, #tpu.memory_space<vmem>>, vector<1x1x64xf32>
    %235 = vector.shape_cast %234 : vector<1x1x64xf32> to vector<1x64xf32>
    %236 = vector.broadcast %235 : vector<1x64xf32> to vector<2x64xf32>
    %237 = arith.addf %233, %236 : vector<2x64xf32>
    %c5_161 = arith.constant 5 : index
    %c0_162 = arith.constant 0 : index
    %c0_163 = arith.constant 0 : index
    %238 = vector.load %arg6[%c5_161, %c0_162, %c0_163] : memref<8x416x64xbf16, #tpu.memory_space<vmem>>, vector<1x416x64xbf16>
    %239 = vector.shape_cast %238 : vector<1x416x64xbf16> to vector<416x64xbf16>
    %cst_164 = arith.constant dense<0.000000e+00> : vector<2x64xf32>
    %240 = tpu.matmul %2, %239, %cst_164 {dimension_numbers = #tpu.dot_dimension_numbers<[1], [0], [0], [1], [0, 0, 1, 1], [], []>} : vector<2x416xbf16>, vector<416x64xbf16>, vector<2x64xf32> -> vector<2x64xf32>
    %c5_165 = arith.constant 5 : index
    %c0_166 = arith.constant 0 : index
    %c0_167 = arith.constant 0 : index
    %241 = vector.load %arg7[%c5_165, %c0_166, %c0_167] : memref<8x1x64xf32, #tpu.memory_space<vmem>>, vector<1x1x64xf32>
    %242 = vector.shape_cast %241 : vector<1x1x64xf32> to vector<1x64xf32>
    %243 = vector.broadcast %242 : vector<1x64xf32> to vector<2x64xf32>
    %244 = arith.addf %240, %243 : vector<2x64xf32>
    %245 = arith.truncf %230 : vector<2x64xf32> to vector<2x64xbf16>
    %246 = arith.truncf %237 : vector<2x64xf32> to vector<2x64xbf16>
    %cst_168 = arith.constant dense<0.000000e+00> : vector<2x2xf32>
    %247 = tpu.matmul %245, %246, %cst_168 {dimension_numbers = #tpu.dot_dimension_numbers<[1], [1], [0], [0], [0, 0, 1, 0], [], []>} : vector<2x64xbf16>, vector<2x64xbf16>, vector<2x2xf32> -> vector<2x2xf32>
    %cst_169 = arith.constant 0.138675049 : f32
    %248 = vector.broadcast %cst_169 : f32 to vector<2x2xf32>
    %249 = arith.mulf %247, %248 : vector<2x2xf32>
    %cst_170 = arith.constant dense<0xFF800000> : vector<2xf32>
    %250 = vector.multi_reduction <maximumf>, %249, %cst_170 [1] : vector<2x2xf32> to vector<2xf32>
    %251 = vector.shape_cast %250 : vector<2xf32> to vector<2x1xf32>
    %252 = vector.broadcast %251 : vector<2x1xf32> to vector<2x2xf32>
    %253 = arith.subf %249, %252 : vector<2x2xf32>
    %254 = math.exp %253 : vector<2x2xf32>
    %cst_171 = arith.constant dense<0.000000e+00> : vector<2xf32>
    %255 = vector.multi_reduction <add>, %254, %cst_171 [1] : vector<2x2xf32> to vector<2xf32>
    %256 = vector.shape_cast %255 : vector<2xf32> to vector<2x1xf32>
    %257 = tpu.reciprocal %256 {approx = true} : vector<2x1xf32> -> vector<2x1xf32>
    %258 = vector.broadcast %257 : vector<2x1xf32> to vector<2x2xf32>
    %259 = arith.mulf %254, %258 : vector<2x2xf32>
    %260 = arith.truncf %259 : vector<2x2xf32> to vector<2x2xbf16>
    %261 = arith.truncf %244 : vector<2x64xf32> to vector<2x64xbf16>
    %cst_172 = arith.constant dense<0.000000e+00> : vector<2x64xf32>
    %262 = tpu.matmul %260, %261, %cst_172 {dimension_numbers = #tpu.dot_dimension_numbers<[1], [0], [0], [1], [0, 0, 1, 1], [], []>} : vector<2x2xbf16>, vector<2x64xbf16>, vector<2x64xf32> -> vector<2x64xf32>
    %263 = arith.truncf %262 : vector<2x64xf32> to vector<2x64xbf16>
    %c5_173 = arith.constant 5 : index
    %c0_174 = arith.constant 0 : index
    %c0_175 = arith.constant 0 : index
    %264 = vector.load %arg8[%c5_173, %c0_174, %c0_175] : memref<8x64x416xbf16, #tpu.memory_space<vmem>>, vector<1x64x416xbf16>
    %265 = vector.shape_cast %264 : vector<1x64x416xbf16> to vector<64x416xbf16>
    %cst_176 = arith.constant dense<0.000000e+00> : vector<2x416xf32>
    %266 = tpu.matmul %263, %265, %cst_176 {dimension_numbers = #tpu.dot_dimension_numbers<[1], [0], [0], [1], [0, 0, 1, 1], [], []>} : vector<2x64xbf16>, vector<64x416xbf16>, vector<2x416xf32> -> vector<2x416xf32>
    %267 = arith.addf %223, %266 : vector<2x416xf32>
    %c6 = arith.constant 6 : index
    %c0_177 = arith.constant 0 : index
    %c0_178 = arith.constant 0 : index
    %268 = vector.load %arg2[%c6, %c0_177, %c0_178] : memref<8x416x64xbf16, #tpu.memory_space<vmem>>, vector<1x416x64xbf16>
    %269 = vector.shape_cast %268 : vector<1x416x64xbf16> to vector<416x64xbf16>
    %cst_179 = arith.constant dense<0.000000e+00> : vector<2x64xf32>
    %270 = tpu.matmul %2, %269, %cst_179 {dimension_numbers = #tpu.dot_dimension_numbers<[1], [0], [0], [1], [0, 0, 1, 1], [], []>} : vector<2x416xbf16>, vector<416x64xbf16>, vector<2x64xf32> -> vector<2x64xf32>
    %c6_180 = arith.constant 6 : index
    %c0_181 = arith.constant 0 : index
    %c0_182 = arith.constant 0 : index
    %271 = vector.load %arg3[%c6_180, %c0_181, %c0_182] : memref<8x1x64xf32, #tpu.memory_space<vmem>>, vector<1x1x64xf32>
    %272 = vector.shape_cast %271 : vector<1x1x64xf32> to vector<1x64xf32>
    %273 = vector.broadcast %272 : vector<1x64xf32> to vector<2x64xf32>
    %274 = arith.addf %270, %273 : vector<2x64xf32>
    %c6_183 = arith.constant 6 : index
    %c0_184 = arith.constant 0 : index
    %c0_185 = arith.constant 0 : index
    %275 = vector.load %arg4[%c6_183, %c0_184, %c0_185] : memref<8x416x64xbf16, #tpu.memory_space<vmem>>, vector<1x416x64xbf16>
    %276 = vector.shape_cast %275 : vector<1x416x64xbf16> to vector<416x64xbf16>
    %cst_186 = arith.constant dense<0.000000e+00> : vector<2x64xf32>
    %277 = tpu.matmul %2, %276, %cst_186 {dimension_numbers = #tpu.dot_dimension_numbers<[1], [0], [0], [1], [0, 0, 1, 1], [], []>} : vector<2x416xbf16>, vector<416x64xbf16>, vector<2x64xf32> -> vector<2x64xf32>
    %c6_187 = arith.constant 6 : index
    %c0_188 = arith.constant 0 : index
    %c0_189 = arith.constant 0 : index
    %278 = vector.load %arg5[%c6_187, %c0_188, %c0_189] : memref<8x1x64xf32, #tpu.memory_space<vmem>>, vector<1x1x64xf32>
    %279 = vector.shape_cast %278 : vector<1x1x64xf32> to vector<1x64xf32>
    %280 = vector.broadcast %279 : vector<1x64xf32> to vector<2x64xf32>
    %281 = arith.addf %277, %280 : vector<2x64xf32>
    %c6_190 = arith.constant 6 : index
    %c0_191 = arith.constant 0 : index
    %c0_192 = arith.constant 0 : index
    %282 = vector.load %arg6[%c6_190, %c0_191, %c0_192] : memref<8x416x64xbf16, #tpu.memory_space<vmem>>, vector<1x416x64xbf16>
    %283 = vector.shape_cast %282 : vector<1x416x64xbf16> to vector<416x64xbf16>
    %cst_193 = arith.constant dense<0.000000e+00> : vector<2x64xf32>
    %284 = tpu.matmul %2, %283, %cst_193 {dimension_numbers = #tpu.dot_dimension_numbers<[1], [0], [0], [1], [0, 0, 1, 1], [], []>} : vector<2x416xbf16>, vector<416x64xbf16>, vector<2x64xf32> -> vector<2x64xf32>
    %c6_194 = arith.constant 6 : index
    %c0_195 = arith.constant 0 : index
    %c0_196 = arith.constant 0 : index
    %285 = vector.load %arg7[%c6_194, %c0_195, %c0_196] : memref<8x1x64xf32, #tpu.memory_space<vmem>>, vector<1x1x64xf32>
    %286 = vector.shape_cast %285 : vector<1x1x64xf32> to vector<1x64xf32>
    %287 = vector.broadcast %286 : vector<1x64xf32> to vector<2x64xf32>
    %288 = arith.addf %284, %287 : vector<2x64xf32>
    %289 = arith.truncf %274 : vector<2x64xf32> to vector<2x64xbf16>
    %290 = arith.truncf %281 : vector<2x64xf32> to vector<2x64xbf16>
    %cst_197 = arith.constant dense<0.000000e+00> : vector<2x2xf32>
    %291 = tpu.matmul %289, %290, %cst_197 {dimension_numbers = #tpu.dot_dimension_numbers<[1], [1], [0], [0], [0, 0, 1, 0], [], []>} : vector<2x64xbf16>, vector<2x64xbf16>, vector<2x2xf32> -> vector<2x2xf32>
    %cst_198 = arith.constant 0.138675049 : f32
    %292 = vector.broadcast %cst_198 : f32 to vector<2x2xf32>
    %293 = arith.mulf %291, %292 : vector<2x2xf32>
    %cst_199 = arith.constant dense<0xFF800000> : vector<2xf32>
    %294 = vector.multi_reduction <maximumf>, %293, %cst_199 [1] : vector<2x2xf32> to vector<2xf32>
    %295 = vector.shape_cast %294 : vector<2xf32> to vector<2x1xf32>
    %296 = vector.broadcast %295 : vector<2x1xf32> to vector<2x2xf32>
    %297 = arith.subf %293, %296 : vector<2x2xf32>
    %298 = math.exp %297 : vector<2x2xf32>
    %cst_200 = arith.constant dense<0.000000e+00> : vector<2xf32>
    %299 = vector.multi_reduction <add>, %298, %cst_200 [1] : vector<2x2xf32> to vector<2xf32>
    %300 = vector.shape_cast %299 : vector<2xf32> to vector<2x1xf32>
    %301 = tpu.reciprocal %300 {approx = true} : vector<2x1xf32> -> vector<2x1xf32>
    %302 = vector.broadcast %301 : vector<2x1xf32> to vector<2x2xf32>
    %303 = arith.mulf %298, %302 : vector<2x2xf32>
    %304 = arith.truncf %303 : vector<2x2xf32> to vector<2x2xbf16>
    %305 = arith.truncf %288 : vector<2x64xf32> to vector<2x64xbf16>
    %cst_201 = arith.constant dense<0.000000e+00> : vector<2x64xf32>
    %306 = tpu.matmul %304, %305, %cst_201 {dimension_numbers = #tpu.dot_dimension_numbers<[1], [0], [0], [1], [0, 0, 1, 1], [], []>} : vector<2x2xbf16>, vector<2x64xbf16>, vector<2x64xf32> -> vector<2x64xf32>
    %307 = arith.truncf %306 : vector<2x64xf32> to vector<2x64xbf16>
    %c6_202 = arith.constant 6 : index
    %c0_203 = arith.constant 0 : index
    %c0_204 = arith.constant 0 : index
    %308 = vector.load %arg8[%c6_202, %c0_203, %c0_204] : memref<8x64x416xbf16, #tpu.memory_space<vmem>>, vector<1x64x416xbf16>
    %309 = vector.shape_cast %308 : vector<1x64x416xbf16> to vector<64x416xbf16>
    %cst_205 = arith.constant dense<0.000000e+00> : vector<2x416xf32>
    %310 = tpu.matmul %307, %309, %cst_205 {dimension_numbers = #tpu.dot_dimension_numbers<[1], [0], [0], [1], [0, 0, 1, 1], [], []>} : vector<2x64xbf16>, vector<64x416xbf16>, vector<2x416xf32> -> vector<2x416xf32>
    %311 = arith.addf %267, %310 : vector<2x416xf32>
    %c7 = arith.constant 7 : index
    %c0_206 = arith.constant 0 : index
    %c0_207 = arith.constant 0 : index
    %312 = vector.load %arg2[%c7, %c0_206, %c0_207] : memref<8x416x64xbf16, #tpu.memory_space<vmem>>, vector<1x416x64xbf16>
    %313 = vector.shape_cast %312 : vector<1x416x64xbf16> to vector<416x64xbf16>
    %cst_208 = arith.constant dense<0.000000e+00> : vector<2x64xf32>
    %314 = tpu.matmul %2, %313, %cst_208 {dimension_numbers = #tpu.dot_dimension_numbers<[1], [0], [0], [1], [0, 0, 1, 1], [], []>} : vector<2x416xbf16>, vector<416x64xbf16>, vector<2x64xf32> -> vector<2x64xf32>
    %c7_209 = arith.constant 7 : index
    %c0_210 = arith.constant 0 : index
    %c0_211 = arith.constant 0 : index
    %315 = vector.load %arg3[%c7_209, %c0_210, %c0_211] : memref<8x1x64xf32, #tpu.memory_space<vmem>>, vector<1x1x64xf32>
    %316 = vector.shape_cast %315 : vector<1x1x64xf32> to vector<1x64xf32>
    %317 = vector.broadcast %316 : vector<1x64xf32> to vector<2x64xf32>
    %318 = arith.addf %314, %317 : vector<2x64xf32>
    %c7_212 = arith.constant 7 : index
    %c0_213 = arith.constant 0 : index
    %c0_214 = arith.constant 0 : index
    %319 = vector.load %arg4[%c7_212, %c0_213, %c0_214] : memref<8x416x64xbf16, #tpu.memory_space<vmem>>, vector<1x416x64xbf16>
    %320 = vector.shape_cast %319 : vector<1x416x64xbf16> to vector<416x64xbf16>
    %cst_215 = arith.constant dense<0.000000e+00> : vector<2x64xf32>
    %321 = tpu.matmul %2, %320, %cst_215 {dimension_numbers = #tpu.dot_dimension_numbers<[1], [0], [0], [1], [0, 0, 1, 1], [], []>} : vector<2x416xbf16>, vector<416x64xbf16>, vector<2x64xf32> -> vector<2x64xf32>
    %c7_216 = arith.constant 7 : index
    %c0_217 = arith.constant 0 : index
    %c0_218 = arith.constant 0 : index
    %322 = vector.load %arg5[%c7_216, %c0_217, %c0_218] : memref<8x1x64xf32, #tpu.memory_space<vmem>>, vector<1x1x64xf32>
    %323 = vector.shape_cast %322 : vector<1x1x64xf32> to vector<1x64xf32>
    %324 = vector.broadcast %323 : vector<1x64xf32> to vector<2x64xf32>
    %325 = arith.addf %321, %324 : vector<2x64xf32>
    %c7_219 = arith.constant 7 : index
    %c0_220 = arith.constant 0 : index
    %c0_221 = arith.constant 0 : index
    %326 = vector.load %arg6[%c7_219, %c0_220, %c0_221] : memref<8x416x64xbf16, #tpu.memory_space<vmem>>, vector<1x416x64xbf16>
    %327 = vector.shape_cast %326 : vector<1x416x64xbf16> to vector<416x64xbf16>
    %cst_222 = arith.constant dense<0.000000e+00> : vector<2x64xf32>
    %328 = tpu.matmul %2, %327, %cst_222 {dimension_numbers = #tpu.dot_dimension_numbers<[1], [0], [0], [1], [0, 0, 1, 1], [], []>} : vector<2x416xbf16>, vector<416x64xbf16>, vector<2x64xf32> -> vector<2x64xf32>
    %c7_223 = arith.constant 7 : index
    %c0_224 = arith.constant 0 : index
    %c0_225 = arith.constant 0 : index
    %329 = vector.load %arg7[%c7_223, %c0_224, %c0_225] : memref<8x1x64xf32, #tpu.memory_space<vmem>>, vector<1x1x64xf32>
    %330 = vector.shape_cast %329 : vector<1x1x64xf32> to vector<1x64xf32>
    %331 = vector.broadcast %330 : vector<1x64xf32> to vector<2x64xf32>
    %332 = arith.addf %328, %331 : vector<2x64xf32>
    %333 = arith.truncf %318 : vector<2x64xf32> to vector<2x64xbf16>
    %334 = arith.truncf %325 : vector<2x64xf32> to vector<2x64xbf16>
    %cst_226 = arith.constant dense<0.000000e+00> : vector<2x2xf32>
    %335 = tpu.matmul %333, %334, %cst_226 {dimension_numbers = #tpu.dot_dimension_numbers<[1], [1], [0], [0], [0, 0, 1, 0], [], []>} : vector<2x64xbf16>, vector<2x64xbf16>, vector<2x2xf32> -> vector<2x2xf32>
    %cst_227 = arith.constant 0.138675049 : f32
    %336 = vector.broadcast %cst_227 : f32 to vector<2x2xf32>
    %337 = arith.mulf %335, %336 : vector<2x2xf32>
    %cst_228 = arith.constant dense<0xFF800000> : vector<2xf32>
    %338 = vector.multi_reduction <maximumf>, %337, %cst_228 [1] : vector<2x2xf32> to vector<2xf32>
    %339 = vector.shape_cast %338 : vector<2xf32> to vector<2x1xf32>
    %340 = vector.broadcast %339 : vector<2x1xf32> to vector<2x2xf32>
    %341 = arith.subf %337, %340 : vector<2x2xf32>
    %342 = math.exp %341 : vector<2x2xf32>
    %cst_229 = arith.constant dense<0.000000e+00> : vector<2xf32>
    %343 = vector.multi_reduction <add>, %342, %cst_229 [1] : vector<2x2xf32> to vector<2xf32>
    %344 = vector.shape_cast %343 : vector<2xf32> to vector<2x1xf32>
    %345 = tpu.reciprocal %344 {approx = true} : vector<2x1xf32> -> vector<2x1xf32>
    %346 = vector.broadcast %345 : vector<2x1xf32> to vector<2x2xf32>
    %347 = arith.mulf %342, %346 : vector<2x2xf32>
    %348 = arith.truncf %347 : vector<2x2xf32> to vector<2x2xbf16>
    %349 = arith.truncf %332 : vector<2x64xf32> to vector<2x64xbf16>
    %cst_230 = arith.constant dense<0.000000e+00> : vector<2x64xf32>
    %350 = tpu.matmul %348, %349, %cst_230 {dimension_numbers = #tpu.dot_dimension_numbers<[1], [0], [0], [1], [0, 0, 1, 1], [], []>} : vector<2x2xbf16>, vector<2x64xbf16>, vector<2x64xf32> -> vector<2x64xf32>
    %351 = arith.truncf %350 : vector<2x64xf32> to vector<2x64xbf16>
    %c7_231 = arith.constant 7 : index
    %c0_232 = arith.constant 0 : index
    %c0_233 = arith.constant 0 : index
    %352 = vector.load %arg8[%c7_231, %c0_232, %c0_233] : memref<8x64x416xbf16, #tpu.memory_space<vmem>>, vector<1x64x416xbf16>
    %353 = vector.shape_cast %352 : vector<1x64x416xbf16> to vector<64x416xbf16>
    %cst_234 = arith.constant dense<0.000000e+00> : vector<2x416xf32>
    %354 = tpu.matmul %351, %353, %cst_234 {dimension_numbers = #tpu.dot_dimension_numbers<[1], [0], [0], [1], [0, 0, 1, 1], [], []>} : vector<2x64xbf16>, vector<64x416xbf16>, vector<2x416xf32> -> vector<2x416xf32>
    %355 = arith.addf %311, %354 : vector<2x416xf32>
    %c0_235 = arith.constant 0 : index
    %c0_236 = arith.constant 0 : index
    %356 = vector.load %arg9[%c0_235, %c0_236] : memref<1x416xf32, #tpu.memory_space<vmem>>, vector<1x416xf32>
    %357 = vector.broadcast %356 : vector<1x416xf32> to vector<2x416xf32>
    %358 = arith.addf %355, %357 : vector<2x416xf32>
    %359 = arith.addf %1, %358 : vector<2x416xf32>
    %c0_237 = arith.constant 0 : index
    %c0_238 = arith.constant 0 : index
    %360 = vector.load %arg10[%c0_237, %c0_238] : memref<1x416xf32, #tpu.memory_space<vmem>>, vector<1x416xf32>
    %c0_239 = arith.constant 0 : index
    %c0_240 = arith.constant 0 : index
    %361 = vector.load %arg11[%c0_239, %c0_240] : memref<1x416xf32, #tpu.memory_space<vmem>>, vector<1x416xf32>
    %cst_241 = arith.constant dense<0.000000e+00> : vector<2xf32>
    %362 = vector.multi_reduction <add>, %359, %cst_241 [1] : vector<2x416xf32> to vector<2xf32>
    %363 = vector.shape_cast %362 : vector<2xf32> to vector<2x1xf32>
    %cst_242 = arith.constant 4.160000e+02 : f32
    %364 = vector.broadcast %cst_242 : f32 to vector<2x1xf32>
    %365 = arith.divf %363, %364 : vector<2x1xf32>
    %366 = vector.broadcast %365 : vector<2x1xf32> to vector<2x416xf32>
    %367 = arith.subf %359, %366 : vector<2x416xf32>
    %368 = arith.mulf %367, %367 : vector<2x416xf32>
    %cst_243 = arith.constant dense<0.000000e+00> : vector<2xf32>
    %369 = vector.multi_reduction <add>, %368, %cst_243 [1] : vector<2x416xf32> to vector<2xf32>
    %370 = vector.shape_cast %369 : vector<2xf32> to vector<2x1xf32>
    %cst_244 = arith.constant 4.160000e+02 : f32
    %371 = vector.broadcast %cst_244 : f32 to vector<2x1xf32>
    %372 = arith.divf %370, %371 : vector<2x1xf32>
    %cst_245 = arith.constant 9.99999974E-6 : f32
    %373 = vector.broadcast %cst_245 : f32 to vector<2x1xf32>
    %374 = arith.addf %372, %373 : vector<2x1xf32>
    %375 = math.rsqrt %374 : vector<2x1xf32>
    %376 = vector.broadcast %375 : vector<2x1xf32> to vector<2x416xf32>
    %377 = arith.mulf %367, %376 : vector<2x416xf32>
    %378 = vector.broadcast %360 : vector<1x416xf32> to vector<2x416xf32>
    %379 = arith.mulf %377, %378 : vector<2x416xf32>
    %380 = vector.broadcast %361 : vector<1x416xf32> to vector<2x416xf32>
    %381 = arith.addf %379, %380 : vector<2x416xf32>
    %382 = arith.truncf %381 : vector<2x416xf32> to vector<2x416xbf16>
    %c0_246 = arith.constant 0 : index
    %c0_247 = arith.constant 0 : index
    %383 = vector.load %arg12[%c0_246, %c0_247] : memref<416x2048xbf16, #tpu.memory_space<vmem>>, vector<416x2048xbf16>
    %cst_248 = arith.constant dense<0.000000e+00> : vector<2x2048xf32>
    %384 = tpu.matmul %382, %383, %cst_248 {dimension_numbers = #tpu.dot_dimension_numbers<[1], [0], [0], [1], [0, 0, 1, 1], [], []>} : vector<2x416xbf16>, vector<416x2048xbf16>, vector<2x2048xf32> -> vector<2x2048xf32>
    %c0_249 = arith.constant 0 : index
    %c0_250 = arith.constant 0 : index
    %385 = vector.load %arg13[%c0_249, %c0_250] : memref<1x2048xf32, #tpu.memory_space<vmem>>, vector<1x2048xf32>
    %386 = vector.broadcast %385 : vector<1x2048xf32> to vector<2x2048xf32>
    %387 = arith.addf %384, %386 : vector<2x2048xf32>
    %cst_251 = arith.constant 0.000000e+00 : f32
    %388 = vector.broadcast %cst_251 : f32 to vector<2x2048xf32>
    %389 = arith.maximumf %387, %388 : vector<2x2048xf32>
    %390 = arith.truncf %389 : vector<2x2048xf32> to vector<2x2048xbf16>
    %c0_252 = arith.constant 0 : index
    %c0_253 = arith.constant 0 : index
    %391 = vector.load %arg14[%c0_252, %c0_253] : memref<2048x416xbf16, #tpu.memory_space<vmem>>, vector<2048x416xbf16>
    %cst_254 = arith.constant dense<0.000000e+00> : vector<2x416xf32>
    %392 = tpu.matmul %390, %391, %cst_254 {dimension_numbers = #tpu.dot_dimension_numbers<[1], [0], [0], [1], [0, 0, 1, 1], [], []>} : vector<2x2048xbf16>, vector<2048x416xbf16>, vector<2x416xf32> -> vector<2x416xf32>
    %c0_255 = arith.constant 0 : index
    %c0_256 = arith.constant 0 : index
    %393 = vector.load %arg15[%c0_255, %c0_256] : memref<1x416xf32, #tpu.memory_space<vmem>>, vector<1x416xf32>
    %394 = vector.broadcast %393 : vector<1x416xf32> to vector<2x416xf32>
    %395 = arith.addf %392, %394 : vector<2x416xf32>
    %396 = arith.addf %381, %395 : vector<2x416xf32>
    %c0_257 = arith.constant 0 : index
    %c0_258 = arith.constant 0 : index
    %397 = vector.load %arg16[%c0_257, %c0_258] : memref<1x416xf32, #tpu.memory_space<vmem>>, vector<1x416xf32>
    %c0_259 = arith.constant 0 : index
    %c0_260 = arith.constant 0 : index
    %398 = vector.load %arg17[%c0_259, %c0_260] : memref<1x416xf32, #tpu.memory_space<vmem>>, vector<1x416xf32>
    %cst_261 = arith.constant dense<0.000000e+00> : vector<2xf32>
    %399 = vector.multi_reduction <add>, %396, %cst_261 [1] : vector<2x416xf32> to vector<2xf32>
    %400 = vector.shape_cast %399 : vector<2xf32> to vector<2x1xf32>
    %cst_262 = arith.constant 4.160000e+02 : f32
    %401 = vector.broadcast %cst_262 : f32 to vector<2x1xf32>
    %402 = arith.divf %400, %401 : vector<2x1xf32>
    %403 = vector.broadcast %402 : vector<2x1xf32> to vector<2x416xf32>
    %404 = arith.subf %396, %403 : vector<2x416xf32>
    %405 = arith.mulf %404, %404 : vector<2x416xf32>
    %cst_263 = arith.constant dense<0.000000e+00> : vector<2xf32>
    %406 = vector.multi_reduction <add>, %405, %cst_263 [1] : vector<2x416xf32> to vector<2xf32>
    %407 = vector.shape_cast %406 : vector<2xf32> to vector<2x1xf32>
    %cst_264 = arith.constant 4.160000e+02 : f32
    %408 = vector.broadcast %cst_264 : f32 to vector<2x1xf32>
    %409 = arith.divf %407, %408 : vector<2x1xf32>
    %cst_265 = arith.constant 9.99999974E-6 : f32
    %410 = vector.broadcast %cst_265 : f32 to vector<2x1xf32>
    %411 = arith.addf %409, %410 : vector<2x1xf32>
    %412 = math.rsqrt %411 : vector<2x1xf32>
    %413 = vector.broadcast %412 : vector<2x1xf32> to vector<2x416xf32>
    %414 = arith.mulf %404, %413 : vector<2x416xf32>
    %415 = vector.broadcast %397 : vector<1x416xf32> to vector<2x416xf32>
    %416 = arith.mulf %414, %415 : vector<2x416xf32>
    %417 = vector.broadcast %398 : vector<1x416xf32> to vector<2x416xf32>
    %418 = arith.addf %416, %417 : vector<2x416xf32>
    %c0_266 = arith.constant 0 : index
    %c0_267 = arith.constant 0 : index
    %c0_268 = arith.constant 0 : index
    %419 = vector.load %arg18[%c0_266, %c0_267, %c0_268] : memref<1x2x416xf32, #tpu.memory_space<vmem>>, vector<1x2x416xf32>
    %420 = vector.shape_cast %419 : vector<1x2x416xf32> to vector<2x416xf32>
    %421 = vector.shape_cast %418 : vector<2x416xf32> to vector<1x2x416xf32>
    tpu.vector_store %arg18[%c0_266, %c0_267, %c0_268], %421 {strides = array<i32>} : memref<1x2x416xf32, #tpu.memory_space<vmem>>, vector<1x2x416xf32>,
    return
  }
  func.func @transform_0(%arg0: i32) -> (i32, i32, i32) {
    %c0_i32 = arith.constant 0 : i32
    %c0_i32_0 = arith.constant 0 : i32
    %c0_i32_1 = arith.constant 0 : i32
    return %arg0, %c0_i32, %c0_i32_0 : i32, i32, i32
  }
  func.func @transform_1(%arg0: i32) -> (i32, i32, i32) {
    %c0_i32 = arith.constant 0 : i32
    %c0_i32_0 = arith.constant 0 : i32
    %c0_i32_1 = arith.constant 0 : i32
    %c0_i32_2 = arith.constant 0 : i32
    return %c0_i32, %c0_i32_0, %c0_i32_1 : i32, i32, i32
  }
  func.func @transform_2(%arg0: i32) -> (i32, i32, i32) {
    %c0_i32 = arith.constant 0 : i32
    %c0_i32_0 = arith.constant 0 : i32
    %c0_i32_1 = arith.constant 0 : i32
    %c0_i32_2 = arith.constant 0 : i32
    return %c0_i32, %c0_i32_0, %c0_i32_1 : i32, i32, i32
  }
  func.func @transform_3(%arg0: i32) -> (i32, i32, i32) {
    %c0_i32 = arith.constant 0 : i32
    %c0_i32_0 = arith.constant 0 : i32
    %c0_i32_1 = arith.constant 0 : i32
    %c0_i32_2 = arith.constant 0 : i32
    return %c0_i32, %c0_i32_0, %c0_i32_1 : i32, i32, i32
  }
  func.func @transform_4(%arg0: i32) -> (i32, i32, i32) {
    %c0_i32 = arith.constant 0 : i32
    %c0_i32_0 = arith.constant 0 : i32
    %c0_i32_1 = arith.constant 0 : i32
    %c0_i32_2 = arith.constant 0 : i32
    return %c0_i32, %c0_i32_0, %c0_i32_1 : i32, i32, i32
  }
  func.func @transform_5(%arg0: i32) -> (i32, i32, i32) {
    %c0_i32 = arith.constant 0 : i32
    %c0_i32_0 = arith.constant 0 : i32
    %c0_i32_1 = arith.constant 0 : i32
    %c0_i32_2 = arith.constant 0 : i32
    return %c0_i32, %c0_i32_0, %c0_i32_1 : i32, i32, i32
  }
  func.func @transform_6(%arg0: i32) -> (i32, i32, i32) {
    %c0_i32 = arith.constant 0 : i32
    %c0_i32_0 = arith.constant 0 : i32
    %c0_i32_1 = arith.constant 0 : i32
    %c0_i32_2 = arith.constant 0 : i32
    return %c0_i32, %c0_i32_0, %c0_i32_1 : i32, i32, i32
  }
  func.func @transform_7(%arg0: i32) -> (i32, i32, i32) {
    %c0_i32 = arith.constant 0 : i32
    %c0_i32_0 = arith.constant 0 : i32
    %c0_i32_1 = arith.constant 0 : i32
    %c0_i32_2 = arith.constant 0 : i32
    return %c0_i32, %c0_i32_0, %c0_i32_1 : i32, i32, i32
  }
  func.func @transform_8(%arg0: i32) -> (i32, i32) {
    %c0_i32 = arith.constant 0 : i32
    %c0_i32_0 = arith.constant 0 : i32
    %c0_i32_1 = arith.constant 0 : i32
    return %c0_i32, %c0_i32_0 : i32, i32
  }
  func.func @transform_9(%arg0: i32) -> (i32, i32) {
    %c0_i32 = arith.constant 0 : i32
    %c0_i32_0 = arith.constant 0 : i32
    %c0_i32_1 = arith.constant 0 : i32
    return %c0_i32, %c0_i32_0 : i32, i32
  }
  func.func @transform_10(%arg0: i32) -> (i32, i32) {
    %c0_i32 = arith.constant 0 : i32
    %c0_i32_0 = arith.constant 0 : i32
    %c0_i32_1 = arith.constant 0 : i32
    return %c0_i32, %c0_i32_0 : i32, i32
  }
  func.func @transform_11(%arg0: i32) -> (i32, i32) {
    %c0_i32 = arith.constant 0 : i32
    %c0_i32_0 = arith.constant 0 : i32
    %c0_i32_1 = arith.constant 0 : i32
    return %c0_i32, %c0_i32_0 : i32, i32
  }
  func.func @transform_12(%arg0: i32) -> (i32, i32) {
    %c0_i32 = arith.constant 0 : i32
    %c0_i32_0 = arith.constant 0 : i32
    %c0_i32_1 = arith.constant 0 : i32
    return %c0_i32, %c0_i32_0 : i32, i32
  }
  func.func @transform_13(%arg0: i32) -> (i32, i32) {
    %c0_i32 = arith.constant 0 : i32
    %c0_i32_0 = arith.constant 0 : i32
    %c0_i32_1 = arith.constant 0 : i32
    return %c0_i32, %c0_i32_0 : i32, i32
  }
  func.func @transform_14(%arg0: i32) -> (i32, i32) {
    %c0_i32 = arith.constant 0 : i32
    %c0_i32_0 = arith.constant 0 : i32
    %c0_i32_1 = arith.constant 0 : i32
    return %c0_i32, %c0_i32_0 : i32, i32
  }
  func.func @transform_15(%arg0: i32) -> (i32, i32) {
    %c0_i32 = arith.constant 0 : i32
    %c0_i32_0 = arith.constant 0 : i32
    %c0_i32_1 = arith.constant 0 : i32
    return %c0_i32, %c0_i32_0 : i32, i32
  }
  func.func @transform_16(%arg0: i32) -> (i32, i32) {
    %c0_i32 = arith.constant 0 : i32
    %c0_i32_0 = arith.constant 0 : i32
    %c0_i32_1 = arith.constant 0 : i32
    return %c0_i32, %c0_i32_0 : i32, i32
  }
  func.func @transform_17(%arg0: i32) -> (i32, i32, i32) {
    %c0_i32 = arith.constant 0 : i32
    %c0_i32_0 = arith.constant 0 : i32
    %c0_i32_1 = arith.constant 0 : i32
    return %arg0, %c0_i32, %c0_i32_0 : i32, i32, i32
  }
}

</mosaic_0001>

<bundles_post_ra>
// kernel: frame_conformer_forward.7
= control target key start
LH: loop header
LB: loop body
LE: loop exit
PB: predicated region body
PF: predicated region fallthrough
CT: control target
= control target key end

     0   :  { %vm190_vm0 = vcmask 1043456   ;;  %vm191_vm1 = vcmask 1044480   ;;  %vm141_vm2 = vcmask 72704   ;;  %v532_v1 = vmov 65535   ;;  %s785_s1 = inlined_call_operand.vmem [shape: bf16[9,16], index: 1, kind: input, shape index: {}]   ;;  %s786_s0 = inlined_call_operand.vmem [shape: bf16[256,9], index: 0, kind: input, shape index: {}]   ;;  %s787_s2 = inlined_call_operand.vmem [shape: f32[1,16], index: 2, kind: input, shape index: {}]   ;;  %s788_s3 = inlined_call_operand.vmem [shape: f32[256,16], index: 3, kind: output, shape index: {}]  }
   0x1   :  { %v515_v0 = vld [vmem:[%s785_s1] sm:$0x1f]   ;;  %v192_v2 = vsel %vm190_vm0, 4294967295, %v532_v1  ;;  %v518_v7 = vld [vmem:[%s786_s0 + $0x8] sm:$0xff]   ;;  %v520_v9 = vld [vmem:[%s786_s0 + $0x10] sm:$0xff]   ;;  %vm390_vm3 = vcmask 130048  }
   0x2   :  { %v516_v3 = vld [vmem:[%s786_s0] sm:$0xff]   ;;  %v193_v4 = vsel %vm191_vm1, %v192_v2, 0  ;;  %v519_v8 = vld [vmem:[%s786_s0 + $0x48] sm:$0xff]   ;;  %v521_v10 = vld [vmem:[%s786_s0 + $0x50] sm:$0xff]  }
   0x3   :  { %v517_v5 = vld [vmem:[%s786_s0 + $0x40] sm:$0xff]   ;;  %v195_v6 = vand.u32 %v515_v0, %v193_v4  ;;  %480 = vmatprep.mubr.msk.bf16.mxu0 %vm141_vm2, %v516_v3  ;;  %v522_v11 = vld [vmem:[%s786_s0 + $0x18] sm:$0xff]   ;;  %v526_v15 = vld [vmem:[%s786_s0 + $0x28] sm:$0xff]  }
   0x4   :  { %496 = vmatprep.mubr.msk.bf16.mxu1 %vm141_vm2, %v517_v5  ;;  %v523_v12 = vld [vmem:[%s786_s0 + $0x58] sm:$0xff]   ;;  %v524_v13 = vld [vmem:[%s786_s0 + $0x20] sm:$0xff]   ;;  %v527_v16 = vld [vmem:[%s786_s0 + $0x68] sm:$0xff]  }
   0x5   :  { %478 = vmatprep.subr.bf16.mxu0 %v195_v6  ;;  %512 = vmatprep.subr.bf16.mxu1 %v195_v6  ;;  %v525_v14 = vld [vmem:[%s786_s0 + $0x60] sm:$0xff]   ;;  %v528_v17 = vld [vmem:[%s786_s0 + $0x30] sm:$0xff]   ;;  %v530_v19 = vld [vmem:[%s786_s0 + $0x38] sm:$0xff]  }
   0x6   :  { %479 = vmatpush3.bf16.msra.mxu0 %v195_v6  ;;  %513 = vmatpush3.bf16.msra.mxu1 %v195_v6  ;;  %v529_v18 = vld [vmem:[%s786_s0 + $0x70] sm:$0xff]   ;;  %v531_v20 = vld [vmem:[%s786_s0 + $0x78] sm:$0xff]   ;;  %v623_v21 = vld [vmem:[%s787_s2] ss:$0 sm:$0xff] }
   0x9   :  { %481 = vmatmul.mubr.msk.bf16.vlgmr.msra.gmra.mrb[0].mxu0 %vm141_vm2, %v518_v7  ;;  %497 = vmatmul.mubr.msk.bf16.vlgmr.msra.gmra.mrb[0].mxu1 %vm141_vm2, %v519_v8 }
   0xa   :  { %484 = vmatprep.mubr.msk.bf16.mxu0 %vm141_vm2, %v520_v9  ;;  %500 = vmatprep.mubr.msk.bf16.mxu1 %vm141_vm2, %v521_v10 }
  0x11   :  { %485 = vmatmul.mubr.msk.bf16.gmra.mrb[4].mxu0 %vm141_vm2, %v522_v11  ;;  %501 = vmatmul.mubr.msk.bf16.gmra.mrb[4].mxu1 %vm141_vm2, %v523_v12 }
  0x12   :  { %488 = vmatprep.mubr.msk.bf16.mxu0 %vm141_vm2, %v524_v13  ;;  %504 = vmatprep.mubr.msk.bf16.mxu1 %vm141_vm2, %v525_v14 }
  0x19   :  { %489 = vmatmul.mubr.msk.bf16.gmra.mrb[8].mxu0 %vm141_vm2, %v526_v15  ;;  %505 = vmatmul.mubr.msk.bf16.gmra.mrb[8].mxu1 %vm141_vm2, %v527_v16 }
  0x1a   :  { %492 = vmatprep.mubr.msk.bf16.mxu0 %vm141_vm2, %v528_v17  ;;  %508 = vmatprep.mubr.msk.bf16.mxu1 %vm141_vm2, %v529_v18 }
  0x21   :  { %493 = vmatmul.mubr.msk.bf16.gmra.mrb[12].mxu0 %vm141_vm2, %v530_v19  ;;  %509 = vmatmul.mubr.msk.bf16.gmra.mrb[12].mxu1 %vm141_vm2, %v531_v20 }
  0xdc   :  { %v482_v22 = vpop.f32.mrb[0].mxu0  ;;  %v498_v23 = vpop.f32.mrb[0].mxu1 }
  0xdd   :  { %v240_v24 = vadd.f32 %v482_v22, %v623_v21  ;;  %v304_v25 = vadd.f32 %v498_v23, %v623_v21  ;;  %v231_v26 = vpop.f32.mrb[1].mxu0  ;;  %v295_v27 = vpop.f32.mrb[1].mxu1 }
  0xde   :  { %v232_v28 = vadd.f32 %v623_v21, %v231_v26  ;;  %v296_v29 = vadd.f32 %v623_v21, %v295_v27  ;;  %v483_v30 = vpop.f32.mrb[2].mxu0  ;;  %v499_v31 = vpop.f32.mrb[2].mxu1 }
  0xdf   :  { %v360_v32 = vmax.f32 %v240_v24, 0.0  ;;  %v376_v33 = vmax.f32 %v304_v25, 0.0  ;;  %v243_v34 = vadd.f32 %v483_v30, %v623_v21  ;;  %v307_v35 = vadd.f32 %v499_v31, %v623_v21  ;;  %v234_v36 = vpop.f32.mrb[3].mxu0  ;;  %v298_v37 = vpop.f32.mrb[3].mxu1 }
  0xe0   :  { %v358_v38 = vmax.f32 %v232_v28, 0.0  ;;  %v374_v39 = vmax.f32 %v296_v29, 0.0  ;;  %v235_v40 = vadd.f32 %v623_v21, %v234_v36  ;;  %v299_v41 = vadd.f32 %v623_v21, %v298_v37 }
  0xe1   :  { %393 = vst.msk [vmem:[%s788_s3 + $0x10] sm:$0xff] %vm390_vm3, %v360_v32  ;;  %409 = vst.msk [vmem:[%s788_s3 + $0x90] sm:$0xff] %vm390_vm3, %v376_v33  ;;  %v361_v42 = vmax.f32 %v243_v34, 0.0  ;;  %v377_v43 = vmax.f32 %v307_v35, 0.0 }
  0xe2   :  { %391 = vst.msk [vmem:[%s788_s3] sm:$0xff] %vm390_vm3, %v358_v38  ;;  %407 = vst.msk [vmem:[%s788_s3 + $0x80] sm:$0xff] %vm390_vm3, %v374_v39  ;;  %v359_v44 = vmax.f32 %v235_v40, 0.0  ;;  %v375_v45 = vmax.f32 %v299_v41, 0.0 }
  0xe3   :  { %394 = vst.msk [vmem:[%s788_s3 + $0x18] sm:$0xff] %vm390_vm3, %v361_v42  ;;  %410 = vst.msk [vmem:[%s788_s3 + $0x98] sm:$0xff] %vm390_vm3, %v377_v43 }
  0xe4   :  { %392 = vst.msk [vmem:[%s788_s3 + $0x8] sm:$0xff] %vm390_vm3, %v359_v44  ;;  %408 = vst.msk [vmem:[%s788_s3 + $0x88] sm:$0xff] %vm390_vm3, %v375_v45  ;;  %v486_v46 = vpop.f32.mrb[4].mxu0  ;;  %v502_v47 = vpop.f32.mrb[4].mxu1 }
  0xe5   :  { %v256_v48 = vadd.f32 %v486_v46, %v623_v21  ;;  %v320_v49 = vadd.f32 %v502_v47, %v623_v21  ;;  %v247_v50 = vpop.f32.mrb[5].mxu0  ;;  %v311_v51 = vpop.f32.mrb[5].mxu1 }
  0xe6   :  { %v248_v52 = vadd.f32 %v623_v21, %v247_v50  ;;  %v312_v53 = vadd.f32 %v623_v21, %v311_v51  ;;  %v487_v54 = vpop.f32.mrb[6].mxu0  ;;  %v503_v55 = vpop.f32.mrb[6].mxu1 }
  0xe7   :  { %v364_v56 = vmax.f32 %v256_v48, 0.0  ;;  %v380_v57 = vmax.f32 %v320_v49, 0.0  ;;  %v259_v58 = vadd.f32 %v487_v54, %v623_v21  ;;  %v323_v59 = vadd.f32 %v503_v55, %v623_v21  ;;  %v250_v60 = vpop.f32.mrb[7].mxu0  ;;  %v314_v61 = vpop.f32.mrb[7].mxu1 }
  0xe8   :  { %v362_v62 = vmax.f32 %v248_v52, 0.0  ;;  %v378_v63 = vmax.f32 %v312_v53, 0.0  ;;  %v251_v0 = vadd.f32 %v623_v21, %v250_v60  ;;  %v315_v1 = vadd.f32 %v623_v21, %v314_v61 }
  0xe9   :  { %397 = vst.msk [vmem:[%s788_s3 + $0x30] sm:$0xff] %vm390_vm3, %v364_v56  ;;  %413 = vst.msk [vmem:[%s788_s3 + $0xb0] sm:$0xff] %vm390_vm3, %v380_v57  ;;  %v365_v2 = vmax.f32 %v259_v58, 0.0  ;;  %v381_v3 = vmax.f32 %v323_v59, 0.0 }
  0xea   :  { %395 = vst.msk [vmem:[%s788_s3 + $0x20] sm:$0xff] %vm390_vm3, %v362_v62  ;;  %411 = vst.msk [vmem:[%s788_s3 + $0xa0] sm:$0xff] %vm390_vm3, %v378_v63  ;;  %v363_v4 = vmax.f32 %v251_v0, 0.0  ;;  %v379_v5 = vmax.f32 %v315_v1, 0.0 }
  0xeb   :  { %398 = vst.msk [vmem:[%s788_s3 + $0x38] sm:$0xff] %vm390_vm3, %v365_v2  ;;  %414 = vst.msk [vmem:[%s788_s3 + $0xb8] sm:$0xff] %vm390_vm3, %v381_v3 }
  0xec   :  { %396 = vst.msk [vmem:[%s788_s3 + $0x28] sm:$0xff] %vm390_vm3, %v363_v4  ;;  %412 = vst.msk [vmem:[%s788_s3 + $0xa8] sm:$0xff] %vm390_vm3, %v379_v5  ;;  %v490_v6 = vpop.f32.mrb[8].mxu0  ;;  %v506_v7 = vpop.f32.mrb[8].mxu1 }
  0xed   :  { %v272_v8 = vadd.f32 %v490_v6, %v623_v21  ;;  %v336_v9 = vadd.f32 %v506_v7, %v623_v21  ;;  %v263_v10 = vpop.f32.mrb[9].mxu0  ;;  %v327_v11 = vpop.f32.mrb[9].mxu1 }
  0xee   :  { %v264_v12 = vadd.f32 %v623_v21, %v263_v10  ;;  %v328_v13 = vadd.f32 %v623_v21, %v327_v11  ;;  %v491_v14 = vpop.f32.mrb[10].mxu0  ;;  %v507_v15 = vpop.f32.mrb[10].mxu1 }
  0xef   :  { %v368_v16 = vmax.f32 %v272_v8, 0.0  ;;  %v384_v17 = vmax.f32 %v336_v9, 0.0  ;;  %v275_v18 = vadd.f32 %v491_v14, %v623_v21  ;;  %v339_v19 = vadd.f32 %v507_v15, %v623_v21  ;;  %v266_v20 = vpop.f32.mrb[11].mxu0  ;;  %v330_v22 = vpop.f32.mrb[11].mxu1 }
  0xf0   :  { %v366_v23 = vmax.f32 %v264_v12, 0.0  ;;  %v382_v24 = vmax.f32 %v328_v13, 0.0  ;;  %v267_v25 = vadd.f32 %v623_v21, %v266_v20  ;;  %v331_v26 = vadd.f32 %v623_v21, %v330_v22 }
  0xf1   :  { %401 = vst.msk [vmem:[%s788_s3 + $0x50] sm:$0xff] %vm390_vm3, %v368_v16  ;;  %417 = vst.msk [vmem:[%s788_s3 + $0xd0] sm:$0xff] %vm390_vm3, %v384_v17  ;;  %v369_v27 = vmax.f32 %v275_v18, 0.0  ;;  %v385_v28 = vmax.f32 %v339_v19, 0.0 }
  0xf2   :  { %399 = vst.msk [vmem:[%s788_s3 + $0x40] sm:$0xff] %vm390_vm3, %v366_v23  ;;  %415 = vst.msk [vmem:[%s788_s3 + $0xc0] sm:$0xff] %vm390_vm3, %v382_v24  ;;  %v367_v29 = vmax.f32 %v267_v25, 0.0  ;;  %v383_v30 = vmax.f32 %v331_v26, 0.0 }
  0xf3   :  { %402 = vst.msk [vmem:[%s788_s3 + $0x58] sm:$0xff] %vm390_vm3, %v369_v27  ;;  %418 = vst.msk [vmem:[%s788_s3 + $0xd8] sm:$0xff] %vm390_vm3, %v385_v28 }
  0xf4   :  { %400 = vst.msk [vmem:[%s788_s3 + $0x48] sm:$0xff] %vm390_vm3, %v367_v29  ;;  %416 = vst.msk [vmem:[%s788_s3 + $0xc8] sm:$0xff] %vm390_vm3, %v383_v30  ;;  %v494_v31 = vpop.f32.mrb[12].mxu0  ;;  %v510_v32 = vpop.f32.mrb[12].mxu1 }
  0xf5   :  { %v288_v33 = vadd.f32 %v494_v31, %v623_v21  ;;  %v352_v34 = vadd.f32 %v510_v32, %v623_v21  ;;  %v279_v35 = vpop.f32.mrb[13].mxu0  ;;  %v343_v36 = vpop.f32.mrb[13].mxu1 }
  0xf6   :  { %v280_v37 = vadd.f32 %v623_v21, %v279_v35  ;;  %v344_v38 = vadd.f32 %v623_v21, %v343_v36  ;;  %v495_v39 = vpop.f32.mrb[14].mxu0  ;;  %v511_v40 = vpop.f32.mrb[14].mxu1 }
  0xf7   :  { %v372_v41 = vmax.f32 %v288_v33, 0.0  ;;  %v388_v42 = vmax.f32 %v352_v34, 0.0  ;;  %v291_v43 = vadd.f32 %v495_v39, %v623_v21  ;;  %v355_v44 = vadd.f32 %v511_v40, %v623_v21  ;;  %v282_v45 = vpop.f32.mrb[15].mxu0  ;;  %v346_v46 = vpop.f32.mrb[15].mxu1 }
  0xf8   :  { %v370_v47 = vmax.f32 %v280_v37, 0.0  ;;  %v386_v48 = vmax.f32 %v344_v38, 0.0  ;;  %v283_v49 = vadd.f32 %v623_v21, %v282_v45  ;;  %v347_v50 = vadd.f32 %v623_v21, %v346_v46 }
  0xf9   :  { %405 = vst.msk [vmem:[%s788_s3 + $0x70] sm:$0xff] %vm390_vm3, %v372_v41  ;;  %421 = vst.msk [vmem:[%s788_s3 + $0xf0] sm:$0xff] %vm390_vm3, %v388_v42  ;;  %v373_v51 = vmax.f32 %v291_v43, 0.0  ;;  %v389_v52 = vmax.f32 %v355_v44, 0.0 }
  0xfa   :  { %403 = vst.msk [vmem:[%s788_s3 + $0x60] sm:$0xff] %vm390_vm3, %v370_v47  ;;  %419 = vst.msk [vmem:[%s788_s3 + $0xe0] sm:$0xff] %vm390_vm3, %v386_v48  ;;  %v371_v21 = vmax.f32 %v283_v49, 0.0  ;;  %v387_v53 = vmax.f32 %v347_v50, 0.0 }
  0xfb   :  { %406 = vst.msk [vmem:[%s788_s3 + $0x78] sm:$0xff] %vm390_vm3, %v373_v51  ;;  %422 = vst.msk [vmem:[%s788_s3 + $0xf8] sm:$0xff] %vm390_vm3, %v389_v52 }
  0xfc   :  { %404 = vst.msk [vmem:[%s788_s3 + $0x68] sm:$0xff] %vm390_vm3, %v371_v21  ;;  %420 = vst.msk [vmem:[%s788_s3 + $0xe8] sm:$0xff] %vm390_vm3, %v387_v53 }

// kernel: frame_conformer_forward.8
= control target key start
LH: loop header
LB: loop body
LE: loop exit
PB: predicated region body
PF: predicated region fallthrough
CT: control target
= control target key end

     0   :  { %v299_v0 = vmov 0   ;;  %vm138_vm0 = vcmask 130048   ;;  %vm224_vm1 = vcmask 261120   ;;  %s410_s1 = inlined_call_operand.vmem [shape: bf16[144,32], index: 1, kind: input, shape index: {}]   ;;  %s411_s0 = inlined_call_operand.vmem [shape: bf16[64,144], index: 0, kind: input, shape index: {}]   ;;  %s412_s2 = inlined_call_operand.vmem [shape: f32[1,32], index: 2, kind: input, shape index: {}]   ;;  %s413_s3 = inlined_call_operand.vmem [shape: f32[64,32], index: 3, kind: output, shape index: {}]  }
   0x1   :  { %151 = vmatprep.subr.bf16.mxu0 %v299_v0  ;;  %259 = vmatprep.subr.bf16.mxu1 %v299_v0  ;;  %v278_v1 = vld [vmem:[%s410_s1] sm:$0xff]   ;;  %v279_v2 = vld [vmem:[%s410_s1 + $0x8] sm:$0xff]   ;;  %v280_v3 = vld [vmem:[%s410_s1 + $0x10] sm:$0xff]  }
   0x2   :  { %152 = vmatpush1.bf16.msra.mxu0 %v278_v1  ;;  %268 = vmatpush1.bf16.msra.mxu1 %v278_v1  ;;  %v281_v4 = vld [vmem:[%s410_s1 + $0x18] sm:$0xff]   ;;  %v289_v5 = vld [vmem:[%s411_s0 + $0x4] ss:$8 sps:$4 sm:$0xff]   ;;  %v284_v9 = vld [vmem:[%s410_s1 + $0x30] sm:$0xff]  }
   0x3   :  { %153 = vmatprep.subr.bf16.mxu0 %v299_v0  ;;  %260 = vmatprep.subr.bf16.mxu1 %v299_v0  ;;  %v292_v6 = vld [vmem:[%s411_s0 + $0x24] ss:$8 sps:$4 sm:$0xff]   ;;  %v285_v10 = vld [vmem:[%s410_s1 + $0x38] sm:$0xff]   ;;  %v287_v12 = vld [vmem:[%s411_s0] ss:$8 sps:$4 sm:$0xff]  }
   0x4   :  { %255 = vmatprep.mubr.msk.bf16.mxu0 %vm138_vm0, %v289_v5  ;;  %257 = vmatprep.mubr.msk.bf16.mxu1 %vm138_vm0, %v292_v6  ;;  %v282_v7 = vld [vmem:[%s410_s1 + $0x20] sm:$0xff]   ;;  %v283_v8 = vld [vmem:[%s410_s1 + $0x28] sm:$0xff]   ;;  %v293_v14 = vld [vmem:[%s411_s0 + $0x14] ss:$8 sps:$4 sm:$0xff]  }
   0x5   :  { %v286_v11 = vld [vmem:[%s410_s1 + $0x40] sm:$0xff]   ;;  %v295_v15 = vld [vmem:[%s411_s0 + $0x34] ss:$8 sps:$4 sm:$0xff]   ;;  %v297_v16 = vld [vmem:[%s411_s0 + $0x10] ss:$8 sps:$4 sm:$0xff]  }
   0x6   :  { %154 = vmatpush1.bf16.msra.mxu0 %v279_v2  ;;  %269 = vmatpush1.bf16.msra.mxu1 %v279_v2  ;;  %v290_v13 = vld [vmem:[%s411_s0 + $0x20] ss:$8 sps:$4 sm:$0xff]   ;;  %v298_v17 = vld [vmem:[%s411_s0 + $0x30] ss:$8 sps:$4 sm:$0xff]  }
   0x7   :  { %155 = vmatprep.subr.bf16.mxu0 %v299_v0  ;;  %261 = vmatprep.subr.bf16.mxu1 %v299_v0  ;;  %v237_v18 = vld [vmem:[%s412_s2] ss:$0 sm:$0xff] }
   0xa   :  { %156 = vmatpush1.bf16.msra.mxu0 %v280_v3  ;;  %270 = vmatpush1.bf16.msra.mxu1 %v280_v3 }
   0xb   :  { %157 = vmatprep.subr.bf16.mxu0 %v299_v0  ;;  %262 = vmatprep.subr.bf16.mxu1 %v299_v0 }
   0xe   :  { %158 = vmatpush1.bf16.msra.mxu0 %v281_v4  ;;  %271 = vmatpush1.bf16.msra.mxu1 %v281_v4 }
   0xf   :  { %159 = vmatprep.subr.bf16.mxu0 %v299_v0  ;;  %263 = vmatprep.subr.bf16.mxu1 %v299_v0 }
  0x12   :  { %160 = vmatpush1.bf16.msra.mxu0 %v282_v7  ;;  %272 = vmatpush1.bf16.msra.mxu1 %v282_v7 }
  0x13   :  { %161 = vmatprep.subr.bf16.mxu0 %v299_v0  ;;  %264 = vmatprep.subr.bf16.mxu1 %v299_v0 }
  0x16   :  { %162 = vmatpush1.bf16.msra.mxu0 %v283_v8  ;;  %273 = vmatpush1.bf16.msra.mxu1 %v283_v8 }
  0x17   :  { %163 = vmatprep.subr.bf16.mxu0 %v299_v0  ;;  %265 = vmatprep.subr.bf16.mxu1 %v299_v0 }
  0x1a   :  { %164 = vmatpush1.bf16.msra.mxu0 %v284_v9  ;;  %274 = vmatpush1.bf16.msra.mxu1 %v284_v9 }
  0x1b   :  { %165 = vmatprep.subr.bf16.mxu0 %v299_v0  ;;  %266 = vmatprep.subr.bf16.mxu1 %v299_v0 }
  0x1e   :  { %166 = vmatpush1.bf16.msra.mxu0 %v285_v10  ;;  %275 = vmatpush1.bf16.msra.mxu1 %v285_v10 }
  0x1f   :  { %167 = vmatprep.subr.bf16.mxu0 %v299_v0  ;;  %267 = vmatprep.subr.bf16.mxu1 %v299_v0 }
  0x22   :  { %168 = vmatpush1.bf16.msra.mxu0 %v286_v11  ;;  %276 = vmatpush1.bf16.msra.mxu1 %v286_v11 }
  0x25   :  { %184 = vmatmul.mubr.bf16.vlgmr.msra.gmra.mrb[0].mxu0 %v287_v12  ;;  %200 = vmatmul.mubr.bf16.vlgmr.msra.gmra.mrb[0].mxu1 %v290_v13 }
  0x26   :  { %256 = vmatprep.mubr.msk.bf16.mxu0 %vm138_vm0, %v293_v14  ;;  %258 = vmatprep.mubr.msk.bf16.mxu1 %vm138_vm0, %v295_v15 }
  0x2d   :  { %192 = vmatmul.mubr.bf16.gmra.mrb[4].mxu0 %v297_v16  ;;  %208 = vmatmul.mubr.bf16.gmra.mrb[4].mxu1 %v298_v17 }
  0xf8   :  { %v185_v19 = vpop.f32.mrb[0].mxu0  ;;  %v201_v20 = vpop.f32.mrb[0].mxu1 }
  0xf9   :  { %v186_v21 = vadd.f32 %v237_v18, %v185_v19  ;;  %v202_v22 = vadd.f32 %v237_v18, %v201_v20  ;;  %v187_v23 = vpop.f32.mrb[1].mxu0  ;;  %v203_v24 = vpop.f32.mrb[1].mxu1 }
  0xfa   :  { %v188_v25 = vpop.f32.mrb[2].mxu0  ;;  %v204_v26 = vpop.f32.mrb[2].mxu1 }
  0xfb   :  { %v216_v27 = vmax.f32 %v186_v21, 0.0  ;;  %v220_v28 = vmax.f32 %v202_v22, 0.0  ;;  %v189_v29 = vadd.f32 %v237_v18, %v188_v25  ;;  %v205_v30 = vadd.f32 %v237_v18, %v204_v26  ;;  %v190_v31 = vpop.f32.mrb[3].mxu0  ;;  %v206_v32 = vpop.f32.mrb[3].mxu1 }
  0xfd   :  { %225 = vst.msk [vmem:[%s413_s3] sm:$0xff] %vm224_vm1, %v216_v27  ;;  %229 = vst.msk [vmem:[%s413_s3 + $0x20] sm:$0xff] %vm224_vm1, %v220_v28  ;;  %v217_v33 = vmax.f32 %v189_v29, 0.0  ;;  %v221_v34 = vmax.f32 %v205_v30, 0.0 }
  0xff   :  { %226 = vst.msk [vmem:[%s413_s3 + $0x8] sm:$0xff] %vm224_vm1, %v217_v33  ;;  %230 = vst.msk [vmem:[%s413_s3 + $0x28] sm:$0xff] %vm224_vm1, %v221_v34 }
 0x100   :  { %v193_v35 = vpop.f32.mrb[4].mxu0  ;;  %v209_v36 = vpop.f32.mrb[4].mxu1 }
 0x101   :  { %v194_v37 = vadd.f32 %v237_v18, %v193_v35  ;;  %v210_v38 = vadd.f32 %v237_v18, %v209_v36  ;;  %v195_v39 = vpop.f32.mrb[5].mxu0  ;;  %v211_v40 = vpop.f32.mrb[5].mxu1 }
 0x102   :  { %v196_v41 = vpop.f32.mrb[6].mxu0  ;;  %v212_v42 = vpop.f32.mrb[6].mxu1 }
 0x103   :  { %v218_v43 = vmax.f32 %v194_v37, 0.0  ;;  %v222_v44 = vmax.f32 %v210_v38, 0.0  ;;  %v197_v45 = vadd.f32 %v237_v18, %v196_v41  ;;  %v213_v46 = vadd.f32 %v237_v18, %v212_v42  ;;  %v198_v47 = vpop.f32.mrb[7].mxu0  ;;  %v214_v48 = vpop.f32.mrb[7].mxu1 }
 0x105   :  { %227 = vst.msk [vmem:[%s413_s3 + $0x10] sm:$0xff] %vm224_vm1, %v218_v43  ;;  %231 = vst.msk [vmem:[%s413_s3 + $0x30] sm:$0xff] %vm224_vm1, %v222_v44  ;;  %v219_v49 = vmax.f32 %v197_v45, 0.0  ;;  %v223_v50 = vmax.f32 %v213_v46, 0.0 }
 0x107   :  { %228 = vst.msk [vmem:[%s413_s3 + $0x18] sm:$0xff] %vm224_vm1, %v219_v49  ;;  %232 = vst.msk [vmem:[%s413_s3 + $0x38] sm:$0xff] %vm224_vm1, %v223_v50 }

// kernel: frame_conformer_forward.9
= control target key start
LH: loop header
LB: loop body
LE: loop exit
PB: predicated region body
PF: predicated region fallthrough
CT: control target
= control target key end

     0   :  { %vm47_vm0 = vcmask 64512   ;;  %vm282_vm1 = vcmask 130112   ;;  %vm289_vm2 = vcmask 195712   ;;  %vm296_vm3 = vcmask 261312   ;;  %s875_s0 = inlined_call_operand.vmem [shape: f32[8,32,8], index: 0, kind: input, shape index: {}]   ;;  %s876_s1 = inlined_call_operand.vmem [shape: bf16[32,416], index: 1, kind: input, shape index: {}]   ;;  %s877_s2 = inlined_call_operand.vmem [shape: f32[1,416], index: 2, kind: input, shape index: {}]   ;;  %s878_s3 = inlined_call_operand.vmem [shape: f32[8,416], index: 3, kind: output, shape index: {}]  }
   0x1   :  { %v19_v0 = vld [vmem:[%s875_s0 + $0x20] sm:$0xff]  ;;  %v20_v2 = vld [vmem:[%s875_s0 + $0x28] sm:$0xff]  ;;  %v18_v8 = vld [vmem:[%s875_s0 + $0x18] sm:$0xff]  ;;  %vm431_vm4 = vcmask 1041409   ;;  %vm433_vm5 = vcmask 1042434   ;;  %vm435_vm6 = vcmask 1043459  }
   0x2   :  { %v15_v1 = vld [vmem:[%s875_s0] sm:$0xff]  ;;  %v60_v3 = vsel %vm47_vm0, %v19_v0, 0.0  ;;  %v16_v5 = vld [vmem:[%s875_s0 + $0x8] sm:$0xff]  ;;  %v63_v6 = vsel %vm47_vm0, %v20_v2, 0.0  ;;  %v17_v9 = vld [vmem:[%s875_s0 + $0x10] sm:$0xff]  ;;  %v57_v10 = vsel %vm47_vm0, %v18_v8, 0.0 }
   0x3   :  { %v48_v4 = vsel %vm47_vm0, %v15_v1, 0.0  ;;  %61 = vadd.xlane.f32.xlu1 %v60_v3  ;;  %v51_v7 = vsel %vm47_vm0, %v16_v5, 0.0  ;;  %v54_v11 = vsel %vm47_vm0, %v17_v9, 0.0  ;;  %v22_v12 = vld [vmem:[%s875_s0 + $0x38] sm:$0xff]  ;;  %v21_v13 = vld [vmem:[%s875_s0 + $0x30] sm:$0xff]  ;;  %v24_v16 = vld [vmem:[%s875_s0 + $0x48] sm:$0xff] }
   0x4   :  { %49 = vadd.xlane.f32.xlu0 %v48_v4  ;;  %v69_v14 = vsel %vm47_vm0, %v22_v12, 0.0  ;;  %v66_v15 = vsel %vm47_vm0, %v21_v13, 0.0  ;;  %v23_v17 = vld [vmem:[%s875_s0 + $0x40] sm:$0xff]  ;;  %v75_v18 = vsel %vm47_vm0, %v24_v16, 0.0  ;;  %v26_v20 = vld [vmem:[%s875_s0 + $0x58] sm:$0xff]  ;;  %v25_v21 = vld [vmem:[%s875_s0 + $0x50] sm:$0xff] }
   0x5   :  { %v72_v19 = vsel %vm47_vm0, %v23_v17, 0.0  ;;  %v81_v22 = vsel %vm47_vm0, %v26_v20, 0.0  ;;  %v78_v23 = vsel %vm47_vm0, %v25_v21, 0.0  ;;  %v28_v24 = vld [vmem:[%s875_s0 + $0x68] sm:$0xff]  ;;  %v27_v25 = vld [vmem:[%s875_s0 + $0x60] sm:$0xff]  ;;  %v30_v28 = vld [vmem:[%s875_s0 + $0x78] sm:$0xff] }
   0x6   :  { %v87_v26 = vsel %vm47_vm0, %v28_v24, 0.0  ;;  %v84_v27 = vsel %vm47_vm0, %v27_v25, 0.0  ;;  %v29_v29 = vld [vmem:[%s875_s0 + $0x70] sm:$0xff]  ;;  %v93_v30 = vsel %vm47_vm0, %v30_v28, 0.0  ;;  %v32_v32 = vld [vmem:[%s875_s0 + $0x88] sm:$0xff]  ;;  %v31_v33 = vld [vmem:[%s875_s0 + $0x80] sm:$0xff] }
   0x7   :  { %64 = vadd.xlane.f32.xlu1 %v63_v6  ;;  %v90_v31 = vsel %vm47_vm0, %v29_v29, 0.0  ;;  %v99_v34 = vsel %vm47_vm0, %v32_v32, 0.0  ;;  %v96_v35 = vsel %vm47_vm0, %v31_v33, 0.0  ;;  %v34_v36 = vld [vmem:[%s875_s0 + $0x98] sm:$0xff]  ;;  %v33_v37 = vld [vmem:[%s875_s0 + $0x90] sm:$0xff]  ;;  %v36_v40 = vld [vmem:[%s875_s0 + $0xa8] sm:$0xff] }
   0x8   :  { %52 = vadd.xlane.f32.xlu0 %v51_v7  ;;  %v105_v38 = vsel %vm47_vm0, %v34_v36, 0.0  ;;  %v102_v39 = vsel %vm47_vm0, %v33_v37, 0.0  ;;  %v35_v41 = vld [vmem:[%s875_s0 + $0xa0] sm:$0xff]  ;;  %v111_v42 = vsel %vm47_vm0, %v36_v40, 0.0  ;;  %v38_v44 = vld [vmem:[%s875_s0 + $0xb8] sm:$0xff]  ;;  %v37_v45 = vld [vmem:[%s875_s0 + $0xb0] sm:$0xff] }
   0x9   :  { %v108_v43 = vsel %vm47_vm0, %v35_v41, 0.0  ;;  %v117_v46 = vsel %vm47_vm0, %v38_v44, 0.0  ;;  %v114_v47 = vsel %vm47_vm0, %v37_v45, 0.0  ;;  %v40_v48 = vld [vmem:[%s875_s0 + $0xc8] sm:$0xff]  ;;  %v39_v49 = vld [vmem:[%s875_s0 + $0xc0] sm:$0xff]  ;;  %v42_v52 = vld [vmem:[%s875_s0 + $0xd8] sm:$0xff] }
   0xa   :  { %v123_v50 = vsel %vm47_vm0, %v40_v48, 0.0  ;;  %v120_v51 = vsel %vm47_vm0, %v39_v49, 0.0  ;;  %v41_v53 = vld [vmem:[%s875_s0 + $0xd0] sm:$0xff]  ;;  %v129_v54 = vsel %vm47_vm0, %v42_v52, 0.0  ;;  %v44_v56 = vld [vmem:[%s875_s0 + $0xe8] sm:$0xff]  ;;  %v43_v57 = vld [vmem:[%s875_s0 + $0xe0] sm:$0xff] }
   0xb   :  { %58 = vadd.xlane.f32.xlu1 %v57_v10  ;;  %v126_v55 = vsel %vm47_vm0, %v41_v53, 0.0  ;;  %v135_v58 = vsel %vm47_vm0, %v44_v56, 0.0  ;;  %v132_v59 = vsel %vm47_vm0, %v43_v57, 0.0  ;;  %v46_v60 = vld [vmem:[%s875_s0 + $0xf8] sm:$0xff]  ;;  %v45_v61 = vld [vmem:[%s875_s0 + $0xf0] sm:$0xff]  ;;  %v603_v8 = vmov 0  }
   0xc   :  { %55 = vadd.xlane.f32.xlu0 %v54_v11  ;;  %v141_v62 = vsel %vm47_vm0, %v46_v60, 0.0  ;;  %v138_v63 = vsel %vm47_vm0, %v45_v61, 0.0  ;;  %v591_v0 = vld [vmem:[%s876_s1 + $0x4] ss:$16 sps:$4 sm:$0xff]   ;;  %v593_v1 = vld [vmem:[%s876_s1 + $0xc] ss:$16 sps:$4 sm:$0xff]   ;;  %522 = vmatprep.mubr.bf16.mxu0 %v603_v8 }
   0xd   :  { %490 = vmatprep.subr.bf16.mxu0 %v591_v0  ;;  %v595_v2 = vld [vmem:[%s876_s1] ss:$16 sps:$4 sm:$0xff]   ;;  %v596_v3 = vld [vmem:[%s876_s1 + $0x8] ss:$16 sps:$4 sm:$0xff]   ;;  %531 = vmatprep.subr.bf16.mxu1 %v593_v1  ;;  %v597_v4 = vld [vmem:[%s876_s1 + $0x24] ss:$16 sps:$4 sm:$0xff]  }
   0xe   :  { %491 = vmatpush1.bf16.msra.mxu0 %v595_v2  ;;  %532 = vmatpush1.bf16.msra.mxu1 %v596_v3  ;;  %v599_v5 = vld [vmem:[%s876_s1 + $0x2c] ss:$16 sps:$4 sm:$0xff]   ;;  %v601_v6 = vld [vmem:[%s876_s1 + $0x20] ss:$16 sps:$4 sm:$0xff]   ;;  %v602_v7 = vld [vmem:[%s876_s1 + $0x28] ss:$16 sps:$4 sm:$0xff]  }
   0xf   :  { %70 = vadd.xlane.f32.xlu1 %v69_v14  ;;  %492 = vmatprep.subr.bf16.mxu0 %v597_v4  ;;  %vm437_vm7 = vcmask 1044484   ;;  %vm439_vm8 = vcmask 1045509   ;;  %vm441_vm9 = vcmask 1046534   ;;  %vm443_vm10 = vcmask 1047559  }
  0x10   :  { %67 = vadd.xlane.f32.xlu0 %v66_v15  ;;  %533 = vmatprep.subr.bf16.mxu1 %v599_v5  ;;  %vm486_vm11 = vcmask 261120  }
  0x11   :  { %563 = vmatprep.mubr.bf16.mxu1 %v603_v8 }
  0x12   :  { %493 = vmatpush1.bf16.msra.mxu0 %v601_v6  ;;  %534 = vmatpush1.bf16.msra.mxu1 %v602_v7 }
  0x13   :  { %76 = vadd.xlane.f32.xlu1 %v75_v18 }
  0x14   :  { %73 = vadd.xlane.f32.xlu0 %v72_v19  ;;  %v203_v19 = vlaneseq }
  0x16   :  { %v776_v29 = vshrl.u32 %v203_v19, 7 }
  0x17   :  { %82 = vadd.xlane.f32.xlu1 %v81_v22  ;;  %v272_v22 = vand.u32 127, %v203_v19 }
  0x18   :  { %79 = vadd.xlane.f32.xlu0 %v78_v23 }
  0x19   :  { %v779_v41 = vsub.s32 %v272_v22, %v776_v29  ;;  %v291_v44 = vadd.s32 4294967272, %v272_v22 }
  0x1b   :  { %88 = vadd.xlane.f32.xlu1 %v87_v26  ;;  %v788_v57 = vsub.s32 %v291_v44, %v776_v29 }
  0x1c   :  { %85 = vadd.xlane.f32.xlu0 %v84_v27 }
  0x1f   :  { %94 = vadd.xlane.f32.xlu1 %v93_v30  ;;  %v277_v30 = vadd.s32 4294967288, %v272_v22 }
  0x20   :  { %91 = vadd.xlane.f32.xlu0 %v90_v31 }
  0x23   :  { %100 = vadd.xlane.f32.xlu1 %v99_v34 }
  0x24   :  { %97 = vadd.xlane.f32.xlu0 %v96_v35 }
  0x27   :  { %106 = vadd.xlane.f32.xlu1 %v105_v38 }
  0x28   :  { %103 = vadd.xlane.f32.xlu0 %v102_v39 }
  0x2b   :  { %112 = vadd.xlane.f32.xlu1 %v111_v42  ;;  %v782_v42 = vsub.s32 %v277_v30, %v776_v29 }
  0x2c   :  { %109 = vadd.xlane.f32.xlu0 %v108_v43  ;;  %v284_v43 = vadd.s32 4294967280, %v272_v22 }
  0x2e   :  { %v785_v56 = vsub.s32 %v284_v43, %v776_v29 }
  0x2f   :  { %118 = vadd.xlane.f32.xlu1 %v117_v46 }
  0x30   :  { %115 = vadd.xlane.f32.xlu0 %v114_v47 }
  0x33   :  { %124 = vadd.xlane.f32.xlu1 %v123_v50 }
  0x34   :  { %121 = vadd.xlane.f32.xlu0 %v120_v51 }
  0x37   :  { %130 = vadd.xlane.f32.xlu1 %v129_v54 }
  0x38   :  { %127 = vadd.xlane.f32.xlu0 %v126_v55 }
  0x3b   :  { %136 = vadd.xlane.f32.xlu1 %v135_v58 }
  0x3c   :  { %133 = vadd.xlane.f32.xlu0 %v132_v59 }
  0x3f   :  { %142 = vadd.xlane.f32.xlu1 %v141_v62 }
  0x40   :  { %139 = vadd.xlane.f32.xlu0 %v138_v63 }
  0x90   :  { %v62_v9 = vpop.xlane.xlu1 %61 }
  0x91   :  { %v50_v10 = vpop.xlane.xlu0 %49  ;;  %v149_v27 = vmul.f32 0.125, %v62_v9 }
  0x92   :  { %v145_v28 = vmul.f32 0.125, %v50_v10 }
  0x94   :  { %v65_v11 = vpop.xlane.xlu1 %64 }
  0x95   :  { %v53_v12 = vpop.xlane.xlu0 %52  ;;  %v150_v25 = vmul.f32 0.125, %v65_v11 }
  0x96   :  { %v146_v26 = vmul.f32 0.125, %v53_v12 }
  0x97   :  { %v179_v33 = vpack.c.bf16 %v150_v25, %v149_v27 }
  0x98   :  { %v59_v13 = vpop.xlane.xlu1 %58  ;;  %v177_v34 = vpack.c.bf16 %v146_v26, %v145_v28 }
  0x99   :  { %v56_v14 = vpop.xlane.xlu0 %55  ;;  %v148_v35 = vmul.f32 0.125, %v59_v13  ;;  %v243_v47 = vunpack.c.l.b16 %v179_v33  ;;  %v244_v48 = vunpack.c.h.b16 %v179_v33 }
  0x9a   :  { %v147_v36 = vmul.f32 0.125, %v56_v14  ;;  %v239_v49 = vunpack.c.l.b16 %v177_v34  ;;  %v240_v50 = vunpack.c.h.b16 %v177_v34 }
  0x9b   :  { %v301_v60 = vrot.slane %v243_v47, %v779_v41  ;;  %v305_v61 = vrot.slane %v244_v48, %v782_v42 }
  0x9c   :  { %v71_v15 = vpop.xlane.xlu1 %70  ;;  %v178_v51 = vpack.c.bf16 %v148_v35, %v147_v36  ;;  %v276_v62 = vrot.slane %v239_v49, %v779_v41  ;;  %v281_v63 = vrot.slane %v240_v50, %v782_v42 }
  0x9d   :  { %v68_v16 = vpop.xlane.xlu0 %67  ;;  %v152_v37 = vmul.f32 0.125, %v71_v15  ;;  %v306_v9 = vsel %vm282_vm1, %v305_v61, %v301_v60 }
  0x9e   :  { %v151_v38 = vmul.f32 0.125, %v68_v16  ;;  %v241_v0 = vunpack.c.l.b16 %v178_v51  ;;  %v242_v1 = vunpack.c.h.b16 %v178_v51  ;;  %v283_v11 = vsel %vm282_vm1, %v281_v63, %v276_v62 }
  0xa0   :  { %v77_v17 = vpop.xlane.xlu1 %76  ;;  %v180_v52 = vpack.c.bf16 %v152_v37, %v151_v38  ;;  %v288_v12 = vrot.slane %v241_v0, %v785_v56  ;;  %v295_v13 = vrot.slane %v242_v1, %v788_v57 }
  0xa1   :  { %v74_v18 = vpop.xlane.xlu0 %73  ;;  %v154_v39 = vmul.f32 0.125, %v77_v17 }
  0xa2   :  { %v153_v40 = vmul.f32 0.125, %v74_v18  ;;  %v245_v4 = vunpack.c.l.b16 %v180_v52  ;;  %v246_v15 = vunpack.c.h.b16 %v180_v52  ;;  %v290_v36 = vsel %vm289_vm2, %v288_v12, %v283_v11 }
  0xa4   :  { %v83_v20 = vpop.xlane.xlu1 %82  ;;  %v181_v53 = vpack.c.bf16 %v154_v39, %v153_v40  ;;  %v310_v16 = vrot.slane %v245_v4, %v785_v56  ;;  %v315_v39 = vrot.slane %v246_v15, %v788_v57 }
  0xa5   :  { %v80_v21 = vpop.xlane.xlu0 %79  ;;  %v156_v54 = vmul.f32 0.125, %v83_v20 }
  0xa6   :  { %v155_v55 = vmul.f32 0.125, %v80_v21  ;;  %v247_v5 = vunpack.c.l.b16 %v181_v53  ;;  %v248_v10 = vunpack.c.h.b16 %v181_v53 }
  0xa8   :  { %v89_v23 = vpop.xlane.xlu1 %88  ;;  %v182_v6 = vpack.c.bf16 %v156_v54, %v155_v55  ;;  %v320_v17 = vrot.slane %v247_v5, %v779_v41  ;;  %v324_v25 = vrot.slane %v248_v10, %v782_v42  ;;  %v810_v54 = vsel %vm296_vm3, %v295_v13, %v290_v36 }
  0xa9   :  { %v86_v24 = vpop.xlane.xlu0 %85  ;;  %v158_v2 = vmul.f32 0.125, %v89_v23 }
  0xaa   :  { %v157_v3 = vmul.f32 0.125, %v86_v24  ;;  %v249_v18 = vunpack.c.l.b16 %v182_v6  ;;  %v250_v26 = vunpack.c.h.b16 %v182_v6 }
  0xac   :  { %v95_v31 = vpop.xlane.xlu1 %94  ;;  %v183_v14 = vpack.c.bf16 %v158_v2, %v157_v3  ;;  %v329_v37 = vrot.slane %v249_v18, %v785_v56  ;;  %v334_v50 = vrot.slane %v250_v26, %v788_v57 }
  0xad   :  { %v92_v32 = vpop.xlane.xlu0 %91  ;;  %v160_v19 = vmul.f32 0.125, %v95_v31 }
  0xae   :  { %v159_v20 = vmul.f32 0.125, %v92_v32  ;;  %v251_v30 = vunpack.c.l.b16 %v183_v14  ;;  %v252_v33 = vunpack.c.h.b16 %v183_v14  ;;  %v311_v32 = vsel %vm289_vm2, %v310_v16, %v306_v9 }
  0xaf   :  { %v316_v2 = vsel %vm296_vm3, %v315_v39, %v311_v32 }
  0xb0   :  { %v101_v45 = vpop.xlane.xlu1 %100  ;;  %v184_v40 = vpack.c.bf16 %v160_v19, %v159_v20  ;;  %v339_v51 = vrot.slane %v251_v30, %v779_v41  ;;  %v343_v52 = vrot.slane %v252_v33, %v782_v42 }
  0xb1   :  { %v98_v46 = vpop.xlane.xlu0 %97  ;;  %v162_v21 = vmul.f32 0.125, %v101_v45 }
  0xb2   :  { %v161_v22 = vmul.f32 0.125, %v98_v46  ;;  %v325_v46 = vsel %vm282_vm1, %v324_v25, %v320_v17  ;;  %v253_v60 = vunpack.c.l.b16 %v184_v40  ;;  %v254_v61 = vunpack.c.h.b16 %v184_v40 }
  0xb3   :  { %v330_v55 = vsel %vm289_vm2, %v329_v37, %v325_v46 }
  0xb4   :  { %v107_v58 = vpop.xlane.xlu1 %106  ;;  %v185_v43 = vpack.c.bf16 %v162_v21, %v161_v22  ;;  %v335_v6 = vsel %vm296_vm3, %v334_v50, %v330_v55  ;;  %v348_v14 = vrot.slane %v253_v60, %v785_v56  ;;  %v353_v15 = vrot.slane %v254_v61, %v788_v57 }
  0xb5   :  { %v104_v59 = vpop.xlane.xlu0 %103  ;;  %v164_v27 = vmul.f32 0.125, %v107_v58  ;;  %v432_v60 = vsel %vm431_vm4, %v316_v2, %v810_v54 }
  0xb6   :  { %v163_v28 = vmul.f32 0.125, %v104_v59  ;;  %v255_v62 = vunpack.c.l.b16 %v185_v43  ;;  %v256_v63 = vunpack.c.h.b16 %v185_v43 }
  0xb8   :  { %v113_v7 = vpop.xlane.xlu1 %112  ;;  %v186_v47 = vpack.c.bf16 %v164_v27, %v163_v28  ;;  %v358_v16 = vrot.slane %v255_v62, %v779_v41  ;;  %v362_v17 = vrot.slane %v256_v63, %v782_v42 }
  0xb9   :  { %v110_v8 = vpop.xlane.xlu0 %109  ;;  %v166_v34 = vmul.f32 0.125, %v113_v7  ;;  %v344_v7 = vsel %vm282_vm1, %v343_v52, %v339_v51 }
  0xba   :  { %v165_v35 = vmul.f32 0.125, %v110_v8  ;;  %v257_v3 = vunpack.c.l.b16 %v186_v47  ;;  %v258_v20 = vunpack.c.h.b16 %v186_v47  ;;  %v363_v36 = vsel %vm282_vm1, %v362_v17, %v358_v16 }
  0xbc   :  { %v119_v23 = vpop.xlane.xlu1 %118  ;;  %v187_v53 = vpack.c.bf16 %v166_v34, %v165_v35  ;;  %v367_v21 = vrot.slane %v257_v3, %v785_v56  ;;  %v349_v35 = vsel %vm289_vm2, %v348_v14, %v344_v7  ;;  %v372_v40 = vrot.slane %v258_v20, %v788_v57 }
  0xbd   :  { %v116_v24 = vpop.xlane.xlu0 %115  ;;  %v168_v38 = vmul.f32 0.125, %v119_v23 }
  0xbe   :  { %v167_v31 = vmul.f32 0.125, %v116_v24  ;;  %v259_v8 = vunpack.c.l.b16 %v187_v53  ;;  %v260_v9 = vunpack.c.h.b16 %v187_v53  ;;  %v368_v39 = vsel %vm289_vm2, %v367_v21, %v363_v36 }
  0xbf   :  { %v354_v53 = vsel %vm296_vm3, %v353_v15, %v349_v35  ;;  %v373_v61 = vsel %vm296_vm3, %v372_v40, %v368_v39 }
  0xc0   :  { %v125_v44 = vpop.xlane.xlu1 %124  ;;  %v188_v58 = vpack.c.bf16 %v168_v38, %v167_v31  ;;  %v377_v24 = vrot.slane %v259_v8, %v779_v41  ;;  %v381_v25 = vrot.slane %v260_v9, %v782_v42 }
  0xc1   :  { %v122_v45 = vpop.xlane.xlu0 %121  ;;  %v170_v48 = vmul.f32 0.125, %v125_v44 }
  0xc2   :  { %v169_v49 = vmul.f32 0.125, %v122_v45  ;;  %v261_v10 = vunpack.c.l.b16 %v188_v58  ;;  %v262_v26 = vunpack.c.h.b16 %v188_v58  ;;  %v382_v45 = vsel %vm282_vm1, %v381_v25, %v377_v24 }
  0xc4   :  { %v189_v59 = vpack.c.bf16 %v170_v48, %v169_v49  ;;  %v131_v0 = vpop.xlane.xlu1 %130  ;;  %v386_v28 = vrot.slane %v261_v10, %v785_v56  ;;  %v391_v46 = vrot.slane %v262_v26, %v788_v57 }
  0xc5   :  { %v128_v1 = vpop.xlane.xlu0 %127  ;;  %v172_v4 = vmul.f32 0.125, %v131_v0  ;;  %v434_v0 = vsel %vm433_vm5, %v335_v6, %v432_v60 }
  0xc6   :  { %v171_v5 = vmul.f32 0.125, %v128_v1  ;;  %v263_v11 = vunpack.c.l.b16 %v189_v59  ;;  %v264_v12 = vunpack.c.h.b16 %v189_v59  ;;  %v387_v49 = vsel %vm289_vm2, %v386_v28, %v382_v45 }
  0xc7   :  { %v392_v1 = vsel %vm296_vm3, %v391_v46, %v387_v49  ;;  %v436_v3 = vsel %vm435_vm6, %v354_v53, %v434_v0 }
  0xc8   :  { %v190_v13 = vpack.c.bf16 %v172_v4, %v171_v5  ;;  %v137_v18 = vpop.xlane.xlu1 %136  ;;  %v396_v30 = vrot.slane %v263_v11, %v779_v41  ;;  %v400_v33 = vrot.slane %v264_v12, %v782_v42  ;;  %v438_v54 = vsel %vm437_vm7, %v373_v61, %v436_v3  ;;  %v201_v11 = vld [vmem:[%s877_s2] sm:$0xf] }
  0xc9   :  { %v134_v19 = vpop.xlane.xlu0 %133  ;;  %v174_v23 = vmul.f32 0.125, %v137_v18  ;;  %v440_v6 = vsel %vm439_vm8, %v392_v1, %v438_v54  ;;  %v209_v12 = vsub.s32 1, %v776_v29 }
  0xca   :  { %v265_v22 = vunpack.c.l.b16 %v190_v13  ;;  %v173_v27 = vmul.f32 0.125, %v134_v19  ;;  %v266_v34 = vunpack.c.h.b16 %v190_v13  ;;  %v401_v50 = vsel %vm282_vm1, %v400_v33, %v396_v30 }
  0xcb   :  { %v217_v13 = vsub.s32 3, %v776_v29  ;;  %v210_v16 = vrot.slane %v201_v11, %v209_v12 }
  0xcc   :  { %v405_v37 = vrot.slane %v265_v22, %v785_v56  ;;  %v191_v38 = vpack.c.bf16 %v174_v23, %v173_v27  ;;  %v143_v31 = vpop.xlane.xlu1 %142  ;;  %v410_v51 = vrot.slane %v266_v34, %v788_v57 }
  0xcd   :  { %v140_v32 = vpop.xlane.xlu0 %139  ;;  %v176_v43 = vmul.f32 0.125, %v143_v31  ;;  %v218_v17 = vrot.slane %v201_v11, %v217_v13 }
  0xce   :  { %v175_v44 = vmul.f32 0.125, %v140_v32  ;;  %v267_v47 = vunpack.c.l.b16 %v191_v38  ;;  %v268_v48 = vunpack.c.h.b16 %v191_v38  ;;  %v406_v55 = vsel %vm289_vm2, %v405_v37, %v401_v50 }
  0xcf   :  { %v411_v4 = vsel %vm296_vm3, %v410_v51, %v406_v55 }
  0xd0   :  { %v192_v52 = vpack.c.bf16 %v176_v43, %v175_v44  ;;  %v415_v58 = vrot.slane %v267_v47, %v779_v41  ;;  %v419_v59 = vrot.slane %v268_v48, %v782_v42  ;;  %v442_v8 = vsel %vm441_vm9, %v411_v4, %v440_v6 }
  0xd2   :  { %v269_v62 = vunpack.c.l.b16 %v192_v52  ;;  %v270_v63 = vunpack.c.h.b16 %v192_v52  ;;  %v420_v2 = vsel %vm282_vm1, %v419_v59, %v415_v58 }
  0xd4   :  { %v424_v41 = vrot.slane %v269_v62, %v785_v56  ;;  %v429_v42 = vrot.slane %v270_v63, %v788_v57  ;;  %v205_v56 = vsub.s32 0, %v776_v29  ;;  %v213_v57 = vsub.s32 2, %v776_v29 }
  0xd6   :  { %v425_v5 = vsel %vm289_vm2, %v424_v41, %v420_v2  ;;  %v206_v14 = vrot.slane %v201_v11, %v205_v56  ;;  %v214_v15 = vrot.slane %v201_v11, %v213_v57 }
  0xd7   :  { %v430_v7 = vsel %vm296_vm3, %v429_v42, %v425_v5 }
  0xd8   :  { %v444_v9 = vsel %vm443_vm10, %v430_v7, %v442_v8 }
  0xd9   :  { %v445_v10 = vpack.c.b16 %v444_v9, %v444_v9 }
  0xdb   :  { %588 = vmatmul.mubr.msk.bf16.vlgmr.msra.gmra.mrb[0].mxu0 %vm486_vm11, %v445_v10  ;;  %589 = vmatmul.mubr.msk.bf16.vlgmr.msra.gmra.mrb[0].mxu1 %vm486_vm11, %v445_v10 }
 0x1ae   :  { %v524_v18 = vpop.f32.mrb[0].mxu0  ;;  %v565_v19 = vpop.f32.mrb[0].mxu1 }
 0x1af   :  { %v525_v20 = vadd.f32 %v524_v18, %v206_v14  ;;  %v566_v21 = vadd.f32 %v565_v19, %v214_v15  ;;  %v526_v22 = vpop.f32.mrb[1].mxu0  ;;  %v567_v23 = vpop.f32.mrb[1].mxu1 }
 0x1b0   :  { %v527_v24 = vadd.f32 %v526_v22, %v210_v16  ;;  %v568_v25 = vadd.f32 %v567_v23, %v218_v17  ;;  %v528_v26 = vpop.f32.mrb[2].mxu0  ;;  %v569_v27 = vpop.f32.mrb[2].mxu1 }
 0x1b1   :  { %572 = vst [vmem:[%s878_s3] sm:$0xff] %v525_v20  ;;  %574 = vst [vmem:[%s878_s3 + $0x10] sm:$0xff] %v566_v21  ;;  %v529_v29 = vpop.f32.mrb[3].mxu0  ;;  %v570_v28 = vpop.f32.mrb[3].mxu1 }
 0x1b2   :  { %573 = vst [vmem:[%s878_s3 + $0x8] sm:$0xff] %v527_v24  ;;  %575 = vst.msk [vmem:[%s878_s3 + $0x18] sm:$0xff] %vm486_vm11, %v568_v25 }

// kernel: frame_conformer_forward.10
= control target key start
LH: loop header
LB: loop body
LE: loop exit
PB: predicated region body
PF: predicated region fallthrough
CT: control target
= control target key end

     0   :  { %s23074_s24 = smov 0   ;;  %s29102_s0 = inlined_call_operand.vmem [shape: f32[4,2,416], index: 0, kind: input, shape index: {}]   ;;  %s29103_s1 = inlined_call_operand.vmem [shape: bf16[8,416,64], index: 1, kind: input, shape index: {}]   ;;  %s29104_s2 = inlined_call_operand.vmem [shape: f32[8,1,64], index: 2, kind: input, shape index: {}]   ;;  %s29105_s3 = inlined_call_operand.vmem [shape: bf16[8,416,64], index: 3, kind: input, shape index: {}]   ;;  %s29106_s4 = inlined_call_operand.vmem [shape: f32[8,1,64], index: 4, kind: input, shape index: {}]   ;;  %s29107_s5 = inlined_call_operand.vmem [shape: bf16[8,416,64], index: 5, kind: input, shape index: {}]   ;;  %s29108_s6 = inlined_call_operand.vmem [shape: f32[8,1,64], index: 6, kind: input, shape index: {}]   ;;  %s29109_s7 = inlined_call_operand.vmem [shape: bf16[8,64,416], index: 7, kind: input, shape index: {}]   ;;  %s29110_s8 = inlined_call_operand.vmem [shape: f32[1,416], index: 8, kind: input, shape index: {}]   ;;  %s29111_s9 = inlined_call_operand.vmem [shape: f32[1,416], index: 9, kind: input, shape index: {}]   ;;  %s29112_s10 = inlined_call_operand.vmem [shape: f32[1,416], index: 10, kind: input, shape index: {}]   ;;  %s29113_s11 = inlined_call_operand.vmem [shape: bf16[416,2048], index: 11, kind: input, shape index: {}]   ;;  %s29114_s12 = inlined_call_operand.vmem [shape: f32[1,2048], index: 12, kind: input, shape index: {}]   ;;  %s29115_s13 = inlined_call_operand.vmem [shape: bf16[2048,416], index: 13, kind: input, shape index: {}]   ;;  %s29116_s14 = inlined_call_operand.vmem [shape: f32[1,416], index: 14, kind: input, shape index: {}]   ;;  %s29117_s15 = inlined_call_operand.vmem [shape: f32[1,416], index: 15, kind: input, shape index: {}]   ;;  %s29118_s16 = inlined_call_operand.vmem [shape: f32[1,416], index: 16, kind: input, shape index: {}]   ;;  %s29119_s17 = inlined_call_operand.vmem [shape: f32[4,2,416], index: 17, kind: output, shape index: {}]  }
   0x1   :  { %29121 = sst [smem:[#allocation2_spill]] %s29102_s0 }
   0x2   :  { %29122 = sst [smem:[#allocation3_spill]] %s29103_s1 }
   0x3 LB: > { %s17564_s25 = sadd.s32 4294967295, %s22977_s24   ;;  %p17568_p0 = scmp.ge.s32.totalorder %s22977_s24, 1  ;;  %s22977_s24 = sphi %s23074_s24, %s27_s24  }
   0x4   : > { %p487_p1 = scmp.lt.s32.totalorder %s22977_s24, 5 }
   0x6   : > { %p488_p2 = pnand %p17568_p0, %p487_p1 }
   0x7   : > { %s29123_s28 = sld [smem:[#allocation3_spill]] (!%p488_p2)  ;;  %v22979_v1 = vmov (!%p488_p2), 0   ;;  %p539_p3 = scmp.lt.s32.totalorder (!%p488_p2), %s17564_s25, 3  ;;  %v556_v19 = vlaneseq (!%p488_p2)  ;;  %v22980_v26 = vmov (!%p488_p2), 1983009808   ;;  %v21374_v32 = vld [vmem:[%s29105_s3 + $0x40] sm:$0xff] (!%p488_p2)  }
   0x8   : > { %491 = sbr.rel (%p488_p2) target bundleno = 10295 (0x2837), region = 88  ;;  %836 = vmatprep.subr.bf16.mxu1 (!%p488_p2), %v22979_v1  ;;  %s29124_s21 = sld [smem:[#allocation2_spill]] (!%p488_p2)  ;;  %v554_v27 = vunpack.c.l.s4 (!%p488_p2), %v22980_v26  ;;  %vm792_vm0 = vcmask (!%p488_p2), 261120   ;;  %v21375_v43 = vld [vmem:[%s29105_s3] sm:$0xff] (!%p488_p2)   ;;  %v21377_v45 = vld [vmem:[%s29105_s3 + $0x48] sm:$0xff] (!%p488_p2)   ;;  %v21380_v48 = vld [vmem:[%s29105_s3 + $0x50] sm:$0xff] (!%p488_p2)  }
   0x9   : > { %v23166_v23 = vshrl.u32 (!%p488_p2), %v556_v19, 7  ;;  %v21376_v46 = vld [vmem:[%s29105_s3 + $0x80] sm:$0xff] (!%p488_p2)   ;;  %v21378_v47 = vld [vmem:[%s29105_s3 + $0x8] sm:$0xff] (!%p488_p2)   ;;  %v21381_v50 = vld [vmem:[%s29105_s3 + $0x10] sm:$0xff] (!%p488_p2)   ;;  %vm22982_vm1 = vmmov (!%p488_p2), 0   ;;  %vm1468_vm2 = vcmask (!%p488_p2), 523264  }
   0xa   : > { %v555_v30 = vunpack.c.0.s8 (!%p488_p2), %v554_v27  ;;  %v21379_v49 = vld [vmem:[%s29105_s3 + $0x88] sm:$0xff] (!%p488_p2)   ;;  %v21383_v51 = vld [vmem:[%s29105_s3 + $0x58] sm:$0xff] (!%p488_p2)   ;;  %v21382_v52 = vld [vmem:[%s29105_s3 + $0x90] sm:$0xff] (!%p488_p2)   ;;  %vm1534_vm3 = vcmask (!%p488_p2), 1040384   ;;  %vm1516_vm4 = vcmask (!%p488_p2), 9216   ;;  %vm1530_vm5 = vcmask (!%p488_p2), 15360  }
   0xb   : > { %v21384_v53 = vld [vmem:[%s29105_s3 + $0x18] sm:$0xff] (!%p488_p2)   ;;  %v21386_v54 = vld [vmem:[%s29105_s3 + $0x60] sm:$0xff] (!%p488_p2)   ;;  %v21389_v58 = vld [vmem:[%s29105_s3 + $0x68] sm:$0xff] (!%p488_p2)   ;;  %vm10131_vm6 = vcmask (!%p488_p2), 1041408   ;;  %vm10137_vm7 = vcmask (!%p488_p2), 254976   ;;  %vm17502_vm8 = vcmask (!%p488_p2), 1043458  }
   0xc   : > { %v23186_v34 = vsub.s32 (!%p488_p2), %v555_v30, %v23166_v23  ;;  %v21385_v55 = vld [vmem:[%s29105_s3 + $0x98] sm:$0xff] (!%p488_p2)   ;;  %v21387_v56 = vld [vmem:[%s29105_s3 + $0x20] sm:$0xff] (!%p488_p2)   ;;  %v21390_v59 = vld [vmem:[%s29105_s3 + $0x28] sm:$0xff] (!%p488_p2)   ;;  %vm17504_vm10 = vcmask (!%p488_p2), 1045508   ;;  %vm17506_vm12 = vcmask (!%p488_p2), 261126  }
   0xd   : > { %v21347_v0 = vld [vmem:[%s29123_s28 + $0x80] sm:$0xff] (!%p488_p2)   ;;  %v21350_v4 = vld [vmem:[%s29123_s28 + $0x88] sm:$0xff] (!%p488_p2)   ;;  %v21353_v7 = vld [vmem:[%s29123_s28 + $0x90] sm:$0xff] (!%p488_p2)  }
   0xe   : > { %v21348_v2 = vld [vmem:[%s29123_s28 + $0x40] sm:$0xff] (!%p488_p2)   ;;  %837 = vmatpush1.bf16.msra.mxu1 (!%p488_p2), %v21347_v0  ;;  %v21351_v5 = vld [vmem:[%s29123_s28 + $0x48] sm:$0xff] (!%p488_p2)   ;;  %v21354_v8 = vld [vmem:[%s29123_s28 + $0x50] sm:$0xff] (!%p488_p2)  }
   0xf   : > { %v21349_v3 = vld [vmem:[%s29123_s28] sm:$0xff]   ;;  %20570 = vmatprep.subr.bf16.mxu0 %v21348_v2  ;;  %838 = vmatprep.subr.bf16.mxu1 %v22979_v1  ;;  %v21352_v6 = vld [vmem:[%s29123_s28 + $0x8] sm:$0xff]   ;;  %v21355_v9 = vld [vmem:[%s29123_s28 + $0x10] sm:$0xff]   ;;  %s29126_s25 = smov (!%p539_p3, %s17564_s25), 3 }
  0x10   : > { %20571 = vmatpush3.bf16.msra.mxu0 %v21349_v3  ;;  %v21356_v10 = vld [vmem:[%s29123_s28 + $0x98] sm:$0xff]   ;;  %v21360_v13 = vld [vmem:[%s29123_s28 + $0x60] sm:$0xff]   ;;  %v21363_v16 = vld [vmem:[%s29123_s28 + $0x68] sm:$0xff]   ;;  %s20568_s29 = sshll.u32 %s29126_s25, 3 }
  0x11   : > { %20572 = vmatprep.subr.bf16.mxu0 %v21351_v5  ;;  %v21357_v11 = vld [vmem:[%s29123_s28 + $0x58] sm:$0xff]   ;;  %v21359_v14 = vld [vmem:[%s29123_s28 + $0xa0] sm:$0xff]   ;;  %v21362_v17 = vld [vmem:[%s29123_s28 + $0xa8] sm:$0xff]   ;;  %s23164_s22 = scalar_lea.vmem %s29124_s21, %s20568_s29  ;;  %s548_s1 = scalar_lea.vmem %s29119_s17, %s20568_s29 }
  0x12   : > { %839 = vmatpush1.bf16.msra.mxu1 %v21350_v4  ;;  %v21358_v12 = vld [vmem:[%s29123_s28 + $0x18] sm:$0xff]   ;;  %v21361_v15 = vld [vmem:[%s29123_s28 + $0x20] sm:$0xff]   ;;  %v21364_v18 = vld [vmem:[%s29123_s28 + $0x28] sm:$0xff]  }
  0x13   : > { %840 = vmatprep.subr.bf16.mxu1 %v22979_v1  ;;  %v21366_v20 = vld [vmem:[%s29123_s28 + $0x70] sm:$0xff]   ;;  %v21368_v24 = vld [vmem:[%s29123_s28 + $0xb8] sm:$0xff]   ;;  %v550_v28 = vld [vmem:[%s23164_s22] sm:$0xff] }
  0x14   : > { %20573 = vmatpush3.bf16.msra.mxu0 %v21352_v6  ;;  %v21365_v21 = vld [vmem:[%s29123_s28 + $0xb0] sm:$0xff]   ;;  %v21369_v25 = vld [vmem:[%s29123_s28 + $0x78] sm:$0xff]   ;;  %v552_v31 = vcombine.high %v550_v28, %v550_v28  ;;  %v21371_v33 = vld [vmem:[%s29123_s28 + $0xc0] sm:$0xff]   ;;  %v559_v35 = vrot.slane %v550_v28, %v23186_v34 }
  0x15   : > { %20574 = vmatprep.subr.bf16.mxu0 %v21354_v8  ;;  %v21367_v22 = vld [vmem:[%s29123_s28 + $0x30] sm:$0xff]   ;;  %v21370_v29 = vld [vmem:[%s29123_s28 + $0x38] sm:$0xff]   ;;  %v21372_v38 = vld [vmem:[%s29123_s28 + $0xc8] sm:$0xff]  }
  0x16   : > { %841 = vmatpush1.bf16.msra.mxu1 %v21353_v7  ;;  %v566_v36 = vrot.slane %v552_v31, %v23186_v34  ;;  %v567_v37 = vcombine.high %v559_v35, %v559_v35  ;;  %v23194_v40 = vpack.c.bf16 %v559_v35, %v559_v35  ;;  %v21388_v57 = vld [vmem:[%s29105_s3 + $0xa0] sm:$0xff]   ;;  %v21392_v60 = vld [vmem:[%s29105_s3 + $0x70] sm:$0xff]   ;;  %v21391_v61 = vld [vmem:[%s29105_s3 + $0xa8] sm:$0xff]  }
  0x17   : > { %842 = vmatprep.subr.bf16.mxu1 %v22979_v1  ;;  %v21393_v62 = vld [vmem:[%s29105_s3 + $0x30] sm:$0xff]   ;;  %v21395_v63 = vld [vmem:[%s29105_s3 + $0x78] sm:$0xff]   ;;  %v21398_v4 = vld [vmem:[%s29105_s3 + $0xc0] sm:$0xff]  }
  0x18   : > { %20575 = vmatpush3.bf16.msra.mxu0 %v21355_v9  ;;  %v568_v39 = vcombine.high %v566_v36, %v566_v36  ;;  %v23197_v41 = vpack.c.bf16 %v567_v37, %v567_v37  ;;  %v23204_v44 = vpack.c.bf16 %v566_v36, %v566_v36  ;;  %v21394_v0 = vld [vmem:[%s29105_s3 + $0xb0] sm:$0xff]   ;;  %v21396_v2 = vld [vmem:[%s29105_s3 + $0x38] sm:$0xff]   ;;  %v21399_v5 = vld [vmem:[%s29105_s3 + $0xc8] sm:$0xff]  }
  0x19   : > { %20576 = vmatprep.subr.bf16.mxu0 %v21357_v11  ;;  %v21397_v3 = vld [vmem:[%s29105_s3 + $0xb8] sm:$0xff]   ;;  %v21400_v6 = vld [vmem:[%s29107_s5 + $0x80] sm:$0xff]   ;;  %v21401_v7 = vld [vmem:[%s29107_s5 + $0x88] sm:$0xff]  }
  0x1a   : > { %843 = vmatpush1.bf16.msra.mxu1 %v21356_v10  ;;  %v23199_v42 = vpack.c.bf16 %v568_v39, %v568_v39  ;;  %828 = vmatprep.mubr.bf16.mxu0 %v23197_v41  ;;  %v21402_v8 = vld [vmem:[%s29107_s5 + $0x40] sm:$0xff]   ;;  %v21404_v10 = vld [vmem:[%s29107_s5 + $0x90] sm:$0xff]   ;;  %v21405_v11 = vld [vmem:[%s29107_s5 + $0x48] sm:$0xff]  }
  0x1b   : > { %844 = vmatprep.subr.bf16.mxu1 %v22979_v1  ;;  %v21403_v9 = vld [vmem:[%s29107_s5] sm:$0xff]   ;;  %v21419_v26 = vld [vmem:[%s29107_s5 + $0xb8] sm:$0xff]   ;;  %v21420_v27 = vld [vmem:[%s29107_s5 + $0x70] sm:$0xff]  }
  0x1c   : > { %20577 = vmatpush3.bf16.msra.mxu0 %v21358_v12  ;;  %17600 = vmatprep.mubr.msk.bf16.mxu1 %vm792_vm0, %v23199_v42  ;;  %v21406_v12 = vld [vmem:[%s29107_s5 + $0x8] sm:$0xff]   ;;  %v21414_v19 = vld [vmem:[%s29107_s5 + $0x60] sm:$0xff]   ;;  %v21421_v28 = vld [vmem:[%s29107_s5 + $0x30] sm:$0xff]  }
  0x1d   : > { %20578 = vmatprep.subr.bf16.mxu0 %v21360_v13  ;;  %v21408_v13 = vld [vmem:[%s29107_s5 + $0x50] sm:$0xff]   ;;  %v21423_v30 = vld [vmem:[%s29107_s5 + $0x78] sm:$0xff]   ;;  %v17573_v36 = vld [vmem:[%s29104_s2] ss:$0 sm:$0xff] }
  0x1e   : > { %845 = vmatpush1.bf16.msra.mxu1 %v21359_v14  ;;  %v21407_v14 = vld [vmem:[%s29107_s5 + $0x98] sm:$0xff]   ;;  %vm17503_vm9 = vmor %vm17502_vm8, %vm10131_vm6 }
  0x1f   : > { %846 = vmatprep.subr.bf16.mxu1 %v22979_v1  ;;  %v21424_v31 = vld [vmem:[%s29107_s5 + $0x38] sm:$0xff]   ;;  %vm17505_vm11 = vmor %vm17504_vm10, %vm17503_vm9 }
  0x20   : > { %20579 = vmatpush3.bf16.msra.mxu0 %v21361_v15  ;;  %v21409_v15 = vld [vmem:[%s29107_s5 + $0x10] sm:$0xff]   ;;  %vm17507_vm13 = vmor %vm17506_vm12, %vm17505_vm11 }
  0x21   : > { %20580 = vmatprep.subr.bf16.mxu0 %v21363_v16  ;;  %v21411_v16 = vld [vmem:[%s29107_s5 + $0x58] sm:$0xff]  }
  0x22   : > { %847 = vmatpush1.bf16.msra.mxu1 %v21362_v17  ;;  %v21410_v17 = vld [vmem:[%s29107_s5 + $0xa0] sm:$0xff]  }
  0x23   : > { %848 = vmatprep.subr.bf16.mxu1 %v22979_v1 }
  0x24   : > { %20581 = vmatpush3.bf16.msra.mxu0 %v21364_v18  ;;  %v21412_v18 = vld [vmem:[%s29107_s5 + $0x18] sm:$0xff]  }
  0x25   : > { %20582 = vmatprep.subr.bf16.mxu0 %v21366_v20  ;;  %v21413_v20 = vld [vmem:[%s29107_s5 + $0xa8] sm:$0xff]  }
  0x26   : > { %849 = vmatpush1.bf16.msra.mxu1 %v21365_v21  ;;  %v21415_v21 = vld [vmem:[%s29107_s5 + $0x20] sm:$0xff]  }
  0x27   : > { %850 = vmatprep.subr.bf16.mxu1 %v22979_v1 }
  0x28   : > { %20583 = vmatpush3.bf16.msra.mxu0 %v21367_v22  ;;  %v21417_v22 = vld [vmem:[%s29107_s5 + $0x68] sm:$0xff]  }
  0x29   : > { %20584 = vmatprep.subr.bf16.mxu0 %v21369_v25  ;;  %v21418_v25 = vld [vmem:[%s29107_s5 + $0x28] sm:$0xff]  }
  0x2a   : > { %851 = vmatpush1.bf16.msra.mxu1 %v21368_v24  ;;  %v21416_v24 = vld [vmem:[%s29107_s5 + $0xb0] sm:$0xff]  }
  0x2b   : > { %852 = vmatprep.subr.bf16.mxu1 %v22979_v1 }
  0x2c   : > { %20585 = vmatpush3.bf16.msra.mxu0 %v21370_v29  ;;  %v21422_v29 = vld [vmem:[%s29107_s5 + $0xc0] sm:$0xff]  }
  0x2d   : > { %20592 = vmatprep.subr.bf16.mxu0 %v21374_v32  ;;  %v21425_v32 = vld [vmem:[%s29107_s5 + $0xc8] sm:$0xff]  }
  0x2e   : > { %853 = vmatpush1.bf16.msra.mxu1 %v21371_v33  ;;  %v22981_v33 = vmov 0.0  }
  0x2f   : > { %854 = vmatprep.subr.bf16.mxu1 %v22979_v1  ;;  %829 = vmatmul.mubr.bf16.vlgmr.msra.gmra.mrb[0].mxu0 %v23194_v40 }
  0x30   : > { %20593 = vmatpush3.bf16.msra.mxu0 %v21375_v43  ;;  %1123 = vmatprep.mubr.bf16.mxu0 %v23197_v41 }
  0x31   : > { %20594 = vmatprep.subr.bf16.mxu0 %v21377_v45 }
  0x32   : > { %855 = vmatpush1.bf16.msra.mxu1 %v21372_v38 }
  0x33   : > { %1131 = vmatprep.subr.bf16.mxu1 %v22979_v1 }
  0x34   : > { %20595 = vmatpush3.bf16.msra.mxu0 %v21378_v47 }
  0x35   : > { %869 = vmatmul.mubr.bf16.vlgmr.msra.gmra.mrb[0].mxu1 %v23204_v44  ;;  %20596 = vmatprep.subr.bf16.mxu0 %v21380_v48 }
  0x36   : > { %1132 = vmatpush1.bf16.msra.mxu1 %v21376_v46  ;;  %17628 = vmatprep.mubr.msk.bf16.mxu1 %vm792_vm0, %v23199_v42 }
  0x37   : > { %1133 = vmatprep.subr.bf16.mxu1 %v22979_v1 }
  0x38   : > { %20597 = vmatpush3.bf16.msra.mxu0 %v21381_v50 }
  0x39   : > { %20598 = vmatprep.subr.bf16.mxu0 %v21383_v51 }
  0x3a   : > { %1134 = vmatpush1.bf16.msra.mxu1 %v21379_v49 }
  0x3b   : > { %1135 = vmatprep.subr.bf16.mxu1 %v22979_v1 }
  0x3c   : > { %20599 = vmatpush3.bf16.msra.mxu0 %v21384_v53 }
  0x3d   : > { %20600 = vmatprep.subr.bf16.mxu0 %v21386_v54 }
  0x3e   : > { %1136 = vmatpush1.bf16.msra.mxu1 %v21382_v52 }
  0x3f   : > { %1137 = vmatprep.subr.bf16.mxu1 %v22979_v1 }
  0x40   : > { %20601 = vmatpush3.bf16.msra.mxu0 %v21387_v56 }
  0x41   : > { %20602 = vmatprep.subr.bf16.mxu0 %v21389_v58 }
  0x42   : > { %1138 = vmatpush1.bf16.msra.mxu1 %v21385_v55  ;;  %v17601_v55 = vld [vmem:[%s29106_s4] ss:$0 sm:$0xff] }
  0x43   : > { %1139 = vmatprep.subr.bf16.mxu1 %v22979_v1 }
  0x44   : > { %20603 = vmatpush3.bf16.msra.mxu0 %v21390_v59 }
  0x45   : > { %20604 = vmatprep.subr.bf16.mxu0 %v21392_v60 }
  0x46   : > { %1140 = vmatpush1.bf16.msra.mxu1 %v21388_v57 }
  0x47   : > { %1141 = vmatprep.subr.bf16.mxu1 %v22979_v1 }
  0x48   : > { %20605 = vmatpush3.bf16.msra.mxu0 %v21393_v62 }
  0x49   : > { %20606 = vmatprep.subr.bf16.mxu0 %v21395_v63 }
  0x4a   : > { %1142 = vmatpush1.bf16.msra.mxu1 %v21391_v61 }
  0x4b   : > { %1143 = vmatprep.subr.bf16.mxu1 %v22979_v1 }
  0x4c   : > { %20607 = vmatpush3.bf16.msra.mxu0 %v21396_v2 }
  0x4d   : > { %20614 = vmatprep.subr.bf16.mxu0 %v21402_v8 }
  0x4e   : > { %1144 = vmatpush1.bf16.msra.mxu1 %v21394_v0 }
  0x4f   : > { %1145 = vmatprep.subr.bf16.mxu1 %v22979_v1  ;;  %1124 = vmatmul.mubr.bf16.vlgmr.msra.gmra.mrb[4].mxu0 %v23194_v40 }
  0x50   : > { %1418 = vmatprep.mubr.bf16.mxu0 %v23197_v41  ;;  %20615 = vmatpush3.bf16.msra.mxu0 %v21403_v9 }
  0x51   : > { %20616 = vmatprep.subr.bf16.mxu0 %v21405_v11 }
  0x52   : > { %1146 = vmatpush1.bf16.msra.mxu1 %v21397_v3  ;;  %v17629_v3 = vld [vmem:[%s29108_s6] ss:$0 sm:$0xff] }
  0x53   : > { %1147 = vmatprep.subr.bf16.mxu1 %v22979_v1 }
  0x54   : > { %20617 = vmatpush3.bf16.msra.mxu0 %v21406_v12 }
  0x55   : > { %20618 = vmatprep.subr.bf16.mxu0 %v21408_v13 }
  0x56   : > { %1148 = vmatpush1.bf16.msra.mxu1 %v21398_v4 }
  0x57   : > { %1149 = vmatprep.subr.bf16.mxu1 %v22979_v1 }
  0x58   : > { %20619 = vmatpush3.bf16.msra.mxu0 %v21409_v15 }
  0x59   : > { %20620 = vmatprep.subr.bf16.mxu0 %v21411_v16 }
  0x5a   : > { %1150 = vmatpush1.bf16.msra.mxu1 %v21399_v5 }
  0x5b   : > { %1426 = vmatprep.subr.bf16.mxu1 %v22979_v1 }
  0x5c   : > { %20621 = vmatpush3.bf16.msra.mxu0 %v21412_v18 }
  0x5d   : > { %1164 = vmatmul.mubr.bf16.vlgmr.msra.gmra.mrb[4].mxu1 %v23204_v44  ;;  %20622 = vmatprep.subr.bf16.mxu0 %v21414_v19 }
  0x5e   : > { %17656 = vmatprep.mubr.msk.bf16.mxu1 %vm792_vm0, %v23199_v42  ;;  %1427 = vmatpush1.bf16.msra.mxu1 %v21400_v6 }
  0x5f   : > { %1428 = vmatprep.subr.bf16.mxu1 %v22979_v1 }
  0x60   : > { %20623 = vmatpush3.bf16.msra.mxu0 %v21415_v21 }
  0x61   : > { %20624 = vmatprep.subr.bf16.mxu0 %v21417_v22 }
  0x62   : > { %1429 = vmatpush1.bf16.msra.mxu1 %v21401_v7 }
  0x63   : > { %1430 = vmatprep.subr.bf16.mxu1 %v22979_v1 }
  0x64   : > { %20625 = vmatpush3.bf16.msra.mxu0 %v21418_v25 }
  0x65   : > { %20626 = vmatprep.subr.bf16.mxu0 %v21420_v27 }
  0x66   : > { %1431 = vmatpush1.bf16.msra.mxu1 %v21404_v10 }
  0x67   : > { %1432 = vmatprep.subr.bf16.mxu1 %v22979_v1 }
  0x68   : > { %20627 = vmatpush3.bf16.msra.mxu0 %v21421_v28 }
  0x69   : > { %20628 = vmatprep.subr.bf16.mxu0 %v21423_v30  ;;  %v21427_v30 = vld [vmem:[%s29123_s28 + $0x158] sm:$0xff]  }
  0x6a   : > { %1433 = vmatpush1.bf16.msra.mxu1 %v21407_v14 }
  0x6b   : > { %1434 = vmatprep.subr.bf16.mxu1 %v22979_v1 }
  0x6c   : > { %20629 = vmatpush3.bf16.msra.mxu0 %v21424_v31  ;;  %v21428_v31 = vld [vmem:[%s29123_s28 + $0x160] sm:$0xff]  }
  0x6d   : > { %21136 = vmatprep.subr.bf16.mxu0 %v22981_v33 }
  0x6e   : > { %1435 = vmatpush1.bf16.msra.mxu1 %v21410_v17 }
  0x6f   : > { %1436 = vmatprep.subr.bf16.mxu1 %v22979_v1  ;;  %1419 = vmatmul.mubr.bf16.vlgmr.msra.gmra.mrb[8].mxu0 %v23194_v40 }
  0x70   : > { %21138 = vmatprep.mubr.msk.bf16.mxu0 %vm22982_vm1, %v22981_v33 }
  0x72   : > { %1437 = vmatpush1.bf16.msra.mxu1 %v21413_v20 }
  0x73   : > { %1438 = vmatprep.subr.bf16.mxu1 %v22979_v1 }
  0x76   : > { %1439 = vmatpush1.bf16.msra.mxu1 %v21416_v24 }
  0x77   : > { %1440 = vmatprep.subr.bf16.mxu1 %v22979_v1 }
  0x7a   : > { %1441 = vmatpush1.bf16.msra.mxu1 %v21419_v26 }
  0x7b   : > { %1442 = vmatprep.subr.bf16.mxu1 %v22979_v1 }
  0x7e   : > { %1443 = vmatpush1.bf16.msra.mxu1 %v21422_v29  ;;  %v21426_v29 = vld [vmem:[%s29123_s28 + $0x150] sm:$0xff]  }
  0x7f   : > { %1444 = vmatprep.subr.bf16.mxu1 %v22979_v1 }
  0x82   : > { %1445 = vmatpush1.bf16.msra.mxu1 %v21425_v32  ;;  %v21429_v32 = vld [vmem:[%s29123_s28 + $0x168] sm:$0xff]  }
  0x83   : > { %21130 = vmatprep.subr.bf16.mxu1 %v22981_v33 }
  0x85   : > { %1459 = vmatmul.mubr.bf16.vlgmr.msra.gmra.mrb[8].mxu1 %v23204_v44 }
  0x86   : > { %21132 = vmatprep.mubr.msk.bf16.mxu1 %vm22982_vm1, %v22981_v33 }
 0x102   : > { %v20586_v35 = vpop.f32.mrb[0].mxu0 }
 0x103   : > { %v20587_v37 = vpop.f32.mrb[1].mxu0 }
 0x104   : > { %v20588_v38 = vadd.f32 %v20587_v37, %v20586_v35  ;;  %v20589_v43 = vpop.f32.mrb[2].mxu0  ;;  %v21430_v35 = vld [vmem:[%s29123_s28 + $0x110] sm:$0xff]   ;;  %v21435_v37 = vld [vmem:[%s29123_s28 + $0x178] sm:$0xff]  }
 0x105   : > { %v20590_v46 = vpop.f32.mrb[3].mxu0  ;;  %v21444_v43 = vld [vmem:[%s29123_s28 + $0x190] sm:$0xff]  }
 0x106   : > { %v831_v47 = vadd.f32 %v20588_v38, %v17573_v36  ;;  %v21432_v36 = vld [vmem:[%s29123_s28 + $0x170] sm:$0xff]   ;;  %v21438_v38 = vld [vmem:[%s29123_s28 + $0x180] sm:$0xff]  }
 0x107   : > { %v21450_v46 = vld [vmem:[%s29105_s3 + $0x150] sm:$0xff]  }
 0x108   : > { %v870_v39 = vpop.f32.mrb[0].mxu1 }
 0x109   : > { %v872_v45 = vpop.f32.mrb[1].mxu1  ;;  %v871_v50 = vadd.f32 %v870_v39, %v831_v47  ;;  %v21441_v39 = vld [vmem:[%s29123_s28 + $0x188] sm:$0xff]   ;;  %v21453_v47 = vld [vmem:[%s29105_s3 + $0x158] sm:$0xff]  }
 0x10a   : > { %v873_v48 = vpop.f32.mrb[2].mxu1  ;;  %v21447_v45 = vld [vmem:[%s29123_s28 + $0x198] sm:$0xff]  }
 0x10b   : > { %v874_v49 = vpop.f32.mrb[3].mxu1  ;;  %v1466_v2 = vpack.c.bf16 %v871_v50, %v871_v50  ;;  %v21456_v48 = vld [vmem:[%s29105_s3 + $0x160] sm:$0xff]   ;;  %v21462_v50 = vld [vmem:[%s29105_s3 + $0x170] sm:$0xff]  }
 0x10c   : > { %v21459_v49 = vld [vmem:[%s29105_s3 + $0x168] sm:$0xff]  }
 0x122   : > { %v20608_v51 = vpop.f32.mrb[4].mxu0 }
 0x123   : > { %v20609_v52 = vpop.f32.mrb[5].mxu0 }
 0x124   : > { %v20610_v53 = vadd.f32 %v20609_v52, %v20608_v51  ;;  %v20611_v54 = vpop.f32.mrb[6].mxu0  ;;  %v21465_v51 = vld [vmem:[%s29105_s3 + $0x178] sm:$0xff]   ;;  %v21468_v52 = vld [vmem:[%s29105_s3 + $0x180] sm:$0xff]  }
 0x125   : > { %v20612_v56 = vpop.f32.mrb[7].mxu0  ;;  %v21474_v54 = vld [vmem:[%s29105_s3 + $0x190] sm:$0xff]  }
 0x126   : > { %v1126_v57 = vadd.f32 %v20610_v53, %v17601_v55  ;;  %v21471_v53 = vld [vmem:[%s29105_s3 + $0x188] sm:$0xff]   ;;  %v21477_v55 = vld [vmem:[%s29105_s3 + $0x198] sm:$0xff]   ;;  %v21478_v56 = vld [vmem:[%s29107_s5 + $0x150] sm:$0xff]  }
 0x130   : > { %v1165_v58 = vpop.f32.mrb[4].mxu1 }
 0x131   : > { %v1166_v59 = vadd.f32 %v1165_v58, %v1126_v57  ;;  %v1167_v60 = vpop.f32.mrb[5].mxu1  ;;  %v21479_v57 = vld [vmem:[%s29107_s5 + $0x158] sm:$0xff]   ;;  %v21480_v58 = vld [vmem:[%s29107_s5 + $0x160] sm:$0xff]  }
 0x132   : > { %v1168_v61 = vpop.f32.mrb[6].mxu1  ;;  %v21482_v60 = vld [vmem:[%s29107_s5 + $0x170] sm:$0xff]  }
 0x133   : > { %v1467_v62 = vpack.c.bf16 %v1166_v59, %v1166_v59  ;;  %v1169_v63 = vpop.f32.mrb[7].mxu1  ;;  %v21481_v59 = vld [vmem:[%s29107_s5 + $0x168] sm:$0xff]   ;;  %v21483_v61 = vld [vmem:[%s29107_s5 + $0x178] sm:$0xff]  }
 0x134   : > { %v21485_v63 = vld [vmem:[%s29107_s5 + $0x188] sm:$0xff]  }
 0x135   : > { %v1473_v0 = vsel %vm1468_vm2, %v1467_v62, 0  ;;  %v21484_v62 = vld [vmem:[%s29107_s5 + $0x180] sm:$0xff]  }
 0x136   : > { %21131 = vmatpush3.bf16.xpose.msra.mxu1 %v1473_v0  ;;  %v21486_v0 = vld [vmem:[%s29107_s5 + $0x190] sm:$0xff]  }
 0x137   : > { %1852 = vmatprep.subr.bf16.mxu1 %v22979_v1 }
 0x13d   : > { %21133 = vmatmul.mubr.msk.bf16.vlgmr.msra.gmra.mrb[12].mxu1 %vm1468_vm2, %v1466_v2  ;;  %v21487_v2 = vld [vmem:[%s29107_s5 + $0x198] sm:$0xff]  }
 0x13e   : > { %17739 = vmatprep.mubr.msk.bf16.mxu1 %vm792_vm0, %v23199_v42  ;;  %1853 = vmatpush1.bf16.msra.mxu1 %v21426_v29  ;;  %v21451_v29 = vld [vmem:[%s29123_s28 + $0x148] sm:$0xff]  }
 0x13f   : > { %1854 = vmatprep.subr.bf16.mxu1 %v22979_v1 }
 0x142   : > { %v20630_v4 = vpop.f32.mrb[8].mxu0  ;;  %1855 = vmatpush1.bf16.msra.mxu1 %v21427_v30  ;;  %v21452_v30 = vld [vmem:[%s29123_s28 + $0x108] sm:$0xff]  }
 0x143   : > { %v20631_v5 = vpop.f32.mrb[9].mxu0  ;;  %1856 = vmatprep.subr.bf16.mxu1 %v22979_v1 }
 0x144   : > { %v20632_v7 = vadd.f32 %v20631_v5, %v20630_v4  ;;  %v20633_v9 = vpop.f32.mrb[10].mxu0  ;;  %v21488_v4 = vld [vmem:[%s29109_s7] ss:$16 sps:$4 sm:$0xff]   ;;  %v21493_v5 = vld [vmem:[%s29109_s7 + $0x24] ss:$16 sps:$4 sm:$0xff]  }
 0x145   : > { %v20634_v11 = vpop.f32.mrb[11].mxu0  ;;  %v21494_v9 = vld [vmem:[%s29109_s7 + $0x40] ss:$16 sps:$4 sm:$0xff]  }
 0x146   : > { %v1421_v12 = vadd.f32 %v20632_v7, %v17629_v3  ;;  %1857 = vmatpush1.bf16.msra.mxu1 %v21428_v31  ;;  %v21490_v3 = vld [vmem:[%s29109_s7 + $0x4] ss:$16 sps:$4 sm:$0xff]   ;;  %v21497_v11 = vld [vmem:[%s29109_s7 + $0x60] ss:$16 sps:$4 sm:$0xff]  }
 0x147   : > { %1858 = vmatprep.subr.bf16.mxu1 %v22979_v1  ;;  %v21496_v7 = vld [vmem:[%s29109_s7 + $0x44] ss:$16 sps:$4 sm:$0xff]  }
 0x148   : > { %v21454_v31 = vld [vmem:[%s29105_s3 + $0x110] sm:$0xff]  }
 0x14a   : > { %1859 = vmatpush1.bf16.msra.mxu1 %v21429_v32  ;;  %v21455_v32 = vld [vmem:[%s29105_s3 + $0xd0] sm:$0xff]  }
 0x14b   : > { %1860 = vmatprep.subr.bf16.mxu1 %v22979_v1 }
 0x14e   : > { %1861 = vmatpush1.bf16.msra.mxu1 %v21432_v36  ;;  %v21458_v36 = vld [vmem:[%s29105_s3 + $0xd8] sm:$0xff]  }
 0x14f   : > { %1862 = vmatprep.subr.bf16.mxu1 %v22979_v1 }
 0x152   : > { %1863 = vmatpush1.bf16.msra.mxu1 %v21435_v37  ;;  %v21460_v37 = vld [vmem:[%s29105_s3 + $0x120] sm:$0xff]  }
 0x153   : > { %1864 = vmatprep.subr.bf16.mxu1 %v22979_v1 }
 0x156   : > { %1865 = vmatpush1.bf16.msra.mxu1 %v21438_v38  ;;  %v21461_v38 = vld [vmem:[%s29105_s3 + $0xe0] sm:$0xff]  }
 0x157   : > { %1866 = vmatprep.subr.bf16.mxu1 %v22979_v1 }
 0x158   : > { %v1460_v6 = vpop.f32.mrb[8].mxu1 }
 0x159   : > { %v1462_v8 = vpop.f32.mrb[9].mxu1  ;;  %v1461_v14 = vadd.f32 %v1460_v6, %v1421_v12  ;;  %v21491_v6 = vld [vmem:[%s29109_s7 + $0x20] ss:$16 sps:$4 sm:$0xff]  }
 0x15a   : > { %v1463_v10 = vpop.f32.mrb[10].mxu1  ;;  %1867 = vmatpush1.bf16.msra.mxu1 %v21441_v39  ;;  %v21463_v39 = vld [vmem:[%s29105_s3 + $0x128] sm:$0xff]  }
 0x15b   : > { %v1464_v13 = vpop.f32.mrb[11].mxu1  ;;  %v1529_v15 = vpack.c.bf16 %v1461_v14, %v1461_v14  ;;  %1868 = vmatprep.subr.bf16.mxu1 %v22979_v1  ;;  %v21499_v10 = vld [vmem:[%s29109_s7 + $0x64] ss:$16 sps:$4 sm:$0xff]  }
 0x15c   : > { %v21431_v14 = vld [vmem:[%s29123_s28 + $0xd0] sm:$0xff]  }
 0x15d   : > { %v1536_v16 = vsel %vm1534_vm3, %v1529_v15, 0 }
 0x15e   : > { %21137 = vmatpush3.bf16.msra.mxu0 %v1536_v16  ;;  %1869 = vmatpush1.bf16.msra.mxu1 %v21444_v43  ;;  %v21433_v16 = vld [vmem:[%s29123_s28 + $0x118] sm:$0xff]   ;;  %v21464_v43 = vld [vmem:[%s29105_s3 + $0xe8] sm:$0xff]  }
 0x15f   : > { %20640 = vmatprep.subr.bf16.mxu0 %v21430_v35  ;;  %1870 = vmatprep.subr.bf16.mxu1 %v22979_v1  ;;  %v21457_v35 = vld [vmem:[%s29105_s3 + $0x118] sm:$0xff]  }
 0x162   : > { %1871 = vmatpush1.bf16.msra.mxu1 %v21447_v45  ;;  %v21466_v45 = vld [vmem:[%s29105_s3 + $0x130] sm:$0xff]  }
 0x163   : > { %2149 = vmatprep.subr.bf16.mxu1 %v22979_v1 }
 0x165   : > { %1885 = vmatmul.mubr.bf16.vlgmr.msra.gmra.mrb[16].mxu1 %v23204_v44 }
 0x166   : > { %2150 = vmatpush1.bf16.msra.mxu1 %v21450_v46  ;;  %17820 = vmatprep.mubr.msk.bf16.mxu1 %vm792_vm0, %v23199_v42  ;;  %v21467_v46 = vld [vmem:[%s29105_s3 + $0xf0] sm:$0xff]  }
 0x167   : > { %2151 = vmatprep.subr.bf16.mxu1 %v22979_v1 }
 0x16a   : > { %2152 = vmatpush1.bf16.msra.mxu1 %v21453_v47  ;;  %v21469_v47 = vld [vmem:[%s29105_s3 + $0x138] sm:$0xff]  }
 0x16b   : > { %2153 = vmatprep.subr.bf16.mxu1 %v22979_v1 }
 0x16e   : > { %2154 = vmatpush1.bf16.msra.mxu1 %v21456_v48  ;;  %v21470_v48 = vld [vmem:[%s29105_s3 + $0xf8] sm:$0xff]  }
 0x16f   : > { %2155 = vmatprep.subr.bf16.mxu1 %v22979_v1 }
 0x172   : > { %2156 = vmatpush1.bf16.msra.mxu1 %v21459_v49  ;;  %v21472_v49 = vld [vmem:[%s29105_s3 + $0x140] sm:$0xff]  }
 0x173   : > { %2157 = vmatprep.subr.bf16.mxu1 %v22979_v1 }
 0x176   : > { %2158 = vmatpush1.bf16.msra.mxu1 %v21462_v50  ;;  %v21473_v50 = vld [vmem:[%s29105_s3 + $0x100] sm:$0xff]  }
 0x177   : > { %2159 = vmatprep.subr.bf16.mxu1 %v22979_v1 }
 0x17a   : > { %2160 = vmatpush1.bf16.msra.mxu1 %v21465_v51  ;;  %v21475_v51 = vld [vmem:[%s29105_s3 + $0x148] sm:$0xff]  }
 0x17b   : > { %2161 = vmatprep.subr.bf16.mxu1 %v22979_v1 }
 0x17e   : > { %2162 = vmatpush1.bf16.msra.mxu1 %v21468_v52  ;;  %v21476_v52 = vld [vmem:[%s29105_s3 + $0x108] sm:$0xff]  }
 0x17f   : > { %2163 = vmatprep.subr.bf16.mxu1 %v22979_v1 }
 0x182   : > { %2164 = vmatpush1.bf16.msra.mxu1 %v21471_v53 }
 0x183   : > { %2165 = vmatprep.subr.bf16.mxu1 %v22979_v1 }
 0x186   : > { %2166 = vmatpush1.bf16.msra.mxu1 %v21474_v54 }
 0x187   : > { %2167 = vmatprep.subr.bf16.mxu1 %v22979_v1 }
 0x18a   : > { %2168 = vmatpush1.bf16.msra.mxu1 %v21477_v55 }
 0x18b   : > { %2446 = vmatprep.subr.bf16.mxu1 %v22979_v1 }
 0x18d   : > { %2182 = vmatmul.mubr.bf16.vlgmr.msra.gmra.mrb[20].mxu1 %v23204_v44 }
 0x18e   : > { %2447 = vmatpush1.bf16.msra.mxu1 %v21478_v56  ;;  %17901 = vmatprep.mubr.msk.bf16.mxu1 %vm792_vm0, %v23199_v42 }
 0x18f   : > { %2448 = vmatprep.subr.bf16.mxu1 %v22979_v1 }
 0x192   : > { %2449 = vmatpush1.bf16.msra.mxu1 %v21479_v57  ;;  %v21500_v57 = vld [vmem:[%s29107_s5 + $0x110] sm:$0xff]  }
 0x193   : > { %2450 = vmatprep.subr.bf16.mxu1 %v22979_v1 }
 0x196   : > { %2451 = vmatpush1.bf16.msra.mxu1 %v21480_v58  ;;  %v21501_v58 = vld [vmem:[%s29107_s5 + $0xd0] sm:$0xff]  }
 0x197   : > { %2452 = vmatprep.subr.bf16.mxu1 %v22979_v1 }
 0x19a   : > { %2453 = vmatpush1.bf16.msra.mxu1 %v21481_v59  ;;  %v21502_v59 = vld [vmem:[%s29107_s5 + $0x118] sm:$0xff]  }
 0x19b   : > { %2454 = vmatprep.subr.bf16.mxu1 %v22979_v1 }
 0x19e   : > { %2455 = vmatpush1.bf16.msra.mxu1 %v21482_v60  ;;  %v21503_v60 = vld [vmem:[%s29107_s5 + $0xd8] sm:$0xff]  }
 0x19f   : > { %2456 = vmatprep.subr.bf16.mxu1 %v22979_v1 }
 0x1a2   : > { %2457 = vmatpush1.bf16.msra.mxu1 %v21483_v61  ;;  %v21504_v61 = vld [vmem:[%s29107_s5 + $0x120] sm:$0xff]  }
 0x1a3   : > { %2458 = vmatprep.subr.bf16.mxu1 %v22979_v1 }
 0x1a6   : > { %2459 = vmatpush1.bf16.msra.mxu1 %v21484_v62  ;;  %v21505_v62 = vld [vmem:[%s29107_s5 + $0xe0] sm:$0xff]  }
 0x1a7   : > { %2460 = vmatprep.subr.bf16.mxu1 %v22979_v1 }
 0x1aa   : > { %2461 = vmatpush1.bf16.msra.mxu1 %v21485_v63  ;;  %v21506_v63 = vld [vmem:[%s29107_s5 + $0x128] sm:$0xff]  }
 0x1ab   : > { %2462 = vmatprep.subr.bf16.mxu1 %v22979_v1 }
 0x1ae   : > { %2463 = vmatpush1.bf16.msra.mxu1 %v21486_v0  ;;  %v21507_v0 = vld [vmem:[%s29107_s5 + $0xe8] sm:$0xff]  }
 0x1af   : > { %2464 = vmatprep.subr.bf16.mxu1 %v22979_v1 }
 0x1b2   : > { %2465 = vmatpush1.bf16.msra.mxu1 %v21487_v2  ;;  %v21508_v2 = vld [vmem:[%s29107_s5 + $0x130] sm:$0xff]  }
 0x1b3   : > { %2860 = vmatprep.subr.bf16.mxu1 %v21490_v3  ;;  %v21509_v3 = vld [vmem:[%s29107_s5 + $0xf0] sm:$0xff]  }
 0x1b5   : > { %2479 = vmatmul.mubr.bf16.vlgmr.msra.gmra.mrb[24].mxu1 %v23204_v44 }
 0x1b6   : > { %2861 = vmatpush1.bf16.msra.mxu1 %v21488_v4  ;;  %2892 = vmatprep.mubr.bf16.mxu1 %v22979_v1  ;;  %v21510_v4 = vld [vmem:[%s29107_s5 + $0x138] sm:$0xff]  }
 0x1b7   : > { %2862 = vmatprep.subr.bf16.mxu1 %v21493_v5  ;;  %v21511_v5 = vld [vmem:[%s29107_s5 + $0xf8] sm:$0xff]  }
 0x1ba   : > { %2863 = vmatpush1.bf16.msra.mxu1 %v21491_v6  ;;  %v21512_v6 = vld [vmem:[%s29107_s5 + $0x140] sm:$0xff]  }
 0x1bb   : > { %2864 = vmatprep.subr.bf16.mxu1 %v21496_v7  ;;  %v21513_v7 = vld [vmem:[%s29107_s5 + $0x100] sm:$0xff]  }
 0x1be   : > { %2865 = vmatpush1.bf16.msra.mxu1 %v21494_v9  ;;  %v21515_v9 = vld [vmem:[%s29107_s5 + $0x108] sm:$0xff]  }
 0x1bf   : > { %2866 = vmatprep.subr.bf16.mxu1 %v21499_v10 }
 0x1c2   : > { %2867 = vmatpush1.bf16.msra.mxu1 %v21497_v11 }
 0x210   : > { %v1509_v17 = vpop.f32.mrb[12].mxu1 }
 0x211   : > { %v1515_v18 = vmul.f32 0.13867505, %v1509_v17  ;;  %v21134_v19 = vpop.f32.mrb[13].mxu1  ;;  %v21434_v17 = vld [vmem:[%s29123_s28 + $0xd8] sm:$0xff]  }
 0x212   : > { %v1512_v20 = vpop.f32.mrb[14].mxu1  ;;  %v21437_v19 = vld [vmem:[%s29123_s28 + $0xe0] sm:$0xff]  }
 0x213   : > { %v21135_v21 = vpop.f32.mrb[15].mxu1  ;;  %v1517_v22 = vsel %vm1516_vm4, %v1515_v18, -inf  ;;  %v21439_v20 = vld [vmem:[%s29123_s28 + $0x128] sm:$0xff]  }
 0x214   : > { %1518 = vmax.xlane.f32.xlu0 %v1517_v22  ;;  %v21440_v21 = vld [vmem:[%s29123_s28 + $0xe8] sm:$0xff]   ;;  %v21442_v22 = vld [vmem:[%s29123_s28 + $0x130] sm:$0xff]  }
 0x238   : > { %v1886_v53 = vpop.f32.mrb[16].mxu1 }
 0x239   : > { %v1888_v54 = vpop.f32.mrb[17].mxu1 }
 0x23a   : > { %v1889_v55 = vpop.f32.mrb[18].mxu1 }
 0x23b   : > { %v1890_v56 = vpop.f32.mrb[19].mxu1 }
 0x260   : > { %v2183_v10 = vpop.f32.mrb[20].mxu1 }
 0x261   : > { %v2185_v11 = vpop.f32.mrb[21].mxu1 }
 0x262   : > { %v21518_v11 = vld [vmem:[%s29109_s7 + $0x84] ss:$16 sps:$4 sm:$0xff]  }
 0x2a1   : > { %v1519_v24 = vpop.xlane.xlu0 %1518 }
 0x2a2   : > { %v1520_v25 = vsub.f32 %v1515_v18, %v1519_v24  ;;  %v21436_v18 = vld [vmem:[%s29123_s28 + $0x120] sm:$0xff]   ;;  %v21443_v24 = vld [vmem:[%s29123_s28 + $0xf0] sm:$0xff]  }
 0x2a4   : > { %v1521_v26 = vmul.f32 1.442695, %v1520_v25  ;;  %v21445_v25 = vld [vmem:[%s29123_s28 + $0x138] sm:$0xff]  }
 0x2a6   : > { %22932 = vpow2.f32 %v1521_v26  ;;  %v21446_v26 = vld [vmem:[%s29123_s28 + $0xf8] sm:$0xff]  }
 0x2b0   : > { %v23413_v27 = vpop.eup %22932 }
 0x2b1   : > { %v1523_v28 = vsel %vm1516_vm4, %v23413_v27, 0.0 }
 0x2b2   : > { %1524 = vadd.xlane.f32.xlu0 %v1523_v28  ;;  %v21449_v28 = vld [vmem:[%s29123_s28 + $0x100] sm:$0xff]  }
 0x33f   : > { %v1525_v8 = vpop.xlane.xlu0 %1524 }
 0x340   : > { %22934 = vrcp.f32 %v1525_v8  ;;  %v21514_v8 = vld [vmem:[%s29107_s5 + $0x148] sm:$0xff]  }
 0x34a   : > { %v22935_v12 = vpop.eup %22934 }
 0x34b   : > { %v1527_v13 = vmul.f32 %v22935_v12, %v23413_v27  ;;  %v21448_v27 = vld [vmem:[%s29123_s28 + $0x140] sm:$0xff]   ;;  %v2186_v12 = vpop.f32.mrb[22].mxu1 }
 0x34d   : > { %v1528_v15 = vpack.c.bf16 %v1527_v13, %v1527_v13  ;;  %v2187_v13 = vpop.f32.mrb[23].mxu1 }
 0x34f   : > { %21139 = vmatmul.mubr.msk.bf16.vlgmr.msra.gmra.mrb[12].mxu0 %vm1530_vm5, %v1528_v15 }
 0x350   : > { %20641 = vmatpush3.bf16.msra.mxu0 %v21431_v14  ;;  %1844 = vmatprep.mubr.bf16.mxu0 %v23197_v41  ;;  %v2480_v14 = vpop.f32.mrb[24].mxu1 }
 0x351   : > { %20642 = vmatprep.subr.bf16.mxu0 %v21433_v16  ;;  %v2482_v15 = vpop.f32.mrb[25].mxu1 }
 0x352   : > { %v2483_v16 = vpop.f32.mrb[26].mxu1  ;;  %v21516_v15 = vld [vmem:[%s29109_s7 + $0x80] ss:$16 sps:$4 sm:$0xff]  }
 0x354   : > { %20643 = vmatpush3.bf16.msra.mxu0 %v21434_v17  ;;  %v2484_v17 = vpop.f32.mrb[27].mxu1 }
 0x355   : > { %20644 = vmatprep.subr.bf16.mxu0 %v21436_v18  ;;  %v21521_v17 = vld [vmem:[%s29109_s7 + $0xa4] ss:$16 sps:$4 sm:$0xff]  }
 0x358   : > { %20645 = vmatpush3.bf16.msra.mxu0 %v21437_v19 }
 0x359   : > { %20646 = vmatprep.subr.bf16.mxu0 %v21439_v20 }
 0x35c   : > { %20647 = vmatpush3.bf16.msra.mxu0 %v21440_v21 }
 0x35d   : > { %20648 = vmatprep.subr.bf16.mxu0 %v21442_v22 }
 0x360   : > { %20649 = vmatpush3.bf16.msra.mxu0 %v21443_v24 }
 0x361   : > { %20650 = vmatprep.subr.bf16.mxu0 %v21445_v25  ;;  %v17712_v25 = vld [vmem:[%s29104_s2 + $0x1] ss:$0 sm:$0xff] }
 0x364   : > { %20651 = vmatpush3.bf16.msra.mxu0 %v21446_v26 }
 0x365   : > { %20652 = vmatprep.subr.bf16.mxu0 %v21448_v27 }
 0x368   : > { %20653 = vmatpush3.bf16.msra.mxu0 %v21449_v28 }
 0x369   : > { %20654 = vmatprep.subr.bf16.mxu0 %v21451_v29 }
 0x36c   : > { %20655 = vmatpush3.bf16.msra.mxu0 %v21452_v30 }
 0x36d   : > { %20662 = vmatprep.subr.bf16.mxu0 %v21454_v31 }
 0x36f   : > { %1845 = vmatmul.mubr.bf16.vlgmr.msra.gmra.mrb[16].mxu0 %v23194_v40 }
 0x370   : > { %20663 = vmatpush3.bf16.msra.mxu0 %v21455_v32  ;;  %2141 = vmatprep.mubr.bf16.mxu0 %v23197_v41 }
 0x371   : > { %20664 = vmatprep.subr.bf16.mxu0 %v21457_v35 }
 0x374   : > { %20665 = vmatpush3.bf16.msra.mxu0 %v21458_v36  ;;  %v17793_v36 = vld [vmem:[%s29106_s4 + $0x1] ss:$0 sm:$0xff] }
 0x375   : > { %20666 = vmatprep.subr.bf16.mxu0 %v21460_v37 }
 0x378   : > { %20667 = vmatpush3.bf16.msra.mxu0 %v21461_v38 }
 0x379   : > { %20668 = vmatprep.subr.bf16.mxu0 %v21463_v39 }
 0x37c   : > { %20669 = vmatpush3.bf16.msra.mxu0 %v21464_v43 }
 0x37d   : > { %20670 = vmatprep.subr.bf16.mxu0 %v21466_v45 }
 0x380   : > { %20671 = vmatpush3.bf16.msra.mxu0 %v21467_v46 }
 0x381   : > { %20672 = vmatprep.subr.bf16.mxu0 %v21469_v47 }
 0x384   : > { %20673 = vmatpush3.bf16.msra.mxu0 %v21470_v48 }
 0x385   : > { %20674 = vmatprep.subr.bf16.mxu0 %v21472_v49 }
 0x388   : > { %20675 = vmatpush3.bf16.msra.mxu0 %v21473_v50  ;;  %v17874_v50 = vld [vmem:[%s29108_s6 + $0x1] ss:$0 sm:$0xff] }
 0x389   : > { %20676 = vmatprep.subr.bf16.mxu0 %v21475_v51 }
 0x38c   : > { %20677 = vmatpush3.bf16.msra.mxu0 %v21476_v52 }
 0x38d   : > { %20684 = vmatprep.subr.bf16.mxu0 %v21500_v57 }
 0x38f   : > { %2142 = vmatmul.mubr.bf16.vlgmr.msra.gmra.mrb[20].mxu0 %v23194_v40 }
 0x390   : > { %2438 = vmatprep.mubr.bf16.mxu0 %v23197_v41  ;;  %20685 = vmatpush3.bf16.msra.mxu0 %v21501_v58 }
 0x391   : > { %20686 = vmatprep.subr.bf16.mxu0 %v21502_v59 }
 0x394   : > { %20687 = vmatpush3.bf16.msra.mxu0 %v21503_v60 }
 0x395   : > { %20688 = vmatprep.subr.bf16.mxu0 %v21504_v61 }
 0x398   : > { %20689 = vmatpush3.bf16.msra.mxu0 %v21505_v62 }
 0x399   : > { %20690 = vmatprep.subr.bf16.mxu0 %v21506_v63 }
 0x39c   : > { %20691 = vmatpush3.bf16.msra.mxu0 %v21507_v0 }
 0x39d   : > { %20692 = vmatprep.subr.bf16.mxu0 %v21508_v2 }
 0x3a0   : > { %20693 = vmatpush3.bf16.msra.mxu0 %v21509_v3 }
 0x3a1   : > { %20694 = vmatprep.subr.bf16.mxu0 %v21510_v4 }
 0x3a4   : > { %20695 = vmatpush3.bf16.msra.mxu0 %v21511_v5 }
 0x3a5   : > { %20696 = vmatprep.subr.bf16.mxu0 %v21512_v6 }
 0x3a8   : > { %20697 = vmatpush3.bf16.msra.mxu0 %v21513_v7 }
 0x3a9   : > { %20698 = vmatprep.subr.bf16.mxu0 %v21514_v8 }
 0x3ac   : > { %20699 = vmatpush3.bf16.msra.mxu0 %v21515_v9 }
 0x3ad   : > { %21142 = vmatprep.subr.bf16.mxu0 %v22981_v33 }
 0x3af   : > { %2439 = vmatmul.mubr.bf16.vlgmr.msra.gmra.mrb[24].mxu0 %v23194_v40 }
 0x3b0   : > { %21144 = vmatprep.mubr.msk.bf16.mxu0 %vm22982_vm1, %v22981_v33 }
 0x422   : > { %v1572_v18 = vpop.f32.mrb[12].mxu0 }
 0x423   : > { %v23723_v19 = vpack.c.bf16 %v1572_v18, %v1572_v18  ;;  %v21140_v20 = vpop.f32.mrb[13].mxu0  ;;  %v21519_v18 = vld [vmem:[%s29109_s7 + $0xa0] ss:$16 sps:$4 sm:$0xff]  }
 0x424   : > { %v1575_v21 = vpop.f32.mrb[14].mxu0  ;;  %v21524_v20 = vld [vmem:[%s29109_s7 + $0xc4] ss:$16 sps:$4 sm:$0xff]  }
 0x425   : > { %v21141_v22 = vpop.f32.mrb[15].mxu0  ;;  %17954 = vmatmul.mubr.msk.bf16.vlgmr.msra.gmra.mrb[28].mxu1 %vm1468_vm2, %v23723_v19  ;;  %v21522_v21 = vld [vmem:[%s29109_s7 + $0xc0] ss:$16 sps:$4 sm:$0xff]  }
 0x426   : > { %3191 = vmatprep.mubr.bf16.mxu1 %v23197_v41  ;;  %v21527_v22 = vld [vmem:[%s29109_s7 + $0xe4] ss:$16 sps:$4 sm:$0xff]  }
 0x442   : > { %v20656_v24 = vpop.f32.mrb[16].mxu0 }
 0x443   : > { %v20657_v26 = vpop.f32.mrb[17].mxu0 }
 0x444   : > { %v20658_v27 = vadd.f32 %v20657_v26, %v20656_v24  ;;  %v20659_v28 = vpop.f32.mrb[18].mxu0  ;;  %v21525_v24 = vld [vmem:[%s29109_s7 + $0xe0] ss:$16 sps:$4 sm:$0xff]  }
 0x445   : > { %v20660_v29 = vpop.f32.mrb[19].mxu0  ;;  %v21553_v26 = vld [vmem:[%s29123_s28 + $0x1e0] sm:$0xff]   ;;  %v21556_v28 = vld [vmem:[%s29123_s28 + $0x1e8] sm:$0xff]  }
 0x446   : > { %v1847_v30 = vadd.f32 %v20658_v27, %v17712_v25  ;;  %v21530_v25 = vld [vmem:[%s29109_s7 + $0x8c] ss:$16 sps:$4 sm:$0xff]   ;;  %v21554_v27 = vld [vmem:[%s29123_s28 + $0x1a0] sm:$0xff]   ;;  %20710 = vmatprep.subr.bf16.mxu1 %v21553_v26 }
 0x447   : > { %20711 = vmatpush3.bf16.msra.mxu1 %v21554_v27  ;;  %v21557_v29 = vld [vmem:[%s29123_s28 + $0x1a8] sm:$0xff]   ;;  %v21558_v27 = vld [vmem:[%s29123_s28 + $0x230] sm:$0xff]  }
 0x448   : > { %v1887_v31 = vadd.f32 %v1886_v53, %v1847_v30  ;;  %20712 = vmatprep.subr.bf16.mxu1 %v21556_v28  ;;  %v21559_v30 = vld [vmem:[%s29123_s28 + $0x1f0] sm:$0xff]   ;;  %v21555_v26 = vld [vmem:[%s29123_s28 + $0x228] sm:$0xff]   ;;  %v21564_v28 = vld [vmem:[%s29123_s28 + $0x240] sm:$0xff]  }
 0x44a   : > { %v2486_v48 = vpack.c.bf16 %v1887_v31, %v1887_v31  ;;  %v21560_v31 = vld [vmem:[%s29123_s28 + $0x1b0] sm:$0xff]  }
 0x44b   : > { %20713 = vmatpush3.bf16.msra.mxu1 %v21557_v29  ;;  %v21567_v29 = vld [vmem:[%s29123_s28 + $0x248] sm:$0xff]  }
 0x44c   : > { %20714 = vmatprep.subr.bf16.mxu1 %v21559_v30  ;;  %v21570_v30 = vld [vmem:[%s29123_s28 + $0x250] sm:$0xff]  }
 0x44f   : > { %20715 = vmatpush3.bf16.msra.mxu1 %v21560_v31  ;;  %v21573_v31 = vld [vmem:[%s29123_s28 + $0x258] sm:$0xff]  }
 0x462   : > { %v20678_v32 = vpop.f32.mrb[20].mxu0 }
 0x463   : > { %v20679_v35 = vpop.f32.mrb[21].mxu0 }
 0x464   : > { %v20680_v37 = vadd.f32 %v20679_v35, %v20678_v32  ;;  %v20681_v38 = vpop.f32.mrb[22].mxu0  ;;  %v21562_v32 = vld [vmem:[%s29123_s28 + $0x1f8] sm:$0xff]  }
 0x465   : > { %v20682_v39 = vpop.f32.mrb[23].mxu0  ;;  %v21563_v35 = vld [vmem:[%s29123_s28 + $0x1b8] sm:$0xff]   ;;  %20716 = vmatprep.subr.bf16.mxu1 %v21562_v32  ;;  %v21568_v38 = vld [vmem:[%s29123_s28 + $0x208] sm:$0xff]   ;;  %v21576_v32 = vld [vmem:[%s29123_s28 + $0x260] sm:$0xff]  }
 0x466   : > { %v2144_v43 = vadd.f32 %v20680_v37, %v17793_v36  ;;  %20717 = vmatpush3.bf16.msra.mxu1 %v21563_v35  ;;  %v21565_v36 = vld [vmem:[%s29123_s28 + $0x200] sm:$0xff]   ;;  %v21569_v39 = vld [vmem:[%s29123_s28 + $0x1c8] sm:$0xff]  }
 0x467   : > { %v21566_v37 = vld [vmem:[%s29123_s28 + $0x1c0] sm:$0xff]   ;;  %20718 = vmatprep.subr.bf16.mxu1 %v21565_v36  ;;  %v21577_v35 = vld [vmem:[%s29123_s28 + $0x268] sm:$0xff]  }
 0x468   : > { %v2184_v45 = vadd.f32 %v2183_v10, %v2144_v43  ;;  %v21571_v43 = vld [vmem:[%s29123_s28 + $0x210] sm:$0xff]   ;;  %v21580_v36 = vld [vmem:[%s29105_s3 + $0x220] sm:$0xff]  }
 0x46a   : > { %v2487_v46 = vpack.c.bf16 %v2184_v45, %v2184_v45  ;;  %20719 = vmatpush3.bf16.msra.mxu1 %v21566_v37  ;;  %v21572_v45 = vld [vmem:[%s29123_s28 + $0x1d0] sm:$0xff]   ;;  %v21583_v37 = vld [vmem:[%s29105_s3 + $0x228] sm:$0xff]  }
 0x46b   : > { %20720 = vmatprep.subr.bf16.mxu1 %v21568_v38  ;;  %v21586_v38 = vld [vmem:[%s29105_s3 + $0x230] sm:$0xff]  }
 0x46c   : > { %v2492_v47 = vsel %vm1468_vm2, %v2487_v46, 0  ;;  %v21574_v46 = vld [vmem:[%s29123_s28 + $0x218] sm:$0xff]  }
 0x46d   : > { %21143 = vmatpush3.bf16.xpose.msra.mxu0 %v2492_v47  ;;  %v21575_v47 = vld [vmem:[%s29123_s28 + $0x1d8] sm:$0xff]  }
 0x46e   : > { %21148 = vmatprep.subr.bf16.mxu0 %v22981_v33  ;;  %20721 = vmatpush3.bf16.msra.mxu1 %v21569_v39  ;;  %v21589_v39 = vld [vmem:[%s29105_s3 + $0x238] sm:$0xff]  }
 0x46f   : > { %20722 = vmatprep.subr.bf16.mxu1 %v21571_v43  ;;  %v21592_v43 = vld [vmem:[%s29105_s3 + $0x240] sm:$0xff]  }
 0x472   : > { %20723 = vmatpush3.bf16.msra.mxu1 %v21572_v45  ;;  %v21595_v45 = vld [vmem:[%s29105_s3 + $0x248] sm:$0xff]  }
 0x473   : > { %20724 = vmatprep.subr.bf16.mxu1 %v21574_v46  ;;  %v21598_v46 = vld [vmem:[%s29105_s3 + $0x250] sm:$0xff]  }
 0x474   : > { %21145 = vmatmul.mubr.msk.bf16.vlgmr.msra.gmra.mrb[28].mxu0 %vm1468_vm2, %v2486_v48  ;;  %v21578_v48 = vld [vmem:[%s29105_s3 + $0x1e0] sm:$0xff]  }
 0x475   : > { %21150 = vmatprep.mubr.msk.bf16.mxu0 %vm22982_vm1, %v22981_v33 }
 0x476   : > { %20725 = vmatpush3.bf16.msra.mxu1 %v21575_v47  ;;  %v21601_v47 = vld [vmem:[%s29105_s3 + $0x258] sm:$0xff]  }
 0x477   : > { %20732 = vmatprep.subr.bf16.mxu1 %v21578_v48  ;;  %v21602_v48 = vld [vmem:[%s29105_s3 + $0x260] sm:$0xff]  }
 0x479   : > { %3192 = vmatmul.mubr.bf16.vlgmr.msra.gmra.mrb[32].mxu1 %v23194_v40 }
 0x47a   : > { %3488 = vmatprep.mubr.bf16.mxu1 %v23197_v41 }
 0x482   : > { %v20700_v49 = vpop.f32.mrb[24].mxu0 }
 0x483   : > { %v20701_v51 = vpop.f32.mrb[25].mxu0 }
 0x484   : > { %v20702_v52 = vadd.f32 %v20701_v51, %v20700_v49  ;;  %v20703_v53 = vpop.f32.mrb[26].mxu0  ;;  %v21579_v49 = vld [vmem:[%s29105_s3 + $0x1a0] sm:$0xff]   ;;  %v21582_v51 = vld [vmem:[%s29105_s3 + $0x1a8] sm:$0xff]  }
 0x485   : > { %v20704_v54 = vpop.f32.mrb[27].mxu0  ;;  %20733 = vmatpush3.bf16.msra.mxu1 %v21579_v49  ;;  %v21585_v53 = vld [vmem:[%s29105_s3 + $0x1b0] sm:$0xff]   ;;  %v21603_v49 = vld [vmem:[%s29105_s3 + $0x268] sm:$0xff]  }
 0x486   : > { %v2441_v55 = vadd.f32 %v20702_v52, %v17874_v50  ;;  %v21581_v50 = vld [vmem:[%s29105_s3 + $0x1e8] sm:$0xff]   ;;  %v21584_v52 = vld [vmem:[%s29105_s3 + $0x1f0] sm:$0xff]   ;;  %v21587_v54 = vld [vmem:[%s29105_s3 + $0x1f8] sm:$0xff]  }
 0x487   : > { %20734 = vmatprep.subr.bf16.mxu1 %v21581_v50 }
 0x488   : > { %v2481_v56 = vadd.f32 %v2480_v14, %v2441_v55  ;;  %v21588_v55 = vld [vmem:[%s29105_s3 + $0x1b8] sm:$0xff]  }
 0x489   : > { %20735 = vmatpush3.bf16.msra.mxu1 %v21582_v51 }
 0x48a   : > { %v2547_v57 = vpack.c.bf16 %v2481_v56, %v2481_v56  ;;  %20736 = vmatprep.subr.bf16.mxu1 %v21584_v52  ;;  %v21590_v56 = vld [vmem:[%s29105_s3 + $0x200] sm:$0xff]  }
 0x48c   : > { %v2552_v58 = vsel %vm1534_vm3, %v2547_v57, 0  ;;  %v21591_v57 = vld [vmem:[%s29105_s3 + $0x1c0] sm:$0xff]  }
 0x48d   : > { %21149 = vmatpush3.bf16.msra.mxu0 %v2552_v58  ;;  %20737 = vmatpush3.bf16.msra.mxu1 %v21585_v53  ;;  %v21593_v58 = vld [vmem:[%s29105_s3 + $0x208] sm:$0xff]  }
 0x48e   : > { %2695 = vmatprep.subr.bf16.mxu0 %v21518_v11  ;;  %20738 = vmatprep.subr.bf16.mxu1 %v21587_v54  ;;  %v21536_v11 = vld [vmem:[%s29109_s7 + $0xcc] ss:$16 sps:$4 sm:$0xff]  }
 0x491   : > { %20739 = vmatpush3.bf16.msra.mxu1 %v21588_v55  ;;  %v21604_v55 = vld [vmem:[%s29107_s5 + $0x1e0] sm:$0xff]  }
 0x492   : > { %20740 = vmatprep.subr.bf16.mxu1 %v21590_v56  ;;  %v21605_v56 = vld [vmem:[%s29107_s5 + $0x1a0] sm:$0xff]  }
 0x495   : > { %20741 = vmatpush3.bf16.msra.mxu1 %v21591_v57  ;;  %v21606_v57 = vld [vmem:[%s29107_s5 + $0x220] sm:$0xff]  }
 0x496   : > { %20742 = vmatprep.subr.bf16.mxu1 %v21593_v58  ;;  %v21607_v58 = vld [vmem:[%s29107_s5 + $0x1e8] sm:$0xff]  }
 0x4f8   : > { %v23743_v59 = vpop.f32.mrb[28].mxu1 }
 0x4f9   : > { %v23745_v60 = vpop.f32.mrb[29].mxu1 }
 0x4fa   : > { %v2898_v61 = vpop.f32.mrb[30].mxu1 }
 0x4fb   : > { %v2899_v62 = vpop.f32.mrb[31].mxu1  ;;  %v21594_v61 = vld [vmem:[%s29105_s3 + $0x1c8] sm:$0xff]  }
 0x4fc   : > { %20743 = vmatpush3.bf16.msra.mxu1 %v21594_v61  ;;  %v21596_v62 = vld [vmem:[%s29105_s3 + $0x210] sm:$0xff]   ;;  %v21609_v61 = vld [vmem:[%s29107_s5 + $0x228] sm:$0xff]  }
 0x4fd   : > { %20744 = vmatprep.subr.bf16.mxu1 %v21596_v62  ;;  %v21608_v62 = vld [vmem:[%s29107_s5 + $0x1a8] sm:$0xff]  }
 0x547   : > { %v2528_v63 = vpop.f32.mrb[28].mxu0 }
 0x548   : > { %v2534_v0 = vmul.f32 0.13867505, %v2528_v63  ;;  %v21146_v2 = vpop.f32.mrb[29].mxu0  ;;  %v21597_v63 = vld [vmem:[%s29105_s3 + $0x1d0] sm:$0xff]  }
 0x549   : > { %v2531_v3 = vpop.f32.mrb[30].mxu0  ;;  %20745 = vmatpush3.bf16.msra.mxu1 %v21597_v63  ;;  %v21600_v2 = vld [vmem:[%s29105_s3 + $0x1d8] sm:$0xff]   ;;  %v21610_v63 = vld [vmem:[%s29107_s5 + $0x1f0] sm:$0xff]  }
 0x54a   : > { %v21147_v4 = vpop.f32.mrb[31].mxu0  ;;  %v2535_v5 = vsel %vm1516_vm4, %v2534_v0, -inf }
 0x54b   : > { %2536 = vmax.xlane.f32.xlu1 %v2535_v5  ;;  %v21528_v4 = vld [vmem:[%s29109_s7 + $0x88] ss:$16 sps:$4 sm:$0xff]  }
 0x54c   : > { %v20726_v50 = vpop.f32.mrb[32].mxu1 }
 0x54d   : > { %v20727_v51 = vpop.f32.mrb[33].mxu1 }
 0x54e   : > { %v24018_v52 = vadd.f32 %v20727_v51, %v20726_v50  ;;  %v20729_v53 = vpop.f32.mrb[34].mxu1 }
 0x54f   : > { %v20730_v54 = vpop.f32.mrb[35].mxu1 }
 0x550   : > { %v18090_v54 = vld [vmem:[%s29106_s4 + $0x2] ss:$0 sm:$0xff] }
 0x5d8   : > { %v2537_v6 = vpop.xlane.xlu1 %2536 }
 0x5d9   : > { %v2538_v7 = vsub.f32 %v2534_v0, %v2537_v6  ;;  %v21599_v0 = vld [vmem:[%s29105_s3 + $0x218] sm:$0xff]  }
 0x5da   : > { %20746 = vmatprep.subr.bf16.mxu1 %v21599_v0  ;;  %v21612_v0 = vld [vmem:[%s29107_s5 + $0x230] sm:$0xff]  }
 0x5db   : > { %v2539_v8 = vmul.f32 1.442695, %v2538_v7  ;;  %20747 = vmatpush3.bf16.msra.mxu1 %v21600_v2  ;;  %v21533_v7 = vld [vmem:[%s29109_s7 + $0xac] ss:$16 sps:$4 sm:$0xff]   ;;  %v21611_v2 = vld [vmem:[%s29107_s5 + $0x1b0] sm:$0xff]  }
 0x5dc   : > { %20754 = vmatprep.subr.bf16.mxu1 %v21604_v55 }
 0x5dd   : > { %22936 = vpow2.f32 %v2539_v8 }
 0x5de   : > { %3489 = vmatmul.mubr.bf16.vlgmr.msra.gmra.mrb[36].mxu1 %v23194_v40 }
 0x5df   : > { %3785 = vmatprep.mubr.bf16.mxu1 %v23197_v41  ;;  %20755 = vmatpush3.bf16.msra.mxu1 %v21605_v56 }
 0x5e0   : > { %20756 = vmatprep.subr.bf16.mxu1 %v21607_v58 }
 0x5e3   : > { %20757 = vmatpush3.bf16.msra.mxu1 %v21608_v62 }
 0x5e4   : > { %20758 = vmatprep.subr.bf16.mxu1 %v21610_v63 }
 0x5e7   : > { %v22937_v9 = vpop.eup %22936  ;;  %20759 = vmatpush3.bf16.msra.mxu1 %v21611_v2 }
 0x5e8   : > { %v2541_v10 = vsel %vm1516_vm4, %v22937_v9, 0.0 }
 0x5e9   : > { %2542 = vadd.xlane.f32.xlu1 %v2541_v10  ;;  %v21531_v10 = vld [vmem:[%s29109_s7 + $0xa8] ss:$16 sps:$4 sm:$0xff]  }
 0x676   : > { %v2543_v12 = vpop.xlane.xlu1 %2542 }
 0x677   : > { %22938 = vrcp.f32 %v2543_v12  ;;  %v21534_v12 = vld [vmem:[%s29109_s7 + $0xc8] ss:$16 sps:$4 sm:$0xff]  }
 0x681   : > { %v22939_v13 = vpop.eup %22938 }
 0x682   : > { %v2545_v14 = vmul.f32 %v22939_v13, %v22937_v9  ;;  %v21539_v13 = vld [vmem:[%s29109_s7 + $0xec] ss:$16 sps:$4 sm:$0xff]  }
 0x684   : > { %v2546_v16 = vpack.c.bf16 %v2545_v14, %v2545_v14  ;;  %v21537_v14 = vld [vmem:[%s29109_s7 + $0xe8] ss:$16 sps:$4 sm:$0xff]  }
 0x686   : > { %21151 = vmatmul.mubr.msk.bf16.vlgmr.msra.gmra.mrb[32].mxu0 %vm1530_vm5, %v2546_v16  ;;  %v21540_v16 = vld [vmem:[%s29109_s7 + $0x8] ss:$16 sps:$4 sm:$0xff]  }
 0x687   : > { %2696 = vmatpush1.bf16.msra.mxu0 %v21516_v15  ;;  %2727 = vmatprep.mubr.bf16.mxu0 %v22979_v1  ;;  %v21542_v15 = vld [vmem:[%s29109_s7 + $0xc] ss:$16 sps:$4 sm:$0xff]  }
 0x688   : > { %2697 = vmatprep.subr.bf16.mxu0 %v21521_v17  ;;  %v21545_v17 = vld [vmem:[%s29109_s7 + $0x2c] ss:$16 sps:$4 sm:$0xff]  }
 0x68b   : > { %2698 = vmatpush1.bf16.msra.mxu0 %v21519_v18  ;;  %v21543_v18 = vld [vmem:[%s29109_s7 + $0x28] ss:$16 sps:$4 sm:$0xff]  }
 0x68c   : > { %2699 = vmatprep.subr.bf16.mxu0 %v21524_v20  ;;  %v21548_v20 = vld [vmem:[%s29109_s7 + $0x4c] ss:$16 sps:$4 sm:$0xff]  }
 0x68f   : > { %2700 = vmatpush1.bf16.msra.mxu0 %v21522_v21  ;;  %v21546_v21 = vld [vmem:[%s29109_s7 + $0x48] ss:$16 sps:$4 sm:$0xff]  }
 0x690   : > { %2701 = vmatprep.subr.bf16.mxu0 %v21527_v22  ;;  %v21551_v22 = vld [vmem:[%s29109_s7 + $0x6c] ss:$16 sps:$4 sm:$0xff]  }
 0x693   : > { %2702 = vmatpush1.bf16.msra.mxu0 %v21525_v24  ;;  %v21549_v24 = vld [vmem:[%s29109_s7 + $0x68] ss:$16 sps:$4 sm:$0xff]  }
 0x694   : > { %2736 = vmatprep.subr.bf16.mxu0 %v21530_v25  ;;  %v21552_v25 = vld [vmem:[%s29123_s28 + $0x220] sm:$0xff]  }
 0x759   : > { %v2588_v3 = vpop.f32.mrb[32].mxu0 }
 0x75a   : > { %v2594_v5 = vpack.c.bf16 %v2588_v3, %v2588_v3  ;;  %v21152_v6 = vpop.f32.mrb[33].mxu0  ;;  %v21613_v3 = vld [vmem:[%s29107_s5 + $0x1f8] sm:$0xff]  }
 0x75b   : > { %v2591_v8 = vpop.f32.mrb[34].mxu0  ;;  %20760 = vmatprep.subr.bf16.mxu1 %v21613_v3  ;;  %v21616_v6 = vld [vmem:[%s29107_s5 + $0x200] sm:$0xff]  }
 0x75c   : > { %v21153_v9 = vpop.f32.mrb[35].mxu0  ;;  %17936 = vmatmul.mubr.msk.bf16.vlgmr.msra.gmra.mrb[36].mxu0 %vm1468_vm2, %v2594_v5  ;;  %v21617_v8 = vld [vmem:[%s29107_s5 + $0x1c0] sm:$0xff]  }
 0x75d   : > { %2737 = vmatpush1.bf16.msra.mxu0 %v21528_v4  ;;  %2768 = vmatprep.mubr.bf16.mxu0 %v22979_v1  ;;  %v21615_v4 = vld [vmem:[%s29107_s5 + $0x238] sm:$0xff]   ;;  %v21619_v9 = vld [vmem:[%s29107_s5 + $0x208] sm:$0xff]  }
 0x75e   : > { %2738 = vmatprep.subr.bf16.mxu0 %v21533_v7  ;;  %v21618_v7 = vld [vmem:[%s29107_s5 + $0x240] sm:$0xff]  }
 0x761   : > { %2739 = vmatpush1.bf16.msra.mxu0 %v21531_v10  ;;  %v21621_v10 = vld [vmem:[%s29107_s5 + $0x248] sm:$0xff]  }
 0x762   : > { %2740 = vmatprep.subr.bf16.mxu0 %v21536_v11  ;;  %v21620_v11 = vld [vmem:[%s29107_s5 + $0x1c8] sm:$0xff]  }
 0x765   : > { %2741 = vmatpush1.bf16.msra.mxu0 %v21534_v12  ;;  %v21622_v12 = vld [vmem:[%s29107_s5 + $0x210] sm:$0xff]  }
 0x766   : > { %2742 = vmatprep.subr.bf16.mxu0 %v21539_v13  ;;  %v21624_v13 = vld [vmem:[%s29107_s5 + $0x250] sm:$0xff]  }
 0x769   : > { %2743 = vmatpush1.bf16.msra.mxu0 %v21537_v14  ;;  %v21623_v14 = vld [vmem:[%s29107_s5 + $0x1d0] sm:$0xff]  }
 0x76a   : > { %2901 = vmatprep.subr.bf16.mxu0 %v21542_v15  ;;  %v21625_v15 = vld [vmem:[%s29107_s5 + $0x218] sm:$0xff]  }
 0x76c   : > { %17937 = vmatmul.mubr.msk.bf16.vlgmr.msra.gmra.mrb[40].mxu0 %vm1468_vm2, %v2594_v5  ;;  %v21614_v5 = vld [vmem:[%s29107_s5 + $0x1b8] sm:$0xff]  }
 0x76d   : > { %2902 = vmatpush1.bf16.msra.mxu0 %v21540_v16  ;;  %2933 = vmatprep.mubr.bf16.mxu0 %v22979_v1  ;;  %v21627_v16 = vld [vmem:[%s29107_s5 + $0x258] sm:$0xff]  }
 0x76e   : > { %2903 = vmatprep.subr.bf16.mxu0 %v21545_v17  ;;  %20761 = vmatpush3.bf16.msra.mxu1 %v21614_v5  ;;  %v21626_v17 = vld [vmem:[%s29107_s5 + $0x1d8] sm:$0xff]  }
 0x76f   : > { %20762 = vmatprep.subr.bf16.mxu1 %v21616_v6 }
 0x771   : > { %2904 = vmatpush1.bf16.msra.mxu0 %v21543_v18  ;;  %v20748_v18 = vpop.f32.mrb[36].mxu1 }
 0x772   : > { %2905 = vmatprep.subr.bf16.mxu0 %v21548_v20  ;;  %20763 = vmatpush3.bf16.msra.mxu1 %v21617_v8  ;;  %v20749_v20 = vpop.f32.mrb[37].mxu1 }
 0x773   : > { %20764 = vmatprep.subr.bf16.mxu1 %v21619_v9 }
 0x775   : > { %2906 = vmatpush1.bf16.msra.mxu0 %v21546_v21  ;;  %v20750_v21 = vadd.f32 %v20749_v20, %v20748_v18 }
 0x776   : > { %2907 = vmatprep.subr.bf16.mxu0 %v21551_v22  ;;  %20765 = vmatpush3.bf16.msra.mxu1 %v21620_v11  ;;  %v20751_v22 = vpop.f32.mrb[38].mxu1 }
 0x777   : > { %20766 = vmatprep.subr.bf16.mxu1 %v21622_v12  ;;  %v3491_v55 = vadd.f32 %v20750_v21, %v18090_v54  ;;  %v21661_v54 = vld [vmem:[%s29123_s28 + $0x2c0] sm:$0xff]  }
 0x779   : > { %2908 = vmatpush1.bf16.msra.mxu0 %v21549_v24  ;;  %v20752_v24 = vpop.f32.mrb[39].mxu1 }
 0x77a   : > { %3199 = vmatprep.subr.bf16.mxu0 %v22979_v1  ;;  %20767 = vmatpush3.bf16.msra.mxu1 %v21623_v14 }
 0x77b   : > { %20768 = vmatprep.subr.bf16.mxu1 %v21625_v15 }
 0x77c   : > { %17955 = vmatmul.mubr.msk.bf16.vlgmr.msra.gmra.mrb[44].mxu0 %vm1468_vm2, %v23723_v19  ;;  %v21561_v19 = vld [vmem:[%s29123_s28 + $0x238] sm:$0xff]  }
 0x77d   : > { %3200 = vmatpush1.bf16.msra.mxu0 %v21552_v25  ;;  %18036 = vmatprep.mubr.msk.bf16.mxu0 %vm792_vm0, %v23199_v42  ;;  %v21628_v25 = vld [vmem:[%s29107_s5 + $0x260] sm:$0xff]  }
 0x77e   : > { %3201 = vmatprep.subr.bf16.mxu0 %v22979_v1  ;;  %20769 = vmatpush3.bf16.msra.mxu1 %v21626_v17 }
 0x77f   : > { %21154 = vmatprep.subr.bf16.mxu1 %v22981_v33 }
 0x781   : > { %3202 = vmatpush1.bf16.msra.mxu0 %v21555_v26  ;;  %3786 = vmatmul.mubr.bf16.vlgmr.msra.gmra.mrb[40].mxu1 %v23194_v40  ;;  %v21629_v26 = vld [vmem:[%s29107_s5 + $0x268] sm:$0xff]  }
 0x782   : > { %3203 = vmatprep.subr.bf16.mxu0 %v22979_v1  ;;  %21156 = vmatprep.mubr.msk.bf16.mxu1 %vm22982_vm1, %v22981_v33 }
 0x785   : > { %3204 = vmatpush1.bf16.msra.mxu0 %v21558_v27 }
 0x786   : > { %3205 = vmatprep.subr.bf16.mxu0 %v22979_v1 }
 0x789   : > { %3206 = vmatpush1.bf16.msra.mxu0 %v21561_v19 }
 0x78a   : > { %3207 = vmatprep.subr.bf16.mxu0 %v22979_v1 }
 0x78d   : > { %3208 = vmatpush1.bf16.msra.mxu0 %v21564_v28 }
 0x78e   : > { %3209 = vmatprep.subr.bf16.mxu0 %v22979_v1 }
 0x791   : > { %3210 = vmatpush1.bf16.msra.mxu0 %v21567_v29 }
 0x792   : > { %3211 = vmatprep.subr.bf16.mxu0 %v22979_v1 }
 0x795   : > { %3212 = vmatpush1.bf16.msra.mxu0 %v21570_v30 }
 0x796   : > { %3213 = vmatprep.subr.bf16.mxu0 %v22979_v1 }
 0x799   : > { %3214 = vmatpush1.bf16.msra.mxu0 %v21573_v31 }
 0x79a   : > { %3215 = vmatprep.subr.bf16.mxu0 %v22979_v1 }
 0x79d   : > { %3216 = vmatpush1.bf16.msra.mxu0 %v21576_v32 }
 0x79e   : > { %3217 = vmatprep.subr.bf16.mxu0 %v22979_v1 }
 0x7a1   : > { %3218 = vmatpush1.bf16.msra.mxu0 %v21577_v35 }
 0x7a2   : > { %3496 = vmatprep.subr.bf16.mxu0 %v22979_v1 }
 0x7a4   : > { %3232 = vmatmul.mubr.bf16.vlgmr.msra.gmra.mrb[48].mxu0 %v23204_v44 }
 0x7a5   : > { %3497 = vmatpush1.bf16.msra.mxu0 %v21580_v36  ;;  %18117 = vmatprep.mubr.msk.bf16.mxu0 %vm792_vm0, %v23199_v42 }
 0x7a6   : > { %3498 = vmatprep.subr.bf16.mxu0 %v22979_v1 }
 0x7a9   : > { %3499 = vmatpush1.bf16.msra.mxu0 %v21583_v37 }
 0x7aa   : > { %3500 = vmatprep.subr.bf16.mxu0 %v22979_v1 }
 0x7ad   : > { %3501 = vmatpush1.bf16.msra.mxu0 %v21586_v38 }
 0x7ae   : > { %3502 = vmatprep.subr.bf16.mxu0 %v22979_v1 }
 0x7b1   : > { %3503 = vmatpush1.bf16.msra.mxu0 %v21589_v39 }
 0x7b2   : > { %3504 = vmatprep.subr.bf16.mxu0 %v22979_v1 }
 0x7b5   : > { %3505 = vmatpush1.bf16.msra.mxu0 %v21592_v43 }
 0x7b6   : > { %3506 = vmatprep.subr.bf16.mxu0 %v22979_v1 }
 0x7b9   : > { %3507 = vmatpush1.bf16.msra.mxu0 %v21595_v45 }
 0x7ba   : > { %3508 = vmatprep.subr.bf16.mxu0 %v22979_v1 }
 0x7bd   : > { %3509 = vmatpush1.bf16.msra.mxu0 %v21598_v46 }
 0x7be   : > { %3510 = vmatprep.subr.bf16.mxu0 %v22979_v1 }
 0x7c1   : > { %3511 = vmatpush1.bf16.msra.mxu0 %v21601_v47 }
 0x7c2   : > { %3512 = vmatprep.subr.bf16.mxu0 %v22979_v1 }
 0x7c5   : > { %3513 = vmatpush1.bf16.msra.mxu0 %v21602_v48 }
 0x7c6   : > { %3514 = vmatprep.subr.bf16.mxu0 %v22979_v1 }
 0x7c9   : > { %3515 = vmatpush1.bf16.msra.mxu0 %v21603_v49 }
 0x7ca   : > { %3793 = vmatprep.subr.bf16.mxu0 %v22979_v1 }
 0x7cc   : > { %3529 = vmatmul.mubr.bf16.vlgmr.msra.gmra.mrb[52].mxu0 %v23204_v44 }
 0x7cd   : > { %18198 = vmatprep.mubr.msk.bf16.mxu0 %vm792_vm0, %v23199_v42  ;;  %3794 = vmatpush1.bf16.msra.mxu0 %v21606_v57 }
 0x7ce   : > { %3795 = vmatprep.subr.bf16.mxu0 %v22979_v1 }
 0x7d1   : > { %3796 = vmatpush1.bf16.msra.mxu0 %v21609_v61 }
 0x7d2   : > { %3797 = vmatprep.subr.bf16.mxu0 %v22979_v1 }
 0x7d5   : > { %3798 = vmatpush1.bf16.msra.mxu0 %v21612_v0 }
 0x7d6   : > { %3799 = vmatprep.subr.bf16.mxu0 %v22979_v1 }
 0x7d9   : > { %3800 = vmatpush1.bf16.msra.mxu0 %v21615_v4 }
 0x7da   : > { %3801 = vmatprep.subr.bf16.mxu0 %v22979_v1 }
 0x7dd   : > { %3802 = vmatpush1.bf16.msra.mxu0 %v21618_v7  ;;  %v18171_v7 = vld [vmem:[%s29108_s6 + $0x2] ss:$0 sm:$0xff] }
 0x7de   : > { %3803 = vmatprep.subr.bf16.mxu0 %v22979_v1 }
 0x7e1   : > { %3804 = vmatpush1.bf16.msra.mxu0 %v21621_v10 }
 0x7e2   : > { %3805 = vmatprep.subr.bf16.mxu0 %v22979_v1 }
 0x7e5   : > { %3806 = vmatpush1.bf16.msra.mxu0 %v21624_v13 }
 0x7e6   : > { %3807 = vmatprep.subr.bf16.mxu0 %v22979_v1 }
 0x7e9   : > { %3808 = vmatpush1.bf16.msra.mxu0 %v21627_v16 }
 0x7ea   : > { %3809 = vmatprep.subr.bf16.mxu0 %v22979_v1 }
 0x7ed   : > { %3810 = vmatpush1.bf16.msra.mxu0 %v21628_v25 }
 0x7ee   : > { %3811 = vmatprep.subr.bf16.mxu0 %v22979_v1 }
 0x7f1   : > { %3812 = vmatpush1.bf16.msra.mxu0 %v21629_v26 }
 0x7f4   : > { %3826 = vmatmul.mubr.bf16.vlgmr.msra.gmra.mrb[56].mxu0 %v23204_v44 }
 0x7f5   : > { %4377 = vmatprep.mubr.bf16.mxu0 %v23197_v41 }
 0x82f   : > { %v2729_v27 = vpop.f32.mrb[36].mxu0 }
 0x830   : > { %v24114_v19 = vadd.f32 %v23743_v59, %v2729_v27  ;;  %v2731_v28 = vpop.f32.mrb[37].mxu0  ;;  %v18009_v59 = vld [vmem:[%s29104_s2 + $0x2] ss:$0 sm:$0xff] }
 0x831   : > { %v24117_v29 = vadd.f32 %v23745_v60, %v2731_v28  ;;  %v2733_v30 = vpop.f32.mrb[38].mxu0  ;;  %v3194_v60 = vadd.f32 %v24018_v52, %v18009_v59  ;;  %v21641_v59 = vld [vmem:[%s29109_s7 + $0x164] ss:$16 sps:$4 sm:$0xff]  }
 0x832   : > { %v2734_v31 = vpop.f32.mrb[39].mxu0  ;;  %v21632_v30 = vld [vmem:[%s29109_s7 + $0x104] ss:$16 sps:$4 sm:$0xff]  }
 0x83f   : > { %v2770_v32 = vpop.f32.mrb[40].mxu0 }
 0x840   : > { %v2772_v35 = vpop.f32.mrb[41].mxu0 }
 0x841   : > { %v2774_v36 = vpop.f32.mrb[42].mxu0 }
 0x842   : > { %v2775_v37 = vpop.f32.mrb[43].mxu0  ;;  %v21630_v36 = vld [vmem:[%s29109_s7 + $0x100] ss:$16 sps:$4 sm:$0xff]  }
 0x84f   : > { %v2935_v38 = vpop.f32.mrb[44].mxu0 }
 0x850   : > { %v24119_v39 = vadd.f32 %v2935_v38, %v2770_v32  ;;  %v2937_v43 = vpop.f32.mrb[45].mxu0  ;;  %v21635_v38 = vld [vmem:[%s29109_s7 + $0x124] ss:$16 sps:$4 sm:$0xff]  }
 0x851   : > { %v24121_v45 = vadd.f32 %v2937_v43, %v2772_v35  ;;  %v2939_v46 = vpop.f32.mrb[46].mxu0  ;;  %v21633_v43 = vld [vmem:[%s29109_s7 + $0x120] ss:$16 sps:$4 sm:$0xff]  }
 0x852   : > { %v2940_v47 = vpop.f32.mrb[47].mxu0  ;;  %v21638_v46 = vld [vmem:[%s29109_s7 + $0x144] ss:$16 sps:$4 sm:$0xff]  }
 0x853   : > { %v21636_v47 = vld [vmem:[%s29109_s7 + $0x140] ss:$16 sps:$4 sm:$0xff]  }
 0x854   : > { %v20770_v2 = vpop.f32.mrb[40].mxu1 }
 0x855   : > { %v20771_v3 = vpop.f32.mrb[41].mxu1 }
 0x856   : > { %v20772_v4 = vadd.f32 %v20771_v3, %v20770_v2  ;;  %v20773_v5 = vpop.f32.mrb[42].mxu1  ;;  %v21676_v2 = vld [vmem:[%s29123_s28 + $0x2e8] sm:$0xff]  }
 0x857   : > { %v20774_v6 = vpop.f32.mrb[43].mxu1  ;;  %v21677_v3 = vld [vmem:[%s29123_s28 + $0x2a8] sm:$0xff]   ;;  %v21681_v5 = vld [vmem:[%s29105_s3 + $0x270] sm:$0xff]  }
 0x858   : > { %v3788_v8 = vadd.f32 %v20772_v4, %v18171_v7  ;;  %v21680_v4 = vld [vmem:[%s29105_s3 + $0x2b0] sm:$0xff]   ;;  %v21683_v6 = vld [vmem:[%s29105_s3 + $0x2b8] sm:$0xff]  }
 0x859   : > { %v21684_v7 = vld [vmem:[%s29105_s3 + $0x278] sm:$0xff]  }
 0x877   : > { %v3233_v48 = vpop.f32.mrb[48].mxu0 }
 0x878   : > { %v3234_v49 = vadd.f32 %v3233_v48, %v3194_v60  ;;  %v3235_v50 = vpop.f32.mrb[49].mxu0  ;;  %v21639_v60 = vld [vmem:[%s29109_s7 + $0x160] ss:$16 sps:$4 sm:$0xff]   ;;  %v21644_v48 = vld [vmem:[%s29109_s7 + $0x10c] ss:$16 sps:$4 sm:$0xff]  }
 0x879   : > { %v3236_v51 = vpop.f32.mrb[50].mxu0  ;;  %v21656_v50 = vld [vmem:[%s29123_s28 + $0x270] sm:$0xff]  }
 0x87a   : > { %v3237_v53 = vpop.f32.mrb[51].mxu0  ;;  %v3833_v52 = vpack.c.bf16 %v3234_v49, %v3234_v49  ;;  %v21655_v49 = vld [vmem:[%s29123_s28 + $0x2b0] sm:$0xff]   ;;  %v21658_v51 = vld [vmem:[%s29123_s28 + $0x2b8] sm:$0xff]  }
 0x87b   : > { %20780 = vmatprep.subr.bf16.mxu0 %v21655_v49  ;;  %v21659_v53 = vld [vmem:[%s29123_s28 + $0x278] sm:$0xff]   ;;  %v21678_v49 = vld [vmem:[%s29123_s28 + $0x330] sm:$0xff]  }
 0x87c   : > { %20781 = vmatpush3.bf16.msra.mxu0 %v21656_v50  ;;  %v21679_v50 = vld [vmem:[%s29123_s28 + $0x338] sm:$0xff]  }
 0x87d   : > { %20782 = vmatprep.subr.bf16.mxu0 %v21658_v51  ;;  %v21682_v51 = vld [vmem:[%s29105_s3 + $0x2f0] sm:$0xff]  }
 0x880   : > { %20783 = vmatpush3.bf16.msra.mxu0 %v21659_v53  ;;  %v21685_v53 = vld [vmem:[%s29105_s3 + $0x2f8] sm:$0xff]  }
 0x881   : > { %20784 = vmatprep.subr.bf16.mxu0 %v21661_v54  ;;  %v21688_v54 = vld [vmem:[%s29105_s3 + $0x300] sm:$0xff]  }
 0x89f   : > { %v3530_v56 = vpop.f32.mrb[52].mxu0 }
 0x8a0   : > { %v3531_v57 = vadd.f32 %v3530_v56, %v3491_v55  ;;  %v3532_v58 = vpop.f32.mrb[53].mxu0  ;;  %v21662_v55 = vld [vmem:[%s29123_s28 + $0x280] sm:$0xff]   ;;  %v21664_v56 = vld [vmem:[%s29123_s28 + $0x2c8] sm:$0xff]  }
 0x8a1   : > { %v3533_v61 = vpop.f32.mrb[54].mxu0  ;;  %20785 = vmatpush3.bf16.msra.mxu0 %v21662_v55  ;;  %v21667_v58 = vld [vmem:[%s29123_s28 + $0x2d0] sm:$0xff]   ;;  %v21691_v55 = vld [vmem:[%s29105_s3 + $0x308] sm:$0xff]  }
 0x8a2   : > { %v3834_v62 = vpack.c.bf16 %v3531_v57, %v3531_v57  ;;  %v3534_v63 = vpop.f32.mrb[55].mxu0  ;;  %v21665_v57 = vld [vmem:[%s29123_s28 + $0x288] sm:$0xff]   ;;  %20786 = vmatprep.subr.bf16.mxu0 %v21664_v56  ;;  %v21668_v61 = vld [vmem:[%s29123_s28 + $0x290] sm:$0xff]  }
 0x8a3   : > { %v21671_v63 = vld [vmem:[%s29123_s28 + $0x298] sm:$0xff]   ;;  %v21694_v56 = vld [vmem:[%s29105_s3 + $0x310] sm:$0xff]  }
 0x8a4   : > { %v3839_v0 = vsel %vm1468_vm2, %v3834_v62, 0  ;;  %v21670_v62 = vld [vmem:[%s29123_s28 + $0x2d8] sm:$0xff]  }
 0x8a5   : > { %21155 = vmatpush3.bf16.xpose.msra.mxu1 %v3839_v0  ;;  %20787 = vmatpush3.bf16.msra.mxu0 %v21665_v57  ;;  %v21673_v0 = vld [vmem:[%s29123_s28 + $0x2e0] sm:$0xff]   ;;  %v21697_v57 = vld [vmem:[%s29105_s3 + $0x318] sm:$0xff]  }
 0x8a6   : > { %21160 = vmatprep.subr.bf16.mxu1 %v22981_v33  ;;  %20788 = vmatprep.subr.bf16.mxu0 %v21667_v58  ;;  %v21700_v58 = vld [vmem:[%s29105_s3 + $0x320] sm:$0xff]  }
 0x8a9   : > { %20789 = vmatpush3.bf16.msra.mxu0 %v21668_v61  ;;  %v21703_v61 = vld [vmem:[%s29105_s3 + $0x328] sm:$0xff]  }
 0x8aa   : > { %20790 = vmatprep.subr.bf16.mxu0 %v21670_v62  ;;  %v21704_v62 = vld [vmem:[%s29105_s3 + $0x330] sm:$0xff]  }
 0x8ac   : > { %21157 = vmatmul.mubr.msk.bf16.vlgmr.msra.gmra.mrb[44].mxu1 %vm1468_vm2, %v3833_v52  ;;  %v21674_v52 = vld [vmem:[%s29123_s28 + $0x2a0] sm:$0xff]  }
 0x8ad   : > { %21162 = vmatprep.mubr.msk.bf16.mxu1 %vm22982_vm1, %v22981_v33  ;;  %20791 = vmatpush3.bf16.msra.mxu0 %v21671_v63  ;;  %v21705_v63 = vld [vmem:[%s29105_s3 + $0x338] sm:$0xff]  }
 0x8ae   : > { %20792 = vmatprep.subr.bf16.mxu0 %v21673_v0 }
 0x8b1   : > { %20793 = vmatpush3.bf16.msra.mxu0 %v21674_v52 }
 0x8b2   : > { %20794 = vmatprep.subr.bf16.mxu0 %v21676_v2 }
 0x8b5   : > { %20795 = vmatpush3.bf16.msra.mxu0 %v21677_v3 }
 0x8b6   : > { %20802 = vmatprep.subr.bf16.mxu0 %v21680_v4 }
 0x8b8   : > { %4378 = vmatmul.mubr.bf16.vlgmr.msra.gmra.mrb[60].mxu0 %v23194_v40 }
 0x8b9   : > { %4674 = vmatprep.mubr.bf16.mxu0 %v23197_v41  ;;  %20803 = vmatpush3.bf16.msra.mxu0 %v21681_v5  ;;  %v21706_v5 = vld [vmem:[%s29107_s5 + $0x2b0] sm:$0xff]  }
 0x8ba   : > { %20804 = vmatprep.subr.bf16.mxu0 %v21683_v6  ;;  %v21707_v6 = vld [vmem:[%s29107_s5 + $0x270] sm:$0xff]  }
 0x8bd   : > { %20805 = vmatpush3.bf16.msra.mxu0 %v21684_v7  ;;  %v21708_v7 = vld [vmem:[%s29107_s5 + $0x2f0] sm:$0xff]  }
 0x8c7   : > { %v3827_v9 = vpop.f32.mrb[56].mxu0 }
 0x8c8   : > { %v3828_v10 = vadd.f32 %v3827_v9, %v3788_v8  ;;  %v3829_v11 = vpop.f32.mrb[57].mxu0  ;;  %v21686_v8 = vld [vmem:[%s29105_s3 + $0x2c0] sm:$0xff]  }
 0x8c9   : > { %v3830_v12 = vpop.f32.mrb[58].mxu0  ;;  %v21687_v9 = vld [vmem:[%s29105_s3 + $0x280] sm:$0xff]   ;;  %20806 = vmatprep.subr.bf16.mxu0 %v21686_v8  ;;  %v21690_v11 = vld [vmem:[%s29105_s3 + $0x288] sm:$0xff]   ;;  %v21709_v8 = vld [vmem:[%s29107_s5 + $0x2b8] sm:$0xff]  }
 0x8ca   : > { %v3894_v13 = vpack.c.bf16 %v3828_v10, %v3828_v10  ;;  %v3831_v14 = vpop.f32.mrb[59].mxu0  ;;  %20807 = vmatpush3.bf16.msra.mxu0 %v21687_v9  ;;  %v21689_v10 = vld [vmem:[%s29105_s3 + $0x2c8] sm:$0xff]   ;;  %v21692_v12 = vld [vmem:[%s29105_s3 + $0x2d0] sm:$0xff]   ;;  %v21711_v9 = vld [vmem:[%s29107_s5 + $0x2f8] sm:$0xff]  }
 0x8cb   : > { %20808 = vmatprep.subr.bf16.mxu0 %v21689_v10  ;;  %v21695_v14 = vld [vmem:[%s29105_s3 + $0x2d8] sm:$0xff]  }
 0x8cc   : > { %v3899_v15 = vsel %vm1534_vm3, %v3894_v13, 0  ;;  %v21693_v13 = vld [vmem:[%s29105_s3 + $0x290] sm:$0xff]   ;;  %v21710_v10 = vld [vmem:[%s29107_s5 + $0x278] sm:$0xff]  }
 0x8cd   : > { %21161 = vmatpush3.bf16.msra.mxu1 %v3899_v15  ;;  %v21696_v15 = vld [vmem:[%s29105_s3 + $0x298] sm:$0xff]  }
 0x8ce   : > { %4042 = vmatprep.subr.bf16.mxu1 %v21632_v30  ;;  %20809 = vmatpush3.bf16.msra.mxu0 %v21690_v11  ;;  %v21645_v30 = vld [vmem:[%s29109_s7 + $0x128] ss:$16 sps:$4 sm:$0xff]   ;;  %v21712_v11 = vld [vmem:[%s29107_s5 + $0x2c0] sm:$0xff]  }
 0x8cf   : > { %20810 = vmatprep.subr.bf16.mxu0 %v21692_v12  ;;  %v21714_v12 = vld [vmem:[%s29107_s5 + $0x300] sm:$0xff]  }
 0x8d2   : > { %20811 = vmatpush3.bf16.msra.mxu0 %v21693_v13  ;;  %v21713_v13 = vld [vmem:[%s29107_s5 + $0x280] sm:$0xff]  }
 0x8d3   : > { %20812 = vmatprep.subr.bf16.mxu0 %v21695_v14  ;;  %v21715_v14 = vld [vmem:[%s29107_s5 + $0x2c8] sm:$0xff]  }
 0x8d6   : > { %20813 = vmatpush3.bf16.msra.mxu0 %v21696_v15  ;;  %v21717_v15 = vld [vmem:[%s29107_s5 + $0x308] sm:$0xff]  }
 0x97f   : > { %v3875_v16 = vpop.f32.mrb[44].mxu1 }
 0x980   : > { %v3881_v17 = vmul.f32 0.13867505, %v3875_v16  ;;  %v21158_v18 = vpop.f32.mrb[45].mxu1  ;;  %v21698_v16 = vld [vmem:[%s29105_s3 + $0x2e0] sm:$0xff]  }
 0x981   : > { %v3878_v20 = vpop.f32.mrb[46].mxu1  ;;  %20814 = vmatprep.subr.bf16.mxu0 %v21698_v16  ;;  %v21701_v18 = vld [vmem:[%s29105_s3 + $0x2e8] sm:$0xff]  }
 0x982   : > { %v21159_v21 = vpop.f32.mrb[47].mxu1  ;;  %v3882_v22 = vsel %vm1516_vm4, %v3881_v17, -inf  ;;  %v21702_v20 = vld [vmem:[%s29105_s3 + $0x2a8] sm:$0xff]  }
 0x983   : > { %3883 = vmax.xlane.f32.xlu0 %v3882_v22  ;;  %v21642_v22 = vld [vmem:[%s29109_s7 + $0x108] ss:$16 sps:$4 sm:$0xff]  }
 0x984   : > { %v21716_v16 = vld [vmem:[%s29107_s5 + $0x288] sm:$0xff]  }
 0x98b   : > { %v20796_v0 = vpop.f32.mrb[60].mxu0 }
 0x98c   : > { %v20797_v52 = vpop.f32.mrb[61].mxu0 }
 0x98d   : > { %v24383_v2 = vadd.f32 %v20797_v52, %v20796_v0  ;;  %v20799_v3 = vpop.f32.mrb[62].mxu0 }
 0x98e   : > { %v20800_v4 = vpop.f32.mrb[63].mxu0 }
 0xa10   : > { %v3884_v24 = vpop.xlane.xlu0 %3883 }
 0xa11   : > { %v3885_v25 = vsub.f32 %v3881_v17, %v3884_v24  ;;  %v21699_v17 = vld [vmem:[%s29105_s3 + $0x2a0] sm:$0xff]  }
 0xa12   : > { %20815 = vmatpush3.bf16.msra.mxu0 %v21699_v17  ;;  %v21718_v17 = vld [vmem:[%s29107_s5 + $0x2d0] sm:$0xff]  }
 0xa13   : > { %v3886_v26 = vmul.f32 1.442695, %v3885_v25  ;;  %20816 = vmatprep.subr.bf16.mxu0 %v21701_v18  ;;  %v21720_v18 = vld [vmem:[%s29107_s5 + $0x310] sm:$0xff]  }
 0xa15   : > { %22940 = vpow2.f32 %v3886_v26  ;;  %v21647_v26 = vld [vmem:[%s29109_s7 + $0x12c] ss:$16 sps:$4 sm:$0xff]  }
 0xa16   : > { %20817 = vmatpush3.bf16.msra.mxu0 %v21702_v20  ;;  %v21719_v20 = vld [vmem:[%s29107_s5 + $0x290] sm:$0xff]  }
 0xa17   : > { %20824 = vmatprep.subr.bf16.mxu0 %v21706_v5 }
 0xa19   : > { %4675 = vmatmul.mubr.bf16.vlgmr.msra.gmra.mrb[64].mxu0 %v23194_v40 }
 0xa1a   : > { %4971 = vmatprep.mubr.bf16.mxu0 %v23197_v41  ;;  %20825 = vmatpush3.bf16.msra.mxu0 %v21707_v6 }
 0xa1b   : > { %20826 = vmatprep.subr.bf16.mxu0 %v21709_v8 }
 0xa1e   : > { %20827 = vmatpush3.bf16.msra.mxu0 %v21710_v10 }
 0xa1f   : > { %v22941_v27 = vpop.eup %22940  ;;  %20828 = vmatprep.subr.bf16.mxu0 %v21712_v11 }
 0xa20   : > { %v3888_v28 = vsel %vm1516_vm4, %v22941_v27, 0.0 }
 0xa21   : > { %3889 = vadd.xlane.f32.xlu1 %v3888_v28 }
 0xa22   : > { %20829 = vmatpush3.bf16.msra.mxu0 %v21713_v13 }
 0xa23   : > { %20830 = vmatprep.subr.bf16.mxu0 %v21715_v14  ;;  %v18450_v14 = vld [vmem:[%s29108_s6 + $0x3] ss:$0 sm:$0xff] }
 0xa26   : > { %20831 = vmatpush3.bf16.msra.mxu0 %v21716_v16 }
 0xa27   : > { %20832 = vmatprep.subr.bf16.mxu0 %v21718_v17 }
 0xa2a   : > { %20833 = vmatpush3.bf16.msra.mxu0 %v21719_v20 }
 0xaae   : > { %v3890_v31 = vpop.xlane.xlu1 %3889 }
 0xaaf   : > { %22942 = vrcp.f32 %v3890_v31  ;;  %v21650_v31 = vld [vmem:[%s29109_s7 + $0x14c] ss:$16 sps:$4 sm:$0xff]  }
 0xab9   : > { %v22943_v32 = vpop.eup %22942 }
 0xaba   : > { %v3892_v35 = vmul.f32 %v22943_v32, %v22941_v27  ;;  %v21648_v32 = vld [vmem:[%s29109_s7 + $0x148] ss:$16 sps:$4 sm:$0xff]  }
 0xabc   : > { %v3893_v37 = vpack.c.bf16 %v3892_v35, %v3892_v35  ;;  %v21653_v35 = vld [vmem:[%s29109_s7 + $0x16c] ss:$16 sps:$4 sm:$0xff]  }
 0xabe   : > { %21163 = vmatmul.mubr.msk.bf16.vlgmr.msra.gmra.mrb[48].mxu1 %vm1530_vm5, %v3893_v37  ;;  %v21654_v37 = vld [vmem:[%s29123_s28 + $0x2f0] sm:$0xff]  }
 0xabf   : > { %4043 = vmatpush1.bf16.msra.mxu1 %v21630_v36  ;;  %4074 = vmatprep.mubr.bf16.mxu1 %v22979_v1  ;;  %v21651_v36 = vld [vmem:[%s29109_s7 + $0x168] ss:$16 sps:$4 sm:$0xff]  }
 0xac0   : > { %4044 = vmatprep.subr.bf16.mxu1 %v21635_v38  ;;  %v21657_v38 = vld [vmem:[%s29123_s28 + $0x2f8] sm:$0xff]  }
 0xac3   : > { %4045 = vmatpush1.bf16.msra.mxu1 %v21633_v43  ;;  %v21660_v43 = vld [vmem:[%s29123_s28 + $0x300] sm:$0xff]  }
 0xac4   : > { %4046 = vmatprep.subr.bf16.mxu1 %v21638_v46  ;;  %v21663_v46 = vld [vmem:[%s29123_s28 + $0x308] sm:$0xff]  }
 0xac7   : > { %4047 = vmatpush1.bf16.msra.mxu1 %v21636_v47  ;;  %v21666_v47 = vld [vmem:[%s29123_s28 + $0x310] sm:$0xff]  }
 0xac8   : > { %4048 = vmatprep.subr.bf16.mxu1 %v21641_v59  ;;  %v21669_v59 = vld [vmem:[%s29123_s28 + $0x318] sm:$0xff]  }
 0xacb   : > { %4049 = vmatpush1.bf16.msra.mxu1 %v21639_v60  ;;  %v21672_v60 = vld [vmem:[%s29123_s28 + $0x320] sm:$0xff]  }
 0xacc   : > { %4083 = vmatprep.subr.bf16.mxu1 %v21644_v48  ;;  %v21675_v48 = vld [vmem:[%s29123_s28 + $0x328] sm:$0xff]  }
 0xb91   : > { %v3935_v21 = vpop.f32.mrb[48].mxu1 }
 0xb92   : > { %v3941_v24 = vpack.c.bf16 %v3935_v21, %v3935_v21  ;;  %v21164_v25 = vpop.f32.mrb[49].mxu1  ;;  %v21721_v21 = vld [vmem:[%s29107_s5 + $0x2d8] sm:$0xff]  }
 0xb93   : > { %v3938_v27 = vpop.f32.mrb[50].mxu1  ;;  %20834 = vmatprep.subr.bf16.mxu0 %v21721_v21  ;;  %v21724_v25 = vld [vmem:[%s29107_s5 + $0x2e0] sm:$0xff]  }
 0xb94   : > { %v21165_v28 = vpop.f32.mrb[51].mxu1  ;;  %18233 = vmatmul.mubr.msk.bf16.vlgmr.msra.gmra.mrb[52].mxu1 %vm1468_vm2, %v3941_v24  ;;  %v21725_v27 = vld [vmem:[%s29107_s5 + $0x2a0] sm:$0xff]  }
 0xb95   : > { %4084 = vmatpush1.bf16.msra.mxu1 %v21642_v22  ;;  %4115 = vmatprep.mubr.bf16.mxu1 %v22979_v1  ;;  %v21723_v22 = vld [vmem:[%s29107_s5 + $0x318] sm:$0xff]   ;;  %v21727_v28 = vld [vmem:[%s29107_s5 + $0x2e8] sm:$0xff]  }
 0xb96   : > { %4085 = vmatprep.subr.bf16.mxu1 %v21647_v26  ;;  %v21726_v26 = vld [vmem:[%s29107_s5 + $0x320] sm:$0xff]  }
 0xb99   : > { %4086 = vmatpush1.bf16.msra.mxu1 %v21645_v30  ;;  %v21729_v30 = vld [vmem:[%s29107_s5 + $0x328] sm:$0xff]  }
 0xb9a   : > { %4087 = vmatprep.subr.bf16.mxu1 %v21650_v31  ;;  %v21728_v31 = vld [vmem:[%s29107_s5 + $0x2a8] sm:$0xff]  }
 0xb9d   : > { %4088 = vmatpush1.bf16.msra.mxu1 %v21648_v32  ;;  %v20818_v32 = vpop.f32.mrb[64].mxu0 }
 0xb9e   : > { %4089 = vmatprep.subr.bf16.mxu1 %v21653_v35  ;;  %v20819_v35 = vpop.f32.mrb[65].mxu0 }
 0xba1   : > { %4090 = vmatpush1.bf16.msra.mxu1 %v21651_v36  ;;  %v20820_v36 = vadd.f32 %v20819_v35, %v20818_v32 }
 0xba2   : > { %4385 = vmatprep.subr.bf16.mxu1 %v22979_v1 }
 0xba4   : > { %18234 = vmatmul.mubr.msk.bf16.vlgmr.msra.gmra.mrb[56].mxu1 %vm1468_vm2, %v3941_v24  ;;  %v21722_v24 = vld [vmem:[%s29107_s5 + $0x298] sm:$0xff]  }
 0xba5   : > { %4386 = vmatpush1.bf16.msra.mxu1 %v21654_v37  ;;  %18315 = vmatprep.mubr.msk.bf16.mxu1 %vm792_vm0, %v23199_v42  ;;  %v20821_v37 = vpop.f32.mrb[66].mxu0 }
 0xba6   : > { %4387 = vmatprep.subr.bf16.mxu1 %v22979_v1  ;;  %20835 = vmatpush3.bf16.msra.mxu0 %v21722_v24 }
 0xba7   : > { %20836 = vmatprep.subr.bf16.mxu0 %v21724_v25 }
 0xba9   : > { %4388 = vmatpush1.bf16.msra.mxu1 %v21657_v38  ;;  %v20822_v38 = vpop.f32.mrb[67].mxu0 }
 0xbaa   : > { %4389 = vmatprep.subr.bf16.mxu1 %v22979_v1  ;;  %20837 = vmatpush3.bf16.msra.mxu0 %v21725_v27 }
 0xbab   : > { %20838 = vmatprep.subr.bf16.mxu0 %v21727_v28 }
 0xbad   : > { %4390 = vmatpush1.bf16.msra.mxu1 %v21660_v43  ;;  %v21730_v43 = vld [vmem:[%s29107_s5 + $0x330] sm:$0xff]  }
 0xbae   : > { %4391 = vmatprep.subr.bf16.mxu1 %v22979_v1  ;;  %20839 = vmatpush3.bf16.msra.mxu0 %v21728_v31 }
 0xbaf   : > { %21166 = vmatprep.subr.bf16.mxu0 %v22981_v33 }
 0xbb1   : > { %4392 = vmatpush1.bf16.msra.mxu1 %v21663_v46  ;;  %4972 = vmatmul.mubr.bf16.vlgmr.msra.gmra.mrb[68].mxu0 %v23194_v40  ;;  %v21731_v46 = vld [vmem:[%s29107_s5 + $0x338] sm:$0xff]  }
 0xbb2   : > { %4393 = vmatprep.subr.bf16.mxu1 %v22979_v1  ;;  %21168 = vmatprep.mubr.msk.bf16.mxu0 %vm22982_vm1, %v22981_v33 }
 0xbb5   : > { %4394 = vmatpush1.bf16.msra.mxu1 %v21666_v47 }
 0xbb6   : > { %4395 = vmatprep.subr.bf16.mxu1 %v22979_v1 }
 0xbb9   : > { %4396 = vmatpush1.bf16.msra.mxu1 %v21669_v59 }
 0xbba   : > { %4397 = vmatprep.subr.bf16.mxu1 %v22979_v1 }
 0xbbd   : > { %4398 = vmatpush1.bf16.msra.mxu1 %v21672_v60 }
 0xbbe   : > { %4399 = vmatprep.subr.bf16.mxu1 %v22979_v1 }
 0xbc1   : > { %4400 = vmatpush1.bf16.msra.mxu1 %v21675_v48 }
 0xbc2   : > { %4401 = vmatprep.subr.bf16.mxu1 %v22979_v1 }
 0xbc5   : > { %4402 = vmatpush1.bf16.msra.mxu1 %v21678_v49 }
 0xbc6   : > { %4403 = vmatprep.subr.bf16.mxu1 %v22979_v1 }
 0xbc9   : > { %4404 = vmatpush1.bf16.msra.mxu1 %v21679_v50 }
 0xbca   : > { %4682 = vmatprep.subr.bf16.mxu1 %v22979_v1 }
 0xbcc   : > { %4418 = vmatmul.mubr.bf16.vlgmr.msra.gmra.mrb[60].mxu1 %v23204_v44 }
 0xbcd   : > { %4683 = vmatpush1.bf16.msra.mxu1 %v21682_v51  ;;  %18396 = vmatprep.mubr.msk.bf16.mxu1 %vm792_vm0, %v23199_v42 }
 0xbce   : > { %4684 = vmatprep.subr.bf16.mxu1 %v22979_v1 }
 0xbd1   : > { %4685 = vmatpush1.bf16.msra.mxu1 %v21685_v53 }
 0xbd2   : > { %4686 = vmatprep.subr.bf16.mxu1 %v22979_v1 }
 0xbd5   : > { %4687 = vmatpush1.bf16.msra.mxu1 %v21688_v54 }
 0xbd6   : > { %4688 = vmatprep.subr.bf16.mxu1 %v22979_v1 }
 0xbd9   : > { %4689 = vmatpush1.bf16.msra.mxu1 %v21691_v55 }
 0xbda   : > { %4690 = vmatprep.subr.bf16.mxu1 %v22979_v1 }
 0xbdd   : > { %4691 = vmatpush1.bf16.msra.mxu1 %v21694_v56 }
 0xbde   : > { %4692 = vmatprep.subr.bf16.mxu1 %v22979_v1 }
 0xbe1   : > { %4693 = vmatpush1.bf16.msra.mxu1 %v21697_v57 }
 0xbe2   : > { %4694 = vmatprep.subr.bf16.mxu1 %v22979_v1 }
 0xbe5   : > { %4695 = vmatpush1.bf16.msra.mxu1 %v21700_v58 }
 0xbe6   : > { %4696 = vmatprep.subr.bf16.mxu1 %v22979_v1 }
 0xbe9   : > { %4697 = vmatpush1.bf16.msra.mxu1 %v21703_v61 }
 0xbea   : > { %4698 = vmatprep.subr.bf16.mxu1 %v22979_v1 }
 0xbed   : > { %4699 = vmatpush1.bf16.msra.mxu1 %v21704_v62 }
 0xbee   : > { %4700 = vmatprep.subr.bf16.mxu1 %v22979_v1 }
 0xbf1   : > { %4701 = vmatpush1.bf16.msra.mxu1 %v21705_v63 }
 0xbf2   : > { %4979 = vmatprep.subr.bf16.mxu1 %v22979_v1 }
 0xbf4   : > { %4715 = vmatmul.mubr.bf16.vlgmr.msra.gmra.mrb[64].mxu1 %v23204_v44 }
 0xbf5   : > { %18477 = vmatprep.mubr.msk.bf16.mxu1 %vm792_vm0, %v23199_v42  ;;  %4980 = vmatpush1.bf16.msra.mxu1 %v21708_v7 }
 0xbf6   : > { %4981 = vmatprep.subr.bf16.mxu1 %v22979_v1 }
 0xbf9   : > { %4982 = vmatpush1.bf16.msra.mxu1 %v21711_v9 }
 0xbfa   : > { %4983 = vmatprep.subr.bf16.mxu1 %v22979_v1 }
 0xbfd   : > { %4984 = vmatpush1.bf16.msra.mxu1 %v21714_v12 }
 0xbfe   : > { %4985 = vmatprep.subr.bf16.mxu1 %v22979_v1 }
 0xc01   : > { %4986 = vmatpush1.bf16.msra.mxu1 %v21717_v15 }
 0xc02   : > { %4987 = vmatprep.subr.bf16.mxu1 %v22979_v1 }
 0xc05   : > { %4988 = vmatpush1.bf16.msra.mxu1 %v21720_v18 }
 0xc06   : > { %4989 = vmatprep.subr.bf16.mxu1 %v22979_v1 }
 0xc09   : > { %4990 = vmatpush1.bf16.msra.mxu1 %v21723_v22 }
 0xc0a   : > { %4991 = vmatprep.subr.bf16.mxu1 %v22979_v1 }
 0xc0d   : > { %4992 = vmatpush1.bf16.msra.mxu1 %v21726_v26 }
 0xc0e   : > { %4993 = vmatprep.subr.bf16.mxu1 %v22979_v1 }
 0xc11   : > { %4994 = vmatpush1.bf16.msra.mxu1 %v21729_v30 }
 0xc12   : > { %4995 = vmatprep.subr.bf16.mxu1 %v22979_v1 }
 0xc15   : > { %4996 = vmatpush1.bf16.msra.mxu1 %v21730_v43  ;;  %v21734_v43 = vld [vmem:[%s29109_s7 + $0x184] ss:$16 sps:$4 sm:$0xff]  }
 0xc16   : > { %4997 = vmatprep.subr.bf16.mxu1 %v22979_v1 }
 0xc19   : > { %4998 = vmatpush1.bf16.msra.mxu1 %v21731_v46 }
 0xc1c   : > { %5012 = vmatmul.mubr.bf16.vlgmr.msra.gmra.mrb[68].mxu1 %v23204_v44 }
 0xc1d   : > { %5563 = vmatprep.mubr.bf16.mxu1 %v23197_v41 }
 0xc67   : > { %v4076_v47 = vpop.f32.mrb[52].mxu1 }
 0xc68   : > { %v24479_v59 = vadd.f32 %v4076_v47, %v24114_v19  ;;  %v4078_v60 = vpop.f32.mrb[53].mxu1  ;;  %v18288_v19 = vld [vmem:[%s29104_s2 + $0x3] ss:$0 sm:$0xff] }
 0xc69   : > { %v24482_v48 = vadd.f32 %v4078_v60, %v24117_v29  ;;  %v4080_v49 = vpop.f32.mrb[54].mxu1  ;;  %v4380_v58 = vadd.f32 %v24383_v2, %v18288_v19  ;;  %v21743_v19 = vld [vmem:[%s29109_s7 + $0x1e4] ss:$16 sps:$4 sm:$0xff]  }
 0xc6a   : > { %v4081_v50 = vpop.f32.mrb[55].mxu1  ;;  %v21732_v49 = vld [vmem:[%s29109_s7 + $0x180] ss:$16 sps:$4 sm:$0xff]  }
 0xc77   : > { %v4117_v51 = vpop.f32.mrb[56].mxu1 }
 0xc78   : > { %v24485_v53 = vadd.f32 %v4117_v51, %v24119_v39  ;;  %v4119_v54 = vpop.f32.mrb[57].mxu1  ;;  %v18369_v39 = vld [vmem:[%s29106_s4 + $0x3] ss:$0 sm:$0xff]  ;;  %v21737_v51 = vld [vmem:[%s29109_s7 + $0x1a4] ss:$16 sps:$4 sm:$0xff]  }
 0xc79   : > { %v24488_v55 = vadd.f32 %v4119_v54, %v24121_v45  ;;  %v4121_v56 = vpop.f32.mrb[58].mxu1  ;;  %v4677_v52 = vadd.f32 %v20820_v36, %v18369_v39  ;;  %v21735_v54 = vld [vmem:[%s29109_s7 + $0x1a0] ss:$16 sps:$4 sm:$0xff]  }
 0xc7a   : > { %v4122_v57 = vpop.f32.mrb[59].mxu1  ;;  %v21740_v56 = vld [vmem:[%s29109_s7 + $0x1c4] ss:$16 sps:$4 sm:$0xff]  }
 0xc7b   : > { %v21738_v57 = vld [vmem:[%s29109_s7 + $0x1c0] ss:$16 sps:$4 sm:$0xff]  }
 0xc7c   : > { %v21763_v39 = vld [vmem:[%s29123_s28 + $0x390] sm:$0xff]  }
 0xc84   : > { %v20840_v9 = vpop.f32.mrb[68].mxu0 }
 0xc85   : > { %v20841_v10 = vpop.f32.mrb[69].mxu0 }
 0xc86   : > { %v20842_v11 = vadd.f32 %v20841_v10, %v20840_v9  ;;  %v20843_v12 = vpop.f32.mrb[70].mxu0  ;;  %v21778_v9 = vld [vmem:[%s29123_s28 + $0x3b8] sm:$0xff]  }
 0xc87   : > { %v20844_v13 = vpop.f32.mrb[71].mxu0  ;;  %v21779_v10 = vld [vmem:[%s29123_s28 + $0x378] sm:$0xff]   ;;  %v21783_v12 = vld [vmem:[%s29105_s3 + $0x340] sm:$0xff]  }
 0xc88   : > { %v4974_v15 = vadd.f32 %v20842_v11, %v18450_v14  ;;  %v21782_v11 = vld [vmem:[%s29105_s3 + $0x380] sm:$0xff]   ;;  %v21785_v13 = vld [vmem:[%s29105_s3 + $0x388] sm:$0xff]  }
 0xc89   : > { %v21786_v14 = vld [vmem:[%s29105_s3 + $0x348] sm:$0xff]  }
 0xc9f   : > { %v4419_v29 = vpop.f32.mrb[60].mxu1 }
 0xca0   : > { %v4420_v61 = vadd.f32 %v4419_v29, %v4380_v58  ;;  %v4421_v62 = vpop.f32.mrb[61].mxu1  ;;  %v21741_v58 = vld [vmem:[%s29109_s7 + $0x1e0] ss:$16 sps:$4 sm:$0xff]   ;;  %v21746_v29 = vld [vmem:[%s29109_s7 + $0x18c] ss:$16 sps:$4 sm:$0xff]  }
 0xca1   : > { %v4422_v63 = vpop.f32.mrb[62].mxu1  ;;  %v21758_v62 = vld [vmem:[%s29123_s28 + $0x340] sm:$0xff]  }
 0xca2   : > { %v4423_v0 = vpop.f32.mrb[63].mxu1  ;;  %v5019_v2 = vpack.c.bf16 %v4420_v61, %v4420_v61  ;;  %v21757_v61 = vld [vmem:[%s29123_s28 + $0x380] sm:$0xff]   ;;  %v21760_v63 = vld [vmem:[%s29123_s28 + $0x388] sm:$0xff]  }
 0xca3   : > { %20850 = vmatprep.subr.bf16.mxu1 %v21757_v61  ;;  %v21761_v0 = vld [vmem:[%s29123_s28 + $0x348] sm:$0xff]   ;;  %v21780_v61 = vld [vmem:[%s29123_s28 + $0x400] sm:$0xff]  }
 0xca4   : > { %20851 = vmatpush3.bf16.msra.mxu1 %v21758_v62  ;;  %v21781_v62 = vld [vmem:[%s29123_s28 + $0x408] sm:$0xff]  }
 0xca5   : > { %20852 = vmatprep.subr.bf16.mxu1 %v21760_v63  ;;  %v21784_v63 = vld [vmem:[%s29105_s3 + $0x3c0] sm:$0xff]  }
 0xca8   : > { %20853 = vmatpush3.bf16.msra.mxu1 %v21761_v0  ;;  %v21787_v0 = vld [vmem:[%s29105_s3 + $0x3c8] sm:$0xff]  }
 0xca9   : > { %20854 = vmatprep.subr.bf16.mxu1 %v21763_v39  ;;  %v21790_v39 = vld [vmem:[%s29105_s3 + $0x3d0] sm:$0xff]  }
 0xcc7   : > { %v4716_v45 = vpop.f32.mrb[64].mxu1 }
 0xcc8   : > { %v4717_v3 = vadd.f32 %v4716_v45, %v4677_v52  ;;  %v4718_v4 = vpop.f32.mrb[65].mxu1  ;;  %v21764_v52 = vld [vmem:[%s29123_s28 + $0x350] sm:$0xff]   ;;  %v21766_v45 = vld [vmem:[%s29123_s28 + $0x398] sm:$0xff]  }
 0xcc9   : > { %v4719_v5 = vpop.f32.mrb[66].mxu1  ;;  %20855 = vmatpush3.bf16.msra.mxu1 %v21764_v52  ;;  %v21769_v4 = vld [vmem:[%s29123_s28 + $0x3a0] sm:$0xff]   ;;  %v21793_v52 = vld [vmem:[%s29105_s3 + $0x3d8] sm:$0xff]  }
 0xcca   : > { %v5020_v6 = vpack.c.bf16 %v4717_v3, %v4717_v3  ;;  %v4720_v7 = vpop.f32.mrb[67].mxu1  ;;  %v21767_v3 = vld [vmem:[%s29123_s28 + $0x358] sm:$0xff]   ;;  %20856 = vmatprep.subr.bf16.mxu1 %v21766_v45  ;;  %v21770_v5 = vld [vmem:[%s29123_s28 + $0x360] sm:$0xff]  }
 0xccb   : > { %v21773_v7 = vld [vmem:[%s29123_s28 + $0x368] sm:$0xff]   ;;  %v21796_v45 = vld [vmem:[%s29105_s3 + $0x3e0] sm:$0xff]  }
 0xccc   : > { %v5025_v8 = vsel %vm1468_vm2, %v5020_v6, 0  ;;  %v21772_v6 = vld [vmem:[%s29123_s28 + $0x3a8] sm:$0xff]  }
 0xccd   : > { %21167 = vmatpush3.bf16.xpose.msra.mxu0 %v5025_v8  ;;  %20857 = vmatpush3.bf16.msra.mxu1 %v21767_v3  ;;  %v21775_v8 = vld [vmem:[%s29123_s28 + $0x3b0] sm:$0xff]   ;;  %v21799_v3 = vld [vmem:[%s29105_s3 + $0x3e8] sm:$0xff]  }
 0xcce   : > { %21172 = vmatprep.subr.bf16.mxu0 %v22981_v33  ;;  %20858 = vmatprep.subr.bf16.mxu1 %v21769_v4  ;;  %v21802_v4 = vld [vmem:[%s29105_s3 + $0x3f0] sm:$0xff]  }
 0xcd1   : > { %20859 = vmatpush3.bf16.msra.mxu1 %v21770_v5  ;;  %v21805_v5 = vld [vmem:[%s29105_s3 + $0x3f8] sm:$0xff]  }
 0xcd2   : > { %20860 = vmatprep.subr.bf16.mxu1 %v21772_v6  ;;  %v21806_v6 = vld [vmem:[%s29105_s3 + $0x400] sm:$0xff]  }
 0xcd4   : > { %21169 = vmatmul.mubr.msk.bf16.vlgmr.msra.gmra.mrb[72].mxu0 %vm1468_vm2, %v5019_v2  ;;  %v21776_v2 = vld [vmem:[%s29123_s28 + $0x370] sm:$0xff]  }
 0xcd5   : > { %21174 = vmatprep.mubr.msk.bf16.mxu0 %vm22982_vm1, %v22981_v33  ;;  %20861 = vmatpush3.bf16.msra.mxu1 %v21773_v7  ;;  %v21807_v7 = vld [vmem:[%s29105_s3 + $0x408] sm:$0xff]  }
 0xcd6   : > { %20862 = vmatprep.subr.bf16.mxu1 %v21775_v8 }
 0xcd9   : > { %20863 = vmatpush3.bf16.msra.mxu1 %v21776_v2 }
 0xcda   : > { %20864 = vmatprep.subr.bf16.mxu1 %v21778_v9 }
 0xcdd   : > { %20865 = vmatpush3.bf16.msra.mxu1 %v21779_v10 }
 0xcde   : > { %20872 = vmatprep.subr.bf16.mxu1 %v21782_v11 }
 0xce0   : > { %5564 = vmatmul.mubr.bf16.vlgmr.msra.gmra.mrb[72].mxu1 %v23194_v40 }
 0xce1   : > { %5860 = vmatprep.mubr.bf16.mxu1 %v23197_v41  ;;  %20873 = vmatpush3.bf16.msra.mxu1 %v21783_v12  ;;  %v21808_v12 = vld [vmem:[%s29107_s5 + $0x380] sm:$0xff]  }
 0xce2   : > { %20874 = vmatprep.subr.bf16.mxu1 %v21785_v13  ;;  %v21809_v13 = vld [vmem:[%s29107_s5 + $0x340] sm:$0xff]  }
 0xce5   : > { %20875 = vmatpush3.bf16.msra.mxu1 %v21786_v14  ;;  %v21810_v14 = vld [vmem:[%s29107_s5 + $0x3c0] sm:$0xff]  }
 0xcef   : > { %v5013_v16 = vpop.f32.mrb[68].mxu1 }
 0xcf0   : > { %v5014_v17 = vadd.f32 %v5013_v16, %v4974_v15  ;;  %v5015_v18 = vpop.f32.mrb[69].mxu1  ;;  %v21788_v15 = vld [vmem:[%s29105_s3 + $0x390] sm:$0xff]  }
 0xcf1   : > { %v5016_v20 = vpop.f32.mrb[70].mxu1  ;;  %v21789_v16 = vld [vmem:[%s29105_s3 + $0x350] sm:$0xff]   ;;  %20876 = vmatprep.subr.bf16.mxu1 %v21788_v15  ;;  %v21792_v18 = vld [vmem:[%s29105_s3 + $0x358] sm:$0xff]   ;;  %v21811_v15 = vld [vmem:[%s29107_s5 + $0x388] sm:$0xff]  }
 0xcf2   : > { %v5080_v21 = vpack.c.bf16 %v5014_v17, %v5014_v17  ;;  %v5017_v22 = vpop.f32.mrb[71].mxu1  ;;  %20877 = vmatpush3.bf16.msra.mxu1 %v21789_v16  ;;  %v21791_v17 = vld [vmem:[%s29105_s3 + $0x398] sm:$0xff]   ;;  %v21794_v20 = vld [vmem:[%s29105_s3 + $0x3a0] sm:$0xff]   ;;  %v21813_v16 = vld [vmem:[%s29107_s5 + $0x3c8] sm:$0xff]  }
 0xcf3   : > { %20878 = vmatprep.subr.bf16.mxu1 %v21791_v17  ;;  %v21797_v22 = vld [vmem:[%s29105_s3 + $0x3a8] sm:$0xff]  }
 0xcf4   : > { %v5085_v24 = vsel %vm1534_vm3, %v5080_v21, 0  ;;  %v21795_v21 = vld [vmem:[%s29105_s3 + $0x360] sm:$0xff]   ;;  %v21812_v17 = vld [vmem:[%s29107_s5 + $0x348] sm:$0xff]  }
 0xcf5   : > { %21173 = vmatpush3.bf16.msra.mxu0 %v5085_v24  ;;  %v21798_v24 = vld [vmem:[%s29105_s3 + $0x368] sm:$0xff]  }
 0xcf6   : > { %5228 = vmatprep.subr.bf16.mxu0 %v21734_v43  ;;  %20879 = vmatpush3.bf16.msra.mxu1 %v21792_v18  ;;  %v21747_v43 = vld [vmem:[%s29109_s7 + $0x1a8] ss:$16 sps:$4 sm:$0xff]   ;;  %v21814_v18 = vld [vmem:[%s29107_s5 + $0x390] sm:$0xff]  }
 0xcf7   : > { %20880 = vmatprep.subr.bf16.mxu1 %v21794_v20  ;;  %v21816_v20 = vld [vmem:[%s29107_s5 + $0x3d0] sm:$0xff]  }
 0xcfa   : > { %20881 = vmatpush3.bf16.msra.mxu1 %v21795_v21  ;;  %v21815_v21 = vld [vmem:[%s29107_s5 + $0x350] sm:$0xff]  }
 0xcfb   : > { %20882 = vmatprep.subr.bf16.mxu1 %v21797_v22  ;;  %v21817_v22 = vld [vmem:[%s29107_s5 + $0x398] sm:$0xff]  }
 0xcfe   : > { %20883 = vmatpush3.bf16.msra.mxu1 %v21798_v24  ;;  %v21819_v24 = vld [vmem:[%s29107_s5 + $0x3d8] sm:$0xff]  }
 0xda7   : > { %v5061_v25 = vpop.f32.mrb[72].mxu0 }
 0xda8   : > { %v5067_v26 = vmul.f32 0.13867505, %v5061_v25  ;;  %v21170_v27 = vpop.f32.mrb[73].mxu0  ;;  %v21800_v25 = vld [vmem:[%s29105_s3 + $0x3b0] sm:$0xff]  }
 0xda9   : > { %v5064_v28 = vpop.f32.mrb[74].mxu0  ;;  %20884 = vmatprep.subr.bf16.mxu1 %v21800_v25  ;;  %v21803_v27 = vld [vmem:[%s29105_s3 + $0x3b8] sm:$0xff]  }
 0xdaa   : > { %v21171_v30 = vpop.f32.mrb[75].mxu0  ;;  %v5068_v31 = vsel %vm1516_vm4, %v5067_v26, -inf  ;;  %v21804_v28 = vld [vmem:[%s29105_s3 + $0x378] sm:$0xff]  }
 0xdab   : > { %5069 = vmax.xlane.f32.xlu0 %v5068_v31  ;;  %v21744_v31 = vld [vmem:[%s29109_s7 + $0x188] ss:$16 sps:$4 sm:$0xff]  }
 0xdac   : > { %v21818_v25 = vld [vmem:[%s29107_s5 + $0x358] sm:$0xff]  }
 0xdb3   : > { %v20866_v8 = vpop.f32.mrb[72].mxu1 }
 0xdb4   : > { %v20867_v2 = vpop.f32.mrb[73].mxu1 }
 0xdb5   : > { %v24750_v9 = vadd.f32 %v20867_v2, %v20866_v8  ;;  %v20869_v10 = vpop.f32.mrb[74].mxu1 }
 0xdb6   : > { %v20870_v11 = vpop.f32.mrb[75].mxu1 }
 0xe38   : > { %v5070_v32 = vpop.xlane.xlu0 %5069 }
 0xe39   : > { %v5071_v35 = vsub.f32 %v5067_v26, %v5070_v32  ;;  %v21801_v26 = vld [vmem:[%s29105_s3 + $0x370] sm:$0xff]  }
 0xe3a   : > { %20885 = vmatpush3.bf16.msra.mxu1 %v21801_v26  ;;  %v21820_v26 = vld [vmem:[%s29107_s5 + $0x3a0] sm:$0xff]  }
 0xe3b   : > { %v5072_v36 = vmul.f32 1.442695, %v5071_v35  ;;  %20886 = vmatprep.subr.bf16.mxu1 %v21803_v27  ;;  %v21822_v27 = vld [vmem:[%s29107_s5 + $0x3e0] sm:$0xff]  }
 0xe3d   : > { %22944 = vpow2.f32 %v5072_v36  ;;  %v21749_v36 = vld [vmem:[%s29109_s7 + $0x1ac] ss:$16 sps:$4 sm:$0xff]  }
 0xe3e   : > { %20887 = vmatpush3.bf16.msra.mxu1 %v21804_v28  ;;  %v21821_v28 = vld [vmem:[%s29107_s5 + $0x360] sm:$0xff]  }
 0xe3f   : > { %20894 = vmatprep.subr.bf16.mxu1 %v21808_v12 }
 0xe41   : > { %5861 = vmatmul.mubr.bf16.vlgmr.msra.gmra.mrb[76].mxu1 %v23194_v40 }
 0xe42   : > { %6157 = vmatprep.mubr.bf16.mxu1 %v23197_v41  ;;  %20895 = vmatpush3.bf16.msra.mxu1 %v21809_v13 }
 0xe43   : > { %20896 = vmatprep.subr.bf16.mxu1 %v21811_v15 }
 0xe46   : > { %20897 = vmatpush3.bf16.msra.mxu1 %v21812_v17 }
 0xe47   : > { %v22945_v37 = vpop.eup %22944  ;;  %20898 = vmatprep.subr.bf16.mxu1 %v21814_v18 }
 0xe48   : > { %v5074_v38 = vsel %vm1516_vm4, %v22945_v37, 0.0 }
 0xe49   : > { %5075 = vadd.xlane.f32.xlu1 %v5074_v38 }
 0xe4a   : > { %20899 = vmatpush3.bf16.msra.mxu1 %v21815_v21 }
 0xe4b   : > { %20900 = vmatprep.subr.bf16.mxu1 %v21817_v22  ;;  %v18729_v22 = vld [vmem:[%s29108_s6 + $0x4] ss:$0 sm:$0xff] }
 0xe4e   : > { %20901 = vmatpush3.bf16.msra.mxu1 %v21818_v25 }
 0xe4f   : > { %20902 = vmatprep.subr.bf16.mxu1 %v21820_v26 }
 0xe52   : > { %20903 = vmatpush3.bf16.msra.mxu1 %v21821_v28 }
 0xed6   : > { %v5076_v46 = vpop.xlane.xlu1 %5075 }
 0xed7   : > { %22946 = vrcp.f32 %v5076_v46  ;;  %v21752_v46 = vld [vmem:[%s29109_s7 + $0x1cc] ss:$16 sps:$4 sm:$0xff]  }
 0xee1   : > { %v22947_v47 = vpop.eup %22946 }
 0xee2   : > { %v5078_v60 = vmul.f32 %v22947_v47, %v22945_v37  ;;  %v21750_v47 = vld [vmem:[%s29109_s7 + $0x1c8] ss:$16 sps:$4 sm:$0xff]  }
 0xee4   : > { %v5079_v50 = vpack.c.bf16 %v5078_v60, %v5078_v60  ;;  %v21755_v60 = vld [vmem:[%s29109_s7 + $0x1ec] ss:$16 sps:$4 sm:$0xff]  }
 0xee6   : > { %21175 = vmatmul.mubr.msk.bf16.vlgmr.msra.gmra.mrb[76].mxu0 %vm1530_vm5, %v5079_v50  ;;  %v21756_v50 = vld [vmem:[%s29123_s28 + $0x3c0] sm:$0xff]  }
 0xee7   : > { %5229 = vmatpush1.bf16.msra.mxu0 %v21732_v49  ;;  %5260 = vmatprep.mubr.bf16.mxu0 %v22979_v1  ;;  %v21753_v49 = vld [vmem:[%s29109_s7 + $0x1e8] ss:$16 sps:$4 sm:$0xff]  }
 0xee8   : > { %5230 = vmatprep.subr.bf16.mxu0 %v21737_v51  ;;  %v21759_v51 = vld [vmem:[%s29123_s28 + $0x3c8] sm:$0xff]  }
 0xeeb   : > { %5231 = vmatpush1.bf16.msra.mxu0 %v21735_v54  ;;  %v21762_v54 = vld [vmem:[%s29123_s28 + $0x3d0] sm:$0xff]  }
 0xeec   : > { %5232 = vmatprep.subr.bf16.mxu0 %v21740_v56  ;;  %v21765_v56 = vld [vmem:[%s29123_s28 + $0x3d8] sm:$0xff]  }
 0xeef   : > { %5233 = vmatpush1.bf16.msra.mxu0 %v21738_v57  ;;  %v21768_v57 = vld [vmem:[%s29123_s28 + $0x3e0] sm:$0xff]  }
 0xef0   : > { %5234 = vmatprep.subr.bf16.mxu0 %v21743_v19  ;;  %v21771_v19 = vld [vmem:[%s29123_s28 + $0x3e8] sm:$0xff]  }
 0xef3   : > { %5235 = vmatpush1.bf16.msra.mxu0 %v21741_v58  ;;  %v21774_v58 = vld [vmem:[%s29123_s28 + $0x3f0] sm:$0xff]  }
 0xef4   : > { %5269 = vmatprep.subr.bf16.mxu0 %v21746_v29  ;;  %v21777_v29 = vld [vmem:[%s29123_s28 + $0x3f8] sm:$0xff]  }
 0xfb9   : > { %v5121_v30 = vpop.f32.mrb[76].mxu0 }
 0xfba   : > { %v5127_v32 = vpack.c.bf16 %v5121_v30, %v5121_v30  ;;  %v21176_v35 = vpop.f32.mrb[77].mxu0  ;;  %v21823_v30 = vld [vmem:[%s29107_s5 + $0x3a8] sm:$0xff]  }
 0xfbb   : > { %v5124_v37 = vpop.f32.mrb[78].mxu0  ;;  %20904 = vmatprep.subr.bf16.mxu1 %v21823_v30  ;;  %v21826_v35 = vld [vmem:[%s29107_s5 + $0x3b0] sm:$0xff]  }
 0xfbc   : > { %v21177_v38 = vpop.f32.mrb[79].mxu0  ;;  %18512 = vmatmul.mubr.msk.bf16.vlgmr.msra.gmra.mrb[80].mxu0 %vm1468_vm2, %v5127_v32  ;;  %v21827_v37 = vld [vmem:[%s29107_s5 + $0x370] sm:$0xff]  }
 0xfbd   : > { %5270 = vmatpush1.bf16.msra.mxu0 %v21744_v31  ;;  %5301 = vmatprep.mubr.bf16.mxu0 %v22979_v1  ;;  %v21825_v31 = vld [vmem:[%s29107_s5 + $0x3e8] sm:$0xff]   ;;  %v21829_v38 = vld [vmem:[%s29107_s5 + $0x3b8] sm:$0xff]  }
 0xfbe   : > { %5271 = vmatprep.subr.bf16.mxu0 %v21749_v36  ;;  %v21828_v36 = vld [vmem:[%s29107_s5 + $0x3f0] sm:$0xff]  }
 0xfc1   : > { %5272 = vmatpush1.bf16.msra.mxu0 %v21747_v43  ;;  %v21831_v43 = vld [vmem:[%s29107_s5 + $0x3f8] sm:$0xff]  }
 0xfc2   : > { %5273 = vmatprep.subr.bf16.mxu0 %v21752_v46  ;;  %v21830_v46 = vld [vmem:[%s29107_s5 + $0x378] sm:$0xff]  }
 0xfc5   : > { %5274 = vmatpush1.bf16.msra.mxu0 %v21750_v47  ;;  %v20888_v47 = vpop.f32.mrb[76].mxu1 }
 0xfc6   : > { %5275 = vmatprep.subr.bf16.mxu0 %v21755_v60  ;;  %v20889_v60 = vpop.f32.mrb[77].mxu1 }
 0xfc9   : > { %5276 = vmatpush1.bf16.msra.mxu0 %v21753_v49  ;;  %v20890_v49 = vadd.f32 %v20889_v60, %v20888_v47 }
 0xfca   : > { %5571 = vmatprep.subr.bf16.mxu0 %v22979_v1 }
 0xfcc   : > { %18513 = vmatmul.mubr.msk.bf16.vlgmr.msra.gmra.mrb[84].mxu0 %vm1468_vm2, %v5127_v32  ;;  %v21824_v32 = vld [vmem:[%s29107_s5 + $0x368] sm:$0xff]  }
 0xfcd   : > { %5572 = vmatpush1.bf16.msra.mxu0 %v21756_v50  ;;  %18594 = vmatprep.mubr.msk.bf16.mxu0 %vm792_vm0, %v23199_v42  ;;  %v20891_v50 = vpop.f32.mrb[78].mxu1 }
 0xfce   : > { %5573 = vmatprep.subr.bf16.mxu0 %v22979_v1  ;;  %20905 = vmatpush3.bf16.msra.mxu1 %v21824_v32 }
 0xfcf   : > { %20906 = vmatprep.subr.bf16.mxu1 %v21826_v35 }
 0xfd1   : > { %5574 = vmatpush1.bf16.msra.mxu0 %v21759_v51  ;;  %v20892_v51 = vpop.f32.mrb[79].mxu1 }
 0xfd2   : > { %5575 = vmatprep.subr.bf16.mxu0 %v22979_v1  ;;  %20907 = vmatpush3.bf16.msra.mxu1 %v21827_v37 }
 0xfd3   : > { %20908 = vmatprep.subr.bf16.mxu1 %v21829_v38 }
 0xfd5   : > { %5576 = vmatpush1.bf16.msra.mxu0 %v21762_v54  ;;  %v21832_v54 = vld [vmem:[%s29107_s5 + $0x400] sm:$0xff]  }
 0xfd6   : > { %5577 = vmatprep.subr.bf16.mxu0 %v22979_v1  ;;  %20909 = vmatpush3.bf16.msra.mxu1 %v21830_v46 }
 0xfd7   : > { %21178 = vmatprep.subr.bf16.mxu1 %v22981_v33 }
 0xfd9   : > { %5578 = vmatpush1.bf16.msra.mxu0 %v21765_v56  ;;  %6158 = vmatmul.mubr.bf16.vlgmr.msra.gmra.mrb[80].mxu1 %v23194_v40  ;;  %v21833_v56 = vld [vmem:[%s29107_s5 + $0x408] sm:$0xff]  }
 0xfda   : > { %5579 = vmatprep.subr.bf16.mxu0 %v22979_v1  ;;  %21180 = vmatprep.mubr.msk.bf16.mxu1 %vm22982_vm1, %v22981_v33 }
 0xfdd   : > { %5580 = vmatpush1.bf16.msra.mxu0 %v21768_v57 }
 0xfde   : > { %5581 = vmatprep.subr.bf16.mxu0 %v22979_v1 }
 0xfe1   : > { %5582 = vmatpush1.bf16.msra.mxu0 %v21771_v19 }
 0xfe2   : > { %5583 = vmatprep.subr.bf16.mxu0 %v22979_v1 }
 0xfe5   : > { %5584 = vmatpush1.bf16.msra.mxu0 %v21774_v58 }
 0xfe6   : > { %5585 = vmatprep.subr.bf16.mxu0 %v22979_v1 }
 0xfe9   : > { %5586 = vmatpush1.bf16.msra.mxu0 %v21777_v29 }
 0xfea   : > { %5587 = vmatprep.subr.bf16.mxu0 %v22979_v1 }
 0xfed   : > { %5588 = vmatpush1.bf16.msra.mxu0 %v21780_v61 }
 0xfee   : > { %5589 = vmatprep.subr.bf16.mxu0 %v22979_v1 }
 0xff1   : > { %5590 = vmatpush1.bf16.msra.mxu0 %v21781_v62 }
 0xff2   : > { %5868 = vmatprep.subr.bf16.mxu0 %v22979_v1 }
 0xff4   : > { %5604 = vmatmul.mubr.bf16.vlgmr.msra.gmra.mrb[88].mxu0 %v23204_v44 }
 0xff5   : > { %5869 = vmatpush1.bf16.msra.mxu0 %v21784_v63  ;;  %18675 = vmatprep.mubr.msk.bf16.mxu0 %vm792_vm0, %v23199_v42 }
 0xff6   : > { %5870 = vmatprep.subr.bf16.mxu0 %v22979_v1 }
 0xff9   : > { %5871 = vmatpush1.bf16.msra.mxu0 %v21787_v0 }
 0xffa   : > { %5872 = vmatprep.subr.bf16.mxu0 %v22979_v1 }
 0xffd   : > { %5873 = vmatpush1.bf16.msra.mxu0 %v21790_v39 }
 0xffe   : > { %5874 = vmatprep.subr.bf16.mxu0 %v22979_v1 }
0x1001   : > { %5875 = vmatpush1.bf16.msra.mxu0 %v21793_v52 }
0x1002   : > { %5876 = vmatprep.subr.bf16.mxu0 %v22979_v1 }
0x1005   : > { %5877 = vmatpush1.bf16.msra.mxu0 %v21796_v45 }
0x1006   : > { %5878 = vmatprep.subr.bf16.mxu0 %v22979_v1 }
0x1009   : > { %5879 = vmatpush1.bf16.msra.mxu0 %v21799_v3 }
0x100a   : > { %5880 = vmatprep.subr.bf16.mxu0 %v22979_v1 }
0x100d   : > { %5881 = vmatpush1.bf16.msra.mxu0 %v21802_v4 }
0x100e   : > { %5882 = vmatprep.subr.bf16.mxu0 %v22979_v1 }
0x1011   : > { %5883 = vmatpush1.bf16.msra.mxu0 %v21805_v5 }
0x1012   : > { %5884 = vmatprep.subr.bf16.mxu0 %v22979_v1 }
0x1015   : > { %5885 = vmatpush1.bf16.msra.mxu0 %v21806_v6 }
0x1016   : > { %5886 = vmatprep.subr.bf16.mxu0 %v22979_v1 }
0x1019   : > { %5887 = vmatpush1.bf16.msra.mxu0 %v21807_v7 }
0x101a   : > { %6165 = vmatprep.subr.bf16.mxu0 %v22979_v1 }
0x101c   : > { %5901 = vmatmul.mubr.bf16.vlgmr.msra.gmra.mrb[92].mxu0 %v23204_v44 }
0x101d   : > { %18756 = vmatprep.mubr.msk.bf16.mxu0 %vm792_vm0, %v23199_v42  ;;  %6166 = vmatpush1.bf16.msra.mxu0 %v21810_v14 }
0x101e   : > { %6167 = vmatprep.subr.bf16.mxu0 %v22979_v1 }
0x1021   : > { %6168 = vmatpush1.bf16.msra.mxu0 %v21813_v16 }
0x1022   : > { %6169 = vmatprep.subr.bf16.mxu0 %v22979_v1 }
0x1025   : > { %6170 = vmatpush1.bf16.msra.mxu0 %v21816_v20 }
0x1026   : > { %6171 = vmatprep.subr.bf16.mxu0 %v22979_v1 }
0x1029   : > { %6172 = vmatpush1.bf16.msra.mxu0 %v21819_v24 }
0x102a   : > { %6173 = vmatprep.subr.bf16.mxu0 %v22979_v1 }
0x102d   : > { %6174 = vmatpush1.bf16.msra.mxu0 %v21822_v27 }
0x102e   : > { %6175 = vmatprep.subr.bf16.mxu0 %v22979_v1 }
0x1031   : > { %6176 = vmatpush1.bf16.msra.mxu0 %v21825_v31 }
0x1032   : > { %6177 = vmatprep.subr.bf16.mxu0 %v22979_v1 }
0x1035   : > { %6178 = vmatpush1.bf16.msra.mxu0 %v21828_v36 }
0x1036   : > { %6179 = vmatprep.subr.bf16.mxu0 %v22979_v1 }
0x1039   : > { %6180 = vmatpush1.bf16.msra.mxu0 %v21831_v43 }
0x103a   : > { %6181 = vmatprep.subr.bf16.mxu0 %v22979_v1 }
0x103d   : > { %6182 = vmatpush1.bf16.msra.mxu0 %v21832_v54  ;;  %v21836_v54 = vld [vmem:[%s29109_s7 + $0x204] ss:$16 sps:$4 sm:$0xff]  }
0x103e   : > { %6183 = vmatprep.subr.bf16.mxu0 %v22979_v1 }
0x1041   : > { %6184 = vmatpush1.bf16.msra.mxu0 %v21833_v56 }
0x1044   : > { %6198 = vmatmul.mubr.bf16.vlgmr.msra.gmra.mrb[96].mxu0 %v23204_v44 }
0x1045   : > { %6749 = vmatprep.mubr.bf16.mxu0 %v23197_v41 }
0x108f   : > { %v5262_v57 = vpop.f32.mrb[80].mxu0 }
0x1090   : > { %v24846_v19 = vadd.f32 %v5262_v57, %v24479_v59  ;;  %v5264_v58 = vpop.f32.mrb[81].mxu0  ;;  %v18567_v59 = vld [vmem:[%s29104_s2 + $0x4] ss:$0 sm:$0xff] }
0x1091   : > { %v24849_v29 = vadd.f32 %v5264_v58, %v24482_v48  ;;  %v5266_v61 = vpop.f32.mrb[82].mxu0  ;;  %v5566_v4 = vadd.f32 %v24750_v9, %v18567_v59  ;;  %v21845_v59 = vld [vmem:[%s29109_s7 + $0x264] ss:$16 sps:$4 sm:$0xff]  }
0x1092   : > { %v5267_v62 = vpop.f32.mrb[83].mxu0  ;;  %v21834_v61 = vld [vmem:[%s29109_s7 + $0x200] ss:$16 sps:$4 sm:$0xff]  }
0x109f   : > { %v5303_v63 = vpop.f32.mrb[84].mxu0 }
0x10a0   : > { %v24852_v0 = vadd.f32 %v5303_v63, %v24485_v53  ;;  %v5305_v39 = vpop.f32.mrb[85].mxu0  ;;  %v18648_v53 = vld [vmem:[%s29106_s4 + $0x4] ss:$0 sm:$0xff] }
0x10a1   : > { %v24855_v52 = vadd.f32 %v5305_v39, %v24488_v55  ;;  %v5307_v45 = vpop.f32.mrb[86].mxu0  ;;  %v5863_v2 = vadd.f32 %v20890_v49, %v18648_v53  ;;  %v21839_v63 = vld [vmem:[%s29109_s7 + $0x224] ss:$16 sps:$4 sm:$0xff]   ;;  %v21837_v39 = vld [vmem:[%s29109_s7 + $0x220] ss:$16 sps:$4 sm:$0xff]  }
0x10a2   : > { %v5308_v3 = vpop.f32.mrb[87].mxu0  ;;  %v21842_v45 = vld [vmem:[%s29109_s7 + $0x244] ss:$16 sps:$4 sm:$0xff]  }
0x10a3   : > { %v21840_v3 = vld [vmem:[%s29109_s7 + $0x240] ss:$16 sps:$4 sm:$0xff]  }
0x10a4   : > { %v21865_v53 = vld [vmem:[%s29123_s28 + $0x460] sm:$0xff]  }
0x10ac   : > { %v20910_v16 = vpop.f32.mrb[80].mxu1 }
0x10ad   : > { %v20911_v17 = vpop.f32.mrb[81].mxu1 }
0x10ae   : > { %v20912_v18 = vadd.f32 %v20911_v17, %v20910_v16  ;;  %v20913_v20 = vpop.f32.mrb[82].mxu1  ;;  %v21880_v16 = vld [vmem:[%s29123_s28 + $0x488] sm:$0xff]  }
0x10af   : > { %v20914_v21 = vpop.f32.mrb[83].mxu1  ;;  %v21881_v17 = vld [vmem:[%s29123_s28 + $0x448] sm:$0xff]   ;;  %v21885_v20 = vld [vmem:[%s29105_s3 + $0x410] sm:$0xff]  }
0x10b0   : > { %v6160_v24 = vadd.f32 %v20912_v18, %v18729_v22  ;;  %v21884_v18 = vld [vmem:[%s29105_s3 + $0x450] sm:$0xff]   ;;  %v21887_v21 = vld [vmem:[%s29105_s3 + $0x458] sm:$0xff]  }
0x10b1   : > { %v21888_v22 = vld [vmem:[%s29105_s3 + $0x418] sm:$0xff]  }
0x10c7   : > { %v5605_v48 = vpop.f32.mrb[88].mxu0 }
0x10c8   : > { %v5606_v5 = vadd.f32 %v5605_v48, %v5566_v4  ;;  %v5607_v6 = vpop.f32.mrb[89].mxu0  ;;  %v21843_v4 = vld [vmem:[%s29109_s7 + $0x260] ss:$16 sps:$4 sm:$0xff]   ;;  %v21848_v48 = vld [vmem:[%s29109_s7 + $0x20c] ss:$16 sps:$4 sm:$0xff]  }
0x10c9   : > { %v5608_v7 = vpop.f32.mrb[90].mxu0  ;;  %v21860_v6 = vld [vmem:[%s29123_s28 + $0x410] sm:$0xff]  }
0x10ca   : > { %v5609_v8 = vpop.f32.mrb[91].mxu0  ;;  %v6205_v9 = vpack.c.bf16 %v5606_v5, %v5606_v5  ;;  %v21859_v5 = vld [vmem:[%s29123_s28 + $0x450] sm:$0xff]   ;;  %v21862_v7 = vld [vmem:[%s29123_s28 + $0x458] sm:$0xff]  }
0x10cb   : > { %20920 = vmatprep.subr.bf16.mxu0 %v21859_v5  ;;  %v21863_v8 = vld [vmem:[%s29123_s28 + $0x418] sm:$0xff]   ;;  %v21882_v5 = vld [vmem:[%s29123_s28 + $0x4d0] sm:$0xff]  }
0x10cc   : > { %20921 = vmatpush3.bf16.msra.mxu0 %v21860_v6  ;;  %v21883_v6 = vld [vmem:[%s29123_s28 + $0x4d8] sm:$0xff]  }
0x10cd   : > { %20922 = vmatprep.subr.bf16.mxu0 %v21862_v7  ;;  %v21886_v7 = vld [vmem:[%s29105_s3 + $0x490] sm:$0xff]  }
0x10d0   : > { %20923 = vmatpush3.bf16.msra.mxu0 %v21863_v8  ;;  %v21889_v8 = vld [vmem:[%s29105_s3 + $0x498] sm:$0xff]  }
0x10d1   : > { %20924 = vmatprep.subr.bf16.mxu0 %v21865_v53  ;;  %v21892_v53 = vld [vmem:[%s29105_s3 + $0x4a0] sm:$0xff]  }
0x10ef   : > { %v5902_v55 = vpop.f32.mrb[92].mxu0 }
0x10f0   : > { %v5903_v10 = vadd.f32 %v5902_v55, %v5863_v2  ;;  %v5904_v11 = vpop.f32.mrb[93].mxu0  ;;  %v21866_v2 = vld [vmem:[%s29123_s28 + $0x420] sm:$0xff]   ;;  %v21868_v55 = vld [vmem:[%s29123_s28 + $0x468] sm:$0xff]  }
0x10f1   : > { %v5905_v12 = vpop.f32.mrb[94].mxu0  ;;  %20925 = vmatpush3.bf16.msra.mxu0 %v21866_v2  ;;  %v21871_v11 = vld [vmem:[%s29123_s28 + $0x470] sm:$0xff]   ;;  %v21895_v2 = vld [vmem:[%s29105_s3 + $0x4a8] sm:$0xff]  }
0x10f2   : > { %v6206_v13 = vpack.c.bf16 %v5903_v10, %v5903_v10  ;;  %v5906_v14 = vpop.f32.mrb[95].mxu0  ;;  %v21869_v10 = vld [vmem:[%s29123_s28 + $0x428] sm:$0xff]   ;;  %20926 = vmatprep.subr.bf16.mxu0 %v21868_v55  ;;  %v21872_v12 = vld [vmem:[%s29123_s28 + $0x430] sm:$0xff]  }
0x10f3   : > { %v21875_v14 = vld [vmem:[%s29123_s28 + $0x438] sm:$0xff]   ;;  %v21898_v55 = vld [vmem:[%s29105_s3 + $0x4b0] sm:$0xff]  }
0x10f4   : > { %v6211_v15 = vsel %vm1468_vm2, %v6206_v13, 0  ;;  %v21874_v13 = vld [vmem:[%s29123_s28 + $0x478] sm:$0xff]  }
0x10f5   : > { %21179 = vmatpush3.bf16.xpose.msra.mxu1 %v6211_v15  ;;  %20927 = vmatpush3.bf16.msra.mxu0 %v21869_v10  ;;  %v21877_v15 = vld [vmem:[%s29123_s28 + $0x480] sm:$0xff]   ;;  %v21901_v10 = vld [vmem:[%s29105_s3 + $0x4b8] sm:$0xff]  }
0x10f6   : > { %21184 = vmatprep.subr.bf16.mxu1 %v22981_v33  ;;  %20928 = vmatprep.subr.bf16.mxu0 %v21871_v11  ;;  %v21904_v11 = vld [vmem:[%s29105_s3 + $0x4c0] sm:$0xff]  }
0x10f9   : > { %20929 = vmatpush3.bf16.msra.mxu0 %v21872_v12  ;;  %v21907_v12 = vld [vmem:[%s29105_s3 + $0x4c8] sm:$0xff]  }
0x10fa   : > { %20930 = vmatprep.subr.bf16.mxu0 %v21874_v13  ;;  %v21908_v13 = vld [vmem:[%s29105_s3 + $0x4d0] sm:$0xff]  }
0x10fc   : > { %21181 = vmatmul.mubr.msk.bf16.vlgmr.msra.gmra.mrb[84].mxu1 %vm1468_vm2, %v6205_v9  ;;  %v21878_v9 = vld [vmem:[%s29123_s28 + $0x440] sm:$0xff]  }
0x10fd   : > { %21186 = vmatprep.mubr.msk.bf16.mxu1 %vm22982_vm1, %v22981_v33  ;;  %20931 = vmatpush3.bf16.msra.mxu0 %v21875_v14  ;;  %v21909_v14 = vld [vmem:[%s29105_s3 + $0x4d8] sm:$0xff]  }
0x10fe   : > { %20932 = vmatprep.subr.bf16.mxu0 %v21877_v15 }
0x1101   : > { %20933 = vmatpush3.bf16.msra.mxu0 %v21878_v9 }
0x1102   : > { %20934 = vmatprep.subr.bf16.mxu0 %v21880_v16 }
0x1105   : > { %20935 = vmatpush3.bf16.msra.mxu0 %v21881_v17 }
0x1106   : > { %20942 = vmatprep.subr.bf16.mxu0 %v21884_v18 }
0x1108   : > { %6750 = vmatmul.mubr.bf16.vlgmr.msra.gmra.mrb[100].mxu0 %v23194_v40 }
0x1109   : > { %7046 = vmatprep.mubr.bf16.mxu0 %v23197_v41  ;;  %20943 = vmatpush3.bf16.msra.mxu0 %v21885_v20  ;;  %v21910_v20 = vld [vmem:[%s29107_s5 + $0x450] sm:$0xff]  }
0x110a   : > { %20944 = vmatprep.subr.bf16.mxu0 %v21887_v21  ;;  %v21911_v21 = vld [vmem:[%s29107_s5 + $0x410] sm:$0xff]  }
0x110d   : > { %20945 = vmatpush3.bf16.msra.mxu0 %v21888_v22  ;;  %v21912_v22 = vld [vmem:[%s29107_s5 + $0x490] sm:$0xff]  }
0x1117   : > { %v6199_v25 = vpop.f32.mrb[96].mxu0 }
0x1118   : > { %v6200_v26 = vadd.f32 %v6199_v25, %v6160_v24  ;;  %v6201_v27 = vpop.f32.mrb[97].mxu0  ;;  %v21890_v24 = vld [vmem:[%s29105_s3 + $0x460] sm:$0xff]  }
0x1119   : > { %v6202_v28 = vpop.f32.mrb[98].mxu0  ;;  %v21891_v25 = vld [vmem:[%s29105_s3 + $0x420] sm:$0xff]   ;;  %20946 = vmatprep.subr.bf16.mxu0 %v21890_v24  ;;  %v21894_v27 = vld [vmem:[%s29105_s3 + $0x428] sm:$0xff]   ;;  %v21913_v24 = vld [vmem:[%s29107_s5 + $0x458] sm:$0xff]  }
0x111a   : > { %v6266_v30 = vpack.c.bf16 %v6200_v26, %v6200_v26  ;;  %v6203_v31 = vpop.f32.mrb[99].mxu0  ;;  %20947 = vmatpush3.bf16.msra.mxu0 %v21891_v25  ;;  %v21893_v26 = vld [vmem:[%s29105_s3 + $0x468] sm:$0xff]   ;;  %v21896_v28 = vld [vmem:[%s29105_s3 + $0x470] sm:$0xff]   ;;  %v21915_v25 = vld [vmem:[%s29107_s5 + $0x498] sm:$0xff]  }
0x111b   : > { %20948 = vmatprep.subr.bf16.mxu0 %v21893_v26  ;;  %v21899_v31 = vld [vmem:[%s29105_s3 + $0x478] sm:$0xff]  }
0x111c   : > { %v6271_v32 = vsel %vm1534_vm3, %v6266_v30, 0  ;;  %v21897_v30 = vld [vmem:[%s29105_s3 + $0x430] sm:$0xff]   ;;  %v21914_v26 = vld [vmem:[%s29107_s5 + $0x418] sm:$0xff]  }
0x111d   : > { %21185 = vmatpush3.bf16.msra.mxu1 %v6271_v32  ;;  %v21900_v32 = vld [vmem:[%s29105_s3 + $0x438] sm:$0xff]  }
0x111e   : > { %6414 = vmatprep.subr.bf16.mxu1 %v21836_v54  ;;  %20949 = vmatpush3.bf16.msra.mxu0 %v21894_v27  ;;  %v21849_v54 = vld [vmem:[%s29109_s7 + $0x228] ss:$16 sps:$4 sm:$0xff]   ;;  %v21916_v27 = vld [vmem:[%s29107_s5 + $0x460] sm:$0xff]  }
0x111f   : > { %20950 = vmatprep.subr.bf16.mxu0 %v21896_v28  ;;  %v21918_v28 = vld [vmem:[%s29107_s5 + $0x4a0] sm:$0xff]  }
0x1122   : > { %20951 = vmatpush3.bf16.msra.mxu0 %v21897_v30  ;;  %v21917_v30 = vld [vmem:[%s29107_s5 + $0x420] sm:$0xff]  }
0x1123   : > { %20952 = vmatprep.subr.bf16.mxu0 %v21899_v31  ;;  %v21919_v31 = vld [vmem:[%s29107_s5 + $0x468] sm:$0xff]  }
0x1126   : > { %20953 = vmatpush3.bf16.msra.mxu0 %v21900_v32  ;;  %v21921_v32 = vld [vmem:[%s29107_s5 + $0x4a8] sm:$0xff]  }
0x11cf   : > { %v6247_v35 = vpop.f32.mrb[84].mxu1 }
0x11d0   : > { %v6253_v36 = vmul.f32 0.13867505, %v6247_v35  ;;  %v21182_v37 = vpop.f32.mrb[85].mxu1  ;;  %v21902_v35 = vld [vmem:[%s29105_s3 + $0x480] sm:$0xff]  }
0x11d1   : > { %v6250_v38 = vpop.f32.mrb[86].mxu1  ;;  %20954 = vmatprep.subr.bf16.mxu0 %v21902_v35  ;;  %v21905_v37 = vld [vmem:[%s29105_s3 + $0x488] sm:$0xff]  }
0x11d2   : > { %v21183_v43 = vpop.f32.mrb[87].mxu1  ;;  %v6254_v46 = vsel %vm1516_vm4, %v6253_v36, -inf  ;;  %v21906_v38 = vld [vmem:[%s29105_s3 + $0x448] sm:$0xff]  }
0x11d3   : > { %6255 = vmax.xlane.f32.xlu0 %v6254_v46  ;;  %v21846_v46 = vld [vmem:[%s29109_s7 + $0x208] ss:$16 sps:$4 sm:$0xff]  }
0x11d4   : > { %v21920_v35 = vld [vmem:[%s29107_s5 + $0x428] sm:$0xff]  }
0x11db   : > { %v20936_v15 = vpop.f32.mrb[100].mxu0 }
0x11dc   : > { %v20937_v9 = vpop.f32.mrb[101].mxu0 }
0x11dd   : > { %v25117_v16 = vadd.f32 %v20937_v9, %v20936_v15  ;;  %v20939_v17 = vpop.f32.mrb[102].mxu0 }
0x11de   : > { %v20940_v18 = vpop.f32.mrb[103].mxu0 }
0x1260   : > { %v6256_v47 = vpop.xlane.xlu0 %6255 }
0x1261   : > { %v6257_v60 = vsub.f32 %v6253_v36, %v6256_v47  ;;  %v21903_v36 = vld [vmem:[%s29105_s3 + $0x440] sm:$0xff]  }
0x1262   : > { %20955 = vmatpush3.bf16.msra.mxu0 %v21903_v36  ;;  %v21922_v36 = vld [vmem:[%s29107_s5 + $0x470] sm:$0xff]  }
0x1263   : > { %v6258_v49 = vmul.f32 1.442695, %v6257_v60  ;;  %20956 = vmatprep.subr.bf16.mxu0 %v21905_v37  ;;  %v21924_v37 = vld [vmem:[%s29107_s5 + $0x4b0] sm:$0xff]  }
0x1265   : > { %22948 = vpow2.f32 %v6258_v49  ;;  %v21851_v49 = vld [vmem:[%s29109_s7 + $0x22c] ss:$16 sps:$4 sm:$0xff]  }
0x1266   : > { %20957 = vmatpush3.bf16.msra.mxu0 %v21906_v38  ;;  %v21923_v38 = vld [vmem:[%s29107_s5 + $0x430] sm:$0xff]  }
0x1267   : > { %20964 = vmatprep.subr.bf16.mxu0 %v21910_v20 }
0x1269   : > { %7047 = vmatmul.mubr.bf16.vlgmr.msra.gmra.mrb[104].mxu0 %v23194_v40 }
0x126a   : > { %7343 = vmatprep.mubr.bf16.mxu0 %v23197_v41  ;;  %20965 = vmatpush3.bf16.msra.mxu0 %v21911_v21 }
0x126b   : > { %20966 = vmatprep.subr.bf16.mxu0 %v21913_v24 }
0x126e   : > { %20967 = vmatpush3.bf16.msra.mxu0 %v21914_v26 }
0x126f   : > { %v22949_v50 = vpop.eup %22948  ;;  %20968 = vmatprep.subr.bf16.mxu0 %v21916_v27 }
0x1270   : > { %v6260_v51 = vsel %vm1516_vm4, %v22949_v50, 0.0 }
0x1271   : > { %6261 = vadd.xlane.f32.xlu1 %v6260_v51 }
0x1272   : > { %20969 = vmatpush3.bf16.msra.mxu0 %v21917_v30 }
0x1273   : > { %20970 = vmatprep.subr.bf16.mxu0 %v21919_v31  ;;  %v19008_v31 = vld [vmem:[%s29108_s6 + $0x5] ss:$0 sm:$0xff] }
0x1276   : > { %20971 = vmatpush3.bf16.msra.mxu0 %v21920_v35 }
0x1277   : > { %20972 = vmatprep.subr.bf16.mxu0 %v21922_v36 }
0x127a   : > { %20973 = vmatpush3.bf16.msra.mxu0 %v21923_v38 }
0x12fe   : > { %v6262_v56 = vpop.xlane.xlu1 %6261 }
0x12ff   : > { %22950 = vrcp.f32 %v6262_v56  ;;  %v21854_v56 = vld [vmem:[%s29109_s7 + $0x24c] ss:$16 sps:$4 sm:$0xff]  }
0x1309   : > { %v22951_v57 = vpop.eup %22950 }
0x130a   : > { %v6264_v58 = vmul.f32 %v22951_v57, %v22949_v50  ;;  %v21852_v57 = vld [vmem:[%s29109_s7 + $0x248] ss:$16 sps:$4 sm:$0xff]  }
0x130c   : > { %v6265_v62 = vpack.c.bf16 %v6264_v58, %v6264_v58  ;;  %v21857_v58 = vld [vmem:[%s29109_s7 + $0x26c] ss:$16 sps:$4 sm:$0xff]  }
0x130e   : > { %21187 = vmatmul.mubr.msk.bf16.vlgmr.msra.gmra.mrb[88].mxu1 %vm1530_vm5, %v6265_v62  ;;  %v21858_v62 = vld [vmem:[%s29123_s28 + $0x490] sm:$0xff]  }
0x130f   : > { %6415 = vmatpush1.bf16.msra.mxu1 %v21834_v61  ;;  %6446 = vmatprep.mubr.bf16.mxu1 %v22979_v1  ;;  %v21855_v61 = vld [vmem:[%s29109_s7 + $0x268] ss:$16 sps:$4 sm:$0xff]  }
0x1310   : > { %6416 = vmatprep.subr.bf16.mxu1 %v21839_v63  ;;  %v21861_v63 = vld [vmem:[%s29123_s28 + $0x498] sm:$0xff]  }
0x1313   : > { %6417 = vmatpush1.bf16.msra.mxu1 %v21837_v39  ;;  %v21864_v39 = vld [vmem:[%s29123_s28 + $0x4a0] sm:$0xff]  }
0x1314   : > { %6418 = vmatprep.subr.bf16.mxu1 %v21842_v45  ;;  %v21867_v45 = vld [vmem:[%s29123_s28 + $0x4a8] sm:$0xff]  }
0x1317   : > { %6419 = vmatpush1.bf16.msra.mxu1 %v21840_v3  ;;  %v21870_v3 = vld [vmem:[%s29123_s28 + $0x4b0] sm:$0xff]  }
0x1318   : > { %6420 = vmatprep.subr.bf16.mxu1 %v21845_v59  ;;  %v21873_v59 = vld [vmem:[%s29123_s28 + $0x4b8] sm:$0xff]  }
0x131b   : > { %6421 = vmatpush1.bf16.msra.mxu1 %v21843_v4  ;;  %v21876_v4 = vld [vmem:[%s29123_s28 + $0x4c0] sm:$0xff]  }
0x131c   : > { %6455 = vmatprep.subr.bf16.mxu1 %v21848_v48  ;;  %v21879_v48 = vld [vmem:[%s29123_s28 + $0x4c8] sm:$0xff]  }
0x13e1   : > { %v6307_v43 = vpop.f32.mrb[88].mxu1 }
0x13e2   : > { %v6313_v47 = vpack.c.bf16 %v6307_v43, %v6307_v43  ;;  %v21188_v60 = vpop.f32.mrb[89].mxu1  ;;  %v21925_v43 = vld [vmem:[%s29107_s5 + $0x478] sm:$0xff]  }
0x13e3   : > { %v6310_v50 = vpop.f32.mrb[90].mxu1  ;;  %20974 = vmatprep.subr.bf16.mxu0 %v21925_v43  ;;  %v21928_v60 = vld [vmem:[%s29107_s5 + $0x480] sm:$0xff]  }
0x13e4   : > { %v21189_v51 = vpop.f32.mrb[91].mxu1  ;;  %18791 = vmatmul.mubr.msk.bf16.vlgmr.msra.gmra.mrb[92].mxu1 %vm1468_vm2, %v6313_v47  ;;  %v21929_v50 = vld [vmem:[%s29107_s5 + $0x440] sm:$0xff]  }
0x13e5   : > { %6456 = vmatpush1.bf16.msra.mxu1 %v21846_v46  ;;  %6487 = vmatprep.mubr.bf16.mxu1 %v22979_v1  ;;  %v21927_v46 = vld [vmem:[%s29107_s5 + $0x4b8] sm:$0xff]   ;;  %v21931_v51 = vld [vmem:[%s29107_s5 + $0x488] sm:$0xff]  }
0x13e6   : > { %6457 = vmatprep.subr.bf16.mxu1 %v21851_v49  ;;  %v21930_v49 = vld [vmem:[%s29107_s5 + $0x4c0] sm:$0xff]  }
0x13e9   : > { %6458 = vmatpush1.bf16.msra.mxu1 %v21849_v54  ;;  %v21933_v54 = vld [vmem:[%s29107_s5 + $0x4c8] sm:$0xff]  }
0x13ea   : > { %6459 = vmatprep.subr.bf16.mxu1 %v21854_v56  ;;  %v21932_v56 = vld [vmem:[%s29107_s5 + $0x448] sm:$0xff]  }
0x13ed   : > { %6460 = vmatpush1.bf16.msra.mxu1 %v21852_v57  ;;  %v20958_v57 = vpop.f32.mrb[104].mxu0 }
0x13ee   : > { %6461 = vmatprep.subr.bf16.mxu1 %v21857_v58  ;;  %v20959_v58 = vpop.f32.mrb[105].mxu0 }
0x13f1   : > { %6462 = vmatpush1.bf16.msra.mxu1 %v21855_v61  ;;  %v20960_v61 = vadd.f32 %v20959_v58, %v20958_v57 }
0x13f2   : > { %6757 = vmatprep.subr.bf16.mxu1 %v22979_v1 }
0x13f4   : > { %18792 = vmatmul.mubr.msk.bf16.vlgmr.msra.gmra.mrb[96].mxu1 %vm1468_vm2, %v6313_v47  ;;  %v21926_v47 = vld [vmem:[%s29107_s5 + $0x438] sm:$0xff]  }
0x13f5   : > { %6758 = vmatpush1.bf16.msra.mxu1 %v21858_v62  ;;  %18873 = vmatprep.mubr.msk.bf16.mxu1 %vm792_vm0, %v23199_v42  ;;  %v20961_v62 = vpop.f32.mrb[106].mxu0 }
0x13f6   : > { %6759 = vmatprep.subr.bf16.mxu1 %v22979_v1  ;;  %20975 = vmatpush3.bf16.msra.mxu0 %v21926_v47 }
0x13f7   : > { %20976 = vmatprep.subr.bf16.mxu0 %v21928_v60 }
0x13f9   : > { %6760 = vmatpush1.bf16.msra.mxu1 %v21861_v63  ;;  %v20962_v63 = vpop.f32.mrb[107].mxu0 }
0x13fa   : > { %6761 = vmatprep.subr.bf16.mxu1 %v22979_v1  ;;  %20977 = vmatpush3.bf16.msra.mxu0 %v21929_v50 }
0x13fb   : > { %20978 = vmatprep.subr.bf16.mxu0 %v21931_v51 }
0x13fd   : > { %6762 = vmatpush1.bf16.msra.mxu1 %v21864_v39  ;;  %v21934_v39 = vld [vmem:[%s29107_s5 + $0x4d0] sm:$0xff]  }
0x13fe   : > { %6763 = vmatprep.subr.bf16.mxu1 %v22979_v1  ;;  %20979 = vmatpush3.bf16.msra.mxu0 %v21932_v56 }
0x13ff   : > { %21190 = vmatprep.subr.bf16.mxu0 %v22981_v33 }
0x1401   : > { %6764 = vmatpush1.bf16.msra.mxu1 %v21867_v45  ;;  %7344 = vmatmul.mubr.bf16.vlgmr.msra.gmra.mrb[108].mxu0 %v23194_v40  ;;  %v21935_v45 = vld [vmem:[%s29107_s5 + $0x4d8] sm:$0xff]  }
0x1402   : > { %6765 = vmatprep.subr.bf16.mxu1 %v22979_v1  ;;  %21192 = vmatprep.mubr.msk.bf16.mxu0 %vm22982_vm1, %v22981_v33 }
0x1405   : > { %6766 = vmatpush1.bf16.msra.mxu1 %v21870_v3 }
0x1406   : > { %6767 = vmatprep.subr.bf16.mxu1 %v22979_v1 }
0x1409   : > { %6768 = vmatpush1.bf16.msra.mxu1 %v21873_v59 }
0x140a   : > { %6769 = vmatprep.subr.bf16.mxu1 %v22979_v1 }
0x140d   : > { %6770 = vmatpush1.bf16.msra.mxu1 %v21876_v4 }
0x140e   : > { %6771 = vmatprep.subr.bf16.mxu1 %v22979_v1 }
0x1411   : > { %6772 = vmatpush1.bf16.msra.mxu1 %v21879_v48 }
0x1412   : > { %6773 = vmatprep.subr.bf16.mxu1 %v22979_v1 }
0x1415   : > { %6774 = vmatpush1.bf16.msra.mxu1 %v21882_v5 }
0x1416   : > { %6775 = vmatprep.subr.bf16.mxu1 %v22979_v1 }
0x1419   : > { %6776 = vmatpush1.bf16.msra.mxu1 %v21883_v6 }
0x141a   : > { %7054 = vmatprep.subr.bf16.mxu1 %v22979_v1 }
0x141c   : > { %6790 = vmatmul.mubr.bf16.vlgmr.msra.gmra.mrb[100].mxu1 %v23204_v44 }
0x141d   : > { %7055 = vmatpush1.bf16.msra.mxu1 %v21886_v7  ;;  %18954 = vmatprep.mubr.msk.bf16.mxu1 %vm792_vm0, %v23199_v42 }
0x141e   : > { %7056 = vmatprep.subr.bf16.mxu1 %v22979_v1 }
0x1421   : > { %7057 = vmatpush1.bf16.msra.mxu1 %v21889_v8 }
0x1422   : > { %7058 = vmatprep.subr.bf16.mxu1 %v22979_v1 }
0x1425   : > { %7059 = vmatpush1.bf16.msra.mxu1 %v21892_v53 }
0x1426   : > { %7060 = vmatprep.subr.bf16.mxu1 %v22979_v1 }
0x1429   : > { %7061 = vmatpush1.bf16.msra.mxu1 %v21895_v2 }
0x142a   : > { %7062 = vmatprep.subr.bf16.mxu1 %v22979_v1 }
0x142d   : > { %7063 = vmatpush1.bf16.msra.mxu1 %v21898_v55 }
0x142e   : > { %7064 = vmatprep.subr.bf16.mxu1 %v22979_v1 }
0x1431   : > { %7065 = vmatpush1.bf16.msra.mxu1 %v21901_v10 }
0x1432   : > { %7066 = vmatprep.subr.bf16.mxu1 %v22979_v1 }
0x1435   : > { %7067 = vmatpush1.bf16.msra.mxu1 %v21904_v11 }
0x1436   : > { %7068 = vmatprep.subr.bf16.mxu1 %v22979_v1 }
0x1439   : > { %7069 = vmatpush1.bf16.msra.mxu1 %v21907_v12 }
0x143a   : > { %7070 = vmatprep.subr.bf16.mxu1 %v22979_v1 }
0x143d   : > { %7071 = vmatpush1.bf16.msra.mxu1 %v21908_v13 }
0x143e   : > { %7072 = vmatprep.subr.bf16.mxu1 %v22979_v1 }
0x1441   : > { %7073 = vmatpush1.bf16.msra.mxu1 %v21909_v14 }
0x1442   : > { %7351 = vmatprep.subr.bf16.mxu1 %v22979_v1 }
0x1444   : > { %7087 = vmatmul.mubr.bf16.vlgmr.msra.gmra.mrb[104].mxu1 %v23204_v44 }
0x1445   : > { %19035 = vmatprep.mubr.msk.bf16.mxu1 %vm792_vm0, %v23199_v42  ;;  %7352 = vmatpush1.bf16.msra.mxu1 %v21912_v22 }
0x1446   : > { %7353 = vmatprep.subr.bf16.mxu1 %v22979_v1 }
0x1449   : > { %7354 = vmatpush1.bf16.msra.mxu1 %v21915_v25 }
0x144a   : > { %7355 = vmatprep.subr.bf16.mxu1 %v22979_v1 }
0x144d   : > { %7356 = vmatpush1.bf16.msra.mxu1 %v21918_v28 }
0x144e   : > { %7357 = vmatprep.subr.bf16.mxu1 %v22979_v1 }
0x1451   : > { %7358 = vmatpush1.bf16.msra.mxu1 %v21921_v32 }
0x1452   : > { %7359 = vmatprep.subr.bf16.mxu1 %v22979_v1 }
0x1455   : > { %7360 = vmatpush1.bf16.msra.mxu1 %v21924_v37 }
0x1456   : > { %7361 = vmatprep.subr.bf16.mxu1 %v22979_v1 }
0x1459   : > { %7362 = vmatpush1.bf16.msra.mxu1 %v21927_v46 }
0x145a   : > { %7363 = vmatprep.subr.bf16.mxu1 %v22979_v1 }
0x145d   : > { %7364 = vmatpush1.bf16.msra.mxu1 %v21930_v49 }
0x145e   : > { %7365 = vmatprep.subr.bf16.mxu1 %v22979_v1 }
0x1461   : > { %7366 = vmatpush1.bf16.msra.mxu1 %v21933_v54 }
0x1462   : > { %7367 = vmatprep.subr.bf16.mxu1 %v22979_v1 }
0x1465   : > { %7368 = vmatpush1.bf16.msra.mxu1 %v21934_v39  ;;  %v21938_v39 = vld [vmem:[%s29109_s7 + $0x284] ss:$16 sps:$4 sm:$0xff]  }
0x1466   : > { %7369 = vmatprep.subr.bf16.mxu1 %v22979_v1 }
0x1469   : > { %7370 = vmatpush1.bf16.msra.mxu1 %v21935_v45 }
0x146c   : > { %7384 = vmatmul.mubr.bf16.vlgmr.msra.gmra.mrb[108].mxu1 %v23204_v44 }
0x146d   : > { %7935 = vmatprep.mubr.bf16.mxu1 %v23197_v41 }
0x14b7   : > { %v6448_v3 = vpop.f32.mrb[92].mxu1 }
0x14b8   : > { %v25213_v59 = vadd.f32 %v6448_v3, %v24846_v19  ;;  %v6450_v4 = vpop.f32.mrb[93].mxu1  ;;  %v18846_v19 = vld [vmem:[%s29104_s2 + $0x5] ss:$0 sm:$0xff] }
0x14b9   : > { %v25216_v48 = vadd.f32 %v6450_v4, %v24849_v29  ;;  %v6452_v5 = vpop.f32.mrb[94].mxu1  ;;  %v6752_v11 = vadd.f32 %v25117_v16, %v18846_v19  ;;  %v21947_v19 = vld [vmem:[%s29109_s7 + $0x2e4] ss:$16 sps:$4 sm:$0xff]  }
0x14ba   : > { %v6453_v6 = vpop.f32.mrb[95].mxu1  ;;  %v21936_v5 = vld [vmem:[%s29109_s7 + $0x280] ss:$16 sps:$4 sm:$0xff]  }
0x14c7   : > { %v6489_v7 = vpop.f32.mrb[96].mxu1 }
0x14c8   : > { %v25219_v8 = vadd.f32 %v6489_v7, %v24852_v0  ;;  %v6491_v53 = vpop.f32.mrb[97].mxu1  ;;  %v18927_v0 = vld [vmem:[%s29106_s4 + $0x5] ss:$0 sm:$0xff] }
0x14c9   : > { %v25222_v2 = vadd.f32 %v6491_v53, %v24855_v52  ;;  %v6493_v55 = vpop.f32.mrb[98].mxu1  ;;  %v7049_v9 = vadd.f32 %v20960_v61, %v18927_v0  ;;  %v21941_v7 = vld [vmem:[%s29109_s7 + $0x2a4] ss:$16 sps:$4 sm:$0xff]   ;;  %v21939_v53 = vld [vmem:[%s29109_s7 + $0x2a0] ss:$16 sps:$4 sm:$0xff]  }
0x14ca   : > { %v6494_v10 = vpop.f32.mrb[99].mxu1  ;;  %v21944_v55 = vld [vmem:[%s29109_s7 + $0x2c4] ss:$16 sps:$4 sm:$0xff]  }
0x14cb   : > { %v21942_v10 = vld [vmem:[%s29109_s7 + $0x2c0] ss:$16 sps:$4 sm:$0xff]  }
0x14cc   : > { %v21967_v0 = vld [vmem:[%s29123_s28 + $0x530] sm:$0xff]  }
0x14d4   : > { %v20980_v25 = vpop.f32.mrb[108].mxu0 }
0x14d5   : > { %v20981_v26 = vpop.f32.mrb[109].mxu0 }
0x14d6   : > { %v20982_v27 = vadd.f32 %v20981_v26, %v20980_v25  ;;  %v20983_v28 = vpop.f32.mrb[110].mxu0  ;;  %v21982_v25 = vld [vmem:[%s29123_s28 + $0x558] sm:$0xff]  }
0x14d7   : > { %v20984_v30 = vpop.f32.mrb[111].mxu0  ;;  %v21983_v26 = vld [vmem:[%s29123_s28 + $0x518] sm:$0xff]   ;;  %v21987_v28 = vld [vmem:[%s29105_s3 + $0x4e0] sm:$0xff]  }
0x14d8   : > { %v7346_v32 = vadd.f32 %v20982_v27, %v19008_v31  ;;  %v21986_v27 = vld [vmem:[%s29105_s3 + $0x520] sm:$0xff]   ;;  %v21989_v30 = vld [vmem:[%s29105_s3 + $0x528] sm:$0xff]  }
0x14d9   : > { %v21990_v31 = vld [vmem:[%s29105_s3 + $0x4e8] sm:$0xff]  }
0x14ef   : > { %v6791_v29 = vpop.f32.mrb[100].mxu1 }
0x14f0   : > { %v6792_v12 = vadd.f32 %v6791_v29, %v6752_v11  ;;  %v6793_v13 = vpop.f32.mrb[101].mxu1  ;;  %v21945_v11 = vld [vmem:[%s29109_s7 + $0x2e0] ss:$16 sps:$4 sm:$0xff]   ;;  %v21950_v29 = vld [vmem:[%s29109_s7 + $0x28c] ss:$16 sps:$4 sm:$0xff]  }
0x14f1   : > { %v6794_v14 = vpop.f32.mrb[102].mxu1  ;;  %v21962_v13 = vld [vmem:[%s29123_s28 + $0x4e0] sm:$0xff]  }
0x14f2   : > { %v6795_v15 = vpop.f32.mrb[103].mxu1  ;;  %v7391_v16 = vpack.c.bf16 %v6792_v12, %v6792_v12  ;;  %v21961_v12 = vld [vmem:[%s29123_s28 + $0x520] sm:$0xff]   ;;  %v21964_v14 = vld [vmem:[%s29123_s28 + $0x528] sm:$0xff]  }
0x14f3   : > { %20990 = vmatprep.subr.bf16.mxu1 %v21961_v12  ;;  %v21965_v15 = vld [vmem:[%s29123_s28 + $0x4e8] sm:$0xff]   ;;  %v21984_v12 = vld [vmem:[%s29123_s28 + $0x5a0] sm:$0xff]  }
0x14f4   : > { %20991 = vmatpush3.bf16.msra.mxu1 %v21962_v13  ;;  %v21985_v13 = vld [vmem:[%s29123_s28 + $0x5a8] sm:$0xff]  }
0x14f5   : > { %20992 = vmatprep.subr.bf16.mxu1 %v21964_v14  ;;  %v21988_v14 = vld [vmem:[%s29105_s3 + $0x560] sm:$0xff]  }
0x14f8   : > { %20993 = vmatpush3.bf16.msra.mxu1 %v21965_v15  ;;  %v21991_v15 = vld [vmem:[%s29105_s3 + $0x568] sm:$0xff]  }
0x14f9   : > { %20994 = vmatprep.subr.bf16.mxu1 %v21967_v0  ;;  %v21994_v0 = vld [vmem:[%s29105_s3 + $0x570] sm:$0xff]  }
0x1517   : > { %v7088_v52 = vpop.f32.mrb[104].mxu1 }
0x1518   : > { %v7089_v17 = vadd.f32 %v7088_v52, %v7049_v9  ;;  %v7090_v18 = vpop.f32.mrb[105].mxu1  ;;  %v21968_v9 = vld [vmem:[%s29123_s28 + $0x4f0] sm:$0xff]   ;;  %v21970_v52 = vld [vmem:[%s29123_s28 + $0x538] sm:$0xff]  }
0x1519   : > { %v7091_v20 = vpop.f32.mrb[106].mxu1  ;;  %20995 = vmatpush3.bf16.msra.mxu1 %v21968_v9  ;;  %v21973_v18 = vld [vmem:[%s29123_s28 + $0x540] sm:$0xff]   ;;  %v21997_v9 = vld [vmem:[%s29105_s3 + $0x578] sm:$0xff]  }
0x151a   : > { %v7392_v21 = vpack.c.bf16 %v7089_v17, %v7089_v17  ;;  %v7092_v22 = vpop.f32.mrb[107].mxu1  ;;  %v21971_v17 = vld [vmem:[%s29123_s28 + $0x4f8] sm:$0xff]   ;;  %20996 = vmatprep.subr.bf16.mxu1 %v21970_v52  ;;  %v21974_v20 = vld [vmem:[%s29123_s28 + $0x500] sm:$0xff]  }
0x151b   : > { %v21977_v22 = vld [vmem:[%s29123_s28 + $0x508] sm:$0xff]   ;;  %v22000_v52 = vld [vmem:[%s29105_s3 + $0x580] sm:$0xff]  }
0x151c   : > { %v7397_v24 = vsel %vm1468_vm2, %v7392_v21, 0  ;;  %v21976_v21 = vld [vmem:[%s29123_s28 + $0x548] sm:$0xff]  }
0x151d   : > { %21191 = vmatpush3.bf16.xpose.msra.mxu0 %v7397_v24  ;;  %20997 = vmatpush3.bf16.msra.mxu1 %v21971_v17  ;;  %v21979_v24 = vld [vmem:[%s29123_s28 + $0x550] sm:$0xff]   ;;  %v22003_v17 = vld [vmem:[%s29105_s3 + $0x588] sm:$0xff]  }
0x151e   : > { %21196 = vmatprep.subr.bf16.mxu0 %v22981_v33  ;;  %20998 = vmatprep.subr.bf16.mxu1 %v21973_v18  ;;  %v22006_v18 = vld [vmem:[%s29105_s3 + $0x590] sm:$0xff]  }
0x1521   : > { %20999 = vmatpush3.bf16.msra.mxu1 %v21974_v20  ;;  %v22009_v20 = vld [vmem:[%s29105_s3 + $0x598] sm:$0xff]  }
0x1522   : > { %21000 = vmatprep.subr.bf16.mxu1 %v21976_v21  ;;  %v22010_v21 = vld [vmem:[%s29105_s3 + $0x5a0] sm:$0xff]  }
0x1524   : > { %21193 = vmatmul.mubr.msk.bf16.vlgmr.msra.gmra.mrb[112].mxu0 %vm1468_vm2, %v7391_v16  ;;  %v21980_v16 = vld [vmem:[%s29123_s28 + $0x510] sm:$0xff]  }
0x1525   : > { %21198 = vmatprep.mubr.msk.bf16.mxu0 %vm22982_vm1, %v22981_v33  ;;  %21001 = vmatpush3.bf16.msra.mxu1 %v21977_v22  ;;  %v22011_v22 = vld [vmem:[%s29105_s3 + $0x5a8] sm:$0xff]  }
0x1526   : > { %21002 = vmatprep.subr.bf16.mxu1 %v21979_v24 }
0x1529   : > { %21003 = vmatpush3.bf16.msra.mxu1 %v21980_v16 }
0x152a   : > { %21004 = vmatprep.subr.bf16.mxu1 %v21982_v25 }
0x152d   : > { %21005 = vmatpush3.bf16.msra.mxu1 %v21983_v26 }
0x152e   : > { %21012 = vmatprep.subr.bf16.mxu1 %v21986_v27 }
0x1530   : > { %7936 = vmatmul.mubr.bf16.vlgmr.msra.gmra.mrb[112].mxu1 %v23194_v40 }
0x1531   : > { %8232 = vmatprep.mubr.bf16.mxu1 %v23197_v41  ;;  %21013 = vmatpush3.bf16.msra.mxu1 %v21987_v28  ;;  %v22012_v28 = vld [vmem:[%s29107_s5 + $0x520] sm:$0xff]  }
0x1532   : > { %21014 = vmatprep.subr.bf16.mxu1 %v21989_v30  ;;  %v22013_v30 = vld [vmem:[%s29107_s5 + $0x4e0] sm:$0xff]  }
0x1535   : > { %21015 = vmatpush3.bf16.msra.mxu1 %v21990_v31  ;;  %v22014_v31 = vld [vmem:[%s29107_s5 + $0x560] sm:$0xff]  }
0x153f   : > { %v7385_v35 = vpop.f32.mrb[108].mxu1 }
0x1540   : > { %v7386_v36 = vadd.f32 %v7385_v35, %v7346_v32  ;;  %v7387_v37 = vpop.f32.mrb[109].mxu1  ;;  %v21992_v32 = vld [vmem:[%s29105_s3 + $0x530] sm:$0xff]  }
0x1541   : > { %v7388_v38 = vpop.f32.mrb[110].mxu1  ;;  %v21993_v35 = vld [vmem:[%s29105_s3 + $0x4f0] sm:$0xff]   ;;  %21016 = vmatprep.subr.bf16.mxu1 %v21992_v32  ;;  %v21996_v37 = vld [vmem:[%s29105_s3 + $0x4f8] sm:$0xff]   ;;  %v22015_v32 = vld [vmem:[%s29107_s5 + $0x528] sm:$0xff]  }
0x1542   : > { %v7452_v43 = vpack.c.bf16 %v7386_v36, %v7386_v36  ;;  %v7389_v46 = vpop.f32.mrb[111].mxu1  ;;  %21017 = vmatpush3.bf16.msra.mxu1 %v21993_v35  ;;  %v21995_v36 = vld [vmem:[%s29105_s3 + $0x538] sm:$0xff]   ;;  %v21998_v38 = vld [vmem:[%s29105_s3 + $0x540] sm:$0xff]   ;;  %v22017_v35 = vld [vmem:[%s29107_s5 + $0x568] sm:$0xff]  }
0x1543   : > { %21018 = vmatprep.subr.bf16.mxu1 %v21995_v36  ;;  %v22001_v46 = vld [vmem:[%s29105_s3 + $0x548] sm:$0xff]  }
0x1544   : > { %v7457_v47 = vsel %vm1534_vm3, %v7452_v43, 0  ;;  %v21999_v43 = vld [vmem:[%s29105_s3 + $0x500] sm:$0xff]   ;;  %v22016_v36 = vld [vmem:[%s29107_s5 + $0x4e8] sm:$0xff]  }
0x1545   : > { %21197 = vmatpush3.bf16.msra.mxu0 %v7457_v47  ;;  %v22002_v47 = vld [vmem:[%s29105_s3 + $0x508] sm:$0xff]  }
0x1546   : > { %7600 = vmatprep.subr.bf16.mxu0 %v21938_v39  ;;  %21019 = vmatpush3.bf16.msra.mxu1 %v21996_v37  ;;  %v21951_v39 = vld [vmem:[%s29109_s7 + $0x2a8] ss:$16 sps:$4 sm:$0xff]   ;;  %v22018_v37 = vld [vmem:[%s29107_s5 + $0x530] sm:$0xff]  }
0x1547   : > { %21020 = vmatprep.subr.bf16.mxu1 %v21998_v38  ;;  %v22020_v38 = vld [vmem:[%s29107_s5 + $0x570] sm:$0xff]  }
0x154a   : > { %21021 = vmatpush3.bf16.msra.mxu1 %v21999_v43  ;;  %v22019_v43 = vld [vmem:[%s29107_s5 + $0x4f0] sm:$0xff]  }
0x154b   : > { %21022 = vmatprep.subr.bf16.mxu1 %v22001_v46  ;;  %v22021_v46 = vld [vmem:[%s29107_s5 + $0x538] sm:$0xff]  }
0x154e   : > { %21023 = vmatpush3.bf16.msra.mxu1 %v22002_v47  ;;  %v22023_v47 = vld [vmem:[%s29107_s5 + $0x578] sm:$0xff]  }
0x15f7   : > { %v7433_v60 = vpop.f32.mrb[112].mxu0 }
0x15f8   : > { %v7439_v49 = vmul.f32 0.13867505, %v7433_v60  ;;  %v21194_v50 = vpop.f32.mrb[113].mxu0  ;;  %v22004_v60 = vld [vmem:[%s29105_s3 + $0x550] sm:$0xff]  }
0x15f9   : > { %v7436_v51 = vpop.f32.mrb[114].mxu0  ;;  %21024 = vmatprep.subr.bf16.mxu1 %v22004_v60  ;;  %v22007_v50 = vld [vmem:[%s29105_s3 + $0x558] sm:$0xff]  }
0x15fa   : > { %v21195_v54 = vpop.f32.mrb[115].mxu0  ;;  %v7440_v56 = vsel %vm1516_vm4, %v7439_v49, -inf  ;;  %v22008_v51 = vld [vmem:[%s29105_s3 + $0x518] sm:$0xff]  }
0x15fb   : > { %7441 = vmax.xlane.f32.xlu0 %v7440_v56  ;;  %v21948_v56 = vld [vmem:[%s29109_s7 + $0x288] ss:$16 sps:$4 sm:$0xff]  }
0x15fc   : > { %v22022_v60 = vld [vmem:[%s29107_s5 + $0x4f8] sm:$0xff]  }
0x1603   : > { %v21006_v24 = vpop.f32.mrb[112].mxu1 }
0x1604   : > { %v21007_v16 = vpop.f32.mrb[113].mxu1 }
0x1605   : > { %v25484_v25 = vadd.f32 %v21007_v16, %v21006_v24  ;;  %v21009_v26 = vpop.f32.mrb[114].mxu1 }
0x1606   : > { %v21010_v27 = vpop.f32.mrb[115].mxu1 }
0x1688   : > { %v7442_v57 = vpop.xlane.xlu0 %7441 }
0x1689   : > { %v7443_v58 = vsub.f32 %v7439_v49, %v7442_v57  ;;  %v22005_v49 = vld [vmem:[%s29105_s3 + $0x510] sm:$0xff]  }
0x168a   : > { %21025 = vmatpush3.bf16.msra.mxu1 %v22005_v49  ;;  %v22024_v49 = vld [vmem:[%s29107_s5 + $0x540] sm:$0xff]  }
0x168b   : > { %v7444_v61 = vmul.f32 1.442695, %v7443_v58  ;;  %21026 = vmatprep.subr.bf16.mxu1 %v22007_v50  ;;  %v22026_v50 = vld [vmem:[%s29107_s5 + $0x580] sm:$0xff]  }
0x168d   : > { %22952 = vpow2.f32 %v7444_v61  ;;  %v21953_v61 = vld [vmem:[%s29109_s7 + $0x2ac] ss:$16 sps:$4 sm:$0xff]  }
0x168e   : > { %21027 = vmatpush3.bf16.msra.mxu1 %v22008_v51  ;;  %v22025_v51 = vld [vmem:[%s29107_s5 + $0x500] sm:$0xff]  }
0x168f   : > { %21034 = vmatprep.subr.bf16.mxu1 %v22012_v28 }
0x1691   : > { %8233 = vmatmul.mubr.bf16.vlgmr.msra.gmra.mrb[116].mxu1 %v23194_v40 }
0x1692   : > { %8529 = vmatprep.mubr.bf16.mxu1 %v23197_v41  ;;  %21035 = vmatpush3.bf16.msra.mxu1 %v22013_v30 }
0x1693   : > { %21036 = vmatprep.subr.bf16.mxu1 %v22015_v32 }
0x1696   : > { %21037 = vmatpush3.bf16.msra.mxu1 %v22016_v36 }
0x1697   : > { %v22953_v62 = vpop.eup %22952  ;;  %21038 = vmatprep.subr.bf16.mxu1 %v22018_v37 }
0x1698   : > { %v7446_v63 = vsel %vm1516_vm4, %v22953_v62, 0.0 }
0x1699   : > { %7447 = vadd.xlane.f32.xlu1 %v7446_v63 }
0x169a   : > { %21039 = vmatpush3.bf16.msra.mxu1 %v22019_v43 }
0x169b   : > { %21040 = vmatprep.subr.bf16.mxu1 %v22021_v46  ;;  %v19287_v46 = vld [vmem:[%s29108_s6 + $0x6] ss:$0 sm:$0xff] }
0x169e   : > { %21041 = vmatpush3.bf16.msra.mxu1 %v22022_v60 }
0x169f   : > { %21042 = vmatprep.subr.bf16.mxu1 %v22024_v49 }
0x16a2   : > { %21043 = vmatpush3.bf16.msra.mxu1 %v22025_v51 }
0x1726   : > { %v7448_v45 = vpop.xlane.xlu1 %7447 }
0x1727   : > { %22954 = vrcp.f32 %v7448_v45  ;;  %v21956_v45 = vld [vmem:[%s29109_s7 + $0x2cc] ss:$16 sps:$4 sm:$0xff]  }
0x1731   : > { %v22955_v3 = vpop.eup %22954 }
0x1732   : > { %v7450_v4 = vmul.f32 %v22955_v3, %v22953_v62  ;;  %v21954_v3 = vld [vmem:[%s29109_s7 + $0x2c8] ss:$16 sps:$4 sm:$0xff]  }
0x1734   : > { %v7451_v6 = vpack.c.bf16 %v7450_v4, %v7450_v4  ;;  %v21959_v4 = vld [vmem:[%s29109_s7 + $0x2ec] ss:$16 sps:$4 sm:$0xff]  }
0x1736   : > { %21199 = vmatmul.mubr.msk.bf16.vlgmr.msra.gmra.mrb[116].mxu0 %vm1530_vm5, %v7451_v6  ;;  %v21960_v6 = vld [vmem:[%s29123_s28 + $0x560] sm:$0xff]  }
0x1737   : > { %7601 = vmatpush1.bf16.msra.mxu0 %v21936_v5  ;;  %7632 = vmatprep.mubr.bf16.mxu0 %v22979_v1  ;;  %v21957_v5 = vld [vmem:[%s29109_s7 + $0x2e8] ss:$16 sps:$4 sm:$0xff]  }
0x1738   : > { %7602 = vmatprep.subr.bf16.mxu0 %v21941_v7  ;;  %v21963_v7 = vld [vmem:[%s29123_s28 + $0x568] sm:$0xff]  }
0x173b   : > { %7603 = vmatpush1.bf16.msra.mxu0 %v21939_v53  ;;  %v21966_v53 = vld [vmem:[%s29123_s28 + $0x570] sm:$0xff]  }
0x173c   : > { %7604 = vmatprep.subr.bf16.mxu0 %v21944_v55  ;;  %v21969_v55 = vld [vmem:[%s29123_s28 + $0x578] sm:$0xff]  }
0x173f   : > { %7605 = vmatpush1.bf16.msra.mxu0 %v21942_v10  ;;  %v21972_v10 = vld [vmem:[%s29123_s28 + $0x580] sm:$0xff]  }
0x1740   : > { %7606 = vmatprep.subr.bf16.mxu0 %v21947_v19  ;;  %v21975_v19 = vld [vmem:[%s29123_s28 + $0x588] sm:$0xff]  }
0x1743   : > { %7607 = vmatpush1.bf16.msra.mxu0 %v21945_v11  ;;  %v21978_v11 = vld [vmem:[%s29123_s28 + $0x590] sm:$0xff]  }
0x1744   : > { %7641 = vmatprep.subr.bf16.mxu0 %v21950_v29  ;;  %v21981_v29 = vld [vmem:[%s29123_s28 + $0x598] sm:$0xff]  }
0x1809   : > { %v7493_v54 = vpop.f32.mrb[116].mxu0 }
0x180a   : > { %v7499_v57 = vpack.c.bf16 %v7493_v54, %v7493_v54  ;;  %v21200_v58 = vpop.f32.mrb[117].mxu0  ;;  %v22027_v54 = vld [vmem:[%s29107_s5 + $0x548] sm:$0xff]  }
0x180b   : > { %v7496_v62 = vpop.f32.mrb[118].mxu0  ;;  %21044 = vmatprep.subr.bf16.mxu1 %v22027_v54  ;;  %v22030_v58 = vld [vmem:[%s29107_s5 + $0x550] sm:$0xff]  }
0x180c   : > { %v21201_v63 = vpop.f32.mrb[119].mxu0  ;;  %19070 = vmatmul.mubr.msk.bf16.vlgmr.msra.gmra.mrb[120].mxu0 %vm1468_vm2, %v7499_v57  ;;  %v22031_v62 = vld [vmem:[%s29107_s5 + $0x510] sm:$0xff]  }
0x180d   : > { %7642 = vmatpush1.bf16.msra.mxu0 %v21948_v56  ;;  %7673 = vmatprep.mubr.bf16.mxu0 %v22979_v1  ;;  %v22029_v56 = vld [vmem:[%s29107_s5 + $0x588] sm:$0xff]   ;;  %v22033_v63 = vld [vmem:[%s29107_s5 + $0x558] sm:$0xff]  }
0x180e   : > { %7643 = vmatprep.subr.bf16.mxu0 %v21953_v61  ;;  %v22032_v61 = vld [vmem:[%s29107_s5 + $0x590] sm:$0xff]  }
0x1811   : > { %7644 = vmatpush1.bf16.msra.mxu0 %v21951_v39  ;;  %v22035_v39 = vld [vmem:[%s29107_s5 + $0x598] sm:$0xff]  }
0x1812   : > { %7645 = vmatprep.subr.bf16.mxu0 %v21956_v45  ;;  %v22034_v45 = vld [vmem:[%s29107_s5 + $0x518] sm:$0xff]  }
0x1815   : > { %7646 = vmatpush1.bf16.msra.mxu0 %v21954_v3  ;;  %v21028_v3 = vpop.f32.mrb[116].mxu1 }
0x1816   : > { %7647 = vmatprep.subr.bf16.mxu0 %v21959_v4  ;;  %v21029_v4 = vpop.f32.mrb[117].mxu1 }
0x1819   : > { %7648 = vmatpush1.bf16.msra.mxu0 %v21957_v5  ;;  %v21030_v5 = vadd.f32 %v21029_v4, %v21028_v3 }
0x181a   : > { %7943 = vmatprep.subr.bf16.mxu0 %v22979_v1 }
0x181c   : > { %19071 = vmatmul.mubr.msk.bf16.vlgmr.msra.gmra.mrb[124].mxu0 %vm1468_vm2, %v7499_v57  ;;  %v22028_v57 = vld [vmem:[%s29107_s5 + $0x508] sm:$0xff]  }
0x181d   : > { %7944 = vmatpush1.bf16.msra.mxu0 %v21960_v6  ;;  %19152 = vmatprep.mubr.msk.bf16.mxu0 %vm792_vm0, %v23199_v42  ;;  %v21031_v6 = vpop.f32.mrb[118].mxu1 }
0x181e   : > { %7945 = vmatprep.subr.bf16.mxu0 %v22979_v1  ;;  %21045 = vmatpush3.bf16.msra.mxu1 %v22028_v57 }
0x181f   : > { %21046 = vmatprep.subr.bf16.mxu1 %v22030_v58 }
0x1821   : > { %7946 = vmatpush1.bf16.msra.mxu0 %v21963_v7  ;;  %v21032_v7 = vpop.f32.mrb[119].mxu1 }
0x1822   : > { %7947 = vmatprep.subr.bf16.mxu0 %v22979_v1  ;;  %21047 = vmatpush3.bf16.msra.mxu1 %v22031_v62 }
0x1823   : > { %21048 = vmatprep.subr.bf16.mxu1 %v22033_v63 }
0x1825   : > { %7948 = vmatpush1.bf16.msra.mxu0 %v21966_v53  ;;  %v22036_v53 = vld [vmem:[%s29107_s5 + $0x5a0] sm:$0xff]  }
0x1826   : > { %7949 = vmatprep.subr.bf16.mxu0 %v22979_v1  ;;  %21049 = vmatpush3.bf16.msra.mxu1 %v22034_v45 }
0x1827   : > { %21202 = vmatprep.subr.bf16.mxu1 %v22981_v33 }
0x1829   : > { %7950 = vmatpush1.bf16.msra.mxu0 %v21969_v55  ;;  %8530 = vmatmul.mubr.bf16.vlgmr.msra.gmra.mrb[120].mxu1 %v23194_v40  ;;  %v22037_v55 = vld [vmem:[%s29107_s5 + $0x5a8] sm:$0xff]  }
0x182a   : > { %7951 = vmatprep.subr.bf16.mxu0 %v22979_v1  ;;  %21204 = vmatprep.mubr.msk.bf16.mxu1 %vm22982_vm1, %v22981_v33 }
0x182d   : > { %7952 = vmatpush1.bf16.msra.mxu0 %v21972_v10 }
0x182e   : > { %7953 = vmatprep.subr.bf16.mxu0 %v22979_v1 }
0x1831   : > { %7954 = vmatpush1.bf16.msra.mxu0 %v21975_v19 }
0x1832   : > { %7955 = vmatprep.subr.bf16.mxu0 %v22979_v1 }
0x1835   : > { %7956 = vmatpush1.bf16.msra.mxu0 %v21978_v11 }
0x1836   : > { %7957 = vmatprep.subr.bf16.mxu0 %v22979_v1 }
0x1839   : > { %7958 = vmatpush1.bf16.msra.mxu0 %v21981_v29 }
0x183a   : > { %7959 = vmatprep.subr.bf16.mxu0 %v22979_v1 }
0x183d   : > { %7960 = vmatpush1.bf16.msra.mxu0 %v21984_v12 }
0x183e   : > { %7961 = vmatprep.subr.bf16.mxu0 %v22979_v1 }
0x1841   : > { %7962 = vmatpush1.bf16.msra.mxu0 %v21985_v13 }
0x1842   : > { %8240 = vmatprep.subr.bf16.mxu0 %v22979_v1 }
0x1844   : > { %7976 = vmatmul.mubr.bf16.vlgmr.msra.gmra.mrb[128].mxu0 %v23204_v44 }
0x1845   : > { %8241 = vmatpush1.bf16.msra.mxu0 %v21988_v14  ;;  %19233 = vmatprep.mubr.msk.bf16.mxu0 %vm792_vm0, %v23199_v42 }
0x1846   : > { %8242 = vmatprep.subr.bf16.mxu0 %v22979_v1 }
0x1849   : > { %8243 = vmatpush1.bf16.msra.mxu0 %v21991_v15 }
0x184a   : > { %8244 = vmatprep.subr.bf16.mxu0 %v22979_v1 }
0x184d   : > { %8245 = vmatpush1.bf16.msra.mxu0 %v21994_v0 }
0x184e   : > { %8246 = vmatprep.subr.bf16.mxu0 %v22979_v1 }
0x1851   : > { %8247 = vmatpush1.bf16.msra.mxu0 %v21997_v9 }
0x1852   : > { %8248 = vmatprep.subr.bf16.mxu0 %v22979_v1 }
0x1855   : > { %8249 = vmatpush1.bf16.msra.mxu0 %v22000_v52 }
0x1856   : > { %8250 = vmatprep.subr.bf16.mxu0 %v22979_v1 }
0x1859   : > { %8251 = vmatpush1.bf16.msra.mxu0 %v22003_v17 }
0x185a   : > { %8252 = vmatprep.subr.bf16.mxu0 %v22979_v1 }
0x185d   : > { %8253 = vmatpush1.bf16.msra.mxu0 %v22006_v18 }
0x185e   : > { %8254 = vmatprep.subr.bf16.mxu0 %v22979_v1 }
0x1861   : > { %8255 = vmatpush1.bf16.msra.mxu0 %v22009_v20 }
0x1862   : > { %8256 = vmatprep.subr.bf16.mxu0 %v22979_v1 }
0x1865   : > { %8257 = vmatpush1.bf16.msra.mxu0 %v22010_v21 }
0x1866   : > { %8258 = vmatprep.subr.bf16.mxu0 %v22979_v1 }
0x1869   : > { %8259 = vmatpush1.bf16.msra.mxu0 %v22011_v22 }
0x186a   : > { %8537 = vmatprep.subr.bf16.mxu0 %v22979_v1 }
0x186c   : > { %8273 = vmatmul.mubr.bf16.vlgmr.msra.gmra.mrb[132].mxu0 %v23204_v44 }
0x186d   : > { %19314 = vmatprep.mubr.msk.bf16.mxu0 %vm792_vm0, %v23199_v42  ;;  %8538 = vmatpush1.bf16.msra.mxu0 %v22014_v31 }
0x186e   : > { %8539 = vmatprep.subr.bf16.mxu0 %v22979_v1 }
0x1871   : > { %8540 = vmatpush1.bf16.msra.mxu0 %v22017_v35 }
0x1872   : > { %8541 = vmatprep.subr.bf16.mxu0 %v22979_v1 }
0x1875   : > { %8542 = vmatpush1.bf16.msra.mxu0 %v22020_v38 }
0x1876   : > { %8543 = vmatprep.subr.bf16.mxu0 %v22979_v1 }
0x1879   : > { %8544 = vmatpush1.bf16.msra.mxu0 %v22023_v47 }
0x187a   : > { %8545 = vmatprep.subr.bf16.mxu0 %v22979_v1 }
0x187d   : > { %8546 = vmatpush1.bf16.msra.mxu0 %v22026_v50 }
0x187e   : > { %8547 = vmatprep.subr.bf16.mxu0 %v22979_v1 }
0x1881   : > { %8548 = vmatpush1.bf16.msra.mxu0 %v22029_v56 }
0x1882   : > { %8549 = vmatprep.subr.bf16.mxu0 %v22979_v1 }
0x1885   : > { %8550 = vmatpush1.bf16.msra.mxu0 %v22032_v61 }
0x1886   : > { %8551 = vmatprep.subr.bf16.mxu0 %v22979_v1 }
0x1889   : > { %8552 = vmatpush1.bf16.msra.mxu0 %v22035_v39 }
0x188a   : > { %8553 = vmatprep.subr.bf16.mxu0 %v22979_v1 }
0x188d   : > { %8554 = vmatpush1.bf16.msra.mxu0 %v22036_v53  ;;  %v22040_v53 = vld [vmem:[%s29109_s7 + $0x304] ss:$16 sps:$4 sm:$0xff]  }
0x188e   : > { %8555 = vmatprep.subr.bf16.mxu0 %v22979_v1 }
0x1891   : > { %8556 = vmatpush1.bf16.msra.mxu0 %v22037_v55 }
0x1894   : > { %8570 = vmatmul.mubr.bf16.vlgmr.msra.gmra.mrb[136].mxu0 %v23204_v44 }
0x1895   : > { %9121 = vmatprep.mubr.bf16.mxu0 %v23197_v41 }
0x18df   : > { %v7634_v10 = vpop.f32.mrb[120].mxu0 }
0x18e0   : > { %v25580_v19 = vadd.f32 %v7634_v10, %v25213_v59  ;;  %v7636_v11 = vpop.f32.mrb[121].mxu0  ;;  %v19125_v59 = vld [vmem:[%s29104_s2 + $0x6] ss:$0 sm:$0xff] }
0x18e1   : > { %v25583_v29 = vadd.f32 %v7636_v11, %v25216_v48  ;;  %v7638_v12 = vpop.f32.mrb[122].mxu0  ;;  %v7938_v18 = vadd.f32 %v25484_v25, %v19125_v59  ;;  %v22049_v59 = vld [vmem:[%s29109_s7 + $0x364] ss:$16 sps:$4 sm:$0xff]  }
0x18e2   : > { %v7639_v13 = vpop.f32.mrb[123].mxu0  ;;  %v22038_v12 = vld [vmem:[%s29109_s7 + $0x300] ss:$16 sps:$4 sm:$0xff]  }
0x18ef   : > { %v7675_v14 = vpop.f32.mrb[124].mxu0 }
0x18f0   : > { %v25586_v15 = vadd.f32 %v7675_v14, %v25219_v8  ;;  %v7677_v0 = vpop.f32.mrb[125].mxu0  ;;  %v19206_v8 = vld [vmem:[%s29106_s4 + $0x6] ss:$0 sm:$0xff] }
0x18f1   : > { %v25589_v9 = vadd.f32 %v7677_v0, %v25222_v2  ;;  %v7679_v52 = vpop.f32.mrb[126].mxu0  ;;  %v8235_v16 = vadd.f32 %v21030_v5, %v19206_v8  ;;  %v22043_v14 = vld [vmem:[%s29109_s7 + $0x324] ss:$16 sps:$4 sm:$0xff]   ;;  %v22041_v0 = vld [vmem:[%s29109_s7 + $0x320] ss:$16 sps:$4 sm:$0xff]  }
0x18f2   : > { %v7680_v17 = vpop.f32.mrb[127].mxu0  ;;  %v22046_v52 = vld [vmem:[%s29109_s7 + $0x344] ss:$16 sps:$4 sm:$0xff]  }
0x18f3   : > { %v22044_v17 = vld [vmem:[%s29109_s7 + $0x340] ss:$16 sps:$4 sm:$0xff]  }
0x18f4   : > { %v22069_v8 = vld [vmem:[%s29123_s28 + $0x600] sm:$0xff]  }
0x18fc   : > { %v21050_v35 = vpop.f32.mrb[120].mxu1 }
0x18fd   : > { %v21051_v36 = vpop.f32.mrb[121].mxu1 }
0x18fe   : > { %v21052_v37 = vadd.f32 %v21051_v36, %v21050_v35  ;;  %v21053_v38 = vpop.f32.mrb[122].mxu1  ;;  %v22084_v35 = vld [vmem:[%s29123_s28 + $0x628] sm:$0xff]  }
0x18ff   : > { %v21054_v43 = vpop.f32.mrb[123].mxu1  ;;  %v22085_v36 = vld [vmem:[%s29123_s28 + $0x5e8] sm:$0xff]   ;;  %v22089_v38 = vld [vmem:[%s29105_s3 + $0x5b0] sm:$0xff]  }
0x1900   : > { %v8532_v47 = vadd.f32 %v21052_v37, %v19287_v46  ;;  %v22088_v37 = vld [vmem:[%s29105_s3 + $0x5f0] sm:$0xff]   ;;  %v22091_v43 = vld [vmem:[%s29105_s3 + $0x5f8] sm:$0xff]  }
0x1901   : > { %v22092_v46 = vld [vmem:[%s29105_s3 + $0x5b8] sm:$0xff]  }
0x1917   : > { %v7977_v48 = vpop.f32.mrb[128].mxu0 }
0x1918   : > { %v7978_v20 = vadd.f32 %v7977_v48, %v7938_v18  ;;  %v7979_v21 = vpop.f32.mrb[129].mxu0  ;;  %v22047_v18 = vld [vmem:[%s29109_s7 + $0x360] ss:$16 sps:$4 sm:$0xff]   ;;  %v22052_v48 = vld [vmem:[%s29109_s7 + $0x30c] ss:$16 sps:$4 sm:$0xff]  }
0x1919   : > { %v7980_v22 = vpop.f32.mrb[130].mxu0  ;;  %v22064_v21 = vld [vmem:[%s29123_s28 + $0x5b0] sm:$0xff]  }
0x191a   : > { %v7981_v24 = vpop.f32.mrb[131].mxu0  ;;  %v8577_v25 = vpack.c.bf16 %v7978_v20, %v7978_v20  ;;  %v22063_v20 = vld [vmem:[%s29123_s28 + $0x5f0] sm:$0xff]   ;;  %v22066_v22 = vld [vmem:[%s29123_s28 + $0x5f8] sm:$0xff]  }
0x191b   : > { %21060 = vmatprep.subr.bf16.mxu0 %v22063_v20  ;;  %v22067_v24 = vld [vmem:[%s29123_s28 + $0x5b8] sm:$0xff]  }
0x191c   : > { %21061 = vmatpush3.bf16.msra.mxu0 %v22064_v21  ;;  %v22087_v20 = vld [vmem:[%s29123_s28 + $0x678] sm:$0xff]   ;;  %v22090_v21 = vld [vmem:[%s29105_s3 + $0x630] sm:$0xff]  }
0x191d   : > { %21062 = vmatprep.subr.bf16.mxu0 %v22066_v22  ;;  %v22093_v22 = vld [vmem:[%s29105_s3 + $0x638] sm:$0xff]  }
0x1920   : > { %21063 = vmatpush3.bf16.msra.mxu0 %v22067_v24  ;;  %v22096_v24 = vld [vmem:[%s29105_s3 + $0x640] sm:$0xff]  }
0x1921   : > { %21064 = vmatprep.subr.bf16.mxu0 %v22069_v8  ;;  %v22099_v8 = vld [vmem:[%s29105_s3 + $0x648] sm:$0xff]  }
0x193f   : > { %v8274_v2 = vpop.f32.mrb[132].mxu0 }
0x1940   : > { %v8275_v26 = vadd.f32 %v8274_v2, %v8235_v16  ;;  %v8276_v27 = vpop.f32.mrb[133].mxu0  ;;  %v22070_v16 = vld [vmem:[%s29123_s28 + $0x5c0] sm:$0xff]   ;;  %v22072_v2 = vld [vmem:[%s29123_s28 + $0x608] sm:$0xff]  }
0x1941   : > { %v8277_v28 = vpop.f32.mrb[134].mxu0  ;;  %21065 = vmatpush3.bf16.msra.mxu0 %v22070_v16  ;;  %v22075_v27 = vld [vmem:[%s29123_s28 + $0x610] sm:$0xff]  }
0x1942   : > { %v8578_v30 = vpack.c.bf16 %v8275_v26, %v8275_v26  ;;  %v8278_v31 = vpop.f32.mrb[135].mxu0  ;;  %v22073_v26 = vld [vmem:[%s29123_s28 + $0x5c8] sm:$0xff]   ;;  %21066 = vmatprep.subr.bf16.mxu0 %v22072_v2  ;;  %v22076_v28 = vld [vmem:[%s29123_s28 + $0x5d0] sm:$0xff]   ;;  %v22105_v2 = vld [vmem:[%s29105_s3 + $0x658] sm:$0xff]  }
0x1943   : > { %v22079_v31 = vld [vmem:[%s29123_s28 + $0x5d8] sm:$0xff]   ;;  %v22102_v16 = vld [vmem:[%s29105_s3 + $0x650] sm:$0xff]  }
0x1944   : > { %v8583_v32 = vsel %vm1468_vm2, %v8578_v30, 0  ;;  %v22078_v30 = vld [vmem:[%s29123_s28 + $0x618] sm:$0xff]  }
0x1945   : > { %21203 = vmatpush3.bf16.xpose.msra.mxu1 %v8583_v32  ;;  %21067 = vmatpush3.bf16.msra.mxu0 %v22073_v26  ;;  %v22081_v32 = vld [vmem:[%s29123_s28 + $0x620] sm:$0xff]  }
0x1946   : > { %21208 = vmatprep.subr.bf16.mxu1 %v22981_v33  ;;  %21068 = vmatprep.subr.bf16.mxu0 %v22075_v27  ;;  %v22108_v26 = vld [vmem:[%s29105_s3 + $0x660] sm:$0xff]   ;;  %v22111_v27 = vld [vmem:[%s29105_s3 + $0x668] sm:$0xff]  }
0x1949   : > { %21069 = vmatpush3.bf16.msra.mxu0 %v22076_v28  ;;  %v22112_v28 = vld [vmem:[%s29105_s3 + $0x670] sm:$0xff]  }
0x194a   : > { %21070 = vmatprep.subr.bf16.mxu0 %v22078_v30  ;;  %v22113_v30 = vld [vmem:[%s29105_s3 + $0x678] sm:$0xff]  }
0x194c   : > { %21205 = vmatmul.mubr.msk.bf16.vlgmr.msra.gmra.mrb[124].mxu1 %vm1468_vm2, %v8577_v25  ;;  %v22082_v25 = vld [vmem:[%s29123_s28 + $0x5e0] sm:$0xff]  }
0x194d   : > { %21210 = vmatprep.mubr.msk.bf16.mxu1 %vm22982_vm1, %v22981_v33  ;;  %21071 = vmatpush3.bf16.msra.mxu0 %v22079_v31 }
0x194e   : > { %21072 = vmatprep.subr.bf16.mxu0 %v22081_v32 }
0x1951   : > { %21073 = vmatpush3.bf16.msra.mxu0 %v22082_v25 }
0x1952   : > { %21074 = vmatprep.subr.bf16.mxu0 %v22084_v35 }
0x1955   : > { %21075 = vmatpush3.bf16.msra.mxu0 %v22085_v36 }
0x1956   : > { %21082 = vmatprep.subr.bf16.mxu0 %v22088_v37  ;;  %v22114_v37 = vld [vmem:[%s29107_s5 + $0x5f0] sm:$0xff]  }
0x1958   : > { %9122 = vmatmul.mubr.bf16.vlgmr.msra.gmra.mrb[140].mxu0 %v23194_v40 }
0x1959   : > { %9418 = vmatprep.mubr.bf16.mxu0 %v23197_v41  ;;  %21083 = vmatpush3.bf16.msra.mxu0 %v22089_v38  ;;  %v22115_v38 = vld [vmem:[%s29107_s5 + $0x5b0] sm:$0xff]  }
0x195a   : > { %21084 = vmatprep.subr.bf16.mxu0 %v22091_v43  ;;  %v22116_v43 = vld [vmem:[%s29107_s5 + $0x630] sm:$0xff]  }
0x195d   : > { %21085 = vmatpush3.bf16.msra.mxu0 %v22092_v46  ;;  %v22119_v46 = vld [vmem:[%s29107_s5 + $0x638] sm:$0xff]  }
0x1967   : > { %v8571_v60 = vpop.f32.mrb[136].mxu0 }
0x1968   : > { %v8572_v49 = vadd.f32 %v8571_v60, %v8532_v47  ;;  %v8573_v50 = vpop.f32.mrb[137].mxu0  ;;  %v22094_v47 = vld [vmem:[%s29105_s3 + $0x600] sm:$0xff]  }
0x1969   : > { %v8574_v51 = vpop.f32.mrb[138].mxu0  ;;  %v22095_v60 = vld [vmem:[%s29105_s3 + $0x5c0] sm:$0xff]   ;;  %21086 = vmatprep.subr.bf16.mxu0 %v22094_v47  ;;  %v22098_v50 = vld [vmem:[%s29105_s3 + $0x5c8] sm:$0xff]   ;;  %v22118_v47 = vld [vmem:[%s29107_s5 + $0x5b8] sm:$0xff]  }
0x196a   : > { %v8638_v54 = vpack.c.bf16 %v8572_v49, %v8572_v49  ;;  %v8575_v56 = vpop.f32.mrb[139].mxu0  ;;  %21087 = vmatpush3.bf16.msra.mxu0 %v22095_v60  ;;  %v22097_v49 = vld [vmem:[%s29105_s3 + $0x608] sm:$0xff]   ;;  %v22100_v51 = vld [vmem:[%s29105_s3 + $0x610] sm:$0xff]   ;;  %v22120_v60 = vld [vmem:[%s29107_s5 + $0x600] sm:$0xff]  }
0x196b   : > { %21088 = vmatprep.subr.bf16.mxu0 %v22097_v49  ;;  %v22103_v56 = vld [vmem:[%s29105_s3 + $0x618] sm:$0xff]   ;;  %v22122_v49 = vld [vmem:[%s29107_s5 + $0x640] sm:$0xff]  }
0x196c   : > { %v8643_v57 = vsel %vm1534_vm3, %v8638_v54, 0  ;;  %v22101_v54 = vld [vmem:[%s29105_s3 + $0x5d0] sm:$0xff]  }
0x196d   : > { %21209 = vmatpush3.bf16.msra.mxu1 %v8643_v57  ;;  %v22104_v57 = vld [vmem:[%s29105_s3 + $0x5d8] sm:$0xff]  }
0x196e   : > { %8786 = vmatprep.subr.bf16.mxu1 %v22040_v53  ;;  %21089 = vmatpush3.bf16.msra.mxu0 %v22098_v50  ;;  %v22058_v53 = vld [vmem:[%s29109_s7 + $0x34c] ss:$16 sps:$4 sm:$0xff]   ;;  %v22121_v50 = vld [vmem:[%s29107_s5 + $0x5c0] sm:$0xff]  }
0x196f   : > { %21090 = vmatprep.subr.bf16.mxu0 %v22100_v51  ;;  %v22123_v51 = vld [vmem:[%s29107_s5 + $0x608] sm:$0xff]  }
0x1972   : > { %21091 = vmatpush3.bf16.msra.mxu0 %v22101_v54  ;;  %v22125_v54 = vld [vmem:[%s29107_s5 + $0x648] sm:$0xff]  }
0x1973   : > { %21092 = vmatprep.subr.bf16.mxu0 %v22103_v56  ;;  %v22124_v56 = vld [vmem:[%s29107_s5 + $0x5c8] sm:$0xff]  }
0x1976   : > { %21093 = vmatpush3.bf16.msra.mxu0 %v22104_v57  ;;  %v22126_v57 = vld [vmem:[%s29107_s5 + $0x610] sm:$0xff]  }
0x1a1f   : > { %v8619_v58 = vpop.f32.mrb[124].mxu1 }
0x1a20   : > { %v8625_v61 = vmul.f32 0.13867505, %v8619_v58  ;;  %v21206_v62 = vpop.f32.mrb[125].mxu1  ;;  %v22106_v58 = vld [vmem:[%s29105_s3 + $0x620] sm:$0xff]  }
0x1a21   : > { %v8622_v63 = vpop.f32.mrb[126].mxu1  ;;  %21094 = vmatprep.subr.bf16.mxu0 %v22106_v58  ;;  %v22109_v62 = vld [vmem:[%s29105_s3 + $0x628] sm:$0xff]   ;;  %v22128_v58 = vld [vmem:[%s29107_s5 + $0x650] sm:$0xff]  }
0x1a22   : > { %v21207_v39 = vpop.f32.mrb[127].mxu1  ;;  %v8626_v45 = vsel %vm1516_vm4, %v8625_v61, -inf  ;;  %v22110_v63 = vld [vmem:[%s29105_s3 + $0x5e8] sm:$0xff]  }
0x1a23   : > { %8627 = vmax.xlane.f32.xlu0 %v8626_v45  ;;  %v22050_v45 = vld [vmem:[%s29109_s7 + $0x308] ss:$16 sps:$4 sm:$0xff]  }
0x1a2b   : > { %v21076_v31 = vpop.f32.mrb[140].mxu0 }
0x1a2c   : > { %v21077_v32 = vpop.f32.mrb[141].mxu0 }
0x1a2d   : > { %v25851_v25 = vadd.f32 %v21077_v32, %v21076_v31  ;;  %v21079_v35 = vpop.f32.mrb[142].mxu0 }
0x1a2e   : > { %v21080_v36 = vpop.f32.mrb[143].mxu0 }
0x1ab0   : > { %v8628_v3 = vpop.xlane.xlu0 %8627 }
0x1ab1   : > { %v8629_v4 = vsub.f32 %v8625_v61, %v8628_v3  ;;  %v22107_v61 = vld [vmem:[%s29105_s3 + $0x5e0] sm:$0xff]  }
0x1ab2   : > { %21095 = vmatpush3.bf16.msra.mxu0 %v22107_v61  ;;  %v22127_v61 = vld [vmem:[%s29107_s5 + $0x5d0] sm:$0xff]  }
0x1ab3   : > { %v8630_v5 = vmul.f32 1.442695, %v8629_v4  ;;  %21096 = vmatprep.subr.bf16.mxu0 %v22109_v62  ;;  %v22129_v62 = vld [vmem:[%s29107_s5 + $0x618] sm:$0xff]  }
0x1ab5   : > { %22956 = vpow2.f32 %v8630_v5  ;;  %v22055_v5 = vld [vmem:[%s29109_s7 + $0x32c] ss:$16 sps:$4 sm:$0xff]  }
0x1ab6   : > { %21097 = vmatpush3.bf16.msra.mxu0 %v22110_v63  ;;  %v22131_v63 = vld [vmem:[%s29107_s5 + $0x658] sm:$0xff]  }
0x1ab7   : > { %21104 = vmatprep.subr.bf16.mxu0 %v22114_v37 }
0x1ab9   : > { %9419 = vmatmul.mubr.bf16.vlgmr.msra.gmra.mrb[144].mxu0 %v23194_v40 }
0x1aba   : > { %9715 = vmatprep.mubr.bf16.mxu0 %v23197_v41  ;;  %v22053_v41 = vld [vmem:[%s29109_s7 + $0x328] ss:$16 sps:$4 sm:$0xff]   ;;  %21105 = vmatpush3.bf16.msra.mxu0 %v22115_v38 }
0x1abf   : > { %v22957_v6 = vpop.eup %22956 }
0x1ac0   : > { %v8632_v7 = vsel %vm1516_vm4, %v22957_v6, 0.0 }
0x1ac1   : > { %8633 = vadd.xlane.f32.xlu1 %v8632_v7 }
0x1b4e   : > { %v8634_v55 = vpop.xlane.xlu1 %8633 }
0x1b4f   : > { %22958 = vrcp.f32 %v8634_v55  ;;  %v22056_v55 = vld [vmem:[%s29109_s7 + $0x348] ss:$16 sps:$4 sm:$0xff]  }
0x1b59   : > { %v22959_v10 = vpop.eup %22958 }
0x1b5a   : > { %v8636_v11 = vmul.f32 %v22959_v10, %v22957_v6  ;;  %v22061_v10 = vld [vmem:[%s29109_s7 + $0x36c] ss:$16 sps:$4 sm:$0xff]  }
0x1b5c   : > { %v8637_v13 = vpack.c.bf16 %v8636_v11, %v8636_v11  ;;  %v22059_v11 = vld [vmem:[%s29109_s7 + $0x368] ss:$16 sps:$4 sm:$0xff]  }
0x1b5e   : > { %21211 = vmatmul.mubr.msk.bf16.vlgmr.msra.gmra.mrb[128].mxu1 %vm1530_vm5, %v8637_v13  ;;  %v22065_v13 = vld [vmem:[%s29123_s28 + $0x638] sm:$0xff]  }
0x1b5f   : > { %8787 = vmatpush1.bf16.msra.mxu1 %v22038_v12  ;;  %8818 = vmatprep.mubr.bf16.mxu1 %v22979_v1  ;;  %v22062_v12 = vld [vmem:[%s29123_s28 + $0x630] sm:$0xff]  }
0x1b60   : > { %8788 = vmatprep.subr.bf16.mxu1 %v22043_v14  ;;  %v22068_v14 = vld [vmem:[%s29123_s28 + $0x640] sm:$0xff]  }
0x1b63   : > { %8789 = vmatpush1.bf16.msra.mxu1 %v22041_v0  ;;  %v22071_v0 = vld [vmem:[%s29123_s28 + $0x648] sm:$0xff]  }
0x1b64   : > { %8790 = vmatprep.subr.bf16.mxu1 %v22046_v52  ;;  %v22074_v52 = vld [vmem:[%s29123_s28 + $0x650] sm:$0xff]  }
0x1b67   : > { %8791 = vmatpush1.bf16.msra.mxu1 %v22044_v17  ;;  %v22077_v17 = vld [vmem:[%s29123_s28 + $0x658] sm:$0xff]  }
0x1b68   : > { %8792 = vmatprep.subr.bf16.mxu1 %v22049_v59  ;;  %v22080_v59 = vld [vmem:[%s29123_s28 + $0x660] sm:$0xff]  }
0x1b6b   : > { %8793 = vmatpush1.bf16.msra.mxu1 %v22047_v18  ;;  %v22083_v18 = vld [vmem:[%s29123_s28 + $0x668] sm:$0xff]  }
0x1b6c   : > { %8827 = vmatprep.subr.bf16.mxu1 %v22052_v48  ;;  %v22086_v48 = vld [vmem:[%s29123_s28 + $0x670] sm:$0xff]  }
0x1c31   : > { %v8679_v39 = vpop.f32.mrb[128].mxu1 }
0x1c32   : > { %v8685_v3 = vpack.c.bf16 %v8679_v39, %v8679_v39  ;;  %v21212_v4 = vpop.f32.mrb[129].mxu1  ;;  %v22130_v39 = vld [vmem:[%s29107_s5 + $0x5d8] sm:$0xff]  }
0x1c33   : > { %v8682_v6 = vpop.f32.mrb[130].mxu1  ;;  %v22133_v4 = vld [vmem:[%s29107_s5 + $0x5e0] sm:$0xff]  }
0x1c34   : > { %v21213_v7 = vpop.f32.mrb[131].mxu1  ;;  %19349 = vmatmul.mubr.msk.bf16.vlgmr.msra.gmra.mrb[132].mxu1 %vm1468_vm2, %v8685_v3  ;;  %v22137_v6 = vld [vmem:[%s29107_s5 + $0x668] sm:$0xff]  }
0x1c35   : > { %8828 = vmatpush1.bf16.msra.mxu1 %v22050_v45  ;;  %8859 = vmatprep.mubr.bf16.mxu1 %v22979_v1  ;;  %v22132_v45 = vld [vmem:[%s29107_s5 + $0x620] sm:$0xff]   ;;  %v22136_v7 = vld [vmem:[%s29107_s5 + $0x5e8] sm:$0xff]  }
0x1c36   : > { %8829 = vmatprep.subr.bf16.mxu1 %v22055_v5  ;;  %v22135_v5 = vld [vmem:[%s29107_s5 + $0x628] sm:$0xff]  }
0x1c39   : > { %8830 = vmatpush1.bf16.msra.mxu1 %v22053_v41  ;;  %v21098_v41 = vpop.f32.mrb[144].mxu0 }
0x1c3a   : > { %8831 = vmatprep.subr.bf16.mxu1 %v22058_v53  ;;  %v21099_v53 = vpop.f32.mrb[145].mxu0 }
0x1c3d   : > { %8832 = vmatpush1.bf16.msra.mxu1 %v22056_v55  ;;  %v21100_v55 = vadd.f32 %v21099_v53, %v21098_v41  ;;  %v22142_v41 = vld [vmem:[%s29109_s7 + $0x384] ss:$16 sps:$4 sm:$0xff]  }
0x1c3e   : > { %8833 = vmatprep.subr.bf16.mxu1 %v22061_v10  ;;  %v21101_v10 = vpop.f32.mrb[146].mxu0 }
0x1c41   : > { %8834 = vmatpush1.bf16.msra.mxu1 %v22059_v11  ;;  %v21102_v11 = vpop.f32.mrb[147].mxu0 }
0x1c42   : > { %9129 = vmatprep.subr.bf16.mxu1 %v22979_v1  ;;  %v22140_v11 = vld [vmem:[%s29109_s7 + $0x380] ss:$16 sps:$4 sm:$0xff]  }
0x1c44   : > { %19350 = vmatmul.mubr.msk.bf16.vlgmr.msra.gmra.mrb[136].mxu1 %vm1468_vm2, %v8685_v3  ;;  %v22134_v3 = vld [vmem:[%s29107_s5 + $0x660] sm:$0xff]  }
0x1c45   : > { %9130 = vmatpush1.bf16.msra.mxu1 %v22062_v12  ;;  %19431 = vmatprep.mubr.msk.bf16.mxu1 %vm792_vm0, %v23199_v42  ;;  %v22138_v12 = vld [vmem:[%s29107_s5 + $0x670] sm:$0xff]  }
0x1c46   : > { %9131 = vmatprep.subr.bf16.mxu1 %v22979_v1 }
0x1c49   : > { %9132 = vmatpush1.bf16.msra.mxu1 %v22065_v13  ;;  %v22139_v13 = vld [vmem:[%s29107_s5 + $0x678] sm:$0xff]  }
0x1c4a   : > { %9133 = vmatprep.subr.bf16.mxu1 %v22979_v1 }
0x1c4d   : > { %9134 = vmatpush1.bf16.msra.mxu1 %v22068_v14 }
0x1c4e   : > { %9135 = vmatprep.subr.bf16.mxu1 %v22979_v1 }
0x1c51   : > { %9136 = vmatpush1.bf16.msra.mxu1 %v22071_v0 }
0x1c52   : > { %9137 = vmatprep.subr.bf16.mxu1 %v22979_v1 }
0x1c55   : > { %9138 = vmatpush1.bf16.msra.mxu1 %v22074_v52 }
0x1c56   : > { %9139 = vmatprep.subr.bf16.mxu1 %v22979_v1 }
0x1c59   : > { %9140 = vmatpush1.bf16.msra.mxu1 %v22077_v17 }
0x1c5a   : > { %9141 = vmatprep.subr.bf16.mxu1 %v22979_v1 }
0x1c5d   : > { %9142 = vmatpush1.bf16.msra.mxu1 %v22080_v59 }
0x1c5e   : > { %9143 = vmatprep.subr.bf16.mxu1 %v22979_v1 }
0x1c61   : > { %9144 = vmatpush1.bf16.msra.mxu1 %v22083_v18 }
0x1c62   : > { %9145 = vmatprep.subr.bf16.mxu1 %v22979_v1 }
0x1c65   : > { %9146 = vmatpush1.bf16.msra.mxu1 %v22086_v48 }
0x1c66   : > { %9147 = vmatprep.subr.bf16.mxu1 %v22979_v1 }
0x1c69   : > { %9148 = vmatpush1.bf16.msra.mxu1 %v22087_v20 }
0x1c6a   : > { %9426 = vmatprep.subr.bf16.mxu1 %v22979_v1 }
0x1c6c   : > { %9162 = vmatmul.mubr.bf16.vlgmr.msra.gmra.mrb[140].mxu1 %v23204_v44 }
0x1c6d   : > { %9427 = vmatpush1.bf16.msra.mxu1 %v22090_v21  ;;  %19512 = vmatprep.mubr.msk.bf16.mxu1 %vm792_vm0, %v23199_v42 }
0x1c6e   : > { %9428 = vmatprep.subr.bf16.mxu1 %v22979_v1 }
0x1c71   : > { %9429 = vmatpush1.bf16.msra.mxu1 %v22093_v22 }
0x1c72   : > { %9430 = vmatprep.subr.bf16.mxu1 %v22979_v1 }
0x1c75   : > { %9431 = vmatpush1.bf16.msra.mxu1 %v22096_v24 }
0x1c76   : > { %9432 = vmatprep.subr.bf16.mxu1 %v22979_v1 }
0x1c79   : > { %9433 = vmatpush1.bf16.msra.mxu1 %v22099_v8 }
0x1c7a   : > { %9434 = vmatprep.subr.bf16.mxu1 %v22979_v1 }
0x1c7d   : > { %9435 = vmatpush1.bf16.msra.mxu1 %v22102_v16 }
0x1c7e   : > { %9436 = vmatprep.subr.bf16.mxu1 %v22979_v1 }
0x1c81   : > { %9437 = vmatpush1.bf16.msra.mxu1 %v22105_v2 }
0x1c82   : > { %9438 = vmatprep.subr.bf16.mxu1 %v22979_v1 }
0x1c85   : > { %9439 = vmatpush1.bf16.msra.mxu1 %v22108_v26 }
0x1c86   : > { %9440 = vmatprep.subr.bf16.mxu1 %v22979_v1 }
0x1c89   : > { %9441 = vmatpush1.bf16.msra.mxu1 %v22111_v27 }
0x1c8a   : > { %9442 = vmatprep.subr.bf16.mxu1 %v22979_v1 }
0x1c8d   : > { %9443 = vmatpush1.bf16.msra.mxu1 %v22112_v28 }
0x1c8e   : > { %9444 = vmatprep.subr.bf16.mxu1 %v22979_v1 }
0x1c91   : > { %9445 = vmatpush1.bf16.msra.mxu1 %v22113_v30 }
0x1c92   : > { %9723 = vmatprep.subr.bf16.mxu1 %v22979_v1 }
0x1c94   : > { %9459 = vmatmul.mubr.bf16.vlgmr.msra.gmra.mrb[144].mxu1 %v23204_v44 }
0x1c95   : > { %19593 = vmatprep.mubr.msk.bf16.mxu1 %vm792_vm0, %v23199_v42  ;;  %v22117_v42 = vld [vmem:[%s29107_s5 + $0x5f8] sm:$0xff]   ;;  %9724 = vmatpush1.bf16.msra.mxu1 %v22116_v43 }
0x1c96   : > { %9725 = vmatprep.subr.bf16.mxu1 %v22979_v1  ;;  %21106 = vmatprep.subr.bf16.mxu0 %v22117_v42 }
0x1c97   : > { %21107 = vmatpush3.bf16.msra.mxu0 %v22118_v47  ;;  %v19566_v47 = vld [vmem:[%s29108_s6 + $0x7] ss:$0 sm:$0xff] }
0x1c98   : > { %21108 = vmatprep.subr.bf16.mxu0 %v22120_v60 }
0x1c99   : > { %9726 = vmatpush1.bf16.msra.mxu1 %v22119_v46 }
0x1c9a   : > { %9727 = vmatprep.subr.bf16.mxu1 %v22979_v1 }
0x1c9b   : > { %21109 = vmatpush3.bf16.msra.mxu0 %v22121_v50 }
0x1c9c   : > { %21110 = vmatprep.subr.bf16.mxu0 %v22123_v51 }
0x1c9d   : > { %9728 = vmatpush1.bf16.msra.mxu1 %v22122_v49 }
0x1c9e   : > { %9729 = vmatprep.subr.bf16.mxu1 %v22979_v1 }
0x1c9f   : > { %21111 = vmatpush3.bf16.msra.mxu0 %v22124_v56 }
0x1ca0   : > { %21112 = vmatprep.subr.bf16.mxu0 %v22126_v57 }
0x1ca1   : > { %9730 = vmatpush1.bf16.msra.mxu1 %v22125_v54 }
0x1ca2   : > { %9731 = vmatprep.subr.bf16.mxu1 %v22979_v1 }
0x1ca3   : > { %21113 = vmatpush3.bf16.msra.mxu0 %v22127_v61 }
0x1ca4   : > { %21114 = vmatprep.subr.bf16.mxu0 %v22129_v62 }
0x1ca5   : > { %9732 = vmatpush1.bf16.msra.mxu1 %v22128_v58 }
0x1ca6   : > { %9733 = vmatprep.subr.bf16.mxu1 %v22979_v1 }
0x1ca7   : > { %21115 = vmatpush3.bf16.msra.mxu0 %v22130_v39 }
0x1ca8   : > { %21116 = vmatprep.subr.bf16.mxu0 %v22132_v45 }
0x1ca9   : > { %9734 = vmatpush1.bf16.msra.mxu1 %v22131_v63 }
0x1caa   : > { %9735 = vmatprep.subr.bf16.mxu1 %v22979_v1 }
0x1cab   : > { %21117 = vmatpush3.bf16.msra.mxu0 %v22133_v4 }
0x1cac   : > { %21118 = vmatprep.subr.bf16.mxu0 %v22135_v5 }
0x1cad   : > { %9736 = vmatpush1.bf16.msra.mxu1 %v22134_v3 }
0x1cae   : > { %9737 = vmatprep.subr.bf16.mxu1 %v22979_v1 }
0x1caf   : > { %21119 = vmatpush3.bf16.msra.mxu0 %v22136_v7 }
0x1cb0   : > { %21214 = vmatprep.subr.bf16.mxu0 %v22981_v33 }
0x1cb1   : > { %9738 = vmatpush1.bf16.msra.mxu1 %v22137_v6 }
0x1cb2   : > { %9739 = vmatprep.subr.bf16.mxu1 %v22979_v1  ;;  %9716 = vmatmul.mubr.bf16.vlgmr.msra.gmra.mrb[148].mxu0 %v23194_v40 }
0x1cb3   : > { %21216 = vmatprep.mubr.msk.bf16.mxu0 %vm22982_vm1, %v22981_v33 }
0x1cb5   : > { %9740 = vmatpush1.bf16.msra.mxu1 %v22138_v12 }
0x1cb6   : > { %9741 = vmatprep.subr.bf16.mxu1 %v22979_v1 }
0x1cb9   : > { %9742 = vmatpush1.bf16.msra.mxu1 %v22139_v13  ;;  %v22145_v13 = vld [vmem:[%s29109_s7 + $0x3a4] ss:$16 sps:$4 sm:$0xff]  }
0x1cbc   : > { %9756 = vmatmul.mubr.bf16.vlgmr.msra.gmra.mrb[148].mxu1 %v23204_v44 }
0x1d07   : > { %v8820_v14 = vpop.f32.mrb[132].mxu1 }
0x1d08   : > { %v25946_v40 = vadd.f32 %v8820_v14, %v25580_v19  ;;  %v8822_v0 = vpop.f32.mrb[133].mxu1  ;;  %v19404_v19 = vld [vmem:[%s29104_s2 + $0x7] ss:$0 sm:$0xff]  ;;  %v22143_v14 = vld [vmem:[%s29109_s7 + $0x3a0] ss:$16 sps:$4 sm:$0xff]  }
0x1d09   : > { %v25949_v52 = vadd.f32 %v8822_v0, %v25583_v29  ;;  %v8824_v17 = vpop.f32.mrb[134].mxu1  ;;  %v9124_v24 = vadd.f32 %v25851_v25, %v19404_v19  ;;  %v22148_v0 = vld [vmem:[%s29109_s7 + $0x3c4] ss:$16 sps:$4 sm:$0xff]  }
0x1d0a   : > { %v8825_v59 = vpop.f32.mrb[135].mxu1  ;;  %v22146_v17 = vld [vmem:[%s29109_s7 + $0x3c0] ss:$16 sps:$4 sm:$0xff]  }
0x1d0b   : > { %v22151_v59 = vld [vmem:[%s29109_s7 + $0x3e4] ss:$16 sps:$4 sm:$0xff]  }
0x1d17   : > { %v8861_v18 = vpop.f32.mrb[136].mxu1 }
0x1d18   : > { %v25952_v48 = vadd.f32 %v8861_v18, %v25586_v15  ;;  %v8863_v20 = vpop.f32.mrb[137].mxu1  ;;  %v19485_v15 = vld [vmem:[%s29106_s4 + $0x7] ss:$0 sm:$0xff]  ;;  %v22149_v18 = vld [vmem:[%s29109_s7 + $0x3e0] ss:$16 sps:$4 sm:$0xff]  }
0x1d19   : > { %v25955_v21 = vadd.f32 %v8863_v20, %v25589_v9  ;;  %v8865_v22 = vpop.f32.mrb[138].mxu1  ;;  %v9421_v27 = vadd.f32 %v21100_v55, %v19485_v15  ;;  %v22154_v20 = vld [vmem:[%s29109_s7 + $0x38c] ss:$16 sps:$4 sm:$0xff]   ;;  %v22158_v15 = vld [vmem:[%s29109_s7 + $0x3c8] ss:$16 sps:$4 sm:$0xff]  }
0x1d1a   : > { %v8866_v44 = vpop.f32.mrb[139].mxu1 }
0x1d1b   : > { %v22152_v44 = vld [vmem:[%s29109_s7 + $0x388] ss:$16 sps:$4 sm:$0xff]  }
0x1d3f   : > { %v9163_v29 = vpop.f32.mrb[140].mxu1 }
0x1d40   : > { %v9164_v8 = vadd.f32 %v9163_v29, %v9124_v24  ;;  %v9165_v16 = vpop.f32.mrb[141].mxu1  ;;  %v22157_v29 = vld [vmem:[%s29109_s7 + $0x3ac] ss:$16 sps:$4 sm:$0xff]  }
0x1d41   : > { %v9166_v2 = vpop.f32.mrb[142].mxu1 }
0x1d42   : > { %v9167_v26 = vpop.f32.mrb[143].mxu1  ;;  %v9763_v25 = vpack.c.bf16 %v9164_v8, %v9164_v8  ;;  %v22155_v2 = vld [vmem:[%s29109_s7 + $0x3a8] ss:$16 sps:$4 sm:$0xff]  }
0x1d43   : > { %v22160_v26 = vld [vmem:[%s29109_s7 + $0x3cc] ss:$16 sps:$4 sm:$0xff]  }
0x1d67   : > { %v9460_v9 = vpop.f32.mrb[144].mxu1 }
0x1d68   : > { %v9461_v28 = vadd.f32 %v9460_v9, %v9421_v27  ;;  %v9462_v30 = vpop.f32.mrb[145].mxu1  ;;  %v22163_v27 = vld [vmem:[%s29109_s7 + $0x3ec] ss:$16 sps:$4 sm:$0xff]   ;;  %v26029_v9 = vsub.s32 0, %v23166_v23 }
0x1d69   : > { %v9463_v31 = vpop.f32.mrb[146].mxu1  ;;  %v26035_v30 = vsub.s32 1, %v23166_v23 }
0x1d6a   : > { %v9764_v32 = vpack.c.bf16 %v9461_v28, %v9461_v28  ;;  %v9464_v35 = vpop.f32.mrb[147].mxu1  ;;  %v10058_v28 = vld [vmem:[%s29110_s8] sm:$0xf] }
0x1d6b   : > { %v10063_v31 = vrot.slane %v10058_v28, %v26029_v9  ;;  %v10067_v35 = vrot.slane %v10058_v28, %v26035_v30 }
0x1d6c   : > { %v9769_v36 = vsel %vm1468_vm2, %v9764_v32, 0 }
0x1d6d   : > { %21215 = vmatpush3.bf16.xpose.msra.mxu0 %v9769_v36 }
0x1d6e   : > { %21220 = vmatprep.subr.bf16.mxu0 %v22981_v33 }
0x1d74   : > { %21217 = vmatmul.mubr.msk.bf16.vlgmr.msra.gmra.mrb[152].mxu0 %vm1468_vm2, %v9763_v25 }
0x1d75   : > { %21222 = vmatprep.mubr.msk.bf16.mxu0 %vm22982_vm1, %v22981_v33 }
0x1d85   : > { %v21120_v37 = vpop.f32.mrb[148].mxu0 }
0x1d86   : > { %v21121_v38 = vpop.f32.mrb[149].mxu0 }
0x1d87   : > { %v21122_v43 = vadd.f32 %v21121_v38, %v21120_v37  ;;  %v21123_v42 = vpop.f32.mrb[150].mxu0 }
0x1d88   : > { %v21124_v46 = vpop.f32.mrb[151].mxu0 }
0x1d89   : > { %v9718_v60 = vadd.f32 %v21122_v43, %v19566_v47 }
0x1d8f   : > { %v9757_v49 = vpop.f32.mrb[148].mxu1 }
0x1d90   : > { %v9758_v50 = vadd.f32 %v9757_v49, %v9718_v60  ;;  %v9759_v51 = vpop.f32.mrb[149].mxu1  ;;  %v26042_v60 = vsub.s32 2, %v23166_v23  ;;  %v26045_v49 = vsub.s32 3, %v23166_v23 }
0x1d91   : > { %v9760_v54 = vpop.f32.mrb[150].mxu1 }
0x1d92   : > { %v9824_v56 = vpack.c.bf16 %v9758_v50, %v9758_v50  ;;  %v9761_v57 = vpop.f32.mrb[151].mxu1  ;;  %v10071_v50 = vrot.slane %v10058_v28, %v26042_v60 }
0x1d94   : > { %v9829_v58 = vsel %vm1534_vm3, %v9824_v56, 0 }
0x1d95   : > { %21221 = vmatpush3.bf16.msra.mxu0 %v9829_v58 }
0x1d96   : > { %9972 = vmatprep.subr.bf16.mxu0 %v22142_v41 }
0x1e47   : > { %v9805_v33 = vpop.f32.mrb[152].mxu0 }
0x1e48   : > { %v9811_v61 = vmul.f32 0.13867505, %v9805_v33  ;;  %v21218_v62 = vpop.f32.mrb[153].mxu0 }
0x1e49   : > { %v9808_v63 = vpop.f32.mrb[154].mxu0 }
0x1e4a   : > { %v21219_v39 = vpop.f32.mrb[155].mxu0  ;;  %v9812_v45 = vsel %vm1516_vm4, %v9811_v61, -inf }
0x1e4b   : > { %9813 = vmax.xlane.f32.xlu0 %v9812_v45 }
0x1ed8   : > { %v9814_v3 = vpop.xlane.xlu0 %9813 }
0x1ed9   : > { %v9815_v4 = vsub.f32 %v9811_v61, %v9814_v3  ;;  %v22968_v3 = vld [vmem:[%s23164_s22] sm:$0xff] }
0x1edb   : > { %v9816_v5 = vmul.f32 1.442695, %v9815_v4 }
0x1edd   : > { %22960 = vpow2.f32 %v9816_v5 }
0x1ee7   : > { %v22961_v6 = vpop.eup %22960 }
0x1ee8   : > { %v9818_v7 = vsel %vm1516_vm4, %v22961_v6, 0.0 }
0x1ee9   : > { %9819 = vadd.xlane.f32.xlu1 %v9818_v7 }
0x1f76   : > { %v9820_v53 = vpop.xlane.xlu1 %9819 }
0x1f77   : > { %22962 = vrcp.f32 %v9820_v53 }
0x1f81   : > { %v22963_v55 = vpop.eup %22962 }
0x1f82   : > { %v9822_v10 = vmul.f32 %v22963_v55, %v22961_v6 }
0x1f84   : > { %v9823_v12 = vpack.c.bf16 %v9822_v10, %v9822_v10 }
0x1f86   : > { %21223 = vmatmul.mubr.msk.bf16.vlgmr.msra.gmra.mrb[156].mxu0 %vm1530_vm5, %v9823_v12 }
0x1f87   : > { %9973 = vmatpush1.bf16.msra.mxu0 %v22140_v11  ;;  %10004 = vmatprep.mubr.bf16.mxu0 %v22979_v1 }
0x1f88   : > { %9974 = vmatprep.subr.bf16.mxu0 %v22145_v13 }
0x1f8b   : > { %9975 = vmatpush1.bf16.msra.mxu0 %v22143_v14  ;;  %v10297_v14 = vld [vmem:[%s29113_s11] sm:$0xff] }
0x1f8c   : > { %9976 = vmatprep.subr.bf16.mxu0 %v22148_v0  ;;  %v10305_v0 = vld [vmem:[%s29113_s11 + $0x40] sm:$0xff] }
0x1f8f   : > { %9977 = vmatpush1.bf16.msra.mxu0 %v22146_v17  ;;  %v10298_v17 = vld [vmem:[%s29113_s11 + $0x8] sm:$0xff] }
0x1f90   : > { %9978 = vmatprep.subr.bf16.mxu0 %v22151_v59  ;;  %v19630_v59 = vcombine.low %v10297_v14, %v10305_v0 }
0x1f93   : > { %9979 = vmatpush1.bf16.msra.mxu0 %v22149_v18  ;;  %v19631_v18 = vcombine.high %v10297_v14, %v10305_v0  ;;  %v10418_v14 = vld [vmem:[%s29113_s11 + $0x3c8] sm:$0xff] }
0x1f94   : > { %10013 = vmatprep.subr.bf16.mxu0 %v22154_v20  ;;  %v10306_v20 = vld [vmem:[%s29113_s11 + $0x48] sm:$0xff] }
0x1f95   : > { %12880 = vmatprep.subr.bf16.mxu1 %v19631_v18 }
0x1f96   : > { %12881 = vmatpush1.bf16.msra.mxu1 %v19630_v59 }
0x2059   : > { %v9865_v22 = vpop.f32.mrb[156].mxu0 }
0x205a   : > { %v9871_v19 = vpack.c.bf16 %v9865_v22, %v9865_v22  ;;  %v21224_v24 = vpop.f32.mrb[157].mxu0  ;;  %v10313_v22 = vld [vmem:[%s29113_s11 + $0x80] sm:$0xff] }
0x205b   : > { %v9868_v8 = vpop.f32.mrb[158].mxu0  ;;  %v19633_v24 = vcombine.high %v10298_v17, %v10306_v20 }
0x205c   : > { %v21225_v16 = vpop.f32.mrb[159].mxu0  ;;  %19628 = vmatmul.mubr.msk.bf16.vlgmr.msra.gmra.mrb[160].mxu0 %vm1468_vm2, %v9871_v19  ;;  %v10314_v8 = vld [vmem:[%s29113_s11 + $0x88] sm:$0xff] }
0x205d   : > { %10014 = vmatpush1.bf16.msra.mxu0 %v22152_v44  ;;  %10045 = vmatprep.mubr.bf16.mxu0 %v22979_v1  ;;  %v22161_v1 = vld [vmem:[%s29109_s7 + $0x3e8] ss:$16 sps:$4 sm:$0xff]   ;;  %v10321_v44 = vld [vmem:[%s29113_s11 + $0xc0] sm:$0xff] }
0x205e   : > { %10015 = vmatprep.subr.bf16.mxu0 %v22157_v29  ;;  %v19647_v29 = vcombine.high %v10313_v22, %v10321_v44  ;;  %v10322_v16 = vld [vmem:[%s29113_s11 + $0xc8] sm:$0xff] }
0x2060   : > { %12882 = vmatprep.subr.bf16.mxu1 %v19647_v29 }
0x2061   : > { %10016 = vmatpush1.bf16.msra.mxu0 %v22155_v2  ;;  %v10329_v2 = vld [vmem:[%s29113_s11 + $0x100] sm:$0xff] }
0x2062   : > { %10017 = vmatprep.subr.bf16.mxu0 %v22160_v26  ;;  %v19649_v26 = vcombine.high %v10314_v8, %v10322_v16 }
0x2065   : > { %10018 = vmatpush1.bf16.msra.mxu0 %v22158_v15  ;;  %v10337_v15 = vld [vmem:[%s29113_s11 + $0x140] sm:$0xff] }
0x2066   : > { %10019 = vmatprep.subr.bf16.mxu0 %v22163_v27  ;;  %v10330_v27 = vld [vmem:[%s29113_s11 + $0x108] sm:$0xff] }
0x2069   : > { %10020 = vmatpush1.bf16.msra.mxu0 %v22161_v1  ;;  %v10338_v1 = vld [vmem:[%s29113_s11 + $0x148] sm:$0xff] }
0x206a   : > { %12962 = vmatprep.subr.bf16.mxu0 %v19633_v24 }
0x206c   : > { %19629 = vmatmul.mubr.msk.bf16.vlgmr.msra.gmra.mrb[164].mxu0 %vm1468_vm2, %v9871_v19  ;;  %v19632_v19 = vcombine.low %v10298_v17, %v10306_v20  ;;  %v10425_v20 = vld [vmem:[%s29113_s11 + $0x400] sm:$0xff] }
0x206e   : > { %12963 = vmatpush1.bf16.msra.mxu0 %v19632_v19  ;;  %v10434_v19 = vld [vmem:[%s29113_s11 + $0x448] sm:$0xff] }
0x206f   : > { %12964 = vmatprep.subr.bf16.mxu0 %v19649_v26 }
0x212f   : > { %v10006_v32 = vpop.f32.mrb[160].mxu0 }
0x2130   : > { %v10054_v36 = vadd.f32 %v10006_v32, %v25946_v40  ;;  %v10008_v25 = vpop.f32.mrb[161].mxu0  ;;  %v10075_v40 = vrot.slane %v10058_v28, %v26045_v49  ;;  %v19646_v28 = vcombine.low %v10313_v22, %v10321_v44  ;;  %v19663_v32 = vcombine.high %v10329_v2, %v10337_v15  ;;  %v10433_v22 = vld [vmem:[%s29113_s11 + $0x440] sm:$0xff]  ;;  %v10426_v44 = vld [vmem:[%s29113_s11 + $0x408] sm:$0xff] }
0x2131   : > { %v10055_v37 = vadd.f32 %v10008_v25, %v25949_v52  ;;  %v10010_v38 = vpop.f32.mrb[162].mxu0  ;;  %v10353_v25 = vld [vmem:[%s29113_s11 + $0x1c0] sm:$0xff]  ;;  %v19760_v26 = vcombine.low %v10426_v44, %v10434_v19 }
0x2132   : > { %v10080_v43 = vadd.f32 %v10063_v31, %v10054_v36  ;;  %v10011_v42 = vpop.f32.mrb[163].mxu0  ;;  %v19648_v31 = vcombine.low %v10314_v8, %v10322_v16  ;;  %v10345_v36 = vld [vmem:[%s29113_s11 + $0x180] sm:$0xff]  ;;  %v10354_v38 = vld [vmem:[%s29113_s11 + $0x1c8] sm:$0xff]  ;;  %12883 = vmatpush1.bf16.msra.mxu1 %v19646_v28  ;;  %v19759_v8 = vcombine.high %v10425_v20, %v10433_v22  ;;  %v19761_v16 = vcombine.high %v10426_v44, %v10434_v19 }
0x2133   : > { %v10081_v46 = vadd.f32 %v10067_v35, %v10055_v37  ;;  %v19665_v35 = vcombine.high %v10330_v27, %v10338_v1  ;;  %v10346_v37 = vld [vmem:[%s29113_s11 + $0x188] sm:$0xff]  ;;  %12884 = vmatprep.subr.bf16.mxu1 %v19663_v32  ;;  %v19664_v42 = vcombine.low %v10330_v27, %v10338_v1 }
0x2134   : > { %12965 = vmatpush1.bf16.msra.mxu0 %v19648_v31 }
0x2135   : > { %v10088_v47 = vcombine.low %v10080_v43, %v10081_v46  ;;  %v19662_v43 = vcombine.low %v10329_v2, %v10337_v15  ;;  %v19679_v46 = vcombine.high %v10345_v36, %v10353_v25  ;;  %12966 = vmatprep.subr.bf16.mxu0 %v19665_v35  ;;  %v19758_v2 = vcombine.low %v10425_v20, %v10433_v22  ;;  %v10498_v22 = vld [vmem:[%s29113_s11 + $0x648] sm:$0xff] }
0x2136   : > { %v22983_v15 = vmov 269488144  }
0x2137   : > { %v10096_v63 = vrot.slane %v10088_v47, %v23186_v34  ;;  %v19681_v47 = vcombine.high %v10346_v37, %v10354_v38  ;;  %12885 = vmatpush1.bf16.msra.mxu1 %v19662_v43  ;;  %v10146_v27 = vunpack.c.l.s4 %v22983_v15 }
0x2138   : > { %12967 = vmatpush1.bf16.msra.mxu0 %v19664_v42  ;;  %12886 = vmatprep.subr.bf16.mxu1 %v19679_v46 }
0x2139   : > { %12968 = vmatprep.subr.bf16.mxu0 %v19681_v47  ;;  %v10147_v1 = vunpack.c.0.s8 %v10146_v27 }
0x213b   : > { %v26174_v28 = vsub.s32 %v10147_v1, %v23166_v23 }
0x213f   : > { %v10047_v51 = vpop.f32.mrb[164].mxu0 }
0x2140   : > { %v10056_v54 = vadd.f32 %v10047_v51, %v25952_v48  ;;  %v10049_v52 = vpop.f32.mrb[165].mxu0  ;;  %v10369_v51 = vld [vmem:[%s29113_s11 + $0x240] sm:$0xff] }
0x2141   : > { %v10057_v56 = vadd.f32 %v10049_v52, %v25955_v21  ;;  %v10051_v57 = vpop.f32.mrb[166].mxu0  ;;  %v19678_v52 = vcombine.low %v10345_v36, %v10353_v25 }
0x2142   : > { %v10082_v58 = vadd.f32 %v10071_v50, %v10056_v54  ;;  %v10052_v33 = vpop.f32.mrb[167].mxu0  ;;  %v10361_v50 = vld [vmem:[%s29113_s11 + $0x200] sm:$0xff]  ;;  %v10370_v54 = vld [vmem:[%s29113_s11 + $0x248] sm:$0xff] }
0x2143   : > { %v10083_v61 = vadd.f32 %v10075_v40, %v10057_v56  ;;  %v10362_v40 = vld [vmem:[%s29113_s11 + $0x208] sm:$0xff]  ;;  %v19680_v56 = vcombine.low %v10346_v37, %v10354_v38  ;;  %v19695_v57 = vcombine.high %v10361_v50, %v10369_v51  ;;  %v10377_v33 = vld [vmem:[%s29113_s11 + $0x280] sm:$0xff]  ;;  %12887 = vmatpush1.bf16.msra.mxu1 %v19678_v52 }
0x2145   : > { %v10089_v62 = vcombine.low %v10082_v58, %v10083_v61  ;;  %v19697_v58 = vcombine.high %v10362_v40, %v10370_v54  ;;  %v10385_v61 = vld [vmem:[%s29113_s11 + $0x2c0] sm:$0xff]  ;;  %12969 = vmatpush1.bf16.msra.mxu0 %v19680_v56  ;;  %12888 = vmatprep.subr.bf16.mxu1 %v19695_v57 }
0x2146   : > { %v10441_v56 = vld [vmem:[%s29113_s11 + $0x480] sm:$0xff] }
0x2147   : > { %v10103_v39 = vrot.slane %v10089_v62, %v23186_v34  ;;  %v10378_v62 = vld [vmem:[%s29113_s11 + $0x288] sm:$0xff]  ;;  %12970 = vmatprep.subr.bf16.mxu0 %v19697_v58  ;;  %v10449_v57 = vld [vmem:[%s29113_s11 + $0x4c0] sm:$0xff] }
0x2148   : > { %v10442_v58 = vld [vmem:[%s29113_s11 + $0x488] sm:$0xff] }
0x2149   : > { %v10104_v45 = vcombine.low %v10096_v63, %v10103_v39  ;;  %v10386_v63 = vld [vmem:[%s29113_s11 + $0x2c8] sm:$0xff]  ;;  %v19694_v39 = vcombine.low %v10361_v50, %v10369_v51 }
0x214b   : > { %v26054_v4 = vadd.f32 %v22968_v3, %v10104_v45  ;;  %v19696_v45 = vcombine.low %v10362_v40, %v10370_v54  ;;  %v19711_v3 = vcombine.high %v10377_v33, %v10385_v61  ;;  %12889 = vmatpush1.bf16.msra.mxu1 %v19694_v39 }
0x214d   : > { %v10110_v5 = vcombine.high %v26054_v4, %v26054_v4  ;;  %v10117_v48 = vrot.slane %v26054_v4, %v23186_v34  ;;  %12971 = vmatpush1.bf16.msra.mxu0 %v19696_v45  ;;  %12890 = vmatprep.subr.bf16.mxu1 %v19711_v3  ;;  %v10457_v45 = vld [vmem:[%s29113_s11 + $0x500] sm:$0xff] }
0x214e   : > { %v10465_v3 = vld [vmem:[%s29113_s11 + $0x540] sm:$0xff] }
0x214f   : > { %v10124_v21 = vrot.slane %v10110_v5, %v23186_v34  ;;  %v10125_v6 = vcombine.high %v10117_v48, %v10117_v48  ;;  %v10132_v41 = vsel %vm10131_vm6, %v10117_v48, 0.0  ;;  %v19713_v5 = vcombine.high %v10378_v62, %v10386_v63  ;;  %v10393_v48 = vld [vmem:[%s29113_s11 + $0x300] sm:$0xff] }
0x2151   : > { %v10126_v7 = vcombine.high %v10124_v21, %v10124_v21  ;;  %v10133_v53 = vsel %vm10131_vm6, %v10125_v6, 0.0  ;;  %v10135_v10 = vsel %vm10131_vm6, %v10124_v21, 0.0  ;;  %v10401_v21 = vld [vmem:[%s29113_s11 + $0x340] sm:$0xff]  ;;  %v10394_v6 = vld [vmem:[%s29113_s11 + $0x308] sm:$0xff]  ;;  %12972 = vmatprep.subr.bf16.mxu0 %v19713_v5 }
0x2152   : > { %v10134_v55 = vadd.f32 %v10133_v53, %v10132_v41  ;;  %v19710_v41 = vcombine.low %v10377_v33, %v10385_v61  ;;  %v19712_v53 = vcombine.low %v10378_v62, %v10386_v63  ;;  %v19726_v0 = vcombine.low %v10393_v48, %v10401_v21  ;;  %v10450_v61 = vld [vmem:[%s29113_s11 + $0x4c8] sm:$0xff] }
0x2153   : > { %v10138_v12 = vsel %vm10137_vm7, %v10126_v7, 0.0  ;;  %v10402_v7 = vld [vmem:[%s29113_s11 + $0x348] sm:$0xff]  ;;  %v19775_v33 = vcombine.high %v10441_v56, %v10449_v57  ;;  %v19774_v62 = vcombine.low %v10441_v56, %v10449_v57  ;;  %v19776_v63 = vcombine.low %v10442_v58, %v10450_v61  ;;  %v10553_v56 = vld [vmem:[%s29113_s11 + $0x800] sm:$0xff] }
0x2154   : > { %v10136_v11 = vadd.f32 %v10135_v10, %v10134_v55  ;;  %v19727_v55 = vcombine.high %v10393_v48, %v10401_v21  ;;  %v19729_v10 = vcombine.high %v10394_v6, %v10402_v7  ;;  %12891 = vmatpush1.bf16.msra.mxu1 %v19710_v41  ;;  %12973 = vmatpush1.bf16.msra.mxu0 %v19712_v53  ;;  %v10458_v5 = vld [vmem:[%s29113_s11 + $0x508] sm:$0xff]  ;;  %v10473_v53 = vld [vmem:[%s29113_s11 + $0x580] sm:$0xff] }
0x2155   : > { %v19728_v17 = vcombine.low %v10394_v6, %v10402_v7  ;;  %v19777_v39 = vcombine.high %v10442_v58, %v10450_v61  ;;  %v19791_v48 = vcombine.high %v10457_v45, %v10465_v3  ;;  %v10466_v21 = vld [vmem:[%s29113_s11 + $0x548] sm:$0xff]  ;;  %v19790_v6 = vcombine.low %v10457_v45, %v10465_v3  ;;  %v10561_v57 = vld [vmem:[%s29113_s11 + $0x840] sm:$0xff] }
0x2156   : > { %v10139_v13 = vadd.f32 %v10138_v12, %v10136_v11  ;;  %v10409_v11 = vld [vmem:[%s29113_s11 + $0x380] sm:$0xff]  ;;  %12892 = vmatprep.subr.bf16.mxu1 %v19727_v55  ;;  %12974 = vmatprep.subr.bf16.mxu0 %v19729_v10  ;;  %v19792_v7 = vcombine.low %v10458_v5, %v10466_v21  ;;  %v19793_v41 = vcombine.high %v10458_v5, %v10466_v21  ;;  %v10474_v10 = vld [vmem:[%s29113_s11 + $0x588] sm:$0xff] }
0x2157   : > { %v10417_v12 = vld [vmem:[%s29113_s11 + $0x3c0] sm:$0xff]  ;;  %v10554_v58 = vld [vmem:[%s29113_s11 + $0x808] sm:$0xff] }
0x2158   : > { %10140 = vadd.xlane.f32.xlu0 %v10139_v13  ;;  %v10410_v13 = vld [vmem:[%s29113_s11 + $0x388] sm:$0xff]  ;;  %v19743_v59 = vcombine.high %v10409_v11, %v10417_v12  ;;  %12893 = vmatpush1.bf16.msra.mxu1 %v19726_v0  ;;  %v19742_v24 = vcombine.low %v10409_v11, %v10417_v12  ;;  %v10481_v55 = vld [vmem:[%s29113_s11 + $0x5c0] sm:$0xff] }
0x2159   : > { %v19745_v18 = vcombine.high %v10410_v13, %v10418_v14  ;;  %12975 = vmatpush1.bf16.msra.mxu0 %v19728_v17  ;;  %v19744_v29 = vcombine.low %v10410_v13, %v10418_v14  ;;  %v19807_v11 = vcombine.high %v10473_v53, %v10481_v55  ;;  %v10482_v12 = vld [vmem:[%s29113_s11 + $0x5c8] sm:$0xff]  ;;  %v19806_v13 = vcombine.low %v10473_v53, %v10481_v55  ;;  %v10489_v17 = vld [vmem:[%s29113_s11 + $0x600] sm:$0xff] }
0x215a   : > { %12894 = vmatprep.subr.bf16.mxu1 %v19743_v59  ;;  %v19808_v14 = vcombine.low %v10474_v10, %v10482_v12  ;;  %v19809_v0 = vcombine.high %v10474_v10, %v10482_v12  ;;  %v10497_v59 = vld [vmem:[%s29113_s11 + $0x640] sm:$0xff]  ;;  %v10562_v61 = vld [vmem:[%s29113_s11 + $0x848] sm:$0xff] }
0x215b   : > { %12976 = vmatprep.subr.bf16.mxu0 %v19745_v18  ;;  %v10490_v18 = vld [vmem:[%s29113_s11 + $0x608] sm:$0xff]  ;;  %v19823_v20 = vcombine.high %v10489_v17, %v10497_v59  ;;  %v19822_v44 = vcombine.low %v10489_v17, %v10497_v59  ;;  %v10107_v3 = vld [vmem:[%s29111_s9] sm:$0xf] }
0x215c   : > { %12895 = vmatpush1.bf16.msra.mxu1 %v19742_v24  ;;  %v19824_v19 = vcombine.low %v10490_v18, %v10498_v22  ;;  %v19825_v24 = vcombine.high %v10490_v18, %v10498_v22  ;;  %v10215_v53 = vrot.slane %v10107_v3, %v26045_v49 }
0x215d   : > { %12977 = vmatpush1.bf16.msra.mxu0 %v19744_v29  ;;  %12896 = vmatprep.subr.bf16.mxu1 %v19759_v8  ;;  %v10505_v29 = vld [vmem:[%s29113_s11 + $0x680] sm:$0xff] }
0x215e   : > { %12978 = vmatprep.subr.bf16.mxu0 %v19761_v16  ;;  %v10513_v8 = vld [vmem:[%s29113_s11 + $0x6c0] sm:$0xff]  ;;  %v10506_v16 = vld [vmem:[%s29113_s11 + $0x688] sm:$0xff] }
0x215f   : > { %v19838_v15 = vcombine.low %v10505_v29, %v10513_v8 }
0x2160   : > { %12897 = vmatpush1.bf16.msra.mxu1 %v19758_v2  ;;  %v19839_v2 = vcombine.high %v10505_v29, %v10513_v8 }
0x2161   : > { %12979 = vmatpush1.bf16.msra.mxu0 %v19760_v26  ;;  %12898 = vmatprep.subr.bf16.mxu1 %v19775_v33  ;;  %v10514_v26 = vld [vmem:[%s29113_s11 + $0x6c8] sm:$0xff]  ;;  %v19887_v33 = vcombine.high %v10553_v56, %v10561_v57 }
0x2162   : > { %12980 = vmatprep.subr.bf16.mxu0 %v19777_v39  ;;  %v19840_v27 = vcombine.low %v10506_v16, %v10514_v26  ;;  %v19841_v1 = vcombine.high %v10506_v16, %v10514_v26  ;;  %v19889_v39 = vcombine.high %v10554_v58, %v10562_v61 }
0x2164   : > { %12899 = vmatpush1.bf16.msra.mxu1 %v19774_v62  ;;  %v19886_v62 = vcombine.low %v10553_v56, %v10561_v57  ;;  %v10601_v57 = vld [vmem:[%s29113_s11 + $0x980] sm:$0xff] }
0x2165   : > { %12981 = vmatpush1.bf16.msra.mxu0 %v19776_v63  ;;  %12900 = vmatprep.subr.bf16.mxu1 %v19791_v48  ;;  %v19888_v63 = vcombine.low %v10554_v58, %v10562_v61  ;;  %v10108_v48 = vld [vmem:[%s29112_s10] sm:$0xf]  ;;  %v10610_v61 = vld [vmem:[%s29113_s11 + $0x9c8] sm:$0xff] }
0x2166   : > { %12982 = vmatprep.subr.bf16.mxu0 %v19793_v41  ;;  %v10211_v41 = vrot.slane %v10107_v3, %v26042_v60  ;;  %v10239_v55 = vrot.slane %v10108_v48, %v26029_v9  ;;  %v10243_v10 = vrot.slane %v10108_v48, %v26035_v30  ;;  %v10251_v12 = vrot.slane %v10108_v48, %v26045_v49  ;;  %v10609_v58 = vld [vmem:[%s29113_s11 + $0x9c0] sm:$0xff] }
0x2168   : > { %12901 = vmatpush1.bf16.msra.mxu1 %v19790_v6  ;;  %v10203_v6 = vrot.slane %v10107_v3, %v26029_v9 }
0x2169   : > { %12983 = vmatpush1.bf16.msra.mxu0 %v19792_v7  ;;  %12902 = vmatprep.subr.bf16.mxu1 %v19807_v11  ;;  %v10207_v7 = vrot.slane %v10107_v3, %v26035_v30  ;;  %v10247_v11 = vrot.slane %v10108_v48, %v26042_v60  ;;  %v10617_v3 = vld [vmem:[%s29113_s11 + $0xa00] sm:$0xff]  ;;  %v10618_v48 = vld [vmem:[%s29113_s11 + $0xa08] sm:$0xff] }
0x216a   : > { %12984 = vmatprep.subr.bf16.mxu0 %v19809_v0  ;;  %v10252_v0 = vcombine.low %v10239_v55, %v10243_v10  ;;  %v10633_v55 = vld [vmem:[%s29113_s11 + $0xa80] sm:$0xff] }
0x216b   : > { %v10253_v17 = vcombine.low %v10247_v11, %v10251_v12  ;;  %v10641_v10 = vld [vmem:[%s29113_s11 + $0xac0] sm:$0xff]  ;;  %v10634_v11 = vld [vmem:[%s29113_s11 + $0xa88] sm:$0xff] }
0x216c   : > { %12903 = vmatpush1.bf16.msra.mxu1 %v19806_v13  ;;  %v10216_v13 = vcombine.low %v10203_v6, %v10207_v7  ;;  %v19934_v6 = vcombine.low %v10601_v57, %v10609_v58  ;;  %v10642_v12 = vld [vmem:[%s29113_s11 + $0xac8] sm:$0xff] }
0x216d   : > { %12985 = vmatpush1.bf16.msra.mxu0 %v19808_v14  ;;  %12904 = vmatprep.subr.bf16.mxu1 %v19823_v20  ;;  %v10217_v14 = vcombine.low %v10211_v41, %v10215_v53  ;;  %v10260_v20 = vrot.slane %v10252_v0, %v23186_v34  ;;  %v10267_v22 = vrot.slane %v10253_v17, %v23186_v34 }
0x216e   : > { %12986 = vmatprep.subr.bf16.mxu0 %v19825_v24  ;;  %v10224_v59 = vrot.slane %v10216_v13, %v23186_v34  ;;  %v19967_v0 = vcombine.high %v10633_v55, %v10641_v10  ;;  %v19969_v17 = vcombine.high %v10634_v11, %v10642_v12 }
0x216f   : > { %v10231_v18 = vrot.slane %v10217_v14, %v23186_v34  ;;  %v10268_v29 = vcombine.low %v10260_v20, %v10267_v22  ;;  %v10650_v20 = vld [vmem:[%s29113_s11 + $0xb08] sm:$0xff] }
0x2170   : > { %12905 = vmatpush1.bf16.msra.mxu1 %v19822_v44  ;;  %v10658_v22 = vld [vmem:[%s29113_s11 + $0xb48] sm:$0xff] }
0x2171   : > { %12987 = vmatpush1.bf16.msra.mxu0 %v19824_v19  ;;  %12906 = vmatprep.subr.bf16.mxu1 %v19839_v2  ;;  %v10232_v19 = vcombine.low %v10224_v59, %v10231_v18  ;;  %v10649_v59 = vld [vmem:[%s29113_s11 + $0xb00] sm:$0xff] }
0x2172   : > { %12988 = vmatprep.subr.bf16.mxu0 %v19841_v1  ;;  %v10657_v18 = vld [vmem:[%s29113_s11 + $0xb40] sm:$0xff] }
0x2174   : > { %12907 = vmatpush1.bf16.msra.mxu1 %v19838_v15 }
0x2175   : > { %12989 = vmatpush1.bf16.msra.mxu0 %v19840_v27 }
0x21e5   : > { %v10141_v31 = vpop.xlane.xlu0 %10140 }
0x21e6   : > { %v10143_v32 = vmul.f32 0.0024038462, %v10141_v31  ;;  %v10521_v31 = vld [vmem:[%s29113_s11 + $0x700] sm:$0xff] }
0x21e8   : > { %v10151_v35 = vrot.slane %v10143_v32, %v26174_v28  ;;  %v10529_v32 = vld [vmem:[%s29113_s11 + $0x740] sm:$0xff] }
0x21ea   : > { %v26178_v36 = vsub.f32 %v26054_v4, %v10151_v35  ;;  %v10522_v35 = vld [vmem:[%s29113_s11 + $0x708] sm:$0xff] }
0x21ec   : > { %v10154_v25 = vmul.f32 %v26178_v36, %v26178_v36 }
0x21ee   : > { %v10156_v37 = vcombine.high %v10154_v25, %v10154_v25  ;;  %v10163_v38 = vrot.slane %v10154_v25, %v23186_v34  ;;  %v19855_v25 = vcombine.high %v10521_v31, %v10529_v32 }
0x21f0   : > { %v10170_v43 = vrot.slane %v10156_v37, %v23186_v34  ;;  %v10171_v42 = vcombine.high %v10163_v38, %v10163_v38  ;;  %v10177_v47 = vsel %vm10131_vm6, %v10163_v38, 0.0  ;;  %v10530_v37 = vld [vmem:[%s29113_s11 + $0x748] sm:$0xff]  ;;  %v19854_v38 = vcombine.low %v10521_v31, %v10529_v32  ;;  %12908 = vmatprep.subr.bf16.mxu1 %v19855_v25  ;;  %v10569_v31 = vld [vmem:[%s29113_s11 + $0x880] sm:$0xff] }
0x21f1   : > { %v10570_v32 = vld [vmem:[%s29113_s11 + $0x888] sm:$0xff] }
0x21f2   : > { %v10172_v46 = vcombine.high %v10170_v43, %v10170_v43  ;;  %v10178_v50 = vsel %vm10131_vm6, %v10171_v42, 0.0  ;;  %v10180_v40 = vsel %vm10131_vm6, %v10170_v43, 0.0  ;;  %v19856_v43 = vcombine.low %v10522_v35, %v10530_v37  ;;  %12909 = vmatpush1.bf16.msra.mxu1 %v19854_v38 }
0x21f3   : > { %v10179_v51 = vadd.f32 %v10178_v50, %v10177_v47  ;;  %v19857_v42 = vcombine.high %v10522_v35, %v10530_v37  ;;  %v10545_v47 = vld [vmem:[%s29113_s11 + $0x7c0] sm:$0xff]  ;;  %v10538_v50 = vld [vmem:[%s29113_s11 + $0x788] sm:$0xff] }
0x21f4   : > { %v10182_v4 = vsel %vm10137_vm7, %v10172_v46, 0.0  ;;  %v10537_v46 = vld [vmem:[%s29113_s11 + $0x780] sm:$0xff]  ;;  %v10578_v35 = vld [vmem:[%s29113_s11 + $0x8c8] sm:$0xff] }
0x21f5   : > { %v10181_v54 = vadd.f32 %v10180_v40, %v10179_v51  ;;  %12990 = vmatprep.subr.bf16.mxu0 %v19857_v42  ;;  %v19871_v51 = vcombine.high %v10537_v46, %v10545_v47  ;;  %v10546_v40 = vld [vmem:[%s29113_s11 + $0x7c8] sm:$0xff] }
0x21f6   : > { %12991 = vmatpush1.bf16.msra.mxu0 %v19856_v43  ;;  %v10585_v43 = vld [vmem:[%s29113_s11 + $0x900] sm:$0xff] }
0x21f7   : > { %v10183_v52 = vadd.f32 %v10182_v4, %v10181_v54  ;;  %v19870_v54 = vcombine.low %v10537_v46, %v10545_v47  ;;  %v19872_v4 = vcombine.low %v10538_v50, %v10546_v40  ;;  %12910 = vmatprep.subr.bf16.mxu1 %v19871_v51  ;;  %v19905_v47 = vcombine.high %v10570_v32, %v10578_v35  ;;  %v10586_v51 = vld [vmem:[%s29113_s11 + $0x908] sm:$0xff] }
0x21f9   : > { %10184 = vadd.xlane.f32.xlu1 %v10183_v52  ;;  %v19873_v52 = vcombine.high %v10538_v50, %v10546_v40  ;;  %12911 = vmatpush1.bf16.msra.mxu1 %v19870_v54  ;;  %v10593_v50 = vld [vmem:[%s29113_s11 + $0x940] sm:$0xff]  ;;  %v10594_v40 = vld [vmem:[%s29113_s11 + $0x948] sm:$0xff] }
0x21fa   : > { %12921 = vmatprep.subr.bf16.mxu1 %v19887_v33  ;;  %v19921_v56 = vcombine.high %v10586_v51, %v10594_v40  ;;  %v10602_v33 = vld [vmem:[%s29113_s11 + $0x988] sm:$0xff] }
0x21fb   : > { %12992 = vmatprep.subr.bf16.mxu0 %v19873_v52  ;;  %v19919_v52 = vcombine.high %v10585_v43, %v10593_v50  ;;  %v19936_v7 = vcombine.low %v10602_v33, %v10610_v61 }
0x21fc   : > { %12993 = vmatpush1.bf16.msra.mxu0 %v19872_v4  ;;  %v19904_v4 = vcombine.low %v10570_v32, %v10578_v35  ;;  %v10681_v35 = vld [vmem:[%s29113_s11 + $0xc00] sm:$0xff] }
0x21fd   : > { %13003 = vmatprep.subr.bf16.mxu0 %v19889_v39  ;;  %v19935_v39 = vcombine.high %v10601_v57, %v10609_v58 }
0x2286   : > { %v10185_v45 = vpop.xlane.xlu1 %10184 }
0x2287   : > { %v10186_v5 = vmul.f32 0.0024038462, %v10185_v45  ;;  %v19937_v45 = vcombine.high %v10602_v33, %v10610_v61 }
0x2289   : > { %v10187_v21 = vadd.f32 1e-05, %v10186_v5  ;;  %v10625_v5 = vld [vmem:[%s29113_s11 + $0xa40] sm:$0xff] }
0x228a   : > { %v19951_v41 = vcombine.high %v10617_v3, %v10625_v5  ;;  %v19950_v13 = vcombine.low %v10617_v3, %v10625_v5 }
0x228b   : > { %22964 = vrsqrt.f32 %v10187_v21  ;;  %v10626_v21 = vld [vmem:[%s29113_s11 + $0xa48] sm:$0xff] }
0x228c   : > { %v19953_v53 = vcombine.high %v10618_v48, %v10626_v21  ;;  %v19952_v14 = vcombine.low %v10618_v48, %v10626_v21 }
0x2295   : > { %v22965_v44 = vpop.eup %22964 }
0x2296   : > { %v10196_v24 = vrot.slane %v22965_v44, %v26174_v28  ;;  %v19966_v44 = vcombine.low %v10633_v55, %v10641_v10 }
0x2298   : > { %v10198_v8 = vmul.f32 %v10196_v24, %v26178_v36  ;;  %v10577_v36 = vld [vmem:[%s29113_s11 + $0x8c0] sm:$0xff]  ;;  %v19983_v24 = vcombine.high %v10649_v59, %v10657_v18 }
0x2299   : > { %v19903_v46 = vcombine.high %v10569_v31, %v10577_v36  ;;  %v19902_v54 = vcombine.low %v10569_v31, %v10577_v36  ;;  %v19984_v31 = vcombine.low %v10650_v20, %v10658_v22 }
0x229a   : > { %v10234_v16 = vmul.f32 %v10232_v19, %v10198_v8  ;;  %v19968_v19 = vcombine.low %v10634_v11, %v10642_v12  ;;  %v10665_v8 = vld [vmem:[%s29113_s11 + $0xb80] sm:$0xff] }
0x229c   : > { %v26304_v2 = vadd.f32 %v10268_v29, %v10234_v16  ;;  %v19985_v29 = vcombine.high %v10650_v20, %v10658_v22  ;;  %v10673_v16 = vld [vmem:[%s29113_s11 + $0xbc0] sm:$0xff] }
0x229d   : > { %v19999_v36 = vcombine.high %v10665_v8, %v10673_v16 }
0x229e   : > { %v10272_v26 = vcombine.high %v26304_v2, %v26304_v2  ;;  %v10279_v15 = vrot.slane %v26304_v2, %v23186_v34 }
0x22a0   : > { %v26311_v27 = vrot.slane %v10272_v26, %v23186_v34  ;;  %v10287_v1 = vcombine.high %v10279_v15, %v10279_v15  ;;  %v26329_v38 = vpack.c.bf16 %v10279_v15, %v10279_v15  ;;  %v10666_v26 = vld [vmem:[%s29113_s11 + $0xb88] sm:$0xff] }
0x22a1   : > { %v10674_v15 = vld [vmem:[%s29113_s11 + $0xbc8] sm:$0xff] }
0x22a2   : > { %v10288_v25 = vcombine.high %v26311_v27, %v26311_v27  ;;  %v26327_v37 = vpack.c.bf16 %v10287_v1, %v10287_v1  ;;  %v19982_v1 = vcombine.low %v10649_v59, %v10657_v18  ;;  %v20001_v32 = vcombine.high %v10666_v26, %v10674_v15 }
0x22a3   : > { %v26463_v10 = vpack.c.bf16 %v26311_v27, %v26311_v27  ;;  %v10332_v27 = vld [vmem:[%s29113_s11 + $0x118] sm:$0xff] }
0x22a4   : > { %v26334_v42 = vpack.c.bf16 %v10288_v25, %v10288_v25  ;;  %12912 = vmatprep.mubr.bf16.mxu1 %v26327_v37  ;;  %12994 = vmatprep.mubr.bf16.mxu0 %v26327_v37  ;;  %v10689_v25 = vld [vmem:[%s29113_s11 + $0xc40] sm:$0xff] }
0x22a5   : > { %12913 = vmatmul.mubr.bf16.vlgmr.msra.gmra.mrb[152].mxu1 %v26329_v38  ;;  %12995 = vmatmul.mubr.bf16.vlgmr.msra.gmra.mrb[168].mxu0 %v26329_v38  ;;  %v20014_v57 = vcombine.low %v10681_v35, %v10689_v25 }
0x22a6   : > { %12922 = vmatpush1.bf16.msra.mxu1 %v19886_v62  ;;  %13004 = vmatpush1.bf16.msra.mxu0 %v19888_v63  ;;  %v19918_v62 = vcombine.low %v10585_v43, %v10593_v50  ;;  %v19920_v63 = vcombine.low %v10586_v51, %v10594_v40  ;;  %v10682_v43 = vld [vmem:[%s29113_s11 + $0xc08] sm:$0xff]  ;;  %v20000_v50 = vcombine.low %v10666_v26, %v10674_v15 }
0x22a7   : > { %20046 = vmatprep.mubr.msk.bf16.mxu1 %vm792_vm0, %v26334_v42  ;;  %20047 = vmatprep.mubr.msk.bf16.mxu0 %vm792_vm0, %v26334_v42  ;;  %v20015_v51 = vcombine.high %v10681_v35, %v10689_v25 }
0x22a8   : > { %12923 = vmatprep.subr.bf16.mxu1 %v19903_v46  ;;  %13005 = vmatprep.subr.bf16.mxu0 %v19905_v47  ;;  %v10690_v46 = vld [vmem:[%s29113_s11 + $0xc48] sm:$0xff]  ;;  %v19998_v47 = vcombine.low %v10665_v8, %v10673_v16 }
0x22a9   : > { %v20017_v40 = vcombine.high %v10682_v43, %v10690_v46  ;;  %v20016_v58 = vcombine.low %v10682_v43, %v10690_v46 }
0x22aa   : > { %12924 = vmatpush1.bf16.msra.mxu1 %v19902_v54  ;;  %13006 = vmatpush1.bf16.msra.mxu0 %v19904_v4  ;;  %v10697_v54 = vld [vmem:[%s29113_s11 + $0xc80] sm:$0xff] }
0x22ab   : > { %12925 = vmatprep.subr.bf16.mxu1 %v19919_v52  ;;  %13007 = vmatprep.subr.bf16.mxu0 %v19921_v56  ;;  %v10705_v4 = vld [vmem:[%s29113_s11 + $0xcc0] sm:$0xff]  ;;  %v10698_v52 = vld [vmem:[%s29113_s11 + $0xc88] sm:$0xff] }
0x22ac   : > { %v10706_v56 = vld [vmem:[%s29113_s11 + $0xcc8] sm:$0xff]  ;;  %v20031_v33 = vcombine.high %v10697_v54, %v10705_v4  ;;  %v20030_v3 = vcombine.low %v10697_v54, %v10705_v4 }
0x22ad   : > { %v20033_v61 = vcombine.high %v10698_v52, %v10706_v56  ;;  %v20032_v5 = vcombine.low %v10698_v52, %v10706_v56 }
0x22ae   : > { %12926 = vmatpush1.bf16.msra.mxu1 %v19918_v62  ;;  %13008 = vmatpush1.bf16.msra.mxu0 %v19920_v63  ;;  %v10299_v62 = vld [vmem:[%s29113_s11 + $0x10] sm:$0xff] }
0x22af   : > { %12927 = vmatprep.subr.bf16.mxu1 %v19935_v39  ;;  %13009 = vmatprep.subr.bf16.mxu0 %v19937_v45  ;;  %v10307_v63 = vld [vmem:[%s29113_s11 + $0x50] sm:$0xff]  ;;  %v10300_v39 = vld [vmem:[%s29113_s11 + $0x18] sm:$0xff] }
0x22b0   : > { %v10308_v45 = vld [vmem:[%s29113_s11 + $0x58] sm:$0xff]  ;;  %v19635_v48 = vcombine.high %v10299_v62, %v10307_v63  ;;  %v19634_v55 = vcombine.low %v10299_v62, %v10307_v63 }
0x22b1   : > { %v19637_v21 = vcombine.high %v10300_v39, %v10308_v45  ;;  %v19636_v11 = vcombine.low %v10300_v39, %v10308_v45 }
0x22b2   : > { %12928 = vmatpush1.bf16.msra.mxu1 %v19934_v6  ;;  %13010 = vmatpush1.bf16.msra.mxu0 %v19936_v7  ;;  %v10315_v6 = vld [vmem:[%s29113_s11 + $0x90] sm:$0xff] }
0x22b3   : > { %12929 = vmatprep.subr.bf16.mxu1 %v19951_v41  ;;  %13011 = vmatprep.subr.bf16.mxu0 %v19953_v53  ;;  %v10323_v7 = vld [vmem:[%s29113_s11 + $0xd0] sm:$0xff]  ;;  %v10316_v41 = vld [vmem:[%s29113_s11 + $0x98] sm:$0xff] }
0x22b4   : > { %v10324_v53 = vld [vmem:[%s29113_s11 + $0xd8] sm:$0xff]  ;;  %v19651_v12 = vcombine.high %v10315_v6, %v10323_v7  ;;  %v19650_v59 = vcombine.low %v10315_v6, %v10323_v7 }
0x22b5   : > { %v19652_v18 = vcombine.low %v10316_v41, %v10324_v53 }
0x22b6   : > { %12930 = vmatpush1.bf16.msra.mxu1 %v19950_v13  ;;  %13012 = vmatpush1.bf16.msra.mxu0 %v19952_v14  ;;  %v19653_v13 = vcombine.high %v10316_v41, %v10324_v53  ;;  %v10331_v14 = vld [vmem:[%s29113_s11 + $0x110] sm:$0xff] }
0x22b7   : > { %12931 = vmatprep.subr.bf16.mxu1 %v19967_v0  ;;  %13013 = vmatprep.subr.bf16.mxu0 %v19969_v17  ;;  %v10339_v0 = vld [vmem:[%s29113_s11 + $0x150] sm:$0xff]  ;;  %v10340_v17 = vld [vmem:[%s29113_s11 + $0x158] sm:$0xff] }
0x22b8   : > { %v19667_v20 = vcombine.high %v10331_v14, %v10339_v0  ;;  %v19669_v22 = vcombine.high %v10332_v27, %v10340_v17  ;;  %v19666_v8 = vcombine.low %v10331_v14, %v10339_v0  ;;  %v19668_v16 = vcombine.low %v10332_v27, %v10340_v17 }
0x22ba   : > { %12932 = vmatpush1.bf16.msra.mxu1 %v19966_v44  ;;  %13014 = vmatpush1.bf16.msra.mxu0 %v19968_v19  ;;  %v10347_v44 = vld [vmem:[%s29113_s11 + $0x190] sm:$0xff] }
0x22bb   : > { %12933 = vmatprep.subr.bf16.mxu1 %v19983_v24  ;;  %13015 = vmatprep.subr.bf16.mxu0 %v19985_v29  ;;  %v10355_v19 = vld [vmem:[%s29113_s11 + $0x1d0] sm:$0xff]  ;;  %v10348_v24 = vld [vmem:[%s29113_s11 + $0x198] sm:$0xff] }
0x22bc   : > { %v10356_v29 = vld [vmem:[%s29113_s11 + $0x1d8] sm:$0xff]  ;;  %v19683_v26 = vcombine.high %v10347_v44, %v10355_v19  ;;  %v19682_v35 = vcombine.low %v10347_v44, %v10355_v19 }
0x22bd   : > { %v19685_v15 = vcombine.high %v10348_v24, %v10356_v29  ;;  %v19684_v25 = vcombine.low %v10348_v24, %v10356_v29 }
0x22be   : > { %12934 = vmatpush1.bf16.msra.mxu1 %v19982_v1  ;;  %13016 = vmatpush1.bf16.msra.mxu0 %v19984_v31  ;;  %v10363_v1 = vld [vmem:[%s29113_s11 + $0x210] sm:$0xff] }
0x22bf   : > { %12935 = vmatprep.subr.bf16.mxu1 %v19999_v36  ;;  %13017 = vmatprep.subr.bf16.mxu0 %v20001_v32  ;;  %v10371_v31 = vld [vmem:[%s29113_s11 + $0x250] sm:$0xff]  ;;  %v10364_v36 = vld [vmem:[%s29113_s11 + $0x218] sm:$0xff] }
0x22c0   : > { %v10372_v32 = vld [vmem:[%s29113_s11 + $0x258] sm:$0xff]  ;;  %v19699_v43 = vcombine.high %v10363_v1, %v10371_v31  ;;  %v19698_v54 = vcombine.low %v10363_v1, %v10371_v31 }
0x22c1   : > { %v19701_v46 = vcombine.high %v10364_v36, %v10372_v32  ;;  %v19700_v4 = vcombine.low %v10364_v36, %v10372_v32 }
0x22c2   : > { %12936 = vmatpush1.bf16.msra.mxu1 %v19998_v47  ;;  %13018 = vmatpush1.bf16.msra.mxu0 %v20000_v50  ;;  %v10379_v47 = vld [vmem:[%s29113_s11 + $0x290] sm:$0xff] }
0x22c3   : > { %12937 = vmatprep.subr.bf16.mxu1 %v20015_v51  ;;  %13019 = vmatprep.subr.bf16.mxu0 %v20017_v40  ;;  %v10387_v50 = vld [vmem:[%s29113_s11 + $0x2d0] sm:$0xff]  ;;  %v10380_v51 = vld [vmem:[%s29113_s11 + $0x298] sm:$0xff] }
0x22c4   : > { %v10388_v40 = vld [vmem:[%s29113_s11 + $0x2d8] sm:$0xff]  ;;  %v19715_v52 = vcombine.high %v10379_v47, %v10387_v50  ;;  %v19714_v62 = vcombine.low %v10379_v47, %v10387_v50 }
0x22c5   : > { %v19717_v56 = vcombine.high %v10380_v51, %v10388_v40  ;;  %v19716_v63 = vcombine.low %v10380_v51, %v10388_v40 }
0x22c6   : > { %12938 = vmatpush1.bf16.msra.mxu1 %v20014_v57  ;;  %13020 = vmatpush1.bf16.msra.mxu0 %v20016_v58  ;;  %v10395_v57 = vld [vmem:[%s29113_s11 + $0x310] sm:$0xff] }
0x22c7   : > { %12939 = vmatprep.subr.bf16.mxu1 %v20031_v33  ;;  %13021 = vmatprep.subr.bf16.mxu0 %v20033_v61  ;;  %v10403_v58 = vld [vmem:[%s29113_s11 + $0x350] sm:$0xff]  ;;  %v10396_v33 = vld [vmem:[%s29113_s11 + $0x318] sm:$0xff] }
0x22c8   : > { %v10404_v61 = vld [vmem:[%s29113_s11 + $0x358] sm:$0xff]  ;;  %v19731_v39 = vcombine.high %v10395_v57, %v10403_v58  ;;  %v19730_v6 = vcombine.low %v10395_v57, %v10403_v58 }
0x22c9   : > { %v19733_v45 = vcombine.high %v10396_v33, %v10404_v61  ;;  %v19732_v7 = vcombine.low %v10396_v33, %v10404_v61 }
0x22ca   : > { %12940 = vmatpush1.bf16.msra.mxu1 %v20030_v3  ;;  %13022 = vmatpush1.bf16.msra.mxu0 %v20032_v5  ;;  %v10411_v3 = vld [vmem:[%s29113_s11 + $0x390] sm:$0xff] }
0x22cb   : > { %13044 = vmatprep.subr.bf16.mxu1 %v19635_v48  ;;  %13126 = vmatprep.subr.bf16.mxu0 %v19637_v21  ;;  %v10419_v5 = vld [vmem:[%s29113_s11 + $0x3d0] sm:$0xff]  ;;  %v10412_v48 = vld [vmem:[%s29113_s11 + $0x398] sm:$0xff] }
0x22cc   : > { %v10420_v21 = vld [vmem:[%s29113_s11 + $0x3d8] sm:$0xff]  ;;  %v19747_v41 = vcombine.high %v10411_v3, %v10419_v5  ;;  %v19746_v14 = vcombine.low %v10411_v3, %v10419_v5 }
0x22cd   : > { %12954 = vmatmul.mubr.bf16.vlgmr.msra.gmra.mrb[152].mxu1 %v26463_v10  ;;  %13036 = vmatmul.mubr.bf16.vlgmr.msra.gmra.mrb[168].mxu0 %v26463_v10  ;;  %v19749_v53 = vcombine.high %v10412_v48, %v10420_v21  ;;  %v19748_v0 = vcombine.low %v10412_v48, %v10420_v21 }
0x22ce   : > { %13045 = vmatpush1.bf16.msra.mxu1 %v19634_v55  ;;  %13076 = vmatprep.mubr.bf16.mxu1 %v26327_v37  ;;  %v10427_v55 = vld [vmem:[%s29113_s11 + $0x410] sm:$0xff] }
0x22cf   : > { %13127 = vmatpush1.bf16.msra.mxu0 %v19636_v11  ;;  %13158 = vmatprep.mubr.bf16.mxu0 %v26327_v37  ;;  %v10435_v11 = vld [vmem:[%s29113_s11 + $0x450] sm:$0xff] }
0x22d0   : > { %13046 = vmatprep.subr.bf16.mxu1 %v19651_v12  ;;  %13128 = vmatprep.subr.bf16.mxu0 %v19653_v13  ;;  %v10428_v12 = vld [vmem:[%s29113_s11 + $0x418] sm:$0xff]  ;;  %v19763_v27 = vcombine.high %v10427_v55, %v10435_v11  ;;  %v19762_v44 = vcombine.low %v10427_v55, %v10435_v11 }
0x22d1   : > { %v10436_v13 = vld [vmem:[%s29113_s11 + $0x458] sm:$0xff] }
0x22d2   : > { %13047 = vmatpush1.bf16.msra.mxu1 %v19650_v59  ;;  %v19765_v17 = vcombine.high %v10428_v12, %v10436_v13  ;;  %v10443_v59 = vld [vmem:[%s29113_s11 + $0x490] sm:$0xff]  ;;  %v19764_v19 = vcombine.low %v10428_v12, %v10436_v13 }
0x22d3   : > { %13129 = vmatpush1.bf16.msra.mxu0 %v19652_v18  ;;  %13048 = vmatprep.subr.bf16.mxu1 %v19667_v20  ;;  %v10451_v18 = vld [vmem:[%s29113_s11 + $0x4d0] sm:$0xff]  ;;  %v10444_v20 = vld [vmem:[%s29113_s11 + $0x498] sm:$0xff] }
0x22d4   : > { %13130 = vmatprep.subr.bf16.mxu0 %v19669_v22  ;;  %v10452_v22 = vld [vmem:[%s29113_s11 + $0x4d8] sm:$0xff]  ;;  %v19779_v24 = vcombine.high %v10443_v59, %v10451_v18  ;;  %v19778_v1 = vcombine.low %v10443_v59, %v10451_v18 }
0x22d5   : > { %v19781_v29 = vcombine.high %v10444_v20, %v10452_v22  ;;  %v19780_v31 = vcombine.low %v10444_v20, %v10452_v22 }
0x22d6   : > { %13049 = vmatpush1.bf16.msra.mxu1 %v19666_v8  ;;  %v10459_v8 = vld [vmem:[%s29113_s11 + $0x510] sm:$0xff] }
0x22d7   : > { %13131 = vmatpush1.bf16.msra.mxu0 %v19668_v16  ;;  %13050 = vmatprep.subr.bf16.mxu1 %v19683_v26  ;;  %v10467_v16 = vld [vmem:[%s29113_s11 + $0x550] sm:$0xff]  ;;  %v10460_v26 = vld [vmem:[%s29113_s11 + $0x518] sm:$0xff] }
0x22d8   : > { %13132 = vmatprep.subr.bf16.mxu0 %v19685_v15  ;;  %v10468_v15 = vld [vmem:[%s29113_s11 + $0x558] sm:$0xff]  ;;  %v19795_v36 = vcombine.high %v10459_v8, %v10467_v16  ;;  %v19794_v47 = vcombine.low %v10459_v8, %v10467_v16 }
0x22d9   : > { %v19797_v32 = vcombine.high %v10460_v26, %v10468_v15  ;;  %v19796_v50 = vcombine.low %v10460_v26, %v10468_v15 }
0x22da   : > { %13051 = vmatpush1.bf16.msra.mxu1 %v19682_v35  ;;  %v10475_v35 = vld [vmem:[%s29113_s11 + $0x590] sm:$0xff] }
0x22db   : > { %13133 = vmatpush1.bf16.msra.mxu0 %v19684_v25  ;;  %13052 = vmatprep.subr.bf16.mxu1 %v19699_v43  ;;  %v10483_v25 = vld [vmem:[%s29113_s11 + $0x5d0] sm:$0xff]  ;;  %v10476_v43 = vld [vmem:[%s29113_s11 + $0x598] sm:$0xff] }
0x22dc   : > { %13134 = vmatprep.subr.bf16.mxu0 %v19701_v46  ;;  %v10484_v46 = vld [vmem:[%s29113_s11 + $0x5d8] sm:$0xff]  ;;  %v19811_v51 = vcombine.high %v10475_v35, %v10483_v25  ;;  %v19810_v57 = vcombine.low %v10475_v35, %v10483_v25 }
0x22dd   : > { %v19813_v40 = vcombine.high %v10476_v43, %v10484_v46  ;;  %v19812_v58 = vcombine.low %v10476_v43, %v10484_v46  ;;  %v10580_v35 = vld [vmem:[%s29113_s11 + $0x8d8] sm:$0xff]  ;;  %v10587_v46 = vld [vmem:[%s29113_s11 + $0x910] sm:$0xff] }
0x22de   : > { %13053 = vmatpush1.bf16.msra.mxu1 %v19698_v54  ;;  %v10491_v54 = vld [vmem:[%s29113_s11 + $0x610] sm:$0xff] }
0x22df   : > { %13135 = vmatpush1.bf16.msra.mxu0 %v19700_v4  ;;  %13054 = vmatprep.subr.bf16.mxu1 %v19715_v52  ;;  %v10499_v4 = vld [vmem:[%s29113_s11 + $0x650] sm:$0xff]  ;;  %v10492_v52 = vld [vmem:[%s29113_s11 + $0x618] sm:$0xff] }
0x22e0   : > { %13136 = vmatprep.subr.bf16.mxu0 %v19717_v56  ;;  %v10500_v56 = vld [vmem:[%s29113_s11 + $0x658] sm:$0xff]  ;;  %v19827_v33 = vcombine.high %v10491_v54, %v10499_v4  ;;  %v19826_v3 = vcombine.low %v10491_v54, %v10499_v4 }
0x22e1   : > { %v19829_v61 = vcombine.high %v10492_v52, %v10500_v56  ;;  %v19828_v5 = vcombine.low %v10492_v52, %v10500_v56 }
0x22e2   : > { %13055 = vmatpush1.bf16.msra.mxu1 %v19714_v62  ;;  %v10507_v62 = vld [vmem:[%s29113_s11 + $0x690] sm:$0xff] }
0x22e3   : > { %13137 = vmatpush1.bf16.msra.mxu0 %v19716_v63  ;;  %13056 = vmatprep.subr.bf16.mxu1 %v19731_v39  ;;  %v10515_v63 = vld [vmem:[%s29113_s11 + $0x6d0] sm:$0xff]  ;;  %v10508_v39 = vld [vmem:[%s29113_s11 + $0x698] sm:$0xff] }
0x22e4   : > { %13138 = vmatprep.subr.bf16.mxu0 %v19733_v45  ;;  %v10516_v45 = vld [vmem:[%s29113_s11 + $0x6d8] sm:$0xff]  ;;  %v19843_v48 = vcombine.high %v10507_v62, %v10515_v63  ;;  %v19842_v55 = vcombine.low %v10507_v62, %v10515_v63 }
0x22e5   : > { %v19845_v21 = vcombine.high %v10508_v39, %v10516_v45  ;;  %v19844_v11 = vcombine.low %v10508_v39, %v10516_v45 }
0x22e6   : > { %13057 = vmatpush1.bf16.msra.mxu1 %v19730_v6  ;;  %v10523_v6 = vld [vmem:[%s29113_s11 + $0x710] sm:$0xff] }
0x22e7   : > { %13139 = vmatpush1.bf16.msra.mxu0 %v19732_v7  ;;  %13058 = vmatprep.subr.bf16.mxu1 %v19747_v41  ;;  %v10531_v7 = vld [vmem:[%s29113_s11 + $0x750] sm:$0xff]  ;;  %v10524_v41 = vld [vmem:[%s29113_s11 + $0x718] sm:$0xff] }
0x22e8   : > { %13140 = vmatprep.subr.bf16.mxu0 %v19749_v53  ;;  %v10532_v53 = vld [vmem:[%s29113_s11 + $0x758] sm:$0xff]  ;;  %v19859_v12 = vcombine.high %v10523_v6, %v10531_v7  ;;  %v19858_v59 = vcombine.low %v10523_v6, %v10531_v7 }
0x22e9   : > { %v19861_v13 = vcombine.high %v10524_v41, %v10532_v53  ;;  %v19860_v18 = vcombine.low %v10524_v41, %v10532_v53 }
0x22ea   : > { %13059 = vmatpush1.bf16.msra.mxu1 %v19746_v14  ;;  %v10539_v14 = vld [vmem:[%s29113_s11 + $0x790] sm:$0xff] }
0x22eb   : > { %13141 = vmatpush1.bf16.msra.mxu0 %v19748_v0  ;;  %13060 = vmatprep.subr.bf16.mxu1 %v19763_v27  ;;  %v10547_v0 = vld [vmem:[%s29113_s11 + $0x7d0] sm:$0xff]  ;;  %v10540_v27 = vld [vmem:[%s29113_s11 + $0x798] sm:$0xff] }
0x22ec   : > { %13142 = vmatprep.subr.bf16.mxu0 %v19765_v17  ;;  %v10548_v17 = vld [vmem:[%s29113_s11 + $0x7d8] sm:$0xff]  ;;  %v19875_v20 = vcombine.high %v10539_v14, %v10547_v0  ;;  %v19874_v8 = vcombine.low %v10539_v14, %v10547_v0 }
0x22ed   : > { %v19877_v22 = vcombine.high %v10540_v27, %v10548_v17  ;;  %v19876_v16 = vcombine.low %v10540_v27, %v10548_v17 }
0x22ee   : > { %13061 = vmatpush1.bf16.msra.mxu1 %v19762_v44  ;;  %v10555_v44 = vld [vmem:[%s29113_s11 + $0x810] sm:$0xff] }
0x22ef   : > { %13143 = vmatpush1.bf16.msra.mxu0 %v19764_v19  ;;  %13062 = vmatprep.subr.bf16.mxu1 %v19779_v24  ;;  %v10563_v19 = vld [vmem:[%s29113_s11 + $0x850] sm:$0xff]  ;;  %v10556_v24 = vld [vmem:[%s29113_s11 + $0x818] sm:$0xff] }
0x22f0   : > { %13144 = vmatprep.subr.bf16.mxu0 %v19781_v29  ;;  %v10564_v29 = vld [vmem:[%s29113_s11 + $0x858] sm:$0xff]  ;;  %v19891_v26 = vcombine.high %v10555_v44, %v10563_v19 }
0x22f1   : > { %v19893_v15 = vcombine.high %v10556_v24, %v10564_v29  ;;  %v19892_v25 = vcombine.low %v10556_v24, %v10564_v29 }
0x22f2   : > { %13063 = vmatpush1.bf16.msra.mxu1 %v19778_v1  ;;  %v10571_v1 = vld [vmem:[%s29113_s11 + $0x890] sm:$0xff] }
0x22f3   : > { %13145 = vmatpush1.bf16.msra.mxu0 %v19780_v31  ;;  %13064 = vmatprep.subr.bf16.mxu1 %v19795_v36  ;;  %v10579_v31 = vld [vmem:[%s29113_s11 + $0x8d0] sm:$0xff]  ;;  %v19890_v36 = vcombine.low %v10555_v44, %v10563_v19 }
0x22f4   : > { %13146 = vmatprep.subr.bf16.mxu0 %v19797_v32  ;;  %v10572_v32 = vld [vmem:[%s29113_s11 + $0x898] sm:$0xff]  ;;  %v19907_v43 = vcombine.high %v10571_v1, %v10579_v31  ;;  %v19906_v54 = vcombine.low %v10571_v1, %v10579_v31 }
0x22f5   : > { %v19908_v4 = vcombine.low %v10572_v32, %v10580_v35 }
0x22f6   : > { %13065 = vmatpush1.bf16.msra.mxu1 %v19794_v47  ;;  %v10595_v47 = vld [vmem:[%s29113_s11 + $0x950] sm:$0xff] }
0x22f7   : > { %13147 = vmatpush1.bf16.msra.mxu0 %v19796_v50  ;;  %13066 = vmatprep.subr.bf16.mxu1 %v19811_v51  ;;  %v19909_v50 = vcombine.high %v10572_v32, %v10580_v35  ;;  %v10588_v51 = vld [vmem:[%s29113_s11 + $0x918] sm:$0xff]  ;;  %v19923_v52 = vcombine.high %v10587_v46, %v10595_v47  ;;  %v19922_v62 = vcombine.low %v10587_v46, %v10595_v47  ;;  %v10683_v35 = vld [vmem:[%s29113_s11 + $0xc10] sm:$0xff] }
0x22f8   : > { %13148 = vmatprep.subr.bf16.mxu0 %v19813_v40  ;;  %v10596_v40 = vld [vmem:[%s29113_s11 + $0x958] sm:$0xff] }
0x22f9   : > { %v19925_v56 = vcombine.high %v10588_v51, %v10596_v40  ;;  %v19924_v63 = vcombine.low %v10588_v51, %v10596_v40  ;;  %v10692_v46 = vld [vmem:[%s29113_s11 + $0xc58] sm:$0xff] }
0x22fa   : > { %13067 = vmatpush1.bf16.msra.mxu1 %v19810_v57  ;;  %v10603_v57 = vld [vmem:[%s29113_s11 + $0x990] sm:$0xff] }
0x22fb   : > { %13149 = vmatpush1.bf16.msra.mxu0 %v19812_v58  ;;  %13068 = vmatprep.subr.bf16.mxu1 %v19827_v33  ;;  %v10611_v58 = vld [vmem:[%s29113_s11 + $0x9d0] sm:$0xff]  ;;  %v10604_v33 = vld [vmem:[%s29113_s11 + $0x998] sm:$0xff] }
0x22fc   : > { %13150 = vmatprep.subr.bf16.mxu0 %v19829_v61  ;;  %v10612_v61 = vld [vmem:[%s29113_s11 + $0x9d8] sm:$0xff]  ;;  %v19939_v39 = vcombine.high %v10603_v57, %v10611_v58  ;;  %v19938_v6 = vcombine.low %v10603_v57, %v10611_v58 }
0x22fd   : > { %v19941_v45 = vcombine.high %v10604_v33, %v10612_v61  ;;  %v19940_v7 = vcombine.low %v10604_v33, %v10612_v61 }
0x22fe   : > { %13069 = vmatpush1.bf16.msra.mxu1 %v19826_v3  ;;  %v10619_v3 = vld [vmem:[%s29113_s11 + $0xa10] sm:$0xff] }
0x22ff   : > { %13151 = vmatpush1.bf16.msra.mxu0 %v19828_v5  ;;  %13070 = vmatprep.subr.bf16.mxu1 %v19843_v48  ;;  %v10627_v5 = vld [vmem:[%s29113_s11 + $0xa50] sm:$0xff]  ;;  %v10620_v48 = vld [vmem:[%s29113_s11 + $0xa18] sm:$0xff] }
0x2300   : > { %13152 = vmatprep.subr.bf16.mxu0 %v19845_v21  ;;  %v10628_v21 = vld [vmem:[%s29113_s11 + $0xa58] sm:$0xff]  ;;  %v19955_v41 = vcombine.high %v10619_v3, %v10627_v5  ;;  %v19954_v14 = vcombine.low %v10619_v3, %v10627_v5 }
0x2301   : > { %v19957_v53 = vcombine.high %v10620_v48, %v10628_v21  ;;  %v19956_v0 = vcombine.low %v10620_v48, %v10628_v21 }
0x2302   : > { %13071 = vmatpush1.bf16.msra.mxu1 %v19842_v55  ;;  %v10635_v55 = vld [vmem:[%s29113_s11 + $0xa90] sm:$0xff] }
0x2303   : > { %13153 = vmatpush1.bf16.msra.mxu0 %v19844_v11  ;;  %13072 = vmatprep.subr.bf16.mxu1 %v19859_v12  ;;  %v10643_v11 = vld [vmem:[%s29113_s11 + $0xad0] sm:$0xff]  ;;  %v10636_v12 = vld [vmem:[%s29113_s11 + $0xa98] sm:$0xff] }
0x2304   : > { %13154 = vmatprep.subr.bf16.mxu0 %v19861_v13  ;;  %v10644_v13 = vld [vmem:[%s29113_s11 + $0xad8] sm:$0xff]  ;;  %v19971_v27 = vcombine.high %v10635_v55, %v10643_v11  ;;  %v19970_v44 = vcombine.low %v10635_v55, %v10643_v11  ;;  %v10326_v55 = vld [vmem:[%s29113_s11 + $0xe8] sm:$0xff] }
0x2305   : > { %v19973_v17 = vcombine.high %v10636_v12, %v10644_v13  ;;  %v19972_v19 = vcombine.low %v10636_v12, %v10644_v13  ;;  %v10333_v13 = vld [vmem:[%s29113_s11 + $0x120] sm:$0xff] }
0x2306   : > { %13073 = vmatpush1.bf16.msra.mxu1 %v19858_v59  ;;  %v10651_v59 = vld [vmem:[%s29113_s11 + $0xb10] sm:$0xff] }
0x2307   : > { %13155 = vmatpush1.bf16.msra.mxu0 %v19860_v18  ;;  %13074 = vmatprep.subr.bf16.mxu1 %v19875_v20  ;;  %v10659_v18 = vld [vmem:[%s29113_s11 + $0xb50] sm:$0xff]  ;;  %v10652_v20 = vld [vmem:[%s29113_s11 + $0xb18] sm:$0xff] }
0x2308   : > { %13156 = vmatprep.subr.bf16.mxu0 %v19877_v22  ;;  %v10660_v22 = vld [vmem:[%s29113_s11 + $0xb58] sm:$0xff]  ;;  %v19987_v24 = vcombine.high %v10651_v59, %v10659_v18  ;;  %v19986_v1 = vcombine.low %v10651_v59, %v10659_v18 }
0x2309   : > { %v19989_v29 = vcombine.high %v10652_v20, %v10660_v22  ;;  %v19988_v31 = vcombine.low %v10652_v20, %v10660_v22 }
0x230a   : > { %13075 = vmatpush1.bf16.msra.mxu1 %v19874_v8  ;;  %v10667_v8 = vld [vmem:[%s29113_s11 + $0xb90] sm:$0xff] }
0x230b   : > { %13157 = vmatpush1.bf16.msra.mxu0 %v19876_v16  ;;  %13085 = vmatprep.subr.bf16.mxu1 %v19891_v26  ;;  %v10675_v16 = vld [vmem:[%s29113_s11 + $0xbd0] sm:$0xff]  ;;  %v10668_v26 = vld [vmem:[%s29113_s11 + $0xb98] sm:$0xff] }
0x230c   : > { %13167 = vmatprep.subr.bf16.mxu0 %v19893_v15  ;;  %v10676_v15 = vld [vmem:[%s29113_s11 + $0xbd8] sm:$0xff]  ;;  %v20002_v47 = vcombine.low %v10667_v8, %v10675_v16 }
0x230d   : > { %13077 = vmatmul.mubr.bf16.vlgmr.msra.gmra.mrb[156].mxu1 %v26329_v38  ;;  %v20005_v32 = vcombine.high %v10668_v26, %v10676_v15 }
0x230e   : > { %13159 = vmatmul.mubr.bf16.vlgmr.msra.gmra.mrb[172].mxu0 %v26329_v38  ;;  %13086 = vmatpush1.bf16.msra.mxu1 %v19890_v36  ;;  %v20003_v36 = vcombine.high %v10667_v8, %v10675_v16 }
0x230f   : > { %20048 = vmatprep.mubr.msk.bf16.mxu1 %vm792_vm0, %v26334_v42  ;;  %13168 = vmatpush1.bf16.msra.mxu0 %v19892_v25  ;;  %v10691_v25 = vld [vmem:[%s29113_s11 + $0xc50] sm:$0xff] }
0x2310   : > { %20049 = vmatprep.mubr.msk.bf16.mxu0 %vm792_vm0, %v26334_v42  ;;  %13087 = vmatprep.subr.bf16.mxu1 %v19907_v43  ;;  %v10684_v43 = vld [vmem:[%s29113_s11 + $0xc18] sm:$0xff]  ;;  %v20019_v51 = vcombine.high %v10683_v35, %v10691_v25  ;;  %v20018_v57 = vcombine.low %v10683_v35, %v10691_v25 }
0x2311   : > { %13169 = vmatprep.subr.bf16.mxu0 %v19909_v50  ;;  %v20004_v50 = vcombine.low %v10668_v26, %v10676_v15  ;;  %v20021_v40 = vcombine.high %v10684_v43, %v10692_v46  ;;  %v20020_v58 = vcombine.low %v10684_v43, %v10692_v46 }
0x2312   : > { %13088 = vmatpush1.bf16.msra.mxu1 %v19906_v54  ;;  %v10699_v54 = vld [vmem:[%s29113_s11 + $0xc90] sm:$0xff] }
0x2313   : > { %13170 = vmatpush1.bf16.msra.mxu0 %v19908_v4  ;;  %13089 = vmatprep.subr.bf16.mxu1 %v19923_v52  ;;  %v10707_v4 = vld [vmem:[%s29113_s11 + $0xcd0] sm:$0xff]  ;;  %v10700_v52 = vld [vmem:[%s29113_s11 + $0xc98] sm:$0xff] }
0x2314   : > { %13171 = vmatprep.subr.bf16.mxu0 %v19925_v56  ;;  %v10708_v56 = vld [vmem:[%s29113_s11 + $0xcd8] sm:$0xff]  ;;  %v20035_v33 = vcombine.high %v10699_v54, %v10707_v4  ;;  %v20034_v3 = vcombine.low %v10699_v54, %v10707_v4 }
0x2315   : > { %v20037_v61 = vcombine.high %v10700_v52, %v10708_v56  ;;  %v20036_v5 = vcombine.low %v10700_v52, %v10708_v56 }
0x2316   : > { %13090 = vmatpush1.bf16.msra.mxu1 %v19922_v62  ;;  %v10301_v62 = vld [vmem:[%s29113_s11 + $0x20] sm:$0xff] }
0x2317   : > { %13172 = vmatpush1.bf16.msra.mxu0 %v19924_v63  ;;  %13091 = vmatprep.subr.bf16.mxu1 %v19939_v39  ;;  %v10309_v63 = vld [vmem:[%s29113_s11 + $0x60] sm:$0xff]  ;;  %v10302_v39 = vld [vmem:[%s29113_s11 + $0x28] sm:$0xff] }
0x2318   : > { %13173 = vmatprep.subr.bf16.mxu0 %v19941_v45  ;;  %v10310_v45 = vld [vmem:[%s29113_s11 + $0x68] sm:$0xff]  ;;  %v19639_v48 = vcombine.high %v10301_v62, %v10309_v63 }
0x2319   : > { %v19641_v21 = vcombine.high %v10302_v39, %v10310_v45  ;;  %v19640_v11 = vcombine.low %v10302_v39, %v10310_v45 }
0x231a   : > { %13092 = vmatpush1.bf16.msra.mxu1 %v19938_v6  ;;  %v10317_v6 = vld [vmem:[%s29113_s11 + $0xa0] sm:$0xff] }
0x231b   : > { %13174 = vmatpush1.bf16.msra.mxu0 %v19940_v7  ;;  %13093 = vmatprep.subr.bf16.mxu1 %v19955_v41  ;;  %v10325_v7 = vld [vmem:[%s29113_s11 + $0xe0] sm:$0xff]  ;;  %v19638_v41 = vcombine.low %v10301_v62, %v10309_v63 }
0x231c   : > { %13175 = vmatprep.subr.bf16.mxu0 %v19957_v53  ;;  %v10318_v53 = vld [vmem:[%s29113_s11 + $0xa8] sm:$0xff]  ;;  %v19655_v12 = vcombine.high %v10317_v6, %v10325_v7  ;;  %v19654_v59 = vcombine.low %v10317_v6, %v10325_v7 }
0x231d   : > { %v19656_v18 = vcombine.low %v10318_v53, %v10326_v55 }
0x231e   : > { %13094 = vmatpush1.bf16.msra.mxu1 %v19954_v14  ;;  %v10341_v14 = vld [vmem:[%s29113_s11 + $0x160] sm:$0xff] }
0x231f   : > { %13176 = vmatpush1.bf16.msra.mxu0 %v19956_v0  ;;  %13095 = vmatprep.subr.bf16.mxu1 %v19971_v27  ;;  %v19657_v0 = vcombine.high %v10318_v53, %v10326_v55  ;;  %v10334_v27 = vld [vmem:[%s29113_s11 + $0x128] sm:$0xff]  ;;  %v19671_v20 = vcombine.high %v10333_v13, %v10341_v14  ;;  %v19670_v8 = vcombine.low %v10333_v13, %v10341_v14  ;;  %v10429_v55 = vld [vmem:[%s29113_s11 + $0x420] sm:$0xff] }
0x2320   : > { %13177 = vmatprep.subr.bf16.mxu0 %v19973_v17  ;;  %v10342_v17 = vld [vmem:[%s29113_s11 + $0x168] sm:$0xff] }
0x2321   : > { %v19673_v22 = vcombine.high %v10334_v27, %v10342_v17  ;;  %v19672_v16 = vcombine.low %v10334_v27, %v10342_v17  ;;  %v10438_v13 = vld [vmem:[%s29113_s11 + $0x468] sm:$0xff] }
0x2322   : > { %13096 = vmatpush1.bf16.msra.mxu1 %v19970_v44  ;;  %v10349_v44 = vld [vmem:[%s29113_s11 + $0x1a0] sm:$0xff] }
0x2323   : > { %13178 = vmatpush1.bf16.msra.mxu0 %v19972_v19  ;;  %13097 = vmatprep.subr.bf16.mxu1 %v19987_v24  ;;  %v10357_v19 = vld [vmem:[%s29113_s11 + $0x1e0] sm:$0xff]  ;;  %v10350_v24 = vld [vmem:[%s29113_s11 + $0x1a8] sm:$0xff] }
0x2324   : > { %13179 = vmatprep.subr.bf16.mxu0 %v19989_v29  ;;  %v10358_v29 = vld [vmem:[%s29113_s11 + $0x1e8] sm:$0xff]  ;;  %v19687_v26 = vcombine.high %v10349_v44, %v10357_v19  ;;  %v19686_v35 = vcombine.low %v10349_v44, %v10357_v19 }
0x2325   : > { %v19689_v15 = vcombine.high %v10350_v24, %v10358_v29  ;;  %v19688_v25 = vcombine.low %v10350_v24, %v10358_v29 }
0x2326   : > { %13098 = vmatpush1.bf16.msra.mxu1 %v19986_v1  ;;  %v10365_v1 = vld [vmem:[%s29113_s11 + $0x220] sm:$0xff] }
0x2327   : > { %13180 = vmatpush1.bf16.msra.mxu0 %v19988_v31  ;;  %13099 = vmatprep.subr.bf16.mxu1 %v20003_v36  ;;  %v10373_v31 = vld [vmem:[%s29113_s11 + $0x260] sm:$0xff]  ;;  %v10366_v36 = vld [vmem:[%s29113_s11 + $0x228] sm:$0xff] }
0x2328   : > { %13181 = vmatprep.subr.bf16.mxu0 %v20005_v32  ;;  %v10374_v32 = vld [vmem:[%s29113_s11 + $0x268] sm:$0xff]  ;;  %v19703_v43 = vcombine.high %v10365_v1, %v10373_v31  ;;  %v19702_v54 = vcombine.low %v10365_v1, %v10373_v31 }
0x2329   : > { %v19705_v46 = vcombine.high %v10366_v36, %v10374_v32  ;;  %v19704_v4 = vcombine.low %v10366_v36, %v10374_v32 }
0x232a   : > { %13100 = vmatpush1.bf16.msra.mxu1 %v20002_v47  ;;  %v10381_v47 = vld [vmem:[%s29113_s11 + $0x2a0] sm:$0xff] }
0x232b   : > { %13182 = vmatpush1.bf16.msra.mxu0 %v20004_v50  ;;  %13101 = vmatprep.subr.bf16.mxu1 %v20019_v51  ;;  %v10389_v50 = vld [vmem:[%s29113_s11 + $0x2e0] sm:$0xff]  ;;  %v10382_v51 = vld [vmem:[%s29113_s11 + $0x2a8] sm:$0xff] }
0x232c   : > { %13183 = vmatprep.subr.bf16.mxu0 %v20021_v40  ;;  %v10390_v40 = vld [vmem:[%s29113_s11 + $0x2e8] sm:$0xff]  ;;  %v19719_v52 = vcombine.high %v10381_v47, %v10389_v50  ;;  %v19718_v62 = vcombine.low %v10381_v47, %v10389_v50 }
0x232d   : > { %v19721_v56 = vcombine.high %v10382_v51, %v10390_v40  ;;  %v19720_v63 = vcombine.low %v10382_v51, %v10390_v40 }
0x232e   : > { %13102 = vmatpush1.bf16.msra.mxu1 %v20018_v57  ;;  %v10397_v57 = vld [vmem:[%s29113_s11 + $0x320] sm:$0xff] }
0x232f   : > { %13184 = vmatpush1.bf16.msra.mxu0 %v20020_v58  ;;  %13103 = vmatprep.subr.bf16.mxu1 %v20035_v33  ;;  %v10405_v58 = vld [vmem:[%s29113_s11 + $0x360] sm:$0xff]  ;;  %v10398_v33 = vld [vmem:[%s29113_s11 + $0x328] sm:$0xff] }
0x2330   : > { %13185 = vmatprep.subr.bf16.mxu0 %v20037_v61  ;;  %v10406_v61 = vld [vmem:[%s29113_s11 + $0x368] sm:$0xff]  ;;  %v19735_v39 = vcombine.high %v10397_v57, %v10405_v58  ;;  %v19734_v6 = vcombine.low %v10397_v57, %v10405_v58 }
0x2331   : > { %v19737_v45 = vcombine.high %v10398_v33, %v10406_v61  ;;  %v19736_v7 = vcombine.low %v10398_v33, %v10406_v61 }
0x2332   : > { %13104 = vmatpush1.bf16.msra.mxu1 %v20034_v3  ;;  %v10413_v3 = vld [vmem:[%s29113_s11 + $0x3a0] sm:$0xff] }
0x2333   : > { %13186 = vmatpush1.bf16.msra.mxu0 %v20036_v5  ;;  %13208 = vmatprep.subr.bf16.mxu1 %v19639_v48  ;;  %v10421_v5 = vld [vmem:[%s29113_s11 + $0x3e0] sm:$0xff]  ;;  %v10414_v48 = vld [vmem:[%s29113_s11 + $0x3a8] sm:$0xff] }
0x2334   : > { %13290 = vmatprep.subr.bf16.mxu0 %v19641_v21  ;;  %v10422_v21 = vld [vmem:[%s29113_s11 + $0x3e8] sm:$0xff]  ;;  %v19750_v14 = vcombine.low %v10413_v3, %v10421_v5 }
0x2335   : > { %13118 = vmatmul.mubr.bf16.vlgmr.msra.gmra.mrb[156].mxu1 %v26463_v10  ;;  %v19753_v53 = vcombine.high %v10414_v48, %v10422_v21 }
0x2336   : > { %13200 = vmatmul.mubr.bf16.vlgmr.msra.gmra.mrb[172].mxu0 %v26463_v10  ;;  %13209 = vmatpush1.bf16.msra.mxu1 %v19638_v41  ;;  %v19751_v41 = vcombine.high %v10413_v3, %v10421_v5 }
0x2337   : > { %13240 = vmatprep.mubr.bf16.mxu1 %v26327_v37  ;;  %13291 = vmatpush1.bf16.msra.mxu0 %v19640_v11  ;;  %v10437_v11 = vld [vmem:[%s29113_s11 + $0x460] sm:$0xff] }
0x2338   : > { %13322 = vmatprep.mubr.bf16.mxu0 %v26327_v37  ;;  %13210 = vmatprep.subr.bf16.mxu1 %v19655_v12  ;;  %v10430_v12 = vld [vmem:[%s29113_s11 + $0x428] sm:$0xff]  ;;  %v19767_v27 = vcombine.high %v10429_v55, %v10437_v11  ;;  %v19766_v44 = vcombine.low %v10429_v55, %v10437_v11 }
0x2339   : > { %13292 = vmatprep.subr.bf16.mxu0 %v19657_v0  ;;  %v19752_v0 = vcombine.low %v10414_v48, %v10422_v21  ;;  %v19769_v17 = vcombine.high %v10430_v12, %v10438_v13  ;;  %v19768_v19 = vcombine.low %v10430_v12, %v10438_v13 }
0x233a   : > { %13211 = vmatpush1.bf16.msra.mxu1 %v19654_v59  ;;  %v10445_v59 = vld [vmem:[%s29113_s11 + $0x4a0] sm:$0xff] }
0x233b   : > { %13293 = vmatpush1.bf16.msra.mxu0 %v19656_v18  ;;  %13212 = vmatprep.subr.bf16.mxu1 %v19671_v20  ;;  %v10453_v18 = vld [vmem:[%s29113_s11 + $0x4e0] sm:$0xff]  ;;  %v10446_v20 = vld [vmem:[%s29113_s11 + $0x4a8] sm:$0xff] }
0x233c   : > { %13294 = vmatprep.subr.bf16.mxu0 %v19673_v22  ;;  %v10454_v22 = vld [vmem:[%s29113_s11 + $0x4e8] sm:$0xff]  ;;  %v19783_v24 = vcombine.high %v10445_v59, %v10453_v18  ;;  %v19782_v1 = vcombine.low %v10445_v59, %v10453_v18 }
0x233d   : > { %v19785_v29 = vcombine.high %v10446_v20, %v10454_v22  ;;  %v19784_v31 = vcombine.low %v10446_v20, %v10454_v22 }
0x233e   : > { %13213 = vmatpush1.bf16.msra.mxu1 %v19670_v8  ;;  %v10461_v8 = vld [vmem:[%s29113_s11 + $0x520] sm:$0xff] }
0x233f   : > { %13295 = vmatpush1.bf16.msra.mxu0 %v19672_v16  ;;  %13214 = vmatprep.subr.bf16.mxu1 %v19687_v26  ;;  %v10469_v16 = vld [vmem:[%s29113_s11 + $0x560] sm:$0xff]  ;;  %v10462_v26 = vld [vmem:[%s29113_s11 + $0x528] sm:$0xff] }
0x2340   : > { %13296 = vmatprep.subr.bf16.mxu0 %v19689_v15  ;;  %v10470_v15 = vld [vmem:[%s29113_s11 + $0x568] sm:$0xff]  ;;  %v19799_v36 = vcombine.high %v10461_v8, %v10469_v16  ;;  %v19798_v47 = vcombine.low %v10461_v8, %v10469_v16 }
0x2341   : > { %v19801_v32 = vcombine.high %v10462_v26, %v10470_v15  ;;  %v19800_v50 = vcombine.low %v10462_v26, %v10470_v15 }
0x2342   : > { %13215 = vmatpush1.bf16.msra.mxu1 %v19686_v35  ;;  %v10477_v35 = vld [vmem:[%s29113_s11 + $0x5a0] sm:$0xff] }
0x2343   : > { %13297 = vmatpush1.bf16.msra.mxu0 %v19688_v25  ;;  %13216 = vmatprep.subr.bf16.mxu1 %v19703_v43  ;;  %v10485_v25 = vld [vmem:[%s29113_s11 + $0x5e0] sm:$0xff]  ;;  %v10478_v43 = vld [vmem:[%s29113_s11 + $0x5a8] sm:$0xff] }
0x2344   : > { %13298 = vmatprep.subr.bf16.mxu0 %v19705_v46  ;;  %v10486_v46 = vld [vmem:[%s29113_s11 + $0x5e8] sm:$0xff]  ;;  %v19815_v51 = vcombine.high %v10477_v35, %v10485_v25  ;;  %v19814_v57 = vcombine.low %v10477_v35, %v10485_v25 }
0x2345   : > { %v19817_v40 = vcombine.high %v10478_v43, %v10486_v46  ;;  %v19816_v58 = vcombine.low %v10478_v43, %v10486_v46  ;;  %v10582_v35 = vld [vmem:[%s29113_s11 + $0x8e8] sm:$0xff]  ;;  %v10589_v46 = vld [vmem:[%s29113_s11 + $0x920] sm:$0xff] }
0x2346   : > { %13217 = vmatpush1.bf16.msra.mxu1 %v19702_v54  ;;  %v10493_v54 = vld [vmem:[%s29113_s11 + $0x620] sm:$0xff] }
0x2347   : > { %13299 = vmatpush1.bf16.msra.mxu0 %v19704_v4  ;;  %13218 = vmatprep.subr.bf16.mxu1 %v19719_v52  ;;  %v10501_v4 = vld [vmem:[%s29113_s11 + $0x660] sm:$0xff]  ;;  %v10494_v52 = vld [vmem:[%s29113_s11 + $0x628] sm:$0xff] }
0x2348   : > { %13300 = vmatprep.subr.bf16.mxu0 %v19721_v56  ;;  %v10502_v56 = vld [vmem:[%s29113_s11 + $0x668] sm:$0xff]  ;;  %v19831_v33 = vcombine.high %v10493_v54, %v10501_v4  ;;  %v19830_v3 = vcombine.low %v10493_v54, %v10501_v4 }
0x2349   : > { %v19833_v61 = vcombine.high %v10494_v52, %v10502_v56  ;;  %v19832_v5 = vcombine.low %v10494_v52, %v10502_v56 }
0x234a   : > { %13219 = vmatpush1.bf16.msra.mxu1 %v19718_v62  ;;  %v10509_v62 = vld [vmem:[%s29113_s11 + $0x6a0] sm:$0xff] }
0x234b   : > { %13301 = vmatpush1.bf16.msra.mxu0 %v19720_v63  ;;  %13220 = vmatprep.subr.bf16.mxu1 %v19735_v39  ;;  %v10517_v63 = vld [vmem:[%s29113_s11 + $0x6e0] sm:$0xff]  ;;  %v10510_v39 = vld [vmem:[%s29113_s11 + $0x6a8] sm:$0xff] }
0x234c   : > { %13302 = vmatprep.subr.bf16.mxu0 %v19737_v45  ;;  %v10518_v45 = vld [vmem:[%s29113_s11 + $0x6e8] sm:$0xff]  ;;  %v19847_v48 = vcombine.high %v10509_v62, %v10517_v63  ;;  %v19846_v55 = vcombine.low %v10509_v62, %v10517_v63 }
0x234d   : > { %v19849_v21 = vcombine.high %v10510_v39, %v10518_v45  ;;  %v19848_v11 = vcombine.low %v10510_v39, %v10518_v45 }
0x234e   : > { %13221 = vmatpush1.bf16.msra.mxu1 %v19734_v6  ;;  %v10525_v6 = vld [vmem:[%s29113_s11 + $0x720] sm:$0xff] }
0x234f   : > { %13303 = vmatpush1.bf16.msra.mxu0 %v19736_v7  ;;  %13222 = vmatprep.subr.bf16.mxu1 %v19751_v41  ;;  %v10533_v7 = vld [vmem:[%s29113_s11 + $0x760] sm:$0xff]  ;;  %v10526_v41 = vld [vmem:[%s29113_s11 + $0x728] sm:$0xff] }
0x2350   : > { %13304 = vmatprep.subr.bf16.mxu0 %v19753_v53  ;;  %v10534_v53 = vld [vmem:[%s29113_s11 + $0x768] sm:$0xff]  ;;  %v19863_v12 = vcombine.high %v10525_v6, %v10533_v7  ;;  %v19862_v59 = vcombine.low %v10525_v6, %v10533_v7 }
0x2351   : > { %v19865_v13 = vcombine.high %v10526_v41, %v10534_v53  ;;  %v19864_v18 = vcombine.low %v10526_v41, %v10534_v53 }
0x2352   : > { %13223 = vmatpush1.bf16.msra.mxu1 %v19750_v14  ;;  %v10541_v14 = vld [vmem:[%s29113_s11 + $0x7a0] sm:$0xff] }
0x2353   : > { %13305 = vmatpush1.bf16.msra.mxu0 %v19752_v0  ;;  %13224 = vmatprep.subr.bf16.mxu1 %v19767_v27  ;;  %v10549_v0 = vld [vmem:[%s29113_s11 + $0x7e0] sm:$0xff]  ;;  %v10542_v27 = vld [vmem:[%s29113_s11 + $0x7a8] sm:$0xff] }
0x2354   : > { %13306 = vmatprep.subr.bf16.mxu0 %v19769_v17  ;;  %v10550_v17 = vld [vmem:[%s29113_s11 + $0x7e8] sm:$0xff]  ;;  %v19879_v20 = vcombine.high %v10541_v14, %v10549_v0  ;;  %v19878_v8 = vcombine.low %v10541_v14, %v10549_v0 }
0x2355   : > { %v19881_v22 = vcombine.high %v10542_v27, %v10550_v17  ;;  %v19880_v16 = vcombine.low %v10542_v27, %v10550_v17 }
0x2356   : > { %13225 = vmatpush1.bf16.msra.mxu1 %v19766_v44  ;;  %v10557_v44 = vld [vmem:[%s29113_s11 + $0x820] sm:$0xff] }
0x2357   : > { %13307 = vmatpush1.bf16.msra.mxu0 %v19768_v19  ;;  %13226 = vmatprep.subr.bf16.mxu1 %v19783_v24  ;;  %v10565_v19 = vld [vmem:[%s29113_s11 + $0x860] sm:$0xff]  ;;  %v10558_v24 = vld [vmem:[%s29113_s11 + $0x828] sm:$0xff] }
0x2358   : > { %13308 = vmatprep.subr.bf16.mxu0 %v19785_v29  ;;  %v10566_v29 = vld [vmem:[%s29113_s11 + $0x868] sm:$0xff]  ;;  %v19895_v26 = vcombine.high %v10557_v44, %v10565_v19 }
0x2359   : > { %v19897_v15 = vcombine.high %v10558_v24, %v10566_v29  ;;  %v19896_v25 = vcombine.low %v10558_v24, %v10566_v29 }
0x235a   : > { %13227 = vmatpush1.bf16.msra.mxu1 %v19782_v1  ;;  %v10573_v1 = vld [vmem:[%s29113_s11 + $0x8a0] sm:$0xff] }
0x235b   : > { %13309 = vmatpush1.bf16.msra.mxu0 %v19784_v31  ;;  %13228 = vmatprep.subr.bf16.mxu1 %v19799_v36  ;;  %v10581_v31 = vld [vmem:[%s29113_s11 + $0x8e0] sm:$0xff]  ;;  %v19894_v36 = vcombine.low %v10557_v44, %v10565_v19 }
0x235c   : > { %13310 = vmatprep.subr.bf16.mxu0 %v19801_v32  ;;  %v10574_v32 = vld [vmem:[%s29113_s11 + $0x8a8] sm:$0xff]  ;;  %v19911_v43 = vcombine.high %v10573_v1, %v10581_v31  ;;  %v19910_v54 = vcombine.low %v10573_v1, %v10581_v31 }
0x235d   : > { %v19912_v4 = vcombine.low %v10574_v32, %v10582_v35 }
0x235e   : > { %13229 = vmatpush1.bf16.msra.mxu1 %v19798_v47  ;;  %v10597_v47 = vld [vmem:[%s29113_s11 + $0x960] sm:$0xff] }
0x235f   : > { %13311 = vmatpush1.bf16.msra.mxu0 %v19800_v50  ;;  %13230 = vmatprep.subr.bf16.mxu1 %v19815_v51  ;;  %v19913_v50 = vcombine.high %v10574_v32, %v10582_v35  ;;  %v10590_v51 = vld [vmem:[%s29113_s11 + $0x928] sm:$0xff]  ;;  %v19927_v52 = vcombine.high %v10589_v46, %v10597_v47  ;;  %v19926_v62 = vcombine.low %v10589_v46, %v10597_v47  ;;  %v10685_v35 = vld [vmem:[%s29113_s11 + $0xc20] sm:$0xff] }
0x2360   : > { %13312 = vmatprep.subr.bf16.mxu0 %v19817_v40  ;;  %v10598_v40 = vld [vmem:[%s29113_s11 + $0x968] sm:$0xff] }
0x2361   : > { %v19929_v56 = vcombine.high %v10590_v51, %v10598_v40  ;;  %v19928_v63 = vcombine.low %v10590_v51, %v10598_v40  ;;  %v10694_v46 = vld [vmem:[%s29113_s11 + $0xc68] sm:$0xff] }
0x2362   : > { %13231 = vmatpush1.bf16.msra.mxu1 %v19814_v57  ;;  %v10605_v57 = vld [vmem:[%s29113_s11 + $0x9a0] sm:$0xff] }
0x2363   : > { %13313 = vmatpush1.bf16.msra.mxu0 %v19816_v58  ;;  %13232 = vmatprep.subr.bf16.mxu1 %v19831_v33  ;;  %v10613_v58 = vld [vmem:[%s29113_s11 + $0x9e0] sm:$0xff]  ;;  %v10606_v33 = vld [vmem:[%s29113_s11 + $0x9a8] sm:$0xff] }
0x2364   : > { %13314 = vmatprep.subr.bf16.mxu0 %v19833_v61  ;;  %v10614_v61 = vld [vmem:[%s29113_s11 + $0x9e8] sm:$0xff]  ;;  %v19943_v39 = vcombine.high %v10605_v57, %v10613_v58  ;;  %v19942_v6 = vcombine.low %v10605_v57, %v10613_v58 }
0x2365   : > { %v19945_v45 = vcombine.high %v10606_v33, %v10614_v61  ;;  %v19944_v7 = vcombine.low %v10606_v33, %v10614_v61 }
0x2366   : > { %13233 = vmatpush1.bf16.msra.mxu1 %v19830_v3  ;;  %v10621_v3 = vld [vmem:[%s29113_s11 + $0xa20] sm:$0xff] }
0x2367   : > { %13315 = vmatpush1.bf16.msra.mxu0 %v19832_v5  ;;  %13234 = vmatprep.subr.bf16.mxu1 %v19847_v48  ;;  %v10629_v5 = vld [vmem:[%s29113_s11 + $0xa60] sm:$0xff]  ;;  %v10622_v48 = vld [vmem:[%s29113_s11 + $0xa28] sm:$0xff] }
0x2368   : > { %13316 = vmatprep.subr.bf16.mxu0 %v19849_v21  ;;  %v10630_v21 = vld [vmem:[%s29113_s11 + $0xa68] sm:$0xff]  ;;  %v19959_v41 = vcombine.high %v10621_v3, %v10629_v5  ;;  %v19958_v14 = vcombine.low %v10621_v3, %v10629_v5 }
0x2369   : > { %v19961_v53 = vcombine.high %v10622_v48, %v10630_v21  ;;  %v19960_v0 = vcombine.low %v10622_v48, %v10630_v21 }
0x236a   : > { %13235 = vmatpush1.bf16.msra.mxu1 %v19846_v55  ;;  %v10637_v55 = vld [vmem:[%s29113_s11 + $0xaa0] sm:$0xff] }
0x236b   : > { %13317 = vmatpush1.bf16.msra.mxu0 %v19848_v11  ;;  %13236 = vmatprep.subr.bf16.mxu1 %v19863_v12  ;;  %v10645_v11 = vld [vmem:[%s29113_s11 + $0xae0] sm:$0xff]  ;;  %v10638_v12 = vld [vmem:[%s29113_s11 + $0xaa8] sm:$0xff] }
0x236c   : > { %13318 = vmatprep.subr.bf16.mxu0 %v19865_v13  ;;  %v10646_v13 = vld [vmem:[%s29113_s11 + $0xae8] sm:$0xff]  ;;  %v19975_v27 = vcombine.high %v10637_v55, %v10645_v11  ;;  %v19974_v44 = vcombine.low %v10637_v55, %v10645_v11  ;;  %v10328_v55 = vld [vmem:[%s29113_s11 + $0xf8] sm:$0xff] }
0x236d   : > { %v19977_v17 = vcombine.high %v10638_v12, %v10646_v13  ;;  %v19976_v19 = vcombine.low %v10638_v12, %v10646_v13  ;;  %v10335_v13 = vld [vmem:[%s29113_s11 + $0x130] sm:$0xff] }
0x236e   : > { %13237 = vmatpush1.bf16.msra.mxu1 %v19862_v59  ;;  %v10653_v59 = vld [vmem:[%s29113_s11 + $0xb20] sm:$0xff] }
0x236f   : > { %13319 = vmatpush1.bf16.msra.mxu0 %v19864_v18  ;;  %13238 = vmatprep.subr.bf16.mxu1 %v19879_v20  ;;  %v10661_v18 = vld [vmem:[%s29113_s11 + $0xb60] sm:$0xff]  ;;  %v10654_v20 = vld [vmem:[%s29113_s11 + $0xb28] sm:$0xff] }
0x2370   : > { %13320 = vmatprep.subr.bf16.mxu0 %v19881_v22  ;;  %v10662_v22 = vld [vmem:[%s29113_s11 + $0xb68] sm:$0xff]  ;;  %v19991_v24 = vcombine.high %v10653_v59, %v10661_v18  ;;  %v19990_v1 = vcombine.low %v10653_v59, %v10661_v18 }
0x2371   : > { %v19993_v29 = vcombine.high %v10654_v20, %v10662_v22  ;;  %v19992_v31 = vcombine.low %v10654_v20, %v10662_v22 }
0x2372   : > { %13239 = vmatpush1.bf16.msra.mxu1 %v19878_v8  ;;  %v10669_v8 = vld [vmem:[%s29113_s11 + $0xba0] sm:$0xff] }
0x2373   : > { %13321 = vmatpush1.bf16.msra.mxu0 %v19880_v16  ;;  %13249 = vmatprep.subr.bf16.mxu1 %v19895_v26  ;;  %v10677_v16 = vld [vmem:[%s29113_s11 + $0xbe0] sm:$0xff]  ;;  %v10670_v26 = vld [vmem:[%s29113_s11 + $0xba8] sm:$0xff] }
0x2374   : > { %13331 = vmatprep.subr.bf16.mxu0 %v19897_v15  ;;  %v10678_v15 = vld [vmem:[%s29113_s11 + $0xbe8] sm:$0xff]  ;;  %v20006_v47 = vcombine.low %v10669_v8, %v10677_v16 }
0x2375   : > { %13241 = vmatmul.mubr.bf16.vlgmr.msra.gmra.mrb[160].mxu1 %v26329_v38  ;;  %v20009_v32 = vcombine.high %v10670_v26, %v10678_v15 }
0x2376   : > { %13323 = vmatmul.mubr.bf16.vlgmr.msra.gmra.mrb[176].mxu0 %v26329_v38  ;;  %13250 = vmatpush1.bf16.msra.mxu1 %v19894_v36  ;;  %v20007_v36 = vcombine.high %v10669_v8, %v10677_v16 }
0x2377   : > { %20050 = vmatprep.mubr.msk.bf16.mxu1 %vm792_vm0, %v26334_v42  ;;  %13332 = vmatpush1.bf16.msra.mxu0 %v19896_v25  ;;  %v10693_v25 = vld [vmem:[%s29113_s11 + $0xc60] sm:$0xff] }
0x2378   : > { %20051 = vmatprep.mubr.msk.bf16.mxu0 %vm792_vm0, %v26334_v42  ;;  %13251 = vmatprep.subr.bf16.mxu1 %v19911_v43  ;;  %v10686_v43 = vld [vmem:[%s29113_s11 + $0xc28] sm:$0xff]  ;;  %v20023_v51 = vcombine.high %v10685_v35, %v10693_v25  ;;  %v20022_v57 = vcombine.low %v10685_v35, %v10693_v25 }
0x2379   : > { %13333 = vmatprep.subr.bf16.mxu0 %v19913_v50  ;;  %v20008_v50 = vcombine.low %v10670_v26, %v10678_v15  ;;  %v20025_v40 = vcombine.high %v10686_v43, %v10694_v46  ;;  %v20024_v58 = vcombine.low %v10686_v43, %v10694_v46  ;;  %v10360_v26 = vld [vmem:[%s29113_s11 + $0x1f8] sm:$0xff]  ;;  %v10367_v46 = vld [vmem:[%s29113_s11 + $0x230] sm:$0xff] }
0x237a   : > { %13252 = vmatpush1.bf16.msra.mxu1 %v19910_v54  ;;  %v10701_v54 = vld [vmem:[%s29113_s11 + $0xca0] sm:$0xff] }
0x237b   : > { %13334 = vmatpush1.bf16.msra.mxu0 %v19912_v4  ;;  %13253 = vmatprep.subr.bf16.mxu1 %v19927_v52  ;;  %v10709_v4 = vld [vmem:[%s29113_s11 + $0xce0] sm:$0xff]  ;;  %v10702_v52 = vld [vmem:[%s29113_s11 + $0xca8] sm:$0xff] }
0x237c   : > { %13335 = vmatprep.subr.bf16.mxu0 %v19929_v56  ;;  %v10710_v56 = vld [vmem:[%s29113_s11 + $0xce8] sm:$0xff]  ;;  %v20039_v33 = vcombine.high %v10701_v54, %v10709_v4  ;;  %v20038_v3 = vcombine.low %v10701_v54, %v10709_v4 }
0x237d   : > { %v20041_v61 = vcombine.high %v10702_v52, %v10710_v56  ;;  %v20040_v5 = vcombine.low %v10702_v52, %v10710_v56  ;;  %v10383_v56 = vld [vmem:[%s29113_s11 + $0x2b0] sm:$0xff] }
0x237e   : > { %13254 = vmatpush1.bf16.msra.mxu1 %v19926_v62  ;;  %v10303_v62 = vld [vmem:[%s29113_s11 + $0x30] sm:$0xff] }
0x237f   : > { %13336 = vmatpush1.bf16.msra.mxu0 %v19928_v63  ;;  %13255 = vmatprep.subr.bf16.mxu1 %v19943_v39  ;;  %v10311_v63 = vld [vmem:[%s29113_s11 + $0x70] sm:$0xff]  ;;  %v10304_v39 = vld [vmem:[%s29113_s11 + $0x38] sm:$0xff] }
0x2380   : > { %13337 = vmatprep.subr.bf16.mxu0 %v19945_v45  ;;  %v10312_v45 = vld [vmem:[%s29113_s11 + $0x78] sm:$0xff]  ;;  %v19643_v48 = vcombine.high %v10303_v62, %v10311_v63 }
0x2381   : > { %v19645_v21 = vcombine.high %v10304_v39, %v10312_v45  ;;  %v19644_v11 = vcombine.low %v10304_v39, %v10312_v45  ;;  %v10399_v45 = vld [vmem:[%s29113_s11 + $0x330] sm:$0xff] }
0x2382   : > { %13256 = vmatpush1.bf16.msra.mxu1 %v19942_v6  ;;  %v10319_v6 = vld [vmem:[%s29113_s11 + $0xb0] sm:$0xff] }
0x2383   : > { %13338 = vmatpush1.bf16.msra.mxu0 %v19944_v7  ;;  %13257 = vmatprep.subr.bf16.mxu1 %v19959_v41  ;;  %v10327_v7 = vld [vmem:[%s29113_s11 + $0xf0] sm:$0xff]  ;;  %v19642_v41 = vcombine.low %v10303_v62, %v10311_v63 }
0x2384   : > { %13339 = vmatprep.subr.bf16.mxu0 %v19961_v53  ;;  %v10320_v53 = vld [vmem:[%s29113_s11 + $0xb8] sm:$0xff]  ;;  %v19659_v12 = vcombine.high %v10319_v6, %v10327_v7  ;;  %v19658_v59 = vcombine.low %v10319_v6, %v10327_v7 }
0x2385   : > { %v19660_v18 = vcombine.low %v10320_v53, %v10328_v55 }
0x2386   : > { %13258 = vmatpush1.bf16.msra.mxu1 %v19958_v14  ;;  %v10343_v14 = vld [vmem:[%s29113_s11 + $0x170] sm:$0xff] }
0x2387   : > { %13340 = vmatpush1.bf16.msra.mxu0 %v19960_v0  ;;  %13259 = vmatprep.subr.bf16.mxu1 %v19975_v27  ;;  %v19661_v0 = vcombine.high %v10320_v53, %v10328_v55  ;;  %v10336_v27 = vld [vmem:[%s29113_s11 + $0x138] sm:$0xff]  ;;  %v19675_v20 = vcombine.high %v10335_v13, %v10343_v14  ;;  %v10415_v53 = vld [vmem:[%s29113_s11 + $0x3b0] sm:$0xff] }
0x2388   : > { %13341 = vmatprep.subr.bf16.mxu0 %v19977_v17  ;;  %v10344_v17 = vld [vmem:[%s29113_s11 + $0x178] sm:$0xff]  ;;  %v10423_v55 = vld [vmem:[%s29113_s11 + $0x3f0] sm:$0xff] }
0x2389   : > { %v19676_v35 = vcombine.low %v10336_v27, %v10344_v17 }
0x238a   : > { %13260 = vmatpush1.bf16.msra.mxu1 %v19974_v44 }
0x238b   : > { %13342 = vmatpush1.bf16.msra.mxu0 %v19976_v19  ;;  %13261 = vmatprep.subr.bf16.mxu1 %v19991_v24  ;;  %v19677_v19 = vcombine.high %v10336_v27, %v10344_v17  ;;  %v10351_v24 = vld [vmem:[%s29113_s11 + $0x1b0] sm:$0xff] }
0x238c   : > { %13343 = vmatprep.subr.bf16.mxu0 %v19993_v29  ;;  %v10359_v29 = vld [vmem:[%s29113_s11 + $0x1f0] sm:$0xff] }
0x238d   : > { %v19691_v25 = vcombine.high %v10351_v24, %v10359_v29  ;;  %v10431_v17 = vld [vmem:[%s29113_s11 + $0x430] sm:$0xff] }
0x238e   : > { %13262 = vmatpush1.bf16.msra.mxu1 %v19990_v1 }
0x238f   : > { %13344 = vmatpush1.bf16.msra.mxu0 %v19992_v31  ;;  %13263 = vmatprep.subr.bf16.mxu1 %v20007_v36  ;;  %v19674_v31 = vcombine.low %v10335_v13, %v10343_v14 }
0x2390   : > { %13345 = vmatprep.subr.bf16.mxu0 %v20009_v32 }
0x2392   : > { %13264 = vmatpush1.bf16.msra.mxu1 %v20006_v47  ;;  %v10375_v47 = vld [vmem:[%s29113_s11 + $0x270] sm:$0xff] }
0x2393   : > { %13346 = vmatpush1.bf16.msra.mxu0 %v20008_v50  ;;  %13265 = vmatprep.subr.bf16.mxu1 %v20023_v51  ;;  %v10368_v50 = vld [vmem:[%s29113_s11 + $0x238] sm:$0xff]  ;;  %v19707_v4 = vcombine.high %v10367_v46, %v10375_v47 }
0x2394   : > { %13347 = vmatprep.subr.bf16.mxu0 %v20025_v40  ;;  %v10376_v51 = vld [vmem:[%s29113_s11 + $0x278] sm:$0xff]  ;;  %v19690_v40 = vcombine.low %v10351_v24, %v10359_v29 }
0x2395   : > { %v19709_v52 = vcombine.high %v10368_v50, %v10376_v51  ;;  %v19708_v62 = vcombine.low %v10368_v50, %v10376_v51  ;;  %v10472_v50 = vld [vmem:[%s29113_s11 + $0x578] sm:$0xff] }
0x2396   : > { %13266 = vmatpush1.bf16.msra.mxu1 %v20022_v57  ;;  %v10391_v57 = vld [vmem:[%s29113_s11 + $0x2f0] sm:$0xff] }
0x2397   : > { %13348 = vmatpush1.bf16.msra.mxu0 %v20024_v58  ;;  %13267 = vmatprep.subr.bf16.mxu1 %v20039_v33  ;;  %v10384_v58 = vld [vmem:[%s29113_s11 + $0x2b8] sm:$0xff]  ;;  %v19723_v63 = vcombine.high %v10383_v56, %v10391_v57 }
0x2398   : > { %13349 = vmatprep.subr.bf16.mxu0 %v20041_v61  ;;  %v10392_v33 = vld [vmem:[%s29113_s11 + $0x2f8] sm:$0xff]  ;;  %v19706_v61 = vcombine.low %v10367_v46, %v10375_v47  ;;  %v10471_v46 = vld [vmem:[%s29113_s11 + $0x570] sm:$0xff] }
0x2399   : > { %v19725_v39 = vcombine.high %v10384_v58, %v10392_v33  ;;  %v19724_v6 = vcombine.low %v10384_v58, %v10392_v33  ;;  %v10464_v47 = vld [vmem:[%s29113_s11 + $0x538] sm:$0xff] }
0x239a   : > { %13268 = vmatpush1.bf16.msra.mxu1 %v20038_v3  ;;  %v10407_v3 = vld [vmem:[%s29113_s11 + $0x370] sm:$0xff]  ;;  %v10488_v58 = vld [vmem:[%s29113_s11 + $0x5f8] sm:$0xff] }
0x239b   : > { %13350 = vmatpush1.bf16.msra.mxu0 %v20040_v5  ;;  %13372 = vmatprep.subr.bf16.mxu1 %v19643_v48  ;;  %v10400_v5 = vld [vmem:[%s29113_s11 + $0x338] sm:$0xff]  ;;  %v19739_v7 = vcombine.high %v10399_v45, %v10407_v3  ;;  %v19738_v13 = vcombine.low %v10399_v45, %v10407_v3  ;;  %v10503_v45 = vld [vmem:[%s29113_s11 + $0x670] sm:$0xff] }
0x239c   : > { %13454 = vmatprep.subr.bf16.mxu0 %v19645_v21  ;;  %v10408_v48 = vld [vmem:[%s29113_s11 + $0x378] sm:$0xff]  ;;  %v19722_v21 = vcombine.low %v10383_v56, %v10391_v57  ;;  %v10487_v56 = vld [vmem:[%s29113_s11 + $0x5f0] sm:$0xff] }
0x239d   : > { %13282 = vmatmul.mubr.bf16.vlgmr.msra.gmra.mrb[160].mxu1 %v26463_v10  ;;  %v19740_v14 = vcombine.low %v10400_v5, %v10408_v48  ;;  %v10480_v57 = vld [vmem:[%s29113_s11 + $0x5b8] sm:$0xff] }
0x239e   : > { %13364 = vmatmul.mubr.bf16.vlgmr.msra.gmra.mrb[176].mxu0 %v26463_v10  ;;  %13373 = vmatpush1.bf16.msra.mxu1 %v19642_v41  ;;  %v19741_v41 = vcombine.high %v10400_v5, %v10408_v48  ;;  %v10496_v3 = vld [vmem:[%s29113_s11 + $0x638] sm:$0xff] }
0x239f   : > { %13404 = vmatprep.mubr.bf16.mxu1 %v26327_v37  ;;  %13455 = vmatpush1.bf16.msra.mxu0 %v19644_v11  ;;  %v10416_v11 = vld [vmem:[%s29113_s11 + $0x3b8] sm:$0xff] }
0x23a0   : > { %13486 = vmatprep.mubr.bf16.mxu0 %v26327_v37  ;;  %v27125_v22 = vpop.f32.mrb[152].mxu1  ;;  %v27127_v44 = vpop.f32.mrb[168].mxu0  ;;  %13374 = vmatprep.subr.bf16.mxu1 %v19659_v12  ;;  %v10352_v37 = vld [vmem:[%s29113_s11 + $0x1b8] sm:$0xff] }
0x23a1   : > { %v27135_v8 = vpop.f32.mrb[153].mxu1  ;;  %v27137_v16 = vpop.f32.mrb[169].mxu0  ;;  %13456 = vmatprep.subr.bf16.mxu0 %v19661_v0  ;;  %v19693_v43 = vcombine.high %v10352_v37, %v10360_v26  ;;  %v19692_v54 = vcombine.low %v10352_v37, %v10360_v26  ;;  %v10424_v12 = vld [vmem:[%s29113_s11 + $0x3f8] sm:$0xff]  ;;  %v19755_v0 = vcombine.high %v10415_v53, %v10423_v55  ;;  %v10447_v26 = vld [vmem:[%s29113_s11 + $0x4b0] sm:$0xff] }
0x23a2   : > { %v12959_v15 = vpop.f32.mrb[154].mxu1  ;;  %v13041_v1 = vpop.f32.mrb[170].mxu0  ;;  %13375 = vmatpush1.bf16.msra.mxu1 %v19658_v59  ;;  %v19757_v27 = vcombine.high %v10416_v11, %v10424_v12  ;;  %v10439_v59 = vld [vmem:[%s29113_s11 + $0x470] sm:$0xff]  ;;  %v19756_v24 = vcombine.low %v10416_v11, %v10424_v12  ;;  %v10504_v5 = vld [vmem:[%s29113_s11 + $0x678] sm:$0xff] }
0x23a3   : > { %13457 = vmatpush1.bf16.msra.mxu0 %v19660_v18  ;;  %v12960_v36 = vpop.f32.mrb[155].mxu1  ;;  %v13042_v32 = vpop.f32.mrb[171].mxu0  ;;  %13376 = vmatprep.subr.bf16.mxu1 %v19675_v20  ;;  %v10432_v18 = vld [vmem:[%s29113_s11 + $0x438] sm:$0xff]  ;;  %v19771_v29 = vcombine.high %v10431_v17, %v10439_v59  ;;  %v10455_v15 = vld [vmem:[%s29113_s11 + $0x4f0] sm:$0xff] }
0x23a4   : > { %13458 = vmatprep.subr.bf16.mxu0 %v19677_v19  ;;  %v10440_v20 = vld [vmem:[%s29113_s11 + $0x478] sm:$0xff]  ;;  %v19754_v19 = vcombine.low %v10415_v53, %v10423_v55  ;;  %v19770_v36 = vcombine.low %v10431_v17, %v10439_v59  ;;  %v19786_v51 = vcombine.low %v10447_v26, %v10455_v15  ;;  %v10519_v53 = vld [vmem:[%s29113_s11 + $0x6f0] sm:$0xff] }
0x23a5   : > { %v19773_v37 = vcombine.high %v10432_v18, %v10440_v20  ;;  %v10448_v1 = vld [vmem:[%s29113_s11 + $0x4b8] sm:$0xff]  ;;  %v19772_v32 = vcombine.low %v10432_v18, %v10440_v20  ;;  %v10535_v17 = vld [vmem:[%s29113_s11 + $0x770] sm:$0xff] }
0x23a6   : > { %13377 = vmatpush1.bf16.msra.mxu1 %v19674_v31  ;;  %v10456_v31 = vld [vmem:[%s29113_s11 + $0x4f8] sm:$0xff] }
0x23a7   : > { %13459 = vmatpush1.bf16.msra.mxu0 %v19676_v35  ;;  %13378 = vmatprep.subr.bf16.mxu1 %v19691_v25  ;;  %v19787_v35 = vcombine.high %v10447_v26, %v10455_v15  ;;  %v19789_v25 = vcombine.high %v10448_v1, %v10456_v31  ;;  %v10512_v55 = vld [vmem:[%s29113_s11 + $0x6b8] sm:$0xff]  ;;  %v10551_v26 = vld [vmem:[%s29113_s11 + $0x7f0] sm:$0xff] }
0x23a8   : > { %13460 = vmatprep.subr.bf16.mxu0 %v19693_v43  ;;  %v10463_v43 = vld [vmem:[%s29113_s11 + $0x530] sm:$0xff]  ;;  %v10520_v11 = vld [vmem:[%s29113_s11 + $0x6f8] sm:$0xff] }
0x23a9   : > { %v19802_v33 = vcombine.low %v10463_v43, %v10471_v46  ;;  %v10528_v59 = vld [vmem:[%s29113_s11 + $0x738] sm:$0xff] }
0x23aa   : > { %13379 = vmatpush1.bf16.msra.mxu1 %v19690_v40  ;;  %v19788_v40 = vcombine.low %v10448_v1, %v10456_v31  ;;  %v10536_v18 = vld [vmem:[%s29113_s11 + $0x778] sm:$0xff] }
0x23ab   : > { %13461 = vmatpush1.bf16.msra.mxu0 %v19692_v54  ;;  %13380 = vmatprep.subr.bf16.mxu1 %v19707_v4  ;;  %v19803_v54 = vcombine.high %v10463_v43, %v10471_v46  ;;  %v19805_v4 = vcombine.high %v10464_v47, %v10472_v50  ;;  %v10544_v15 = vld [vmem:[%s29113_s11 + $0x7b8] sm:$0xff]  ;;  %v10567_v43 = vld [vmem:[%s29113_s11 + $0x870] sm:$0xff] }
0x23ac   : > { %13462 = vmatprep.subr.bf16.mxu0 %v19709_v52  ;;  %v10479_v52 = vld [vmem:[%s29113_s11 + $0x5b0] sm:$0xff]  ;;  %v10552_v1 = vld [vmem:[%s29113_s11 + $0x7f8] sm:$0xff] }
0x23ad   : > { %v19818_v48 = vcombine.low %v10479_v52, %v10487_v56  ;;  %v10560_v46 = vld [vmem:[%s29113_s11 + $0x838] sm:$0xff] }
0x23ae   : > { %13381 = vmatpush1.bf16.msra.mxu1 %v19706_v61  ;;  %v19804_v61 = vcombine.low %v10464_v47, %v10472_v50  ;;  %v10568_v47 = vld [vmem:[%s29113_s11 + $0x878] sm:$0xff] }
0x23af   : > { %13463 = vmatpush1.bf16.msra.mxu0 %v19708_v62  ;;  %13382 = vmatprep.subr.bf16.mxu1 %v19723_v63  ;;  %v19819_v62 = vcombine.high %v10479_v52, %v10487_v56  ;;  %v19821_v63 = vcombine.high %v10480_v57, %v10488_v58  ;;  %v10583_v52 = vld [vmem:[%s29113_s11 + $0x8f0] sm:$0xff] }
0x23b0   : > { %13464 = vmatprep.subr.bf16.mxu0 %v19725_v39  ;;  %v10495_v39 = vld [vmem:[%s29113_s11 + $0x630] sm:$0xff] }
0x23b1   : > { %v19834_v12 = vcombine.low %v10495_v39, %v10503_v45 }
0x23b2   : > { %13383 = vmatpush1.bf16.msra.mxu1 %v19722_v21  ;;  %v19820_v21 = vcombine.low %v10480_v57, %v10488_v58  ;;  %v10576_v57 = vld [vmem:[%s29113_s11 + $0x8b8] sm:$0xff] }
0x23b3   : > { %13465 = vmatpush1.bf16.msra.mxu0 %v19724_v6  ;;  %13384 = vmatprep.subr.bf16.mxu1 %v19739_v7  ;;  %v19835_v6 = vcombine.high %v10495_v39, %v10503_v45  ;;  %v19837_v7 = vcombine.high %v10496_v3, %v10504_v5  ;;  %v10584_v58 = vld [vmem:[%s29113_s11 + $0x8f8] sm:$0xff] }
0x23b4   : > { %13466 = vmatprep.subr.bf16.mxu0 %v19741_v41  ;;  %v10511_v41 = vld [vmem:[%s29113_s11 + $0x6b0] sm:$0xff]  ;;  %v19917_v39 = vcombine.high %v10576_v57, %v10584_v58  ;;  %v10592_v45 = vld [vmem:[%s29113_s11 + $0x938] sm:$0xff] }
0x23b5   : > { %v19850_v20 = vcombine.low %v10511_v41, %v10519_v53 }
0x23b6   : > { %13385 = vmatpush1.bf16.msra.mxu1 %v19738_v13  ;;  %v19836_v13 = vcombine.low %v10496_v3, %v10504_v5  ;;  %v10600_v3 = vld [vmem:[%s29113_s11 + $0x978] sm:$0xff] }
0x23b7   : > { %13467 = vmatpush1.bf16.msra.mxu0 %v19740_v14  ;;  %13386 = vmatprep.subr.bf16.mxu1 %v19755_v0  ;;  %v19851_v14 = vcombine.high %v10511_v41, %v10519_v53  ;;  %v19853_v0 = vcombine.high %v10512_v55, %v10520_v11  ;;  %v10608_v41 = vld [vmem:[%s29113_s11 + $0x9b8] sm:$0xff] }
0x23b8   : > { %13468 = vmatprep.subr.bf16.mxu0 %v19757_v27  ;;  %v10527_v27 = vld [vmem:[%s29113_s11 + $0x730] sm:$0xff]  ;;  %v10616_v53 = vld [vmem:[%s29113_s11 + $0x9f8] sm:$0xff] }
0x23b9   : > { %v19866_v31 = vcombine.low %v10527_v27, %v10535_v17 }
0x23ba   : > { %13387 = vmatpush1.bf16.msra.mxu1 %v19754_v19  ;;  %v19852_v19 = vcombine.low %v10512_v55, %v10520_v11  ;;  %v19932_v55 = vcombine.low %v10592_v45, %v10600_v3 }
0x23bb   : > { %13469 = vmatpush1.bf16.msra.mxu0 %v19756_v24  ;;  %13388 = vmatprep.subr.bf16.mxu1 %v19771_v29  ;;  %v19867_v24 = vcombine.high %v10527_v27, %v10535_v17  ;;  %v19869_v29 = vcombine.high %v10528_v59, %v10536_v18  ;;  %v10632_v27 = vld [vmem:[%s29113_s11 + $0xa78] sm:$0xff] }
0x23bc   : > { %13470 = vmatprep.subr.bf16.mxu0 %v19773_v37  ;;  %v10543_v37 = vld [vmem:[%s29113_s11 + $0x7b0] sm:$0xff] }
0x23bd   : > { %v19882_v50 = vcombine.low %v10543_v37, %v10551_v26 }
0x23be   : > { %13389 = vmatpush1.bf16.msra.mxu1 %v19770_v36  ;;  %v19868_v36 = vcombine.low %v10528_v59, %v10536_v18  ;;  %v19948_v59 = vcombine.low %v10608_v41, %v10616_v53 }
0x23bf   : > { %13471 = vmatpush1.bf16.msra.mxu0 %v19772_v32  ;;  %13390 = vmatprep.subr.bf16.mxu1 %v19787_v35  ;;  %v19883_v32 = vcombine.high %v10543_v37, %v10551_v26  ;;  %v19885_v35 = vcombine.high %v10544_v15, %v10552_v1  ;;  %v10648_v37 = vld [vmem:[%s29113_s11 + $0xaf8] sm:$0xff] }
0x23c0   : > { %13472 = vmatprep.subr.bf16.mxu0 %v19789_v25  ;;  %v10559_v25 = vld [vmem:[%s29113_s11 + $0x830] sm:$0xff] }
0x23c1   : > { %v19898_v56 = vcombine.low %v10559_v25, %v10567_v43 }
0x23c2   : > { %13391 = vmatpush1.bf16.msra.mxu1 %v19786_v51  ;;  %v19884_v51 = vcombine.low %v10544_v15, %v10552_v1 }
0x23c3   : > { %13473 = vmatpush1.bf16.msra.mxu0 %v19788_v40  ;;  %13392 = vmatprep.subr.bf16.mxu1 %v19803_v54  ;;  %v19899_v40 = vcombine.high %v10559_v25, %v10567_v43  ;;  %v19901_v54 = vcombine.high %v10560_v46, %v10568_v47  ;;  %v10664_v25 = vld [vmem:[%s29113_s11 + $0xb78] sm:$0xff] }
0x23c4   : > { %13474 = vmatprep.subr.bf16.mxu0 %v19805_v4  ;;  %v10575_v4 = vld [vmem:[%s29113_s11 + $0x8b0] sm:$0xff] }
0x23c5   : > { %v19914_v5 = vcombine.low %v10575_v4, %v10583_v52 }
0x23c6   : > { %13393 = vmatpush1.bf16.msra.mxu1 %v19802_v33  ;;  %v19900_v33 = vcombine.low %v10560_v46, %v10568_v47 }
0x23c7   : > { %13475 = vmatpush1.bf16.msra.mxu0 %v19804_v61  ;;  %13394 = vmatprep.subr.bf16.mxu1 %v19819_v62  ;;  %v19915_v61 = vcombine.high %v10575_v4, %v10583_v52  ;;  %v10591_v62 = vld [vmem:[%s29113_s11 + $0x930] sm:$0xff]  ;;  %v10680_v4 = vld [vmem:[%s29113_s11 + $0xbf8] sm:$0xff] }
0x23c8   : > { %13476 = vmatprep.subr.bf16.mxu0 %v19821_v63  ;;  %v10599_v63 = vld [vmem:[%s29113_s11 + $0x970] sm:$0xff] }
0x23ca   : > { %13395 = vmatpush1.bf16.msra.mxu1 %v19818_v48  ;;  %v19916_v48 = vcombine.low %v10576_v57, %v10584_v58 }
0x23cb   : > { %13477 = vmatpush1.bf16.msra.mxu0 %v19820_v21  ;;  %13396 = vmatprep.subr.bf16.mxu1 %v19835_v6  ;;  %v19931_v21 = vcombine.high %v10591_v62, %v10599_v63  ;;  %v19933_v6 = vcombine.high %v10592_v45, %v10600_v3 }
0x23cc   : > { %13478 = vmatprep.subr.bf16.mxu0 %v19837_v7  ;;  %v10607_v7 = vld [vmem:[%s29113_s11 + $0x9b0] sm:$0xff] }
0x23ce   : > { %13397 = vmatpush1.bf16.msra.mxu1 %v19834_v12  ;;  %v19949_v12 = vcombine.high %v10608_v41, %v10616_v53  ;;  %v10712_v41 = vld [vmem:[%s29113_s11 + $0xcf8] sm:$0xff] }
0x23cf   : > { %13479 = vmatpush1.bf16.msra.mxu0 %v19836_v13  ;;  %13398 = vmatprep.subr.bf16.mxu1 %v19851_v14  ;;  %v10623_v13 = vld [vmem:[%s29113_s11 + $0xa30] sm:$0xff] }
0x23d0   : > { %13480 = vmatprep.subr.bf16.mxu0 %v19853_v0  ;;  %v10631_v14 = vld [vmem:[%s29113_s11 + $0xa70] sm:$0xff]  ;;  %v10624_v0 = vld [vmem:[%s29113_s11 + $0xa38] sm:$0xff] }
0x23d1   : > { %v19963_v18 = vcombine.high %v10623_v13, %v10631_v14  ;;  %v19962_v26 = vcombine.low %v10623_v13, %v10631_v14  ;;  %v19964_v15 = vcombine.low %v10624_v0, %v10632_v27 }
0x23d2   : > { %13399 = vmatpush1.bf16.msra.mxu1 %v19850_v20  ;;  %v19965_v20 = vcombine.high %v10624_v0, %v10632_v27  ;;  %v22166_v0 = vld [vmem:[%s29115_s13 + $0x4] ss:$16 sps:$4 sm:$0xff]   ;;  %v22169_v27 = vld [vmem:[%s29115_s13 + $0xc] ss:$16 sps:$4 sm:$0xff]  }
0x23d3   : > { %13481 = vmatpush1.bf16.msra.mxu0 %v19852_v19  ;;  %13400 = vmatprep.subr.bf16.mxu1 %v19867_v24  ;;  %v10639_v19 = vld [vmem:[%s29113_s11 + $0xab0] sm:$0xff] }
0x23d4   : > { %13482 = vmatprep.subr.bf16.mxu0 %v19869_v29  ;;  %v10647_v24 = vld [vmem:[%s29113_s11 + $0xaf0] sm:$0xff]  ;;  %v10640_v29 = vld [vmem:[%s29113_s11 + $0xab8] sm:$0xff] }
0x23d5   : > { %v19979_v1 = vcombine.high %v10639_v19, %v10647_v24  ;;  %v19978_v43 = vcombine.low %v10639_v19, %v10647_v24  ;;  %v19980_v46 = vcombine.low %v10640_v29, %v10648_v37  ;;  %v22175_v19 = vld [vmem:[%s29115_s13 + $0x2c] ss:$16 sps:$4 sm:$0xff]   ;;  %v22170_v24 = vld [vmem:[%s29115_s13 + $0x20] ss:$16 sps:$4 sm:$0xff]  }
0x23d6   : > { %13401 = vmatpush1.bf16.msra.mxu1 %v19866_v31  ;;  %v19981_v31 = vcombine.high %v10640_v29, %v10648_v37  ;;  %v22173_v29 = vld [vmem:[%s29115_s13 + $0x28] ss:$16 sps:$4 sm:$0xff]   ;;  %v22178_v37 = vld [vmem:[%s29115_s13 + $0x44] ss:$16 sps:$4 sm:$0xff]  }
0x23d7   : > { %13483 = vmatpush1.bf16.msra.mxu0 %v19868_v36  ;;  %13402 = vmatprep.subr.bf16.mxu1 %v19883_v32  ;;  %v10655_v36 = vld [vmem:[%s29113_s11 + $0xb30] sm:$0xff] }
0x23d8   : > { %13484 = vmatprep.subr.bf16.mxu0 %v19885_v35  ;;  %v10663_v32 = vld [vmem:[%s29113_s11 + $0xb70] sm:$0xff]  ;;  %v10656_v35 = vld [vmem:[%s29113_s11 + $0xb38] sm:$0xff] }
0x23d9   : > { %v19995_v47 = vcombine.high %v10655_v36, %v10663_v32  ;;  %v19994_v52 = vcombine.low %v10655_v36, %v10663_v32  ;;  %v22176_v32 = vld [vmem:[%s29115_s13 + $0x40] ss:$16 sps:$4 sm:$0xff]  }
0x23da   : > { %13403 = vmatpush1.bf16.msra.mxu1 %v19882_v50  ;;  %v19997_v50 = vcombine.high %v10656_v35, %v10664_v25 }
0x23db   : > { %13485 = vmatpush1.bf16.msra.mxu0 %v19884_v51  ;;  %13413 = vmatprep.subr.bf16.mxu1 %v19899_v40  ;;  %v10671_v51 = vld [vmem:[%s29113_s11 + $0xbb0] sm:$0xff] }
0x23dc   : > { %13495 = vmatprep.subr.bf16.mxu0 %v19901_v54  ;;  %v10679_v40 = vld [vmem:[%s29113_s11 + $0xbf0] sm:$0xff]  ;;  %v10672_v54 = vld [vmem:[%s29113_s11 + $0xbb8] sm:$0xff] }
0x23dd   : > { %13405 = vmatmul.mubr.bf16.vlgmr.msra.gmra.mrb[164].mxu1 %v26329_v38  ;;  %v20011_v57 = vcombine.high %v10671_v51, %v10679_v40  ;;  %v20013_v58 = vcombine.high %v10672_v54, %v10680_v4  ;;  %v20010_v45 = vcombine.low %v10671_v51, %v10679_v40  ;;  %v20012_v3 = vcombine.low %v10672_v54, %v10680_v4  ;;  %v22182_v51 = vld [vmem:[%s29115_s13 + $0x60] ss:$16 sps:$4 sm:$0xff]   ;;  %v22185_v40 = vld [vmem:[%s29115_s13 + $0x68] ss:$16 sps:$4 sm:$0xff]   ;;  %v22190_v54 = vld [vmem:[%s29115_s13 + $0x84] ss:$16 sps:$4 sm:$0xff]  }
0x23de   : > { %13487 = vmatmul.mubr.bf16.vlgmr.msra.gmra.mrb[180].mxu0 %v26329_v38  ;;  %13414 = vmatpush1.bf16.msra.mxu1 %v19898_v56  ;;  %v10615_v38 = vld [vmem:[%s29113_s11 + $0x9f0] sm:$0xff]  ;;  %v19996_v56 = vcombine.low %v10656_v35, %v10664_v25  ;;  %v22193_v4 = vld [vmem:[%s29115_s13 + $0x8c] ss:$16 sps:$4 sm:$0xff]  }
0x23df   : > { %20052 = vmatprep.mubr.msk.bf16.mxu1 %vm792_vm0, %v26334_v42  ;;  %13496 = vmatpush1.bf16.msra.mxu0 %v19900_v33  ;;  %v19947_v11 = vcombine.high %v10607_v7, %v10615_v38  ;;  %v19946_v17 = vcombine.low %v10607_v7, %v10615_v38  ;;  %v10687_v33 = vld [vmem:[%s29113_s11 + $0xc30] sm:$0xff]  ;;  %v10704_v38 = vld [vmem:[%s29113_s11 + $0xcb8] sm:$0xff] }
0x23e0   : > { %20053 = vmatprep.mubr.msk.bf16.mxu0 %vm792_vm0, %v26334_v42  ;;  %13415 = vmatprep.subr.bf16.mxu1 %v19915_v61  ;;  %v19930_v42 = vcombine.low %v10591_v62, %v10599_v63  ;;  %v10695_v61 = vld [vmem:[%s29113_s11 + $0xc70] sm:$0xff]  ;;  %v10688_v62 = vld [vmem:[%s29113_s11 + $0xc38] sm:$0xff]  ;;  %v20044_v14 = vcombine.low %v10704_v38, %v10712_v41 }
0x23e1   : > { %13497 = vmatprep.subr.bf16.mxu0 %v19917_v39  ;;  %v10696_v63 = vld [vmem:[%s29113_s11 + $0xc78] sm:$0xff]  ;;  %v27406_v39 = vld [vmem:[%s29114_s12] sm:$0xff]  ;;  %v20026_v53 = vcombine.low %v10687_v33, %v10695_v61 }
0x23e2   : > { %13416 = vmatpush1.bf16.msra.mxu1 %v19914_v5  ;;  %v20027_v5 = vcombine.high %v10687_v33, %v10695_v61  ;;  %v10724_v7 = vrot.slane %v27406_v39, %v26035_v30  ;;  %v22194_v33 = vld [vmem:[%s29115_s13 + $0xa0] ss:$16 sps:$4 sm:$0xff]   ;;  %v22197_v61 = vld [vmem:[%s29115_s13 + $0xa8] ss:$16 sps:$4 sm:$0xff]  }
0x23e3   : > { %13498 = vmatpush1.bf16.msra.mxu0 %v19916_v48  ;;  %13417 = vmatprep.subr.bf16.mxu1 %v19931_v21  ;;  %v20029_v48 = vcombine.high %v10688_v62, %v10696_v63  ;;  %v10703_v21 = vld [vmem:[%s29113_s11 + $0xcb0] sm:$0xff] }
0x23e4   : > { %13499 = vmatprep.subr.bf16.mxu0 %v19933_v6  ;;  %v10711_v6 = vld [vmem:[%s29113_s11 + $0xcf0] sm:$0xff] }
0x23e5   : > { %v20042_v13 = vcombine.low %v10703_v21, %v10711_v6 }
0x23e6   : > { %13418 = vmatpush1.bf16.msra.mxu1 %v19930_v42  ;;  %v20028_v42 = vcombine.low %v10688_v62, %v10696_v63  ;;  %v22202_v62 = vld [vmem:[%s29115_s13 + $0xc4] ss:$16 sps:$4 sm:$0xff]   ;;  %v22205_v63 = vld [vmem:[%s29115_s13 + $0xcc] ss:$16 sps:$4 sm:$0xff]  }
0x23e7   : > { %13500 = vmatpush1.bf16.msra.mxu0 %v19932_v55  ;;  %13419 = vmatprep.subr.bf16.mxu1 %v19947_v11  ;;  %v20043_v55 = vcombine.high %v10703_v21, %v10711_v6  ;;  %v20045_v11 = vcombine.high %v10704_v38, %v10712_v41  ;;  %v22206_v21 = vld [vmem:[%s29115_s13 + $0xe0] ss:$16 sps:$4 sm:$0xff]   ;;  %v22209_v6 = vld [vmem:[%s29115_s13 + $0xe8] ss:$16 sps:$4 sm:$0xff]   ;;  %v22217_v38 = vld [vmem:[%s29115_s13 + $0x10c] ss:$16 sps:$4 sm:$0xff]  }
0x23e8   : > { %13501 = vmatprep.subr.bf16.mxu0 %v19949_v12  ;;  %v21227_v12 = vadd.f32 %v27135_v8, %v10724_v7  ;;  %v22164_v8 = vld [vmem:[%s29115_s13] ss:$16 sps:$4 sm:$0xff]   ;;  %v22214_v7 = vld [vmem:[%s29115_s13 + $0x104] ss:$16 sps:$4 sm:$0xff]  }
0x23e9   : > { %v22212_v41 = vld [vmem:[%s29115_s13 + $0x100] ss:$16 sps:$4 sm:$0xff]  }
0x23ea   : > { %13420 = vmatpush1.bf16.msra.mxu1 %v19946_v17  ;;  %v13537_v17 = vmax.f32 %v21227_v12, 0.0  ;;  %v22221_v12 = vld [vmem:[%s29115_s13 + $0x128] ss:$16 sps:$4 sm:$0xff]  }
0x23eb   : > { %13502 = vmatpush1.bf16.msra.mxu0 %v19948_v59  ;;  %13421 = vmatprep.subr.bf16.mxu1 %v19963_v18  ;;  %v22167_v59 = vld [vmem:[%s29115_s13 + $0x8] ss:$16 sps:$4 sm:$0xff]   ;;  %v22172_v18 = vld [vmem:[%s29115_s13 + $0x24] ss:$16 sps:$4 sm:$0xff]  }
0x23ec   : > { %13503 = vmatprep.subr.bf16.mxu0 %v19965_v20  ;;  %v13553_v20 = vpack.c.bf16 %v13537_v17, %v13537_v17  ;;  %v22232_v17 = vld [vmem:[%s29115_s13 + $0x164] ss:$16 sps:$4 sm:$0xff]  }
0x23ee   : > { %13422 = vmatpush1.bf16.msra.mxu1 %v19962_v26 }
0x23ef   : > { %13504 = vmatpush1.bf16.msra.mxu0 %v19964_v15  ;;  %13423 = vmatprep.subr.bf16.mxu1 %v19979_v1 }
0x23f0   : > { %13505 = vmatprep.subr.bf16.mxu0 %v19981_v31 }
0x23f2   : > { %13424 = vmatpush1.bf16.msra.mxu1 %v19978_v43  ;;  %v22179_v43 = vld [vmem:[%s29115_s13 + $0x48] ss:$16 sps:$4 sm:$0xff]  }
0x23f3   : > { %13506 = vmatpush1.bf16.msra.mxu0 %v19980_v46  ;;  %13425 = vmatprep.subr.bf16.mxu1 %v19995_v47  ;;  %v22184_v46 = vld [vmem:[%s29115_s13 + $0x64] ss:$16 sps:$4 sm:$0xff]  }
0x23f4   : > { %13507 = vmatprep.subr.bf16.mxu0 %v19997_v50  ;;  %v22187_v50 = vld [vmem:[%s29115_s13 + $0x6c] ss:$16 sps:$4 sm:$0xff]  }
0x23f6   : > { %13426 = vmatpush1.bf16.msra.mxu1 %v19994_v52  ;;  %v22188_v52 = vld [vmem:[%s29115_s13 + $0x80] ss:$16 sps:$4 sm:$0xff]  }
0x23f7   : > { %13508 = vmatpush1.bf16.msra.mxu0 %v19996_v56  ;;  %13427 = vmatprep.subr.bf16.mxu1 %v20011_v57  ;;  %v22191_v56 = vld [vmem:[%s29115_s13 + $0x88] ss:$16 sps:$4 sm:$0xff]   ;;  %v22196_v57 = vld [vmem:[%s29115_s13 + $0xa4] ss:$16 sps:$4 sm:$0xff]  }
0x23f8   : > { %13509 = vmatprep.subr.bf16.mxu0 %v20013_v58  ;;  %v22199_v58 = vld [vmem:[%s29115_s13 + $0xac] ss:$16 sps:$4 sm:$0xff]  }
0x23fa   : > { %13428 = vmatpush1.bf16.msra.mxu1 %v20010_v45  ;;  %v22200_v45 = vld [vmem:[%s29115_s13 + $0xc0] ss:$16 sps:$4 sm:$0xff]  }
0x23fb   : > { %13510 = vmatpush1.bf16.msra.mxu0 %v20012_v3  ;;  %13429 = vmatprep.subr.bf16.mxu1 %v20027_v5  ;;  %v22203_v3 = vld [vmem:[%s29115_s13 + $0xc8] ss:$16 sps:$4 sm:$0xff]   ;;  %v22208_v5 = vld [vmem:[%s29115_s13 + $0xe4] ss:$16 sps:$4 sm:$0xff]  }
0x23fc   : > { %13511 = vmatprep.subr.bf16.mxu0 %v20029_v48  ;;  %v22211_v48 = vld [vmem:[%s29115_s13 + $0xec] ss:$16 sps:$4 sm:$0xff]  }
0x23fe   : > { %13430 = vmatpush1.bf16.msra.mxu1 %v20026_v53  ;;  %v22215_v53 = vld [vmem:[%s29115_s13 + $0x108] ss:$16 sps:$4 sm:$0xff]  }
0x23ff   : > { %13512 = vmatpush1.bf16.msra.mxu0 %v20028_v42  ;;  %13431 = vmatprep.subr.bf16.mxu1 %v20043_v55  ;;  %v22220_v42 = vld [vmem:[%s29115_s13 + $0x124] ss:$16 sps:$4 sm:$0xff]   ;;  %v22223_v55 = vld [vmem:[%s29115_s13 + $0x12c] ss:$16 sps:$4 sm:$0xff]  }
0x2400   : > { %13513 = vmatprep.subr.bf16.mxu0 %v20045_v11  ;;  %v22218_v11 = vld [vmem:[%s29115_s13 + $0x120] ss:$16 sps:$4 sm:$0xff]  }
0x2402   : > { %13432 = vmatpush1.bf16.msra.mxu1 %v20042_v13  ;;  %v22226_v13 = vld [vmem:[%s29115_s13 + $0x144] ss:$16 sps:$4 sm:$0xff]  }
0x2403   : > { %13514 = vmatpush1.bf16.msra.mxu0 %v20044_v14  ;;  %16662 = vmatprep.subr.bf16.mxu1 %v22166_v0  ;;  %v22229_v14 = vld [vmem:[%s29115_s13 + $0x14c] ss:$16 sps:$4 sm:$0xff]   ;;  %v22224_v0 = vld [vmem:[%s29115_s13 + $0x140] ss:$16 sps:$4 sm:$0xff]  }
0x2404   : > { %16990 = vmatprep.subr.bf16.mxu0 %v22169_v27  ;;  %v22227_v27 = vld [vmem:[%s29115_s13 + $0x148] ss:$16 sps:$4 sm:$0xff]  }
0x2405   : > { %13446 = vmatmul.mubr.bf16.vlgmr.msra.gmra.mrb[164].mxu1 %v26463_v10 }
0x2406   : > { %13528 = vmatmul.mubr.bf16.vlgmr.msra.gmra.mrb[180].mxu0 %v26463_v10  ;;  %16663 = vmatpush1.bf16.msra.mxu1 %v22164_v8  ;;  %v22181_v10 = vld [vmem:[%s29115_s13 + $0x4c] ss:$16 sps:$4 sm:$0xff]  }
0x2407   : > { %16694 = vmatprep.mubr.bf16.mxu1 %v13553_v20  ;;  %16991 = vmatpush1.bf16.msra.mxu0 %v22167_v59  ;;  %v22235_v8 = vld [vmem:[%s29115_s13 + $0x16c] ss:$16 sps:$4 sm:$0xff]   ;;  %v22230_v59 = vld [vmem:[%s29115_s13 + $0x160] ss:$16 sps:$4 sm:$0xff]  }
0x2408   : > { %17022 = vmatprep.mubr.bf16.mxu0 %v13553_v20  ;;  %v27452_v26 = vpop.f32.mrb[156].mxu1  ;;  %16664 = vmatprep.subr.bf16.mxu1 %v22172_v18  ;;  %v22233_v18 = vld [vmem:[%s29115_s13 + $0x168] ss:$16 sps:$4 sm:$0xff]   ;;  %v22238_v20 = vld [vmem:[%s29115_s13 + $0x184] ss:$16 sps:$4 sm:$0xff]  }
0x2409   : > { %v27457_v15 = vpop.f32.mrb[172].mxu0  ;;  %v27459_v1 = vpop.f32.mrb[157].mxu1  ;;  %16992 = vmatprep.subr.bf16.mxu0 %v22175_v19  ;;  %v22241_v19 = vld [vmem:[%s29115_s13 + $0x18c] ss:$16 sps:$4 sm:$0xff]  }
0x240a   : > { %v27461_v31 = vpop.f32.mrb[173].mxu0  ;;  %v13123_v36 = vpop.f32.mrb[158].mxu1  ;;  %16665 = vmatpush1.bf16.msra.mxu1 %v22170_v24  ;;  %v22236_v24 = vld [vmem:[%s29115_s13 + $0x180] ss:$16 sps:$4 sm:$0xff]  }
0x240b   : > { %v13205_v35 = vpop.f32.mrb[174].mxu0  ;;  %16993 = vmatpush1.bf16.msra.mxu0 %v22173_v29  ;;  %v13124_v25 = vpop.f32.mrb[159].mxu1  ;;  %16666 = vmatprep.subr.bf16.mxu1 %v22178_v37  ;;  %v22239_v29 = vld [vmem:[%s29115_s13 + $0x188] ss:$16 sps:$4 sm:$0xff]   ;;  %v22244_v37 = vld [vmem:[%s29115_s13 + $0x1a4] ss:$16 sps:$4 sm:$0xff]  }
0x240c   : > { %v13206_v47 = vpop.f32.mrb[175].mxu0  ;;  %16994 = vmatprep.subr.bf16.mxu0 %v22181_v10  ;;  %v22247_v10 = vld [vmem:[%s29115_s13 + $0x1ac] ss:$16 sps:$4 sm:$0xff]   ;;  %v22242_v36 = vld [vmem:[%s29115_s13 + $0x1a0] ss:$16 sps:$4 sm:$0xff]  }
0x240d   : > { %v22245_v35 = vld [vmem:[%s29115_s13 + $0x1a8] ss:$16 sps:$4 sm:$0xff]   ;;  %v22250_v25 = vld [vmem:[%s29115_s13 + $0x1c4] ss:$16 sps:$4 sm:$0xff]   ;;  %v22248_v47 = vld [vmem:[%s29115_s13 + $0x1c0] ss:$16 sps:$4 sm:$0xff]  }
0x240e   : > { %16667 = vmatpush1.bf16.msra.mxu1 %v22176_v32  ;;  %v10720_v32 = vrot.slane %v27406_v39, %v26029_v9 }
0x240f   : > { %16995 = vmatpush1.bf16.msra.mxu0 %v22179_v43  ;;  %16668 = vmatprep.subr.bf16.mxu1 %v22184_v46  ;;  %v22253_v43 = vld [vmem:[%s29115_s13 + $0x1cc] ss:$16 sps:$4 sm:$0xff]   ;;  %v10732_v46 = vrot.slane %v27406_v39, %v26045_v49 }
0x2410   : > { %16996 = vmatprep.subr.bf16.mxu0 %v22187_v50  ;;  %v21226_v50 = vadd.f32 %v27125_v22, %v10720_v32  ;;  %v22254_v22 = vld [vmem:[%s29115_s13 + $0x1e0] ss:$16 sps:$4 sm:$0xff]   ;;  %v22313_v32 = vld [vmem:[%s29115_s13 + $0x30c] ss:$16 sps:$4 sm:$0xff]  }
0x2412   : > { %16669 = vmatpush1.bf16.msra.mxu1 %v22182_v51  ;;  %v22251_v51 = vld [vmem:[%s29115_s13 + $0x1c8] ss:$16 sps:$4 sm:$0xff]  }
0x2413   : > { %16997 = vmatpush1.bf16.msra.mxu0 %v22185_v40  ;;  %16670 = vmatprep.subr.bf16.mxu1 %v22190_v54  ;;  %v22256_v40 = vld [vmem:[%s29115_s13 + $0x1e4] ss:$16 sps:$4 sm:$0xff]   ;;  %v22259_v54 = vld [vmem:[%s29115_s13 + $0x1ec] ss:$16 sps:$4 sm:$0xff]  }
0x2414   : > { %16998 = vmatprep.subr.bf16.mxu0 %v22193_v4  ;;  %v21229_v4 = vadd.f32 %v27137_v16, %v10732_v46  ;;  %v22265_v16 = vld [vmem:[%s29115_s13 + $0x20c] ss:$16 sps:$4 sm:$0xff]  }
0x2415   : > { %v22319_v46 = vld [vmem:[%s29115_s13 + $0x32c] ss:$16 sps:$4 sm:$0xff]  }
0x2416   : > { %16671 = vmatpush1.bf16.msra.mxu1 %v22188_v52  ;;  %v13536_v52 = vmax.f32 %v21226_v50, 0.0  ;;  %v22317_v50 = vld [vmem:[%s29115_s13 + $0x328] ss:$16 sps:$4 sm:$0xff]  }
0x2417   : > { %16999 = vmatpush1.bf16.msra.mxu0 %v22191_v56  ;;  %16672 = vmatprep.subr.bf16.mxu1 %v22196_v57  ;;  %v22257_v56 = vld [vmem:[%s29115_s13 + $0x1e8] ss:$16 sps:$4 sm:$0xff]   ;;  %v22262_v57 = vld [vmem:[%s29115_s13 + $0x204] ss:$16 sps:$4 sm:$0xff]  }
0x2418   : > { %17000 = vmatprep.subr.bf16.mxu0 %v22199_v58  ;;  %v13539_v58 = vmax.f32 %v21229_v4, 0.0  ;;  %v22323_v4 = vld [vmem:[%s29115_s13 + $0x348] ss:$16 sps:$4 sm:$0xff]  }
0x241a   : > { %16673 = vmatpush1.bf16.msra.mxu1 %v22194_v33  ;;  %v22260_v33 = vld [vmem:[%s29115_s13 + $0x200] ss:$16 sps:$4 sm:$0xff]  }
0x241b   : > { %17001 = vmatpush1.bf16.msra.mxu0 %v22197_v61  ;;  %16674 = vmatprep.subr.bf16.mxu1 %v22202_v62  ;;  %v13552_v61 = vpack.c.bf16 %v13536_v52, %v13536_v52  ;;  %v22263_v62 = vld [vmem:[%s29115_s13 + $0x208] ss:$16 sps:$4 sm:$0xff]   ;;  %v22331_v52 = vld [vmem:[%s29115_s13 + $0x36c] ss:$16 sps:$4 sm:$0xff]  }
0x241c   : > { %17002 = vmatprep.subr.bf16.mxu0 %v22205_v63  ;;  %v22268_v63 = vld [vmem:[%s29115_s13 + $0x224] ss:$16 sps:$4 sm:$0xff]  }
0x241e   : > { %16675 = vmatpush1.bf16.msra.mxu1 %v22200_v45  ;;  %v13555_v45 = vpack.c.bf16 %v13539_v58, %v13539_v58 }
0x241f   : > { %17003 = vmatpush1.bf16.msra.mxu0 %v22203_v3  ;;  %16676 = vmatprep.subr.bf16.mxu1 %v22208_v5  ;;  %v22271_v3 = vld [vmem:[%s29115_s13 + $0x22c] ss:$16 sps:$4 sm:$0xff]   ;;  %v22266_v5 = vld [vmem:[%s29115_s13 + $0x220] ss:$16 sps:$4 sm:$0xff]  }
0x2420   : > { %17004 = vmatprep.subr.bf16.mxu0 %v22211_v48  ;;  %v22269_v48 = vld [vmem:[%s29115_s13 + $0x228] ss:$16 sps:$4 sm:$0xff]  }
0x2422   : > { %16677 = vmatpush1.bf16.msra.mxu1 %v22206_v21  ;;  %v22274_v21 = vld [vmem:[%s29115_s13 + $0x244] ss:$16 sps:$4 sm:$0xff]  }
0x2423   : > { %17005 = vmatpush1.bf16.msra.mxu0 %v22209_v6  ;;  %16678 = vmatprep.subr.bf16.mxu1 %v22214_v7  ;;  %v22277_v6 = vld [vmem:[%s29115_s13 + $0x24c] ss:$16 sps:$4 sm:$0xff]   ;;  %v22272_v7 = vld [vmem:[%s29115_s13 + $0x240] ss:$16 sps:$4 sm:$0xff]  }
0x2424   : > { %17006 = vmatprep.subr.bf16.mxu0 %v22217_v38  ;;  %v22275_v38 = vld [vmem:[%s29115_s13 + $0x248] ss:$16 sps:$4 sm:$0xff]  }
0x2426   : > { %16679 = vmatpush1.bf16.msra.mxu1 %v22212_v41  ;;  %v22280_v41 = vld [vmem:[%s29115_s13 + $0x264] ss:$16 sps:$4 sm:$0xff]  }
0x2427   : > { %17007 = vmatpush1.bf16.msra.mxu0 %v22215_v53  ;;  %16680 = vmatprep.subr.bf16.mxu1 %v22220_v42  ;;  %v22283_v53 = vld [vmem:[%s29115_s13 + $0x26c] ss:$16 sps:$4 sm:$0xff]   ;;  %v22278_v42 = vld [vmem:[%s29115_s13 + $0x260] ss:$16 sps:$4 sm:$0xff]  }
0x2428   : > { %17008 = vmatprep.subr.bf16.mxu0 %v22223_v55  ;;  %v22281_v55 = vld [vmem:[%s29115_s13 + $0x268] ss:$16 sps:$4 sm:$0xff]  }
0x242a   : > { %16681 = vmatpush1.bf16.msra.mxu1 %v22218_v11  ;;  %v22286_v11 = vld [vmem:[%s29115_s13 + $0x284] ss:$16 sps:$4 sm:$0xff]  }
0x242b   : > { %17009 = vmatpush1.bf16.msra.mxu0 %v22221_v12  ;;  %16682 = vmatprep.subr.bf16.mxu1 %v22226_v13  ;;  %v22289_v12 = vld [vmem:[%s29115_s13 + $0x28c] ss:$16 sps:$4 sm:$0xff]   ;;  %v22284_v13 = vld [vmem:[%s29115_s13 + $0x280] ss:$16 sps:$4 sm:$0xff]  }
0x242c   : > { %17010 = vmatprep.subr.bf16.mxu0 %v22229_v14  ;;  %v22287_v14 = vld [vmem:[%s29115_s13 + $0x288] ss:$16 sps:$4 sm:$0xff]  }
0x242e   : > { %16683 = vmatpush1.bf16.msra.mxu1 %v22224_v0  ;;  %v22292_v0 = vld [vmem:[%s29115_s13 + $0x2a4] ss:$16 sps:$4 sm:$0xff]  }
0x242f   : > { %17011 = vmatpush1.bf16.msra.mxu0 %v22227_v27  ;;  %16684 = vmatprep.subr.bf16.mxu1 %v22232_v17  ;;  %v22295_v27 = vld [vmem:[%s29115_s13 + $0x2ac] ss:$16 sps:$4 sm:$0xff]   ;;  %v22290_v17 = vld [vmem:[%s29115_s13 + $0x2a0] ss:$16 sps:$4 sm:$0xff]  }
0x2430   : > { %17012 = vmatprep.subr.bf16.mxu0 %v22235_v8  ;;  %v22293_v8 = vld [vmem:[%s29115_s13 + $0x2a8] ss:$16 sps:$4 sm:$0xff]  }
0x2432   : > { %16685 = vmatpush1.bf16.msra.mxu1 %v22230_v59  ;;  %v22298_v59 = vld [vmem:[%s29115_s13 + $0x2c4] ss:$16 sps:$4 sm:$0xff]  }
0x2433   : > { %17013 = vmatpush1.bf16.msra.mxu0 %v22233_v18  ;;  %16686 = vmatprep.subr.bf16.mxu1 %v22238_v20  ;;  %v22301_v18 = vld [vmem:[%s29115_s13 + $0x2cc] ss:$16 sps:$4 sm:$0xff]   ;;  %v22296_v20 = vld [vmem:[%s29115_s13 + $0x2c0] ss:$16 sps:$4 sm:$0xff]  }
0x2434   : > { %17014 = vmatprep.subr.bf16.mxu0 %v22241_v19  ;;  %v22299_v19 = vld [vmem:[%s29115_s13 + $0x2c8] ss:$16 sps:$4 sm:$0xff]  }
0x2436   : > { %16687 = vmatpush1.bf16.msra.mxu1 %v22236_v24  ;;  %v22304_v24 = vld [vmem:[%s29115_s13 + $0x2e4] ss:$16 sps:$4 sm:$0xff]  }
0x2437   : > { %17015 = vmatpush1.bf16.msra.mxu0 %v22239_v29  ;;  %16688 = vmatprep.subr.bf16.mxu1 %v22244_v37  ;;  %v22307_v29 = vld [vmem:[%s29115_s13 + $0x2ec] ss:$16 sps:$4 sm:$0xff]   ;;  %v22302_v37 = vld [vmem:[%s29115_s13 + $0x2e0] ss:$16 sps:$4 sm:$0xff]  }
0x2438   : > { %17016 = vmatprep.subr.bf16.mxu0 %v22247_v10  ;;  %v22305_v10 = vld [vmem:[%s29115_s13 + $0x2e8] ss:$16 sps:$4 sm:$0xff]  }
0x243a   : > { %16689 = vmatpush1.bf16.msra.mxu1 %v22242_v36  ;;  %v22310_v36 = vld [vmem:[%s29115_s13 + $0x304] ss:$16 sps:$4 sm:$0xff]  }
0x243b   : > { %17017 = vmatpush1.bf16.msra.mxu0 %v22245_v35  ;;  %16690 = vmatprep.subr.bf16.mxu1 %v22250_v25  ;;  %v22308_v35 = vld [vmem:[%s29115_s13 + $0x300] ss:$16 sps:$4 sm:$0xff]   ;;  %v22311_v25 = vld [vmem:[%s29115_s13 + $0x308] ss:$16 sps:$4 sm:$0xff]  }
0x243c   : > { %17018 = vmatprep.subr.bf16.mxu0 %v22253_v43  ;;  %v22316_v43 = vld [vmem:[%s29115_s13 + $0x324] ss:$16 sps:$4 sm:$0xff]  }
0x243e   : > { %16691 = vmatpush1.bf16.msra.mxu1 %v22248_v47  ;;  %v22314_v47 = vld [vmem:[%s29115_s13 + $0x320] ss:$16 sps:$4 sm:$0xff]  }
0x243f   : > { %17019 = vmatpush1.bf16.msra.mxu0 %v22251_v51  ;;  %16692 = vmatprep.subr.bf16.mxu1 %v22256_v40  ;;  %v22322_v51 = vld [vmem:[%s29115_s13 + $0x344] ss:$16 sps:$4 sm:$0xff]   ;;  %v22325_v40 = vld [vmem:[%s29115_s13 + $0x34c] ss:$16 sps:$4 sm:$0xff]  }
0x2440   : > { %17020 = vmatprep.subr.bf16.mxu0 %v22259_v54  ;;  %v22320_v54 = vld [vmem:[%s29115_s13 + $0x340] ss:$16 sps:$4 sm:$0xff]  }
0x2442   : > { %16693 = vmatpush1.bf16.msra.mxu1 %v22254_v22  ;;  %v22328_v22 = vld [vmem:[%s29115_s13 + $0x364] ss:$16 sps:$4 sm:$0xff]  }
0x2443   : > { %17021 = vmatpush1.bf16.msra.mxu0 %v22257_v56  ;;  %16703 = vmatprep.subr.bf16.mxu1 %v22262_v57  ;;  %v22326_v56 = vld [vmem:[%s29115_s13 + $0x360] ss:$16 sps:$4 sm:$0xff]   ;;  %v22329_v57 = vld [vmem:[%s29115_s13 + $0x368] ss:$16 sps:$4 sm:$0xff]  }
0x2444   : > { %17031 = vmatprep.subr.bf16.mxu0 %v22265_v16  ;;  %v22334_v16 = vld [vmem:[%s29115_s13 + $0x384] ss:$16 sps:$4 sm:$0xff]  }
0x2445   : > { %16695 = vmatmul.mubr.bf16.vlgmr.msra.gmra.mrb[168].mxu1 %v13552_v61 }
0x2446   : > { %17023 = vmatmul.mubr.bf16.vlgmr.msra.gmra.mrb[184].mxu0 %v13552_v61  ;;  %16704 = vmatpush1.bf16.msra.mxu1 %v22260_v33  ;;  %v22337_v33 = vld [vmem:[%s29115_s13 + $0x38c] ss:$16 sps:$4 sm:$0xff]  }
0x2447   : > { %16735 = vmatprep.mubr.bf16.mxu1 %v13555_v45  ;;  %17032 = vmatpush1.bf16.msra.mxu0 %v22263_v62 }
0x2448   : > { %17063 = vmatprep.mubr.bf16.mxu0 %v13555_v45  ;;  %16705 = vmatprep.subr.bf16.mxu1 %v22268_v63 }
0x2449   : > { %17033 = vmatprep.subr.bf16.mxu0 %v22271_v3  ;;  %v22332_v3 = vld [vmem:[%s29115_s13 + $0x380] ss:$16 sps:$4 sm:$0xff]  }
0x244a   : > { %16706 = vmatpush1.bf16.msra.mxu1 %v22266_v5 }
0x244b   : > { %17034 = vmatpush1.bf16.msra.mxu0 %v22269_v48  ;;  %16707 = vmatprep.subr.bf16.mxu1 %v22274_v21  ;;  %v22335_v21 = vld [vmem:[%s29115_s13 + $0x388] ss:$16 sps:$4 sm:$0xff]  }
0x244c   : > { %17035 = vmatprep.subr.bf16.mxu0 %v22277_v6  ;;  %v22340_v6 = vld [vmem:[%s29115_s13 + $0x3a4] ss:$16 sps:$4 sm:$0xff]  }
0x244e   : > { %16708 = vmatpush1.bf16.msra.mxu1 %v22272_v7 }
0x244f   : > { %17036 = vmatpush1.bf16.msra.mxu0 %v22275_v38  ;;  %16709 = vmatprep.subr.bf16.mxu1 %v22280_v41  ;;  %v22343_v38 = vld [vmem:[%s29115_s13 + $0x3ac] ss:$16 sps:$4 sm:$0xff]   ;;  %v10739_v41 = vsub.s32 5, %v23166_v23 }
0x2450   : > { %17037 = vmatprep.subr.bf16.mxu0 %v22283_v53  ;;  %v22338_v53 = vld [vmem:[%s29115_s13 + $0x3a0] ss:$16 sps:$4 sm:$0xff]  }
0x2452   : > { %16710 = vmatpush1.bf16.msra.mxu1 %v22278_v42  ;;  %v10728_v42 = vrot.slane %v27406_v39, %v26042_v60 }
0x2453   : > { %17038 = vmatpush1.bf16.msra.mxu0 %v22281_v55  ;;  %16711 = vmatprep.subr.bf16.mxu1 %v22286_v11  ;;  %v22341_v55 = vld [vmem:[%s29115_s13 + $0x3a8] ss:$16 sps:$4 sm:$0xff]   ;;  %v22346_v11 = vld [vmem:[%s29115_s13 + $0x3c4] ss:$16 sps:$4 sm:$0xff]  }
0x2454   : > { %17039 = vmatprep.subr.bf16.mxu0 %v22289_v12  ;;  %v22349_v12 = vld [vmem:[%s29115_s13 + $0x3cc] ss:$16 sps:$4 sm:$0xff]  }
0x2456   : > { %16712 = vmatpush1.bf16.msra.mxu1 %v22284_v13  ;;  %v10740_v13 = vrot.slane %v27406_v39, %v10739_v41 }
0x2457   : > { %17040 = vmatpush1.bf16.msra.mxu0 %v22287_v14  ;;  %16713 = vmatprep.subr.bf16.mxu1 %v22292_v0  ;;  %v22344_v14 = vld [vmem:[%s29115_s13 + $0x3c0] ss:$16 sps:$4 sm:$0xff]   ;;  %v21228_v0 = vadd.f32 %v27127_v44, %v10728_v42 }
0x2458   : > { %17041 = vmatprep.subr.bf16.mxu0 %v22295_v27  ;;  %v22347_v27 = vld [vmem:[%s29115_s13 + $0x3c8] ss:$16 sps:$4 sm:$0xff]   ;;  %v22350_v44 = vld [vmem:[%s29115_s13 + $0x3e0] ss:$16 sps:$4 sm:$0xff]  }
0x2459   : > { %v22398_v42 = vld [vmem:[%s29115_s13 + $0x4e0] ss:$16 sps:$4 sm:$0xff]  }
0x245a   : > { %16714 = vmatpush1.bf16.msra.mxu1 %v22290_v17  ;;  %v22352_v17 = vld [vmem:[%s29115_s13 + $0x3e4] ss:$16 sps:$4 sm:$0xff]  }
0x245b   : > { %17042 = vmatpush1.bf16.msra.mxu0 %v22293_v8  ;;  %16715 = vmatprep.subr.bf16.mxu1 %v22298_v59  ;;  %v22355_v8 = vld [vmem:[%s29115_s13 + $0x3ec] ss:$16 sps:$4 sm:$0xff]   ;;  %v21231_v59 = vadd.f32 %v27459_v1, %v10740_v13  ;;  %v22404_v13 = vld [vmem:[%s29115_s13 + $0x500] ss:$16 sps:$4 sm:$0xff]  }
0x245c   : > { %17043 = vmatprep.subr.bf16.mxu0 %v22301_v18  ;;  %v13538_v18 = vmax.f32 %v21228_v0, 0.0  ;;  %v22361_v1 = vld [vmem:[%s29115_s13 + $0x40c] ss:$16 sps:$4 sm:$0xff]   ;;  %v22412_v0 = vld [vmem:[%s29115_s13 + $0x524] ss:$16 sps:$4 sm:$0xff]  }
0x245e   : > { %16716 = vmatpush1.bf16.msra.mxu1 %v22296_v20  ;;  %v22353_v20 = vld [vmem:[%s29115_s13 + $0x3e8] ss:$16 sps:$4 sm:$0xff]  }
0x245f   : > { %17044 = vmatpush1.bf16.msra.mxu0 %v22299_v19  ;;  %16717 = vmatprep.subr.bf16.mxu1 %v22304_v24  ;;  %v22358_v19 = vld [vmem:[%s29115_s13 + $0x404] ss:$16 sps:$4 sm:$0xff]   ;;  %v13541_v24 = vmax.f32 %v21231_v59, 0.0 }
0x2460   : > { %17045 = vmatprep.subr.bf16.mxu0 %v22307_v29  ;;  %v22356_v29 = vld [vmem:[%s29115_s13 + $0x400] ss:$16 sps:$4 sm:$0xff]   ;;  %v22418_v59 = vld [vmem:[%s29115_s13 + $0x544] ss:$16 sps:$4 sm:$0xff]  }
0x2462   : > { %16718 = vmatpush1.bf16.msra.mxu1 %v22302_v37  ;;  %v13554_v37 = vpack.c.bf16 %v13538_v18, %v13538_v18  ;;  %v22416_v18 = vld [vmem:[%s29115_s13 + $0x540] ss:$16 sps:$4 sm:$0xff]  }
0x2463   : > { %17046 = vmatpush1.bf16.msra.mxu0 %v22305_v10  ;;  %16719 = vmatprep.subr.bf16.mxu1 %v22310_v36  ;;  %v22359_v10 = vld [vmem:[%s29115_s13 + $0x408] ss:$16 sps:$4 sm:$0xff]   ;;  %v22364_v36 = vld [vmem:[%s29115_s13 + $0x424] ss:$16 sps:$4 sm:$0xff]  }
0x2464   : > { %17047 = vmatprep.subr.bf16.mxu0 %v22313_v32  ;;  %v13557_v32 = vpack.c.bf16 %v13541_v24, %v13541_v24  ;;  %v22422_v24 = vld [vmem:[%s29115_s13 + $0x560] ss:$16 sps:$4 sm:$0xff]  }
0x2466   : > { %16720 = vmatpush1.bf16.msra.mxu1 %v22308_v35  ;;  %v22367_v35 = vld [vmem:[%s29115_s13 + $0x42c] ss:$16 sps:$4 sm:$0xff]  }
0x2467   : > { %17048 = vmatpush1.bf16.msra.mxu0 %v22311_v25  ;;  %16721 = vmatprep.subr.bf16.mxu1 %v22316_v43  ;;  %v22362_v25 = vld [vmem:[%s29115_s13 + $0x420] ss:$16 sps:$4 sm:$0xff]   ;;  %v22365_v43 = vld [vmem:[%s29115_s13 + $0x428] ss:$16 sps:$4 sm:$0xff]  }
0x2468   : > { %17049 = vmatprep.subr.bf16.mxu0 %v22319_v46  ;;  %v22370_v46 = vld [vmem:[%s29115_s13 + $0x444] ss:$16 sps:$4 sm:$0xff]  }
0x246a   : > { %16722 = vmatpush1.bf16.msra.mxu1 %v22314_v47  ;;  %v22373_v47 = vld [vmem:[%s29115_s13 + $0x44c] ss:$16 sps:$4 sm:$0xff]  }
0x246b   : > { %17050 = vmatpush1.bf16.msra.mxu0 %v22317_v50  ;;  %16723 = vmatprep.subr.bf16.mxu1 %v22322_v51  ;;  %v22368_v50 = vld [vmem:[%s29115_s13 + $0x440] ss:$16 sps:$4 sm:$0xff]   ;;  %v22371_v51 = vld [vmem:[%s29115_s13 + $0x448] ss:$16 sps:$4 sm:$0xff]  }
0x246c   : > { %17051 = vmatprep.subr.bf16.mxu0 %v22325_v40  ;;  %v22376_v40 = vld [vmem:[%s29115_s13 + $0x464] ss:$16 sps:$4 sm:$0xff]  }
0x246e   : > { %16724 = vmatpush1.bf16.msra.mxu1 %v22320_v54  ;;  %v22379_v54 = vld [vmem:[%s29115_s13 + $0x46c] ss:$16 sps:$4 sm:$0xff]  }
0x246f   : > { %17052 = vmatpush1.bf16.msra.mxu0 %v22323_v4  ;;  %16725 = vmatprep.subr.bf16.mxu1 %v22328_v22  ;;  %v22374_v4 = vld [vmem:[%s29115_s13 + $0x460] ss:$16 sps:$4 sm:$0xff]   ;;  %v22377_v22 = vld [vmem:[%s29115_s13 + $0x468] ss:$16 sps:$4 sm:$0xff]  }
0x2470   : > { %v27778_v58 = vpop.f32.mrb[160].mxu1  ;;  %17053 = vmatprep.subr.bf16.mxu0 %v22331_v52  ;;  %v22382_v52 = vld [vmem:[%s29115_s13 + $0x484] ss:$16 sps:$4 sm:$0xff]  }
0x2471   : > { %v27783_v61 = vpop.f32.mrb[176].mxu0  ;;  %v27785_v62 = vpop.f32.mrb[161].mxu1 }
0x2472   : > { %v27787_v63 = vpop.f32.mrb[177].mxu0  ;;  %v13287_v45 = vpop.f32.mrb[162].mxu1  ;;  %16726 = vmatpush1.bf16.msra.mxu1 %v22326_v56  ;;  %v22385_v56 = vld [vmem:[%s29115_s13 + $0x48c] ss:$16 sps:$4 sm:$0xff]  }
0x2473   : > { %v13369_v5 = vpop.f32.mrb[178].mxu0  ;;  %17054 = vmatpush1.bf16.msra.mxu0 %v22329_v57  ;;  %v13288_v48 = vpop.f32.mrb[163].mxu1  ;;  %16727 = vmatprep.subr.bf16.mxu1 %v22334_v16  ;;  %v22380_v57 = vld [vmem:[%s29115_s13 + $0x480] ss:$16 sps:$4 sm:$0xff]   ;;  %v22383_v16 = vld [vmem:[%s29115_s13 + $0x488] ss:$16 sps:$4 sm:$0xff]  }
0x2474   : > { %v13370_v7 = vpop.f32.mrb[179].mxu0  ;;  %17055 = vmatprep.subr.bf16.mxu0 %v22337_v33  ;;  %v22388_v33 = vld [vmem:[%s29115_s13 + $0x4a4] ss:$16 sps:$4 sm:$0xff]   ;;  %v22391_v45 = vld [vmem:[%s29115_s13 + $0x4ac] ss:$16 sps:$4 sm:$0xff]  }
0x2475   : > { %v22389_v5 = vld [vmem:[%s29115_s13 + $0x4a8] ss:$16 sps:$4 sm:$0xff]   ;;  %v22394_v48 = vld [vmem:[%s29115_s13 + $0x4c4] ss:$16 sps:$4 sm:$0xff]  }
0x2476   : > { %16728 = vmatpush1.bf16.msra.mxu1 %v22332_v3  ;;  %v22386_v3 = vld [vmem:[%s29115_s13 + $0x4a0] ss:$16 sps:$4 sm:$0xff]   ;;  %v22395_v7 = vld [vmem:[%s29115_s13 + $0x4c8] ss:$16 sps:$4 sm:$0xff]  }
0x2477   : > { %17056 = vmatpush1.bf16.msra.mxu0 %v22335_v21  ;;  %16729 = vmatprep.subr.bf16.mxu1 %v22340_v6  ;;  %v22397_v21 = vld [vmem:[%s29115_s13 + $0x4cc] ss:$16 sps:$4 sm:$0xff]   ;;  %v22392_v6 = vld [vmem:[%s29115_s13 + $0x4c0] ss:$16 sps:$4 sm:$0xff]  }
0x2478   : > { %17057 = vmatprep.subr.bf16.mxu0 %v22343_v38  ;;  %v22400_v38 = vld [vmem:[%s29115_s13 + $0x4e4] ss:$16 sps:$4 sm:$0xff]  }
0x247a   : > { %16730 = vmatpush1.bf16.msra.mxu1 %v22338_v53  ;;  %v22403_v53 = vld [vmem:[%s29115_s13 + $0x4ec] ss:$16 sps:$4 sm:$0xff]  }
0x247b   : > { %17058 = vmatpush1.bf16.msra.mxu0 %v22341_v55  ;;  %16731 = vmatprep.subr.bf16.mxu1 %v22346_v11  ;;  %v22401_v55 = vld [vmem:[%s29115_s13 + $0x4e8] ss:$16 sps:$4 sm:$0xff]   ;;  %v22406_v11 = vld [vmem:[%s29115_s13 + $0x504] ss:$16 sps:$4 sm:$0xff]  }
0x247c   : > { %17059 = vmatprep.subr.bf16.mxu0 %v22349_v12  ;;  %v22409_v12 = vld [vmem:[%s29115_s13 + $0x50c] ss:$16 sps:$4 sm:$0xff]  }
0x247e   : > { %16732 = vmatpush1.bf16.msra.mxu1 %v22344_v14  ;;  %v22407_v14 = vld [vmem:[%s29115_s13 + $0x508] ss:$16 sps:$4 sm:$0xff]  }
0x247f   : > { %17060 = vmatpush1.bf16.msra.mxu0 %v22347_v27  ;;  %16733 = vmatprep.subr.bf16.mxu1 %v22352_v17  ;;  %v22415_v27 = vld [vmem:[%s29115_s13 + $0x52c] ss:$16 sps:$4 sm:$0xff]   ;;  %v22410_v17 = vld [vmem:[%s29115_s13 + $0x520] ss:$16 sps:$4 sm:$0xff]  }
0x2480   : > { %17061 = vmatprep.subr.bf16.mxu0 %v22355_v8  ;;  %v22413_v8 = vld [vmem:[%s29115_s13 + $0x528] ss:$16 sps:$4 sm:$0xff]  }
0x2482   : > { %16734 = vmatpush1.bf16.msra.mxu1 %v22350_v44  ;;  %v22421_v44 = vld [vmem:[%s29115_s13 + $0x54c] ss:$16 sps:$4 sm:$0xff]  }
0x2483   : > { %17062 = vmatpush1.bf16.msra.mxu0 %v22353_v20  ;;  %16744 = vmatprep.subr.bf16.mxu1 %v22358_v19  ;;  %v22419_v20 = vld [vmem:[%s29115_s13 + $0x548] ss:$16 sps:$4 sm:$0xff]   ;;  %v22424_v19 = vld [vmem:[%s29115_s13 + $0x564] ss:$16 sps:$4 sm:$0xff]  }
0x2484   : > { %17072 = vmatprep.subr.bf16.mxu0 %v22361_v1  ;;  %v22427_v1 = vld [vmem:[%s29115_s13 + $0x56c] ss:$16 sps:$4 sm:$0xff]  }
0x2485   : > { %16736 = vmatmul.mubr.bf16.vlgmr.msra.gmra.mrb[168].mxu1 %v13554_v37 }
0x2486   : > { %17064 = vmatmul.mubr.bf16.vlgmr.msra.gmra.mrb[184].mxu0 %v13554_v37  ;;  %16745 = vmatpush1.bf16.msra.mxu1 %v22356_v29  ;;  %v22425_v29 = vld [vmem:[%s29115_s13 + $0x568] ss:$16 sps:$4 sm:$0xff]   ;;  %v22430_v37 = vld [vmem:[%s29115_s13 + $0x584] ss:$16 sps:$4 sm:$0xff]  }
0x2487   : > { %16776 = vmatprep.mubr.bf16.mxu1 %v13557_v32  ;;  %17073 = vmatpush1.bf16.msra.mxu0 %v22359_v10  ;;  %v22433_v10 = vld [vmem:[%s29115_s13 + $0x58c] ss:$16 sps:$4 sm:$0xff]  }
0x2488   : > { %17104 = vmatprep.mubr.bf16.mxu0 %v13557_v32  ;;  %16746 = vmatprep.subr.bf16.mxu1 %v22364_v36  ;;  %v22428_v36 = vld [vmem:[%s29115_s13 + $0x580] ss:$16 sps:$4 sm:$0xff]   ;;  %v10735_v32 = vsub.s32 4, %v23166_v23 }
0x2489   : > { %17074 = vmatprep.subr.bf16.mxu0 %v22367_v35  ;;  %v22431_v35 = vld [vmem:[%s29115_s13 + $0x588] ss:$16 sps:$4 sm:$0xff]  }
0x248a   : > { %16747 = vmatpush1.bf16.msra.mxu1 %v22362_v25  ;;  %v22436_v25 = vld [vmem:[%s29115_s13 + $0x5a4] ss:$16 sps:$4 sm:$0xff]  }
0x248b   : > { %17075 = vmatpush1.bf16.msra.mxu0 %v22365_v43  ;;  %16748 = vmatprep.subr.bf16.mxu1 %v22370_v46  ;;  %v22439_v43 = vld [vmem:[%s29115_s13 + $0x5ac] ss:$16 sps:$4 sm:$0xff]   ;;  %v10747_v46 = vsub.s32 7, %v23166_v23 }
0x248c   : > { %17076 = vmatprep.subr.bf16.mxu0 %v22373_v47  ;;  %v22434_v47 = vld [vmem:[%s29115_s13 + $0x5a0] ss:$16 sps:$4 sm:$0xff]  }
0x248e   : > { %16749 = vmatpush1.bf16.msra.mxu1 %v22368_v50  ;;  %v10736_v50 = vrot.slane %v27406_v39, %v10735_v32 }
0x248f   : > { %17077 = vmatpush1.bf16.msra.mxu0 %v22371_v51  ;;  %16750 = vmatprep.subr.bf16.mxu1 %v22376_v40  ;;  %v22437_v51 = vld [vmem:[%s29115_s13 + $0x5a8] ss:$16 sps:$4 sm:$0xff]   ;;  %v22442_v40 = vld [vmem:[%s29115_s13 + $0x5c4] ss:$16 sps:$4 sm:$0xff]  }
0x2490   : > { %17078 = vmatprep.subr.bf16.mxu0 %v22379_v54  ;;  %v22445_v54 = vld [vmem:[%s29115_s13 + $0x5cc] ss:$16 sps:$4 sm:$0xff]  }
0x2492   : > { %16751 = vmatpush1.bf16.msra.mxu1 %v22374_v4  ;;  %v10748_v4 = vrot.slane %v27406_v39, %v10747_v46  ;;  %v22451_v39 = vld [vmem:[%s29115_s13 + $0x5ec] ss:$16 sps:$4 sm:$0xff]  }
0x2493   : > { %17079 = vmatpush1.bf16.msra.mxu0 %v22377_v22  ;;  %16752 = vmatprep.subr.bf16.mxu1 %v22382_v52  ;;  %v22440_v22 = vld [vmem:[%s29115_s13 + $0x5c0] ss:$16 sps:$4 sm:$0xff]   ;;  %v21230_v52 = vadd.f32 %v27452_v26, %v10736_v50 }
0x2494   : > { %17080 = vmatprep.subr.bf16.mxu0 %v22385_v56  ;;  %v22443_v56 = vld [vmem:[%s29115_s13 + $0x5c8] ss:$16 sps:$4 sm:$0xff]   ;;  %v22446_v26 = vld [vmem:[%s29115_s13 + $0x5e0] ss:$16 sps:$4 sm:$0xff]  }
0x2495   : > { %v22488_v50 = vld [vmem:[%s29115_s13 + $0x6c0] ss:$16 sps:$4 sm:$0xff]  }
0x2496   : > { %16753 = vmatpush1.bf16.msra.mxu1 %v22380_v57  ;;  %v22448_v57 = vld [vmem:[%s29115_s13 + $0x5e4] ss:$16 sps:$4 sm:$0xff]  }
0x2497   : > { %17081 = vmatpush1.bf16.msra.mxu0 %v22383_v16  ;;  %16754 = vmatprep.subr.bf16.mxu1 %v22388_v33  ;;  %v21233_v16 = vadd.f32 %v27461_v31, %v10748_v4  ;;  %v13540_v33 = vmax.f32 %v21230_v52, 0.0  ;;  %v22457_v31 = vld [vmem:[%s29115_s13 + $0x60c] ss:$16 sps:$4 sm:$0xff]   ;;  %v22496_v4 = vld [vmem:[%s29115_s13 + $0x6e4] ss:$16 sps:$4 sm:$0xff]  }
0x2498   : > { %17082 = vmatprep.subr.bf16.mxu0 %v22391_v45  ;;  %v22449_v45 = vld [vmem:[%s29115_s13 + $0x5e8] ss:$16 sps:$4 sm:$0xff]   ;;  %v22499_v52 = vld [vmem:[%s29115_s13 + $0x6ec] ss:$16 sps:$4 sm:$0xff]  }
0x249a   : > { %16755 = vmatpush1.bf16.msra.mxu1 %v22386_v3  ;;  %v22454_v3 = vld [vmem:[%s29115_s13 + $0x604] ss:$16 sps:$4 sm:$0xff]  }
0x249b   : > { %17083 = vmatpush1.bf16.msra.mxu0 %v22389_v5  ;;  %16756 = vmatprep.subr.bf16.mxu1 %v22394_v48  ;;  %v13543_v5 = vmax.f32 %v21233_v16, 0.0  ;;  %v22452_v48 = vld [vmem:[%s29115_s13 + $0x600] ss:$16 sps:$4 sm:$0xff]   ;;  %v22505_v16 = vld [vmem:[%s29115_s13 + $0x70c] ss:$16 sps:$4 sm:$0xff]  }
0x249c   : > { %17084 = vmatprep.subr.bf16.mxu0 %v22397_v21  ;;  %v13556_v21 = vpack.c.bf16 %v13540_v33, %v13540_v33  ;;  %v22503_v33 = vld [vmem:[%s29115_s13 + $0x708] ss:$16 sps:$4 sm:$0xff]  }
0x249e   : > { %16757 = vmatpush1.bf16.msra.mxu1 %v22392_v6  ;;  %v22455_v6 = vld [vmem:[%s29115_s13 + $0x608] ss:$16 sps:$4 sm:$0xff]  }
0x249f   : > { %17085 = vmatpush1.bf16.msra.mxu0 %v22395_v7  ;;  %16758 = vmatprep.subr.bf16.mxu1 %v22400_v38  ;;  %v22460_v7 = vld [vmem:[%s29115_s13 + $0x624] ss:$16 sps:$4 sm:$0xff]   ;;  %v13559_v38 = vpack.c.bf16 %v13543_v5, %v13543_v5  ;;  %v22509_v5 = vld [vmem:[%s29115_s13 + $0x728] ss:$16 sps:$4 sm:$0xff]  }
0x24a0   : > { %17086 = vmatprep.subr.bf16.mxu0 %v22403_v53  ;;  %v22463_v53 = vld [vmem:[%s29115_s13 + $0x62c] ss:$16 sps:$4 sm:$0xff]  }
0x24a2   : > { %16759 = vmatpush1.bf16.msra.mxu1 %v22398_v42  ;;  %v22458_v42 = vld [vmem:[%s29115_s13 + $0x620] ss:$16 sps:$4 sm:$0xff]  }
0x24a3   : > { %17087 = vmatpush1.bf16.msra.mxu0 %v22401_v55  ;;  %16760 = vmatprep.subr.bf16.mxu1 %v22406_v11  ;;  %v22461_v55 = vld [vmem:[%s29115_s13 + $0x628] ss:$16 sps:$4 sm:$0xff]   ;;  %v22466_v11 = vld [vmem:[%s29115_s13 + $0x644] ss:$16 sps:$4 sm:$0xff]  }
0x24a4   : > { %17088 = vmatprep.subr.bf16.mxu0 %v22409_v12  ;;  %v22469_v12 = vld [vmem:[%s29115_s13 + $0x64c] ss:$16 sps:$4 sm:$0xff]  }
0x24a6   : > { %16761 = vmatpush1.bf16.msra.mxu1 %v22404_v13  ;;  %v22464_v13 = vld [vmem:[%s29115_s13 + $0x640] ss:$16 sps:$4 sm:$0xff]  }
0x24a7   : > { %17089 = vmatpush1.bf16.msra.mxu0 %v22407_v14  ;;  %16762 = vmatprep.subr.bf16.mxu1 %v22412_v0  ;;  %v22467_v14 = vld [vmem:[%s29115_s13 + $0x648] ss:$16 sps:$4 sm:$0xff]   ;;  %v22472_v0 = vld [vmem:[%s29115_s13 + $0x664] ss:$16 sps:$4 sm:$0xff]  }
0x24a8   : > { %17090 = vmatprep.subr.bf16.mxu0 %v22415_v27  ;;  %v22475_v27 = vld [vmem:[%s29115_s13 + $0x66c] ss:$16 sps:$4 sm:$0xff]  }
0x24aa   : > { %16763 = vmatpush1.bf16.msra.mxu1 %v22410_v17  ;;  %v22470_v17 = vld [vmem:[%s29115_s13 + $0x660] ss:$16 sps:$4 sm:$0xff]  }
0x24ab   : > { %17091 = vmatpush1.bf16.msra.mxu0 %v22413_v8  ;;  %16764 = vmatprep.subr.bf16.mxu1 %v22418_v59  ;;  %v22473_v8 = vld [vmem:[%s29115_s13 + $0x668] ss:$16 sps:$4 sm:$0xff]   ;;  %v22478_v59 = vld [vmem:[%s29115_s13 + $0x684] ss:$16 sps:$4 sm:$0xff]  }
0x24ac   : > { %17092 = vmatprep.subr.bf16.mxu0 %v22421_v44  ;;  %v22481_v44 = vld [vmem:[%s29115_s13 + $0x68c] ss:$16 sps:$4 sm:$0xff]  }
0x24ae   : > { %16765 = vmatpush1.bf16.msra.mxu1 %v22416_v18  ;;  %v22476_v18 = vld [vmem:[%s29115_s13 + $0x680] ss:$16 sps:$4 sm:$0xff]  }
0x24af   : > { %17093 = vmatpush1.bf16.msra.mxu0 %v22419_v20  ;;  %16766 = vmatprep.subr.bf16.mxu1 %v22424_v19  ;;  %v22479_v20 = vld [vmem:[%s29115_s13 + $0x688] ss:$16 sps:$4 sm:$0xff]   ;;  %v22484_v19 = vld [vmem:[%s29115_s13 + $0x6a4] ss:$16 sps:$4 sm:$0xff]  }
0x24b0   : > { %17094 = vmatprep.subr.bf16.mxu0 %v22427_v1  ;;  %v22487_v1 = vld [vmem:[%s29115_s13 + $0x6ac] ss:$16 sps:$4 sm:$0xff]  }
0x24b2   : > { %16767 = vmatpush1.bf16.msra.mxu1 %v22422_v24  ;;  %v22482_v24 = vld [vmem:[%s29115_s13 + $0x6a0] ss:$16 sps:$4 sm:$0xff]  }
0x24b3   : > { %17095 = vmatpush1.bf16.msra.mxu0 %v22425_v29  ;;  %16768 = vmatprep.subr.bf16.mxu1 %v22430_v37  ;;  %v22485_v29 = vld [vmem:[%s29115_s13 + $0x6a8] ss:$16 sps:$4 sm:$0xff]   ;;  %v22490_v37 = vld [vmem:[%s29115_s13 + $0x6c4] ss:$16 sps:$4 sm:$0xff]  }
0x24b4   : > { %17096 = vmatprep.subr.bf16.mxu0 %v22433_v10 }
0x24b6   : > { %16769 = vmatpush1.bf16.msra.mxu1 %v22428_v36  ;;  %v22493_v36 = vld [vmem:[%s29115_s13 + $0x6cc] ss:$16 sps:$4 sm:$0xff]  }
0x24b7   : > { %17097 = vmatpush1.bf16.msra.mxu0 %v22431_v35  ;;  %16770 = vmatprep.subr.bf16.mxu1 %v22436_v25 }
0x24b8   : > { %17098 = vmatprep.subr.bf16.mxu0 %v22439_v43 }
0x24ba   : > { %16771 = vmatpush1.bf16.msra.mxu1 %v22434_v47 }
0x24bb   : > { %17099 = vmatpush1.bf16.msra.mxu0 %v22437_v51  ;;  %16772 = vmatprep.subr.bf16.mxu1 %v22442_v40 }
0x24bc   : > { %17100 = vmatprep.subr.bf16.mxu0 %v22445_v54  ;;  %v22491_v54 = vld [vmem:[%s29115_s13 + $0x6c8] ss:$16 sps:$4 sm:$0xff]  }
0x24be   : > { %16773 = vmatpush1.bf16.msra.mxu1 %v22440_v22 }
0x24bf   : > { %17101 = vmatpush1.bf16.msra.mxu0 %v22443_v56  ;;  %16774 = vmatprep.subr.bf16.mxu1 %v22448_v57  ;;  %v22494_v56 = vld [vmem:[%s29115_s13 + $0x6e0] ss:$16 sps:$4 sm:$0xff]   ;;  %v22497_v57 = vld [vmem:[%s29115_s13 + $0x6e8] ss:$16 sps:$4 sm:$0xff]  }
0x24c0   : > { %17102 = vmatprep.subr.bf16.mxu0 %v22451_v39  ;;  %v22502_v39 = vld [vmem:[%s29115_s13 + $0x704] ss:$16 sps:$4 sm:$0xff]  }
0x24c2   : > { %16775 = vmatpush1.bf16.msra.mxu1 %v22446_v26  ;;  %v22500_v26 = vld [vmem:[%s29115_s13 + $0x700] ss:$16 sps:$4 sm:$0xff]  }
0x24c3   : > { %17103 = vmatpush1.bf16.msra.mxu0 %v22449_v45  ;;  %16785 = vmatprep.subr.bf16.mxu1 %v22454_v3  ;;  %v22508_v45 = vld [vmem:[%s29115_s13 + $0x724] ss:$16 sps:$4 sm:$0xff]   ;;  %v22511_v3 = vld [vmem:[%s29115_s13 + $0x72c] ss:$16 sps:$4 sm:$0xff]  }
0x24c4   : > { %17113 = vmatprep.subr.bf16.mxu0 %v22457_v31  ;;  %v22506_v31 = vld [vmem:[%s29115_s13 + $0x720] ss:$16 sps:$4 sm:$0xff]  }
0x24c5   : > { %16777 = vmatmul.mubr.bf16.vlgmr.msra.gmra.mrb[168].mxu1 %v13556_v21 }
0x24c6   : > { %17105 = vmatmul.mubr.bf16.vlgmr.msra.gmra.mrb[184].mxu0 %v13556_v21  ;;  %16786 = vmatpush1.bf16.msra.mxu1 %v22452_v48  ;;  %v22514_v48 = vld [vmem:[%s29115_s13 + $0x744] ss:$16 sps:$4 sm:$0xff]   ;;  %v22517_v21 = vld [vmem:[%s29115_s13 + $0x74c] ss:$16 sps:$4 sm:$0xff]  }
0x24c7   : > { %16817 = vmatprep.mubr.bf16.mxu1 %v13559_v38  ;;  %17114 = vmatpush1.bf16.msra.mxu0 %v22455_v6  ;;  %v22512_v6 = vld [vmem:[%s29115_s13 + $0x740] ss:$16 sps:$4 sm:$0xff]  }
0x24c8   : > { %17145 = vmatprep.mubr.bf16.mxu0 %v13559_v38  ;;  %16787 = vmatprep.subr.bf16.mxu1 %v22460_v7  ;;  %v22515_v7 = vld [vmem:[%s29115_s13 + $0x748] ss:$16 sps:$4 sm:$0xff]   ;;  %v22520_v38 = vld [vmem:[%s29115_s13 + $0x764] ss:$16 sps:$4 sm:$0xff]  }
0x24c9   : > { %17115 = vmatprep.subr.bf16.mxu0 %v22463_v53  ;;  %v22523_v53 = vld [vmem:[%s29115_s13 + $0x76c] ss:$16 sps:$4 sm:$0xff]  }
0x24ca   : > { %16788 = vmatpush1.bf16.msra.mxu1 %v22458_v42  ;;  %v22518_v42 = vld [vmem:[%s29115_s13 + $0x760] ss:$16 sps:$4 sm:$0xff]  }
0x24cb   : > { %17116 = vmatpush1.bf16.msra.mxu0 %v22461_v55  ;;  %16789 = vmatprep.subr.bf16.mxu1 %v22466_v11  ;;  %v22521_v55 = vld [vmem:[%s29115_s13 + $0x768] ss:$16 sps:$4 sm:$0xff]   ;;  %v22526_v11 = vld [vmem:[%s29115_s13 + $0x784] ss:$16 sps:$4 sm:$0xff]  }
0x24cc   : > { %17117 = vmatprep.subr.bf16.mxu0 %v22469_v12  ;;  %v22529_v12 = vld [vmem:[%s29115_s13 + $0x78c] ss:$16 sps:$4 sm:$0xff]  }
0x24ce   : > { %16790 = vmatpush1.bf16.msra.mxu1 %v22464_v13  ;;  %v22524_v13 = vld [vmem:[%s29115_s13 + $0x780] ss:$16 sps:$4 sm:$0xff]  }
0x24cf   : > { %17118 = vmatpush1.bf16.msra.mxu0 %v22467_v14  ;;  %16791 = vmatprep.subr.bf16.mxu1 %v22472_v0  ;;  %v10743_v14 = vsub.s32 6, %v23166_v23  ;;  %v22527_v0 = vld [vmem:[%s29115_s13 + $0x788] ss:$16 sps:$4 sm:$0xff]   ;;  %v22920_v23 = vld [vmem:[%s29115_s13 + $0xfc0] ss:$16 sps:$4 sm:$0xff]  }
0x24d0   : > { %17119 = vmatprep.subr.bf16.mxu0 %v22475_v27  ;;  %v22532_v27 = vld [vmem:[%s29115_s13 + $0x7a4] ss:$16 sps:$4 sm:$0xff]  }
0x24d2   : > { %16792 = vmatpush1.bf16.msra.mxu1 %v22470_v17  ;;  %v22535_v17 = vld [vmem:[%s29115_s13 + $0x7ac] ss:$16 sps:$4 sm:$0xff]  }
0x24d3   : > { %17120 = vmatpush1.bf16.msra.mxu0 %v22473_v8  ;;  %16793 = vmatprep.subr.bf16.mxu1 %v22478_v59  ;;  %v28215_v8 = vld [vmem:[%s29114_s12 + $0x8] sm:$0xff]  ;;  %v22530_v59 = vld [vmem:[%s29115_s13 + $0x7a0] ss:$16 sps:$4 sm:$0xff]  }
0x24d4   : > { %17121 = vmatprep.subr.bf16.mxu0 %v22481_v44  ;;  %v22969_v44 = vld [vmem:[%s29114_s12] sm:$0xff] }
0x24d6   : > { %16794 = vmatpush1.bf16.msra.mxu1 %v22476_v18  ;;  %v10744_v18 = vrot.slane %v22969_v44, %v10743_v14  ;;  %v22584_v44 = vld [vmem:[%s29115_s13 + $0x8c0] ss:$16 sps:$4 sm:$0xff]  }
0x24d7   : > { %17122 = vmatpush1.bf16.msra.mxu0 %v22479_v20  ;;  %16795 = vmatprep.subr.bf16.mxu1 %v22484_v19  ;;  %v22533_v20 = vld [vmem:[%s29115_s13 + $0x7a8] ss:$16 sps:$4 sm:$0xff]   ;;  %v22538_v19 = vld [vmem:[%s29115_s13 + $0x7c4] ss:$16 sps:$4 sm:$0xff]  }
0x24d8   : > { %v28116_v10 = vpop.f32.mrb[164].mxu1  ;;  %17123 = vmatprep.subr.bf16.mxu0 %v22487_v1  ;;  %v22541_v1 = vld [vmem:[%s29115_s13 + $0x7cc] ss:$16 sps:$4 sm:$0xff]  }
0x24d9   : > { %v28121_v35 = vpop.f32.mrb[180].mxu0  ;;  %v28123_v25 = vpop.f32.mrb[165].mxu1 }
0x24da   : > { %v28125_v43 = vpop.f32.mrb[181].mxu0  ;;  %v13451_v47 = vpop.f32.mrb[166].mxu1  ;;  %16796 = vmatpush1.bf16.msra.mxu1 %v22482_v24  ;;  %v10756_v24 = vrot.slane %v28215_v8, %v26035_v30 }
0x24db   : > { %v13533_v51 = vpop.f32.mrb[182].mxu0  ;;  %17124 = vmatpush1.bf16.msra.mxu0 %v22485_v29  ;;  %v13452_v40 = vpop.f32.mrb[167].mxu1  ;;  %16797 = vmatprep.subr.bf16.mxu1 %v22490_v37  ;;  %v22536_v29 = vld [vmem:[%s29115_s13 + $0x7c0] ss:$16 sps:$4 sm:$0xff]   ;;  %v21232_v37 = vadd.f32 %v27457_v15, %v10744_v18  ;;  %v22544_v47 = vld [vmem:[%s29115_s13 + $0x7e4] ss:$16 sps:$4 sm:$0xff]  }
0x24dc   : > { %v13534_v22 = vpop.f32.mrb[183].mxu0  ;;  %17125 = vmatprep.subr.bf16.mxu0 %v22493_v36  ;;  %v22539_v36 = vld [vmem:[%s29115_s13 + $0x7c8] ss:$16 sps:$4 sm:$0xff]   ;;  %v21235_v51 = vadd.f32 %v27785_v62, %v10756_v24  ;;  %v22542_v15 = vld [vmem:[%s29115_s13 + $0x7e0] ss:$16 sps:$4 sm:$0xff]  }
0x24dd   : > { %v13542_v40 = vmax.f32 %v21232_v37, 0.0  ;;  %v22553_v62 = vld [vmem:[%s29115_s13 + $0x80c] ss:$16 sps:$4 sm:$0xff]   ;;  %v22587_v18 = vld [vmem:[%s29115_s13 + $0x8c8] ss:$16 sps:$4 sm:$0xff]  }
0x24de   : > { %16798 = vmatpush1.bf16.msra.mxu1 %v22488_v50  ;;  %v22547_v50 = vld [vmem:[%s29115_s13 + $0x7ec] ss:$16 sps:$4 sm:$0xff]   ;;  %v13545_v22 = vmax.f32 %v21235_v51, 0.0  ;;  %v22593_v24 = vld [vmem:[%s29115_s13 + $0x8e8] ss:$16 sps:$4 sm:$0xff]  }
0x24df   : > { %17126 = vmatpush1.bf16.msra.mxu0 %v22491_v54  ;;  %16799 = vmatprep.subr.bf16.mxu1 %v22496_v4  ;;  %v22545_v54 = vld [vmem:[%s29115_s13 + $0x7e8] ss:$16 sps:$4 sm:$0xff]   ;;  %v22550_v4 = vld [vmem:[%s29115_s13 + $0x804] ss:$16 sps:$4 sm:$0xff]   ;;  %v22601_v37 = vld [vmem:[%s29115_s13 + $0x90c] ss:$16 sps:$4 sm:$0xff]  }
0x24e0   : > { %17127 = vmatprep.subr.bf16.mxu0 %v22499_v52  ;;  %v22548_v52 = vld [vmem:[%s29115_s13 + $0x800] ss:$16 sps:$4 sm:$0xff]   ;;  %v22607_v51 = vld [vmem:[%s29115_s13 + $0x92c] ss:$16 sps:$4 sm:$0xff]  }
0x24e2   : > { %16800 = vmatpush1.bf16.msra.mxu1 %v22494_v56  ;;  %v13558_v56 = vpack.c.bf16 %v13542_v40, %v13542_v40  ;;  %v22605_v40 = vld [vmem:[%s29115_s13 + $0x928] ss:$16 sps:$4 sm:$0xff]  }
0x24e3   : > { %17128 = vmatpush1.bf16.msra.mxu0 %v22497_v57  ;;  %16801 = vmatprep.subr.bf16.mxu1 %v22502_v39  ;;  %v22551_v57 = vld [vmem:[%s29115_s13 + $0x808] ss:$16 sps:$4 sm:$0xff]   ;;  %v22556_v39 = vld [vmem:[%s29115_s13 + $0x824] ss:$16 sps:$4 sm:$0xff]  }
0x24e4   : > { %17129 = vmatprep.subr.bf16.mxu0 %v22505_v16  ;;  %v13561_v16 = vpack.c.bf16 %v13545_v22, %v13545_v22  ;;  %v22611_v22 = vld [vmem:[%s29115_s13 + $0x948] ss:$16 sps:$4 sm:$0xff]  }
0x24e6   : > { %16802 = vmatpush1.bf16.msra.mxu1 %v22500_v26  ;;  %v22559_v26 = vld [vmem:[%s29115_s13 + $0x82c] ss:$16 sps:$4 sm:$0xff]  }
0x24e7   : > { %17130 = vmatpush1.bf16.msra.mxu0 %v22503_v33  ;;  %16803 = vmatprep.subr.bf16.mxu1 %v22508_v45  ;;  %v22554_v33 = vld [vmem:[%s29115_s13 + $0x820] ss:$16 sps:$4 sm:$0xff]   ;;  %v22557_v45 = vld [vmem:[%s29115_s13 + $0x828] ss:$16 sps:$4 sm:$0xff]  }
0x24e8   : > { %17131 = vmatprep.subr.bf16.mxu0 %v22511_v3  ;;  %v22562_v3 = vld [vmem:[%s29115_s13 + $0x844] ss:$16 sps:$4 sm:$0xff]  }
0x24ea   : > { %16804 = vmatpush1.bf16.msra.mxu1 %v22506_v31  ;;  %v22565_v31 = vld [vmem:[%s29115_s13 + $0x84c] ss:$16 sps:$4 sm:$0xff]  }
0x24eb   : > { %17132 = vmatpush1.bf16.msra.mxu0 %v22509_v5  ;;  %16805 = vmatprep.subr.bf16.mxu1 %v22514_v48  ;;  %v22560_v5 = vld [vmem:[%s29115_s13 + $0x840] ss:$16 sps:$4 sm:$0xff]   ;;  %v22563_v48 = vld [vmem:[%s29115_s13 + $0x848] ss:$16 sps:$4 sm:$0xff]  }
0x24ec   : > { %17133 = vmatprep.subr.bf16.mxu0 %v22517_v21  ;;  %v22568_v21 = vld [vmem:[%s29115_s13 + $0x864] ss:$16 sps:$4 sm:$0xff]  }
0x24ee   : > { %16806 = vmatpush1.bf16.msra.mxu1 %v22512_v6  ;;  %v22571_v6 = vld [vmem:[%s29115_s13 + $0x86c] ss:$16 sps:$4 sm:$0xff]  }
0x24ef   : > { %17134 = vmatpush1.bf16.msra.mxu0 %v22515_v7  ;;  %16807 = vmatprep.subr.bf16.mxu1 %v22520_v38  ;;  %v22566_v7 = vld [vmem:[%s29115_s13 + $0x860] ss:$16 sps:$4 sm:$0xff]   ;;  %v22569_v38 = vld [vmem:[%s29115_s13 + $0x868] ss:$16 sps:$4 sm:$0xff]  }
0x24f0   : > { %17135 = vmatprep.subr.bf16.mxu0 %v22523_v53  ;;  %v22574_v53 = vld [vmem:[%s29115_s13 + $0x884] ss:$16 sps:$4 sm:$0xff]  }
0x24f2   : > { %16808 = vmatpush1.bf16.msra.mxu1 %v22518_v42  ;;  %v22577_v42 = vld [vmem:[%s29115_s13 + $0x88c] ss:$16 sps:$4 sm:$0xff]  }
0x24f3   : > { %17136 = vmatpush1.bf16.msra.mxu0 %v22521_v55  ;;  %16809 = vmatprep.subr.bf16.mxu1 %v22526_v11  ;;  %v22572_v55 = vld [vmem:[%s29115_s13 + $0x880] ss:$16 sps:$4 sm:$0xff]   ;;  %v22575_v11 = vld [vmem:[%s29115_s13 + $0x888] ss:$16 sps:$4 sm:$0xff]  }
0x24f4   : > { %17137 = vmatprep.subr.bf16.mxu0 %v22529_v12  ;;  %v22580_v12 = vld [vmem:[%s29115_s13 + $0x8a4] ss:$16 sps:$4 sm:$0xff]  }
0x24f6   : > { %16810 = vmatpush1.bf16.msra.mxu1 %v22524_v13  ;;  %v22583_v13 = vld [vmem:[%s29115_s13 + $0x8ac] ss:$16 sps:$4 sm:$0xff]  }
0x24f7   : > { %17138 = vmatpush1.bf16.msra.mxu0 %v22527_v0  ;;  %16811 = vmatprep.subr.bf16.mxu1 %v22532_v27  ;;  %v22578_v0 = vld [vmem:[%s29115_s13 + $0x8a0] ss:$16 sps:$4 sm:$0xff]   ;;  %v22581_v27 = vld [vmem:[%s29115_s13 + $0x8a8] ss:$16 sps:$4 sm:$0xff]  }
0x24f8   : > { %17139 = vmatprep.subr.bf16.mxu0 %v22535_v17  ;;  %v22586_v17 = vld [vmem:[%s29115_s13 + $0x8c4] ss:$16 sps:$4 sm:$0xff]  }
0x24fa   : > { %16812 = vmatpush1.bf16.msra.mxu1 %v22530_v59  ;;  %v22589_v59 = vld [vmem:[%s29115_s13 + $0x8cc] ss:$16 sps:$4 sm:$0xff]  }
0x24fb   : > { %17140 = vmatpush1.bf16.msra.mxu0 %v22533_v20  ;;  %16813 = vmatprep.subr.bf16.mxu1 %v22538_v19  ;;  %v22592_v20 = vld [vmem:[%s29115_s13 + $0x8e4] ss:$16 sps:$4 sm:$0xff]   ;;  %v22595_v19 = vld [vmem:[%s29115_s13 + $0x8ec] ss:$16 sps:$4 sm:$0xff]  }
0x24fc   : > { %17141 = vmatprep.subr.bf16.mxu0 %v22541_v1  ;;  %v22590_v1 = vld [vmem:[%s29115_s13 + $0x8e0] ss:$16 sps:$4 sm:$0xff]  }
0x24fe   : > { %16814 = vmatpush1.bf16.msra.mxu1 %v22536_v29  ;;  %v22598_v29 = vld [vmem:[%s29115_s13 + $0x904] ss:$16 sps:$4 sm:$0xff]  }
0x24ff   : > { %17142 = vmatpush1.bf16.msra.mxu0 %v22539_v36  ;;  %16815 = vmatprep.subr.bf16.mxu1 %v22544_v47  ;;  %v22596_v36 = vld [vmem:[%s29115_s13 + $0x900] ss:$16 sps:$4 sm:$0xff]   ;;  %v22599_v47 = vld [vmem:[%s29115_s13 + $0x908] ss:$16 sps:$4 sm:$0xff]  }
0x2500   : > { %17143 = vmatprep.subr.bf16.mxu0 %v22547_v50  ;;  %v22604_v50 = vld [vmem:[%s29115_s13 + $0x924] ss:$16 sps:$4 sm:$0xff]  }
0x2502   : > { %16816 = vmatpush1.bf16.msra.mxu1 %v22542_v15  ;;  %v22602_v15 = vld [vmem:[%s29115_s13 + $0x920] ss:$16 sps:$4 sm:$0xff]  }
0x2503   : > { %17144 = vmatpush1.bf16.msra.mxu0 %v22545_v54  ;;  %16826 = vmatprep.subr.bf16.mxu1 %v22550_v4  ;;  %v22610_v54 = vld [vmem:[%s29115_s13 + $0x944] ss:$16 sps:$4 sm:$0xff]   ;;  %v22613_v4 = vld [vmem:[%s29115_s13 + $0x94c] ss:$16 sps:$4 sm:$0xff]  }
0x2504   : > { %17154 = vmatprep.subr.bf16.mxu0 %v22553_v62  ;;  %v22608_v62 = vld [vmem:[%s29115_s13 + $0x940] ss:$16 sps:$4 sm:$0xff]  }
0x2505   : > { %16818 = vmatmul.mubr.bf16.vlgmr.msra.gmra.mrb[168].mxu1 %v13558_v56 }
0x2506   : > { %17146 = vmatmul.mubr.bf16.vlgmr.msra.gmra.mrb[184].mxu0 %v13558_v56  ;;  %16827 = vmatpush1.bf16.msra.mxu1 %v22548_v52  ;;  %v22616_v52 = vld [vmem:[%s29115_s13 + $0x964] ss:$16 sps:$4 sm:$0xff]   ;;  %v22619_v56 = vld [vmem:[%s29115_s13 + $0x96c] ss:$16 sps:$4 sm:$0xff]  }
0x2507   : > { %16858 = vmatprep.mubr.bf16.mxu1 %v13561_v16  ;;  %17155 = vmatpush1.bf16.msra.mxu0 %v22551_v57  ;;  %v22614_v57 = vld [vmem:[%s29115_s13 + $0x960] ss:$16 sps:$4 sm:$0xff]  }
0x2508   : > { %17186 = vmatprep.mubr.bf16.mxu0 %v13561_v16  ;;  %16828 = vmatprep.subr.bf16.mxu1 %v22556_v39  ;;  %v22617_v39 = vld [vmem:[%s29115_s13 + $0x968] ss:$16 sps:$4 sm:$0xff]   ;;  %v22622_v16 = vld [vmem:[%s29115_s13 + $0x984] ss:$16 sps:$4 sm:$0xff]  }
0x2509   : > { %17156 = vmatprep.subr.bf16.mxu0 %v22559_v26  ;;  %v22625_v26 = vld [vmem:[%s29115_s13 + $0x98c] ss:$16 sps:$4 sm:$0xff]  }
0x250a   : > { %16829 = vmatpush1.bf16.msra.mxu1 %v22554_v33  ;;  %v22620_v33 = vld [vmem:[%s29115_s13 + $0x980] ss:$16 sps:$4 sm:$0xff]  }
0x250b   : > { %17157 = vmatpush1.bf16.msra.mxu0 %v22557_v45  ;;  %16830 = vmatprep.subr.bf16.mxu1 %v22562_v3  ;;  %v22623_v45 = vld [vmem:[%s29115_s13 + $0x988] ss:$16 sps:$4 sm:$0xff]   ;;  %v22628_v3 = vld [vmem:[%s29115_s13 + $0x9a4] ss:$16 sps:$4 sm:$0xff]  }
0x250c   : > { %17158 = vmatprep.subr.bf16.mxu0 %v22565_v31  ;;  %v22631_v31 = vld [vmem:[%s29115_s13 + $0x9ac] ss:$16 sps:$4 sm:$0xff]  }
0x250e   : > { %16831 = vmatpush1.bf16.msra.mxu1 %v22560_v5  ;;  %v22626_v5 = vld [vmem:[%s29115_s13 + $0x9a0] ss:$16 sps:$4 sm:$0xff]  }
0x250f   : > { %17159 = vmatpush1.bf16.msra.mxu0 %v22563_v48  ;;  %16832 = vmatprep.subr.bf16.mxu1 %v22568_v21  ;;  %v10752_v48 = vrot.slane %v28215_v8, %v26029_v9  ;;  %v22629_v21 = vld [vmem:[%s29115_s13 + $0x9a8] ss:$16 sps:$4 sm:$0xff]  }
0x2510   : > { %17160 = vmatprep.subr.bf16.mxu0 %v22571_v6  ;;  %v22634_v6 = vld [vmem:[%s29115_s13 + $0x9c4] ss:$16 sps:$4 sm:$0xff]  }
0x2512   : > { %16833 = vmatpush1.bf16.msra.mxu1 %v22566_v7  ;;  %v22637_v7 = vld [vmem:[%s29115_s13 + $0x9cc] ss:$16 sps:$4 sm:$0xff]  }
0x2513   : > { %17161 = vmatpush1.bf16.msra.mxu0 %v22569_v38  ;;  %16834 = vmatprep.subr.bf16.mxu1 %v22574_v53  ;;  %v10764_v38 = vrot.slane %v28215_v8, %v26045_v49  ;;  %v22632_v53 = vld [vmem:[%s29115_s13 + $0x9c0] ss:$16 sps:$4 sm:$0xff]  }
0x2514   : > { %17162 = vmatprep.subr.bf16.mxu0 %v22577_v42  ;;  %v21234_v42 = vadd.f32 %v27778_v58, %v10752_v48  ;;  %v22638_v58 = vld [vmem:[%s29115_s13 + $0x9e0] ss:$16 sps:$4 sm:$0xff]   ;;  %v22691_v48 = vld [vmem:[%s29115_s13 + $0xaec] ss:$16 sps:$4 sm:$0xff]  }
0x2516   : > { %16835 = vmatpush1.bf16.msra.mxu1 %v22572_v55  ;;  %v22635_v55 = vld [vmem:[%s29115_s13 + $0x9c8] ss:$16 sps:$4 sm:$0xff]  }
0x2517   : > { %17163 = vmatpush1.bf16.msra.mxu0 %v22575_v11  ;;  %16836 = vmatprep.subr.bf16.mxu1 %v22580_v12  ;;  %v22640_v11 = vld [vmem:[%s29115_s13 + $0x9e4] ss:$16 sps:$4 sm:$0xff]   ;;  %v22643_v12 = vld [vmem:[%s29115_s13 + $0x9ec] ss:$16 sps:$4 sm:$0xff]  }
0x2518   : > { %17164 = vmatprep.subr.bf16.mxu0 %v22583_v13  ;;  %v21237_v13 = vadd.f32 %v27787_v63, %v10764_v38  ;;  %v22649_v63 = vld [vmem:[%s29115_s13 + $0xa0c] ss:$16 sps:$4 sm:$0xff]  }
0x2519   : > { %v22697_v38 = vld [vmem:[%s29115_s13 + $0xb0c] ss:$16 sps:$4 sm:$0xff]  }
0x251a   : > { %16837 = vmatpush1.bf16.msra.mxu1 %v22578_v0  ;;  %v13544_v0 = vmax.f32 %v21234_v42, 0.0  ;;  %v22695_v42 = vld [vmem:[%s29115_s13 + $0xb08] ss:$16 sps:$4 sm:$0xff]  }
0x251b   : > { %17165 = vmatpush1.bf16.msra.mxu0 %v22581_v27  ;;  %16838 = vmatprep.subr.bf16.mxu1 %v22586_v17  ;;  %v22641_v27 = vld [vmem:[%s29115_s13 + $0x9e8] ss:$16 sps:$4 sm:$0xff]   ;;  %v22646_v17 = vld [vmem:[%s29115_s13 + $0xa04] ss:$16 sps:$4 sm:$0xff]  }
0x251c   : > { %17166 = vmatprep.subr.bf16.mxu0 %v22589_v59  ;;  %v13547_v59 = vmax.f32 %v21237_v13, 0.0  ;;  %v22701_v13 = vld [vmem:[%s29115_s13 + $0xb28] ss:$16 sps:$4 sm:$0xff]  }
0x251e   : > { %16839 = vmatpush1.bf16.msra.mxu1 %v22584_v44  ;;  %v22644_v44 = vld [vmem:[%s29115_s13 + $0xa00] ss:$16 sps:$4 sm:$0xff]  }
0x251f   : > { %17167 = vmatpush1.bf16.msra.mxu0 %v22587_v18  ;;  %16840 = vmatprep.subr.bf16.mxu1 %v22592_v20  ;;  %v13560_v18 = vpack.c.bf16 %v13544_v0, %v13544_v0  ;;  %v22647_v20 = vld [vmem:[%s29115_s13 + $0xa08] ss:$16 sps:$4 sm:$0xff]   ;;  %v22709_v0 = vld [vmem:[%s29115_s13 + $0xb4c] ss:$16 sps:$4 sm:$0xff]  }
0x2520   : > { %17168 = vmatprep.subr.bf16.mxu0 %v22595_v19  ;;  %v22652_v19 = vld [vmem:[%s29115_s13 + $0xa24] ss:$16 sps:$4 sm:$0xff]  }
0x2522   : > { %16841 = vmatpush1.bf16.msra.mxu1 %v22590_v1  ;;  %v13563_v1 = vpack.c.bf16 %v13547_v59, %v13547_v59  ;;  %v22715_v59 = vld [vmem:[%s29115_s13 + $0xb6c] ss:$16 sps:$4 sm:$0xff]  }
0x2523   : > { %17169 = vmatpush1.bf16.msra.mxu0 %v22593_v24  ;;  %16842 = vmatprep.subr.bf16.mxu1 %v22598_v29  ;;  %v22655_v24 = vld [vmem:[%s29115_s13 + $0xa2c] ss:$16 sps:$4 sm:$0xff]   ;;  %v22650_v29 = vld [vmem:[%s29115_s13 + $0xa20] ss:$16 sps:$4 sm:$0xff]  }
0x2524   : > { %17170 = vmatprep.subr.bf16.mxu0 %v22601_v37  ;;  %v22653_v37 = vld [vmem:[%s29115_s13 + $0xa28] ss:$16 sps:$4 sm:$0xff]  }
0x2526   : > { %16843 = vmatpush1.bf16.msra.mxu1 %v22596_v36  ;;  %v22658_v36 = vld [vmem:[%s29115_s13 + $0xa44] ss:$16 sps:$4 sm:$0xff]  }
0x2527   : > { %17171 = vmatpush1.bf16.msra.mxu0 %v22599_v47  ;;  %16844 = vmatprep.subr.bf16.mxu1 %v22604_v50  ;;  %v22661_v47 = vld [vmem:[%s29115_s13 + $0xa4c] ss:$16 sps:$4 sm:$0xff]   ;;  %v22656_v50 = vld [vmem:[%s29115_s13 + $0xa40] ss:$16 sps:$4 sm:$0xff]  }
0x2528   : > { %17172 = vmatprep.subr.bf16.mxu0 %v22607_v51  ;;  %v22659_v51 = vld [vmem:[%s29115_s13 + $0xa48] ss:$16 sps:$4 sm:$0xff]  }
0x252a   : > { %16845 = vmatpush1.bf16.msra.mxu1 %v22602_v15  ;;  %v22664_v15 = vld [vmem:[%s29115_s13 + $0xa64] ss:$16 sps:$4 sm:$0xff]  }
0x252b   : > { %17173 = vmatpush1.bf16.msra.mxu0 %v22605_v40  ;;  %16846 = vmatprep.subr.bf16.mxu1 %v22610_v54  ;;  %v22667_v40 = vld [vmem:[%s29115_s13 + $0xa6c] ss:$16 sps:$4 sm:$0xff]   ;;  %v22662_v54 = vld [vmem:[%s29115_s13 + $0xa60] ss:$16 sps:$4 sm:$0xff]  }
0x252c   : > { %17174 = vmatprep.subr.bf16.mxu0 %v22613_v4  ;;  %v22665_v4 = vld [vmem:[%s29115_s13 + $0xa68] ss:$16 sps:$4 sm:$0xff]  }
0x252e   : > { %16847 = vmatpush1.bf16.msra.mxu1 %v22608_v62  ;;  %v22670_v62 = vld [vmem:[%s29115_s13 + $0xa84] ss:$16 sps:$4 sm:$0xff]  }
0x252f   : > { %17175 = vmatpush1.bf16.msra.mxu0 %v22611_v22  ;;  %16848 = vmatprep.subr.bf16.mxu1 %v22616_v52  ;;  %v22673_v22 = vld [vmem:[%s29115_s13 + $0xa8c] ss:$16 sps:$4 sm:$0xff]   ;;  %v22668_v52 = vld [vmem:[%s29115_s13 + $0xa80] ss:$16 sps:$4 sm:$0xff]  }
0x2530   : > { %17176 = vmatprep.subr.bf16.mxu0 %v22619_v56  ;;  %v22671_v56 = vld [vmem:[%s29115_s13 + $0xa88] ss:$16 sps:$4 sm:$0xff]  }
0x2532   : > { %16849 = vmatpush1.bf16.msra.mxu1 %v22614_v57  ;;  %v22676_v57 = vld [vmem:[%s29115_s13 + $0xaa4] ss:$16 sps:$4 sm:$0xff]  }
0x2533   : > { %17177 = vmatpush1.bf16.msra.mxu0 %v22617_v39  ;;  %16850 = vmatprep.subr.bf16.mxu1 %v22622_v16  ;;  %v22679_v39 = vld [vmem:[%s29115_s13 + $0xaac] ss:$16 sps:$4 sm:$0xff]   ;;  %v22674_v16 = vld [vmem:[%s29115_s13 + $0xaa0] ss:$16 sps:$4 sm:$0xff]  }
0x2534   : > { %17178 = vmatprep.subr.bf16.mxu0 %v22625_v26  ;;  %v22677_v26 = vld [vmem:[%s29115_s13 + $0xaa8] ss:$16 sps:$4 sm:$0xff]  }
0x2536   : > { %16851 = vmatpush1.bf16.msra.mxu1 %v22620_v33  ;;  %v22682_v33 = vld [vmem:[%s29115_s13 + $0xac4] ss:$16 sps:$4 sm:$0xff]  }
0x2537   : > { %17179 = vmatpush1.bf16.msra.mxu0 %v22623_v45  ;;  %16852 = vmatprep.subr.bf16.mxu1 %v22628_v3  ;;  %v22685_v45 = vld [vmem:[%s29115_s13 + $0xacc] ss:$16 sps:$4 sm:$0xff]   ;;  %v22680_v3 = vld [vmem:[%s29115_s13 + $0xac0] ss:$16 sps:$4 sm:$0xff]  }
0x2538   : > { %17180 = vmatprep.subr.bf16.mxu0 %v22631_v31  ;;  %v22683_v31 = vld [vmem:[%s29115_s13 + $0xac8] ss:$16 sps:$4 sm:$0xff]  }
0x253a   : > { %16853 = vmatpush1.bf16.msra.mxu1 %v22626_v5  ;;  %v22688_v5 = vld [vmem:[%s29115_s13 + $0xae4] ss:$16 sps:$4 sm:$0xff]  }
0x253b   : > { %17181 = vmatpush1.bf16.msra.mxu0 %v22629_v21  ;;  %16854 = vmatprep.subr.bf16.mxu1 %v22634_v6  ;;  %v22686_v21 = vld [vmem:[%s29115_s13 + $0xae0] ss:$16 sps:$4 sm:$0xff]   ;;  %v22689_v6 = vld [vmem:[%s29115_s13 + $0xae8] ss:$16 sps:$4 sm:$0xff]  }
0x253c   : > { %17182 = vmatprep.subr.bf16.mxu0 %v22637_v7  ;;  %v22694_v7 = vld [vmem:[%s29115_s13 + $0xb04] ss:$16 sps:$4 sm:$0xff]  }
0x253e   : > { %16855 = vmatpush1.bf16.msra.mxu1 %v22632_v53  ;;  %v22692_v53 = vld [vmem:[%s29115_s13 + $0xb00] ss:$16 sps:$4 sm:$0xff]  }
0x253f   : > { %17183 = vmatpush1.bf16.msra.mxu0 %v22635_v55  ;;  %16856 = vmatprep.subr.bf16.mxu1 %v22640_v11  ;;  %v22700_v55 = vld [vmem:[%s29115_s13 + $0xb24] ss:$16 sps:$4 sm:$0xff]   ;;  %v22703_v11 = vld [vmem:[%s29115_s13 + $0xb2c] ss:$16 sps:$4 sm:$0xff]  }
0x2540   : > { %17184 = vmatprep.subr.bf16.mxu0 %v22643_v12  ;;  %v22698_v12 = vld [vmem:[%s29115_s13 + $0xb20] ss:$16 sps:$4 sm:$0xff]  }
0x2542   : > { %16857 = vmatpush1.bf16.msra.mxu1 %v22638_v58  ;;  %v22706_v58 = vld [vmem:[%s29115_s13 + $0xb44] ss:$16 sps:$4 sm:$0xff]  }
0x2543   : > { %17185 = vmatpush1.bf16.msra.mxu0 %v22641_v27  ;;  %16867 = vmatprep.subr.bf16.mxu1 %v22646_v17  ;;  %v22704_v27 = vld [vmem:[%s29115_s13 + $0xb40] ss:$16 sps:$4 sm:$0xff]   ;;  %v22707_v17 = vld [vmem:[%s29115_s13 + $0xb48] ss:$16 sps:$4 sm:$0xff]  }
0x2544   : > { %17195 = vmatprep.subr.bf16.mxu0 %v22649_v63  ;;  %v22712_v63 = vld [vmem:[%s29115_s13 + $0xb64] ss:$16 sps:$4 sm:$0xff]  }
0x2545   : > { %16859 = vmatmul.mubr.bf16.vlgmr.msra.gmra.mrb[168].mxu1 %v13560_v18 }
0x2546   : > { %17187 = vmatmul.mubr.bf16.vlgmr.msra.gmra.mrb[184].mxu0 %v13560_v18  ;;  %16868 = vmatpush1.bf16.msra.mxu1 %v22644_v44  ;;  %v22710_v44 = vld [vmem:[%s29115_s13 + $0xb60] ss:$16 sps:$4 sm:$0xff]   ;;  %v22713_v18 = vld [vmem:[%s29115_s13 + $0xb68] ss:$16 sps:$4 sm:$0xff]  }
0x2547   : > { %16899 = vmatprep.mubr.bf16.mxu1 %v13563_v1  ;;  %17196 = vmatpush1.bf16.msra.mxu0 %v22647_v20  ;;  %v22718_v20 = vld [vmem:[%s29115_s13 + $0xb84] ss:$16 sps:$4 sm:$0xff]  }
0x2548   : > { %17227 = vmatprep.mubr.bf16.mxu0 %v13563_v1  ;;  %16869 = vmatprep.subr.bf16.mxu1 %v22652_v19  ;;  %v22721_v19 = vld [vmem:[%s29115_s13 + $0xb8c] ss:$16 sps:$4 sm:$0xff]   ;;  %v22716_v1 = vld [vmem:[%s29115_s13 + $0xb80] ss:$16 sps:$4 sm:$0xff]  }
0x2549   : > { %17197 = vmatprep.subr.bf16.mxu0 %v22655_v24  ;;  %v22719_v24 = vld [vmem:[%s29115_s13 + $0xb88] ss:$16 sps:$4 sm:$0xff]  }
0x254a   : > { %16870 = vmatpush1.bf16.msra.mxu1 %v22650_v29  ;;  %v22724_v29 = vld [vmem:[%s29115_s13 + $0xba4] ss:$16 sps:$4 sm:$0xff]  }
0x254b   : > { %17198 = vmatpush1.bf16.msra.mxu0 %v22653_v37  ;;  %16871 = vmatprep.subr.bf16.mxu1 %v22658_v36  ;;  %v22727_v37 = vld [vmem:[%s29115_s13 + $0xbac] ss:$16 sps:$4 sm:$0xff]   ;;  %v22722_v36 = vld [vmem:[%s29115_s13 + $0xba0] ss:$16 sps:$4 sm:$0xff]  }
0x254c   : > { %17199 = vmatprep.subr.bf16.mxu0 %v22661_v47  ;;  %v10760_v47 = vrot.slane %v28215_v8, %v26042_v60 }
0x254e   : > { %16872 = vmatpush1.bf16.msra.mxu1 %v22656_v50  ;;  %v22725_v50 = vld [vmem:[%s29115_s13 + $0xba8] ss:$16 sps:$4 sm:$0xff]  }
0x254f   : > { %17200 = vmatpush1.bf16.msra.mxu0 %v22659_v51  ;;  %16873 = vmatprep.subr.bf16.mxu1 %v22664_v15  ;;  %v22730_v51 = vld [vmem:[%s29115_s13 + $0xbc4] ss:$16 sps:$4 sm:$0xff]   ;;  %v22733_v15 = vld [vmem:[%s29115_s13 + $0xbcc] ss:$16 sps:$4 sm:$0xff]  }
0x2550   : > { %17201 = vmatprep.subr.bf16.mxu0 %v22667_v40  ;;  %v10772_v40 = vrot.slane %v28215_v8, %v10739_v41  ;;  %v22739_v41 = vld [vmem:[%s29115_s13 + $0xbec] ss:$16 sps:$4 sm:$0xff]  }
0x2552   : > { %16874 = vmatpush1.bf16.msra.mxu1 %v22662_v54  ;;  %v22728_v54 = vld [vmem:[%s29115_s13 + $0xbc0] ss:$16 sps:$4 sm:$0xff]  }
0x2553   : > { %17202 = vmatpush1.bf16.msra.mxu0 %v22665_v4  ;;  %16875 = vmatprep.subr.bf16.mxu1 %v22670_v62  ;;  %v21236_v4 = vadd.f32 %v27783_v61, %v10760_v47  ;;  %v22731_v62 = vld [vmem:[%s29115_s13 + $0xbc8] ss:$16 sps:$4 sm:$0xff]   ;;  %v22734_v61 = vld [vmem:[%s29115_s13 + $0xbe0] ss:$16 sps:$4 sm:$0xff]   ;;  %v22790_v47 = vld [vmem:[%s29115_s13 + $0xd04] ss:$16 sps:$4 sm:$0xff]  }
0x2554   : > { %17203 = vmatprep.subr.bf16.mxu0 %v22673_v22  ;;  %v22736_v22 = vld [vmem:[%s29115_s13 + $0xbe4] ss:$16 sps:$4 sm:$0xff]  }
0x2556   : > { %16876 = vmatpush1.bf16.msra.mxu1 %v22668_v52  ;;  %v21239_v52 = vadd.f32 %v28123_v25, %v10772_v40  ;;  %v22745_v25 = vld [vmem:[%s29115_s13 + $0xc0c] ss:$16 sps:$4 sm:$0xff]   ;;  %v22796_v40 = vld [vmem:[%s29115_s13 + $0xd24] ss:$16 sps:$4 sm:$0xff]  }
0x2557   : > { %17204 = vmatpush1.bf16.msra.mxu0 %v22671_v56  ;;  %16877 = vmatprep.subr.bf16.mxu1 %v22676_v57  ;;  %v13546_v56 = vmax.f32 %v21236_v4, 0.0  ;;  %v22737_v57 = vld [vmem:[%s29115_s13 + $0xbe8] ss:$16 sps:$4 sm:$0xff]   ;;  %v22794_v4 = vld [vmem:[%s29115_s13 + $0xd20] ss:$16 sps:$4 sm:$0xff]  }
0x2558   : > { %17205 = vmatprep.subr.bf16.mxu0 %v22679_v39  ;;  %v22742_v39 = vld [vmem:[%s29115_s13 + $0xc04] ss:$16 sps:$4 sm:$0xff]  }
0x255a   : > { %16878 = vmatpush1.bf16.msra.mxu1 %v22674_v16  ;;  %v13549_v16 = vmax.f32 %v21239_v52, 0.0  ;;  %v22800_v52 = vld [vmem:[%s29115_s13 + $0xd40] ss:$16 sps:$4 sm:$0xff]  }
0x255b   : > { %17206 = vmatpush1.bf16.msra.mxu0 %v22677_v26  ;;  %16879 = vmatprep.subr.bf16.mxu1 %v22682_v33  ;;  %v22740_v26 = vld [vmem:[%s29115_s13 + $0xc00] ss:$16 sps:$4 sm:$0xff]   ;;  %v13562_v33 = vpack.c.bf16 %v13546_v56, %v13546_v56  ;;  %v22808_v56 = vld [vmem:[%s29115_s13 + $0xd64] ss:$16 sps:$4 sm:$0xff]  }
0x255c   : > { %17207 = vmatprep.subr.bf16.mxu0 %v22685_v45  ;;  %v22743_v45 = vld [vmem:[%s29115_s13 + $0xc08] ss:$16 sps:$4 sm:$0xff]  }
0x255e   : > { %16880 = vmatpush1.bf16.msra.mxu1 %v22680_v3  ;;  %v22748_v3 = vld [vmem:[%s29115_s13 + $0xc24] ss:$16 sps:$4 sm:$0xff]  }
0x255f   : > { %17208 = vmatpush1.bf16.msra.mxu0 %v22683_v31  ;;  %16881 = vmatprep.subr.bf16.mxu1 %v22688_v5  ;;  %v13565_v31 = vpack.c.bf16 %v13549_v16, %v13549_v16  ;;  %v22751_v5 = vld [vmem:[%s29115_s13 + $0xc2c] ss:$16 sps:$4 sm:$0xff]   ;;  %v22814_v16 = vld [vmem:[%s29115_s13 + $0xd84] ss:$16 sps:$4 sm:$0xff]  }
0x2560   : > { %17209 = vmatprep.subr.bf16.mxu0 %v22691_v48  ;;  %v22746_v48 = vld [vmem:[%s29115_s13 + $0xc20] ss:$16 sps:$4 sm:$0xff]  }
0x2562   : > { %16882 = vmatpush1.bf16.msra.mxu1 %v22686_v21  ;;  %v22749_v21 = vld [vmem:[%s29115_s13 + $0xc28] ss:$16 sps:$4 sm:$0xff]  }
0x2563   : > { %17210 = vmatpush1.bf16.msra.mxu0 %v22689_v6  ;;  %16883 = vmatprep.subr.bf16.mxu1 %v22694_v7  ;;  %v22754_v6 = vld [vmem:[%s29115_s13 + $0xc44] ss:$16 sps:$4 sm:$0xff]   ;;  %v22757_v7 = vld [vmem:[%s29115_s13 + $0xc4c] ss:$16 sps:$4 sm:$0xff]  }
0x2564   : > { %17211 = vmatprep.subr.bf16.mxu0 %v22697_v38  ;;  %v22752_v38 = vld [vmem:[%s29115_s13 + $0xc40] ss:$16 sps:$4 sm:$0xff]  }
0x2566   : > { %16884 = vmatpush1.bf16.msra.mxu1 %v22692_v53  ;;  %v22755_v53 = vld [vmem:[%s29115_s13 + $0xc48] ss:$16 sps:$4 sm:$0xff]  }
0x2567   : > { %17212 = vmatpush1.bf16.msra.mxu0 %v22695_v42  ;;  %16885 = vmatprep.subr.bf16.mxu1 %v22700_v55  ;;  %v22760_v42 = vld [vmem:[%s29115_s13 + $0xc64] ss:$16 sps:$4 sm:$0xff]   ;;  %v22763_v55 = vld [vmem:[%s29115_s13 + $0xc6c] ss:$16 sps:$4 sm:$0xff]  }
0x2568   : > { %17213 = vmatprep.subr.bf16.mxu0 %v22703_v11  ;;  %v22758_v11 = vld [vmem:[%s29115_s13 + $0xc60] ss:$16 sps:$4 sm:$0xff]  }
0x256a   : > { %16886 = vmatpush1.bf16.msra.mxu1 %v22698_v12  ;;  %v22761_v12 = vld [vmem:[%s29115_s13 + $0xc68] ss:$16 sps:$4 sm:$0xff]  }
0x256b   : > { %17214 = vmatpush1.bf16.msra.mxu0 %v22701_v13  ;;  %16887 = vmatprep.subr.bf16.mxu1 %v22706_v58  ;;  %v22766_v13 = vld [vmem:[%s29115_s13 + $0xc84] ss:$16 sps:$4 sm:$0xff]   ;;  %v22769_v58 = vld [vmem:[%s29115_s13 + $0xc8c] ss:$16 sps:$4 sm:$0xff]  }
0x256c   : > { %17215 = vmatprep.subr.bf16.mxu0 %v22709_v0  ;;  %v22764_v0 = vld [vmem:[%s29115_s13 + $0xc80] ss:$16 sps:$4 sm:$0xff]  }
0x256e   : > { %16888 = vmatpush1.bf16.msra.mxu1 %v22704_v27  ;;  %v22767_v27 = vld [vmem:[%s29115_s13 + $0xc88] ss:$16 sps:$4 sm:$0xff]  }
0x256f   : > { %17216 = vmatpush1.bf16.msra.mxu0 %v22707_v17  ;;  %16889 = vmatprep.subr.bf16.mxu1 %v22712_v63  ;;  %v22772_v17 = vld [vmem:[%s29115_s13 + $0xca4] ss:$16 sps:$4 sm:$0xff]   ;;  %v22775_v63 = vld [vmem:[%s29115_s13 + $0xcac] ss:$16 sps:$4 sm:$0xff]  }
0x2570   : > { %17217 = vmatprep.subr.bf16.mxu0 %v22715_v59  ;;  %v22770_v59 = vld [vmem:[%s29115_s13 + $0xca0] ss:$16 sps:$4 sm:$0xff]  }
0x2572   : > { %16890 = vmatpush1.bf16.msra.mxu1 %v22710_v44  ;;  %v22773_v44 = vld [vmem:[%s29115_s13 + $0xca8] ss:$16 sps:$4 sm:$0xff]  }
0x2573   : > { %17218 = vmatpush1.bf16.msra.mxu0 %v22713_v18  ;;  %16891 = vmatprep.subr.bf16.mxu1 %v22718_v20  ;;  %v22778_v18 = vld [vmem:[%s29115_s13 + $0xcc4] ss:$16 sps:$4 sm:$0xff]   ;;  %v22781_v20 = vld [vmem:[%s29115_s13 + $0xccc] ss:$16 sps:$4 sm:$0xff]  }
0x2574   : > { %17219 = vmatprep.subr.bf16.mxu0 %v22721_v19  ;;  %v22776_v19 = vld [vmem:[%s29115_s13 + $0xcc0] ss:$16 sps:$4 sm:$0xff]  }
0x2576   : > { %16892 = vmatpush1.bf16.msra.mxu1 %v22716_v1  ;;  %v22779_v1 = vld [vmem:[%s29115_s13 + $0xcc8] ss:$16 sps:$4 sm:$0xff]  }
0x2577   : > { %17220 = vmatpush1.bf16.msra.mxu0 %v22719_v24  ;;  %16893 = vmatprep.subr.bf16.mxu1 %v22724_v29  ;;  %v22784_v24 = vld [vmem:[%s29115_s13 + $0xce4] ss:$16 sps:$4 sm:$0xff]   ;;  %v22787_v29 = vld [vmem:[%s29115_s13 + $0xcec] ss:$16 sps:$4 sm:$0xff]  }
0x2578   : > { %17221 = vmatprep.subr.bf16.mxu0 %v22727_v37  ;;  %v22782_v37 = vld [vmem:[%s29115_s13 + $0xce0] ss:$16 sps:$4 sm:$0xff]  }
0x257a   : > { %16894 = vmatpush1.bf16.msra.mxu1 %v22722_v36  ;;  %v22785_v36 = vld [vmem:[%s29115_s13 + $0xce8] ss:$16 sps:$4 sm:$0xff]  }
0x257b   : > { %17222 = vmatpush1.bf16.msra.mxu0 %v22725_v50  ;;  %16895 = vmatprep.subr.bf16.mxu1 %v22730_v51  ;;  %v22793_v50 = vld [vmem:[%s29115_s13 + $0xd0c] ss:$16 sps:$4 sm:$0xff]   ;;  %v22788_v51 = vld [vmem:[%s29115_s13 + $0xd00] ss:$16 sps:$4 sm:$0xff]  }
0x257c   : > { %17223 = vmatprep.subr.bf16.mxu0 %v22733_v15  ;;  %v22791_v15 = vld [vmem:[%s29115_s13 + $0xd08] ss:$16 sps:$4 sm:$0xff]  }
0x257e   : > { %16896 = vmatpush1.bf16.msra.mxu1 %v22728_v54  ;;  %v22799_v54 = vld [vmem:[%s29115_s13 + $0xd2c] ss:$16 sps:$4 sm:$0xff]  }
0x257f   : > { %17224 = vmatpush1.bf16.msra.mxu0 %v22731_v62  ;;  %16897 = vmatprep.subr.bf16.mxu1 %v22736_v22  ;;  %v22797_v62 = vld [vmem:[%s29115_s13 + $0xd28] ss:$16 sps:$4 sm:$0xff]   ;;  %v22802_v22 = vld [vmem:[%s29115_s13 + $0xd44] ss:$16 sps:$4 sm:$0xff]  }
0x2580   : > { %17225 = vmatprep.subr.bf16.mxu0 %v22739_v41  ;;  %v22805_v41 = vld [vmem:[%s29115_s13 + $0xd4c] ss:$16 sps:$4 sm:$0xff]  }
0x2582   : > { %16898 = vmatpush1.bf16.msra.mxu1 %v22734_v61  ;;  %v22803_v61 = vld [vmem:[%s29115_s13 + $0xd48] ss:$16 sps:$4 sm:$0xff]  }
0x2583   : > { %17226 = vmatpush1.bf16.msra.mxu0 %v22737_v57  ;;  %16908 = vmatprep.subr.bf16.mxu1 %v22742_v39  ;;  %v22811_v57 = vld [vmem:[%s29115_s13 + $0xd6c] ss:$16 sps:$4 sm:$0xff]   ;;  %v22806_v39 = vld [vmem:[%s29115_s13 + $0xd60] ss:$16 sps:$4 sm:$0xff]  }
0x2584   : > { %17236 = vmatprep.subr.bf16.mxu0 %v22745_v25  ;;  %v22809_v25 = vld [vmem:[%s29115_s13 + $0xd68] ss:$16 sps:$4 sm:$0xff]  }
0x2585   : > { %16900 = vmatmul.mubr.bf16.vlgmr.msra.gmra.mrb[168].mxu1 %v13562_v33 }
0x2586   : > { %17228 = vmatmul.mubr.bf16.vlgmr.msra.gmra.mrb[184].mxu0 %v13562_v33  ;;  %16909 = vmatpush1.bf16.msra.mxu1 %v22740_v26  ;;  %v22817_v26 = vld [vmem:[%s29115_s13 + $0xd8c] ss:$16 sps:$4 sm:$0xff]   ;;  %v22812_v33 = vld [vmem:[%s29115_s13 + $0xd80] ss:$16 sps:$4 sm:$0xff]  }
0x2587   : > { %16940 = vmatprep.mubr.bf16.mxu1 %v13565_v31  ;;  %17237 = vmatpush1.bf16.msra.mxu0 %v22743_v45  ;;  %v22815_v45 = vld [vmem:[%s29115_s13 + $0xd88] ss:$16 sps:$4 sm:$0xff]  }
0x2588   : > { %17268 = vmatprep.mubr.bf16.mxu0 %v13565_v31  ;;  %16910 = vmatprep.subr.bf16.mxu1 %v22748_v3  ;;  %v22820_v3 = vld [vmem:[%s29115_s13 + $0xda4] ss:$16 sps:$4 sm:$0xff]   ;;  %v22823_v31 = vld [vmem:[%s29115_s13 + $0xdac] ss:$16 sps:$4 sm:$0xff]  }
0x2589   : > { %17238 = vmatprep.subr.bf16.mxu0 %v22751_v5  ;;  %v22818_v5 = vld [vmem:[%s29115_s13 + $0xda0] ss:$16 sps:$4 sm:$0xff]  }
0x258a   : > { %16911 = vmatpush1.bf16.msra.mxu1 %v22746_v48  ;;  %v10768_v48 = vrot.slane %v28215_v8, %v10735_v32  ;;  %v22824_v32 = vld [vmem:[%s29115_s13 + $0xdc0] ss:$16 sps:$4 sm:$0xff]  }
0x258b   : > { %17239 = vmatpush1.bf16.msra.mxu0 %v22749_v21  ;;  %16912 = vmatprep.subr.bf16.mxu1 %v22754_v6  ;;  %v22821_v21 = vld [vmem:[%s29115_s13 + $0xda8] ss:$16 sps:$4 sm:$0xff]   ;;  %v22826_v6 = vld [vmem:[%s29115_s13 + $0xdc4] ss:$16 sps:$4 sm:$0xff]  }
0x258c   : > { %17240 = vmatprep.subr.bf16.mxu0 %v22757_v7  ;;  %v22829_v7 = vld [vmem:[%s29115_s13 + $0xdcc] ss:$16 sps:$4 sm:$0xff]  }
0x258e   : > { %16913 = vmatpush1.bf16.msra.mxu1 %v22752_v38  ;;  %v10780_v38 = vrot.slane %v28215_v8, %v10747_v46  ;;  %v22835_v46 = vld [vmem:[%s29115_s13 + $0xdec] ss:$16 sps:$4 sm:$0xff]  }
0x258f   : > { %17241 = vmatpush1.bf16.msra.mxu0 %v22755_v53  ;;  %16914 = vmatprep.subr.bf16.mxu1 %v22760_v42  ;;  %v21238_v53 = vadd.f32 %v28116_v10, %v10768_v48  ;;  %v22827_v42 = vld [vmem:[%s29115_s13 + $0xdc8] ss:$16 sps:$4 sm:$0xff]   ;;  %v22830_v10 = vld [vmem:[%s29115_s13 + $0xde0] ss:$16 sps:$4 sm:$0xff]   ;;  %v22895_v48 = vld [vmem:[%s29115_s13 + $0xf2c] ss:$16 sps:$4 sm:$0xff]  }
0x2590   : > { %17242 = vmatprep.subr.bf16.mxu0 %v22763_v55  ;;  %v22832_v55 = vld [vmem:[%s29115_s13 + $0xde4] ss:$16 sps:$4 sm:$0xff]   ;;  %v21241_v8 = vadd.f32 %v28125_v43, %v10780_v38  ;;  %v22841_v43 = vld [vmem:[%s29115_s13 + $0xe0c] ss:$16 sps:$4 sm:$0xff]  }
0x2591   : > { %v22901_v38 = vld [vmem:[%s29115_s13 + $0xf4c] ss:$16 sps:$4 sm:$0xff]  }
0x2592   : > { %16915 = vmatpush1.bf16.msra.mxu1 %v22758_v11  ;;  %v13548_v11 = vmax.f32 %v21238_v53, 0.0  ;;  %v22899_v53 = vld [vmem:[%s29115_s13 + $0xf48] ss:$16 sps:$4 sm:$0xff]  }
0x2593   : > { %17243 = vmatpush1.bf16.msra.mxu0 %v22761_v12  ;;  %16916 = vmatprep.subr.bf16.mxu1 %v22766_v13  ;;  %v22833_v12 = vld [vmem:[%s29115_s13 + $0xde8] ss:$16 sps:$4 sm:$0xff]   ;;  %v22838_v13 = vld [vmem:[%s29115_s13 + $0xe04] ss:$16 sps:$4 sm:$0xff]  }
0x2594   : > { %17244 = vmatprep.subr.bf16.mxu0 %v22769_v58  ;;  %v13551_v58 = vmax.f32 %v21241_v8, 0.0  ;;  %v22905_v8 = vld [vmem:[%s29115_s13 + $0xf68] ss:$16 sps:$4 sm:$0xff]  }
0x2596   : > { %16917 = vmatpush1.bf16.msra.mxu1 %v22764_v0  ;;  %v22836_v0 = vld [vmem:[%s29115_s13 + $0xe00] ss:$16 sps:$4 sm:$0xff]  }
0x2597   : > { %17245 = vmatpush1.bf16.msra.mxu0 %v22767_v27  ;;  %16918 = vmatprep.subr.bf16.mxu1 %v22772_v17  ;;  %v13564_v27 = vpack.c.bf16 %v13548_v11, %v13548_v11  ;;  %v22839_v17 = vld [vmem:[%s29115_s13 + $0xe08] ss:$16 sps:$4 sm:$0xff]   ;;  %v22913_v11 = vld [vmem:[%s29115_s13 + $0xf8c] ss:$16 sps:$4 sm:$0xff]  }
0x2598   : > { %17246 = vmatprep.subr.bf16.mxu0 %v22775_v63  ;;  %v22844_v63 = vld [vmem:[%s29115_s13 + $0xe24] ss:$16 sps:$4 sm:$0xff]  }
0x259a   : > { %16919 = vmatpush1.bf16.msra.mxu1 %v22770_v59  ;;  %v13567_v59 = vpack.c.bf16 %v13551_v58, %v13551_v58  ;;  %v22919_v58 = vld [vmem:[%s29115_s13 + $0xfac] ss:$16 sps:$4 sm:$0xff]  }
0x259b   : > { %17247 = vmatpush1.bf16.msra.mxu0 %v22773_v44  ;;  %16920 = vmatprep.subr.bf16.mxu1 %v22778_v18  ;;  %v22847_v44 = vld [vmem:[%s29115_s13 + $0xe2c] ss:$16 sps:$4 sm:$0xff]   ;;  %v22842_v18 = vld [vmem:[%s29115_s13 + $0xe20] ss:$16 sps:$4 sm:$0xff]  }
0x259c   : > { %17248 = vmatprep.subr.bf16.mxu0 %v22781_v20  ;;  %v22845_v20 = vld [vmem:[%s29115_s13 + $0xe28] ss:$16 sps:$4 sm:$0xff]  }
0x259e   : > { %16921 = vmatpush1.bf16.msra.mxu1 %v22776_v19  ;;  %v22850_v19 = vld [vmem:[%s29115_s13 + $0xe44] ss:$16 sps:$4 sm:$0xff]  }
0x259f   : > { %17249 = vmatpush1.bf16.msra.mxu0 %v22779_v1  ;;  %16922 = vmatprep.subr.bf16.mxu1 %v22784_v24  ;;  %v22853_v1 = vld [vmem:[%s29115_s13 + $0xe4c] ss:$16 sps:$4 sm:$0xff]   ;;  %v22848_v24 = vld [vmem:[%s29115_s13 + $0xe40] ss:$16 sps:$4 sm:$0xff]  }
0x25a0   : > { %17250 = vmatprep.subr.bf16.mxu0 %v22787_v29  ;;  %v22851_v29 = vld [vmem:[%s29115_s13 + $0xe48] ss:$16 sps:$4 sm:$0xff]  }
0x25a2   : > { %16923 = vmatpush1.bf16.msra.mxu1 %v22782_v37  ;;  %v22856_v37 = vld [vmem:[%s29115_s13 + $0xe64] ss:$16 sps:$4 sm:$0xff]  }
0x25a3   : > { %17251 = vmatpush1.bf16.msra.mxu0 %v22785_v36  ;;  %16924 = vmatprep.subr.bf16.mxu1 %v22790_v47  ;;  %v22859_v36 = vld [vmem:[%s29115_s13 + $0xe6c] ss:$16 sps:$4 sm:$0xff]   ;;  %v22854_v47 = vld [vmem:[%s29115_s13 + $0xe60] ss:$16 sps:$4 sm:$0xff]  }
0x25a4   : > { %17252 = vmatprep.subr.bf16.mxu0 %v22793_v50  ;;  %v22857_v50 = vld [vmem:[%s29115_s13 + $0xe68] ss:$16 sps:$4 sm:$0xff]  }
0x25a6   : > { %16925 = vmatpush1.bf16.msra.mxu1 %v22788_v51  ;;  %v22862_v51 = vld [vmem:[%s29115_s13 + $0xe84] ss:$16 sps:$4 sm:$0xff]  }
0x25a7   : > { %17253 = vmatpush1.bf16.msra.mxu0 %v22791_v15  ;;  %16926 = vmatprep.subr.bf16.mxu1 %v22796_v40  ;;  %v22865_v15 = vld [vmem:[%s29115_s13 + $0xe8c] ss:$16 sps:$4 sm:$0xff]   ;;  %v22860_v40 = vld [vmem:[%s29115_s13 + $0xe80] ss:$16 sps:$4 sm:$0xff]  }
0x25a8   : > { %17254 = vmatprep.subr.bf16.mxu0 %v22799_v54  ;;  %v22863_v54 = vld [vmem:[%s29115_s13 + $0xe88] ss:$16 sps:$4 sm:$0xff]  }
0x25aa   : > { %16927 = vmatpush1.bf16.msra.mxu1 %v22794_v4  ;;  %v22868_v4 = vld [vmem:[%s29115_s13 + $0xea4] ss:$16 sps:$4 sm:$0xff]  }
0x25ab   : > { %17255 = vmatpush1.bf16.msra.mxu0 %v22797_v62  ;;  %16928 = vmatprep.subr.bf16.mxu1 %v22802_v22  ;;  %v22871_v62 = vld [vmem:[%s29115_s13 + $0xeac] ss:$16 sps:$4 sm:$0xff]   ;;  %v22866_v22 = vld [vmem:[%s29115_s13 + $0xea0] ss:$16 sps:$4 sm:$0xff]  }
0x25ac   : > { %17256 = vmatprep.subr.bf16.mxu0 %v22805_v41  ;;  %v22869_v41 = vld [vmem:[%s29115_s13 + $0xea8] ss:$16 sps:$4 sm:$0xff]  }
0x25ae   : > { %16929 = vmatpush1.bf16.msra.mxu1 %v22800_v52  ;;  %v22874_v52 = vld [vmem:[%s29115_s13 + $0xec4] ss:$16 sps:$4 sm:$0xff]  }
0x25af   : > { %17257 = vmatpush1.bf16.msra.mxu0 %v22803_v61  ;;  %16930 = vmatprep.subr.bf16.mxu1 %v22808_v56  ;;  %v22877_v61 = vld [vmem:[%s29115_s13 + $0xecc] ss:$16 sps:$4 sm:$0xff]   ;;  %v22872_v56 = vld [vmem:[%s29115_s13 + $0xec0] ss:$16 sps:$4 sm:$0xff]  }
0x25b0   : > { %17258 = vmatprep.subr.bf16.mxu0 %v22811_v57  ;;  %v22875_v57 = vld [vmem:[%s29115_s13 + $0xec8] ss:$16 sps:$4 sm:$0xff]  }
0x25b2   : > { %16931 = vmatpush1.bf16.msra.mxu1 %v22806_v39  ;;  %v22880_v39 = vld [vmem:[%s29115_s13 + $0xee4] ss:$16 sps:$4 sm:$0xff]  }
0x25b3   : > { %17259 = vmatpush1.bf16.msra.mxu0 %v22809_v25  ;;  %16932 = vmatprep.subr.bf16.mxu1 %v22814_v16  ;;  %v22883_v25 = vld [vmem:[%s29115_s13 + $0xeec] ss:$16 sps:$4 sm:$0xff]   ;;  %v22878_v16 = vld [vmem:[%s29115_s13 + $0xee0] ss:$16 sps:$4 sm:$0xff]  }
0x25b4   : > { %17260 = vmatprep.subr.bf16.mxu0 %v22817_v26  ;;  %v22881_v26 = vld [vmem:[%s29115_s13 + $0xee8] ss:$16 sps:$4 sm:$0xff]  }
0x25b6   : > { %16933 = vmatpush1.bf16.msra.mxu1 %v22812_v33  ;;  %v22886_v33 = vld [vmem:[%s29115_s13 + $0xf04] ss:$16 sps:$4 sm:$0xff]  }
0x25b7   : > { %17261 = vmatpush1.bf16.msra.mxu0 %v22815_v45  ;;  %16934 = vmatprep.subr.bf16.mxu1 %v22820_v3  ;;  %v22889_v45 = vld [vmem:[%s29115_s13 + $0xf0c] ss:$16 sps:$4 sm:$0xff]   ;;  %v22884_v3 = vld [vmem:[%s29115_s13 + $0xf00] ss:$16 sps:$4 sm:$0xff]  }
0x25b8   : > { %17262 = vmatprep.subr.bf16.mxu0 %v22823_v31  ;;  %v22887_v31 = vld [vmem:[%s29115_s13 + $0xf08] ss:$16 sps:$4 sm:$0xff]  }
0x25ba   : > { %16935 = vmatpush1.bf16.msra.mxu1 %v22818_v5  ;;  %v22892_v5 = vld [vmem:[%s29115_s13 + $0xf24] ss:$16 sps:$4 sm:$0xff]  }
0x25bb   : > { %17263 = vmatpush1.bf16.msra.mxu0 %v22821_v21  ;;  %16936 = vmatprep.subr.bf16.mxu1 %v22826_v6  ;;  %v22890_v21 = vld [vmem:[%s29115_s13 + $0xf20] ss:$16 sps:$4 sm:$0xff]   ;;  %v22893_v6 = vld [vmem:[%s29115_s13 + $0xf28] ss:$16 sps:$4 sm:$0xff]  }
0x25bc   : > { %17264 = vmatprep.subr.bf16.mxu0 %v22829_v7  ;;  %v22898_v7 = vld [vmem:[%s29115_s13 + $0xf44] ss:$16 sps:$4 sm:$0xff]  }
0x25be   : > { %16937 = vmatpush1.bf16.msra.mxu1 %v22824_v32  ;;  %v22896_v32 = vld [vmem:[%s29115_s13 + $0xf40] ss:$16 sps:$4 sm:$0xff]  }
0x25bf   : > { %17265 = vmatpush1.bf16.msra.mxu0 %v22827_v42  ;;  %16938 = vmatprep.subr.bf16.mxu1 %v22832_v55  ;;  %v22904_v42 = vld [vmem:[%s29115_s13 + $0xf64] ss:$16 sps:$4 sm:$0xff]   ;;  %v22907_v55 = vld [vmem:[%s29115_s13 + $0xf6c] ss:$16 sps:$4 sm:$0xff]  }
0x25c0   : > { %17266 = vmatprep.subr.bf16.mxu0 %v22835_v46  ;;  %v22902_v46 = vld [vmem:[%s29115_s13 + $0xf60] ss:$16 sps:$4 sm:$0xff]  }
0x25c2   : > { %16939 = vmatpush1.bf16.msra.mxu1 %v22830_v10  ;;  %v22910_v10 = vld [vmem:[%s29115_s13 + $0xf84] ss:$16 sps:$4 sm:$0xff]  }
0x25c3   : > { %17267 = vmatpush1.bf16.msra.mxu0 %v22833_v12  ;;  %16949 = vmatprep.subr.bf16.mxu1 %v22838_v13  ;;  %v22908_v12 = vld [vmem:[%s29115_s13 + $0xf80] ss:$16 sps:$4 sm:$0xff]   ;;  %v22911_v13 = vld [vmem:[%s29115_s13 + $0xf88] ss:$16 sps:$4 sm:$0xff]  }
0x25c4   : > { %17277 = vmatprep.subr.bf16.mxu0 %v22841_v43  ;;  %v22916_v43 = vld [vmem:[%s29115_s13 + $0xfa4] ss:$16 sps:$4 sm:$0xff]  }
0x25c5   : > { %16941 = vmatmul.mubr.bf16.vlgmr.msra.gmra.mrb[168].mxu1 %v13564_v27 }
0x25c6   : > { %17269 = vmatmul.mubr.bf16.vlgmr.msra.gmra.mrb[184].mxu0 %v13564_v27  ;;  %16950 = vmatpush1.bf16.msra.mxu1 %v22836_v0  ;;  %v22914_v0 = vld [vmem:[%s29115_s13 + $0xfa0] ss:$16 sps:$4 sm:$0xff]   ;;  %v22970_v27 = vld [vmem:[%s29114_s12 + $0x8] sm:$0xff] }
0x25c7   : > { %16981 = vmatprep.mubr.bf16.mxu1 %v13567_v59  ;;  %17278 = vmatpush1.bf16.msra.mxu0 %v22839_v17  ;;  %v10776_v17 = vrot.slane %v22970_v27, %v10743_v14 }
0x25c8   : > { %17309 = vmatprep.mubr.bf16.mxu0 %v13567_v59  ;;  %16951 = vmatprep.subr.bf16.mxu1 %v22844_v63  ;;  %v22917_v63 = vld [vmem:[%s29115_s13 + $0xfa8] ss:$16 sps:$4 sm:$0xff]   ;;  %v22922_v59 = vld [vmem:[%s29115_s13 + $0xfc4] ss:$16 sps:$4 sm:$0xff]  }
0x25c9   : > { %17279 = vmatprep.subr.bf16.mxu0 %v22847_v44  ;;  %v22925_v44 = vld [vmem:[%s29115_s13 + $0xfcc] ss:$16 sps:$4 sm:$0xff]   ;;  %v21240_v14 = vadd.f32 %v28121_v35, %v10776_v17  ;;  %v22926_v35 = vld [vmem:[%s29115_s13 + $0xfe0] ss:$16 sps:$4 sm:$0xff]  }
0x25ca   : > { %16952 = vmatpush1.bf16.msra.mxu1 %v22842_v18  ;;  %v22923_v18 = vld [vmem:[%s29115_s13 + $0xfc8] ss:$16 sps:$4 sm:$0xff]  }
0x25cb   : > { %17280 = vmatpush1.bf16.msra.mxu0 %v22845_v20  ;;  %16953 = vmatprep.subr.bf16.mxu1 %v22850_v19  ;;  %v22928_v20 = vld [vmem:[%s29115_s13 + $0xfe4] ss:$16 sps:$4 sm:$0xff]   ;;  %v22931_v19 = vld [vmem:[%s29115_s13 + $0xfec] ss:$16 sps:$4 sm:$0xff]  }
0x25cc   : > { %17281 = vmatprep.subr.bf16.mxu0 %v22853_v1  ;;  %v13550_v1 = vmax.f32 %v21240_v14, 0.0 }
0x25ce   : > { %16954 = vmatpush1.bf16.msra.mxu1 %v22848_v24  ;;  %v22929_v24 = vld [vmem:[%s29115_s13 + $0xfe8] ss:$16 sps:$4 sm:$0xff]  }
0x25cf   : > { %17282 = vmatpush1.bf16.msra.mxu0 %v22851_v29  ;;  %16955 = vmatprep.subr.bf16.mxu1 %v22856_v37  ;;  %v13566_v29 = vpack.c.bf16 %v13550_v1, %v13550_v1  ;;  %v14080_v37 = vld [vmem:[%s29116_s14] sm:$0xf] }
0x25d0   : > { %17283 = vmatprep.subr.bf16.mxu0 %v22859_v36  ;;  %v14085_v36 = vrot.slane %v14080_v37, %v26029_v9  ;;  %v17342_v1 = vld [vmem:[%s29118_s16] sm:$0xf] }
0x25d2   : > { %16956 = vmatpush1.bf16.msra.mxu1 %v22854_v47  ;;  %v14093_v47 = vrot.slane %v14080_v37, %v26042_v60 }
0x25d3   : > { %17284 = vmatpush1.bf16.msra.mxu0 %v22857_v50  ;;  %16957 = vmatprep.subr.bf16.mxu1 %v22862_v51  ;;  %v14089_v50 = vrot.slane %v14080_v37, %v26035_v30  ;;  %v14097_v51 = vrot.slane %v14080_v37, %v26045_v49 }
0x25d4   : > { %17285 = vmatprep.subr.bf16.mxu0 %v22865_v15 }
0x25d6   : > { %16958 = vmatpush1.bf16.msra.mxu1 %v22860_v40 }
0x25d7   : > { %17286 = vmatpush1.bf16.msra.mxu0 %v22863_v54  ;;  %16959 = vmatprep.subr.bf16.mxu1 %v22868_v4 }
0x25d8   : > { %17287 = vmatprep.subr.bf16.mxu0 %v22871_v62 }
0x25da   : > { %16960 = vmatpush1.bf16.msra.mxu1 %v22866_v22 }
0x25db   : > { %17288 = vmatpush1.bf16.msra.mxu0 %v22869_v41  ;;  %16961 = vmatprep.subr.bf16.mxu1 %v22874_v52 }
0x25dc   : > { %17289 = vmatprep.subr.bf16.mxu0 %v22877_v61 }
0x25de   : > { %16962 = vmatpush1.bf16.msra.mxu1 %v22872_v56 }
0x25df   : > { %17290 = vmatpush1.bf16.msra.mxu0 %v22875_v57  ;;  %16963 = vmatprep.subr.bf16.mxu1 %v22880_v39 }
0x25e0   : > { %17291 = vmatprep.subr.bf16.mxu0 %v22883_v25 }
0x25e2   : > { %16964 = vmatpush1.bf16.msra.mxu1 %v22878_v16 }
0x25e3   : > { %17292 = vmatpush1.bf16.msra.mxu0 %v22881_v26  ;;  %16965 = vmatprep.subr.bf16.mxu1 %v22886_v33 }
0x25e4   : > { %17293 = vmatprep.subr.bf16.mxu0 %v22889_v45 }
0x25e6   : > { %16966 = vmatpush1.bf16.msra.mxu1 %v22884_v3 }
0x25e7   : > { %17294 = vmatpush1.bf16.msra.mxu0 %v22887_v31  ;;  %16967 = vmatprep.subr.bf16.mxu1 %v22892_v5 }
0x25e8   : > { %17295 = vmatprep.subr.bf16.mxu0 %v22895_v48 }
0x25ea   : > { %16968 = vmatpush1.bf16.msra.mxu1 %v22890_v21 }
0x25eb   : > { %17296 = vmatpush1.bf16.msra.mxu0 %v22893_v6  ;;  %16969 = vmatprep.subr.bf16.mxu1 %v22898_v7 }
0x25ec   : > { %17297 = vmatprep.subr.bf16.mxu0 %v22901_v38 }
0x25ee   : > { %16970 = vmatpush1.bf16.msra.mxu1 %v22896_v32 }
0x25ef   : > { %17298 = vmatpush1.bf16.msra.mxu0 %v22899_v53  ;;  %16971 = vmatprep.subr.bf16.mxu1 %v22904_v42 }
0x25f0   : > { %17299 = vmatprep.subr.bf16.mxu0 %v22907_v55 }
0x25f2   : > { %16972 = vmatpush1.bf16.msra.mxu1 %v22902_v46 }
0x25f3   : > { %17300 = vmatpush1.bf16.msra.mxu0 %v22905_v8  ;;  %16973 = vmatprep.subr.bf16.mxu1 %v22910_v10 }
0x25f4   : > { %17301 = vmatprep.subr.bf16.mxu0 %v22913_v11 }
0x25f6   : > { %16974 = vmatpush1.bf16.msra.mxu1 %v22908_v12 }
0x25f7   : > { %17302 = vmatpush1.bf16.msra.mxu0 %v22911_v13  ;;  %16975 = vmatprep.subr.bf16.mxu1 %v22916_v43 }
0x25f8   : > { %17303 = vmatprep.subr.bf16.mxu0 %v22919_v58 }
0x25fa   : > { %16976 = vmatpush1.bf16.msra.mxu1 %v22914_v0 }
0x25fb   : > { %17304 = vmatpush1.bf16.msra.mxu0 %v22917_v63  ;;  %16977 = vmatprep.subr.bf16.mxu1 %v22922_v59 }
0x25fc   : > { %17305 = vmatprep.subr.bf16.mxu0 %v22925_v44 }
0x25fe   : > { %16978 = vmatpush1.bf16.msra.mxu1 %v22920_v23 }
0x25ff   : > { %17306 = vmatpush1.bf16.msra.mxu0 %v22923_v18  ;;  %16979 = vmatprep.subr.bf16.mxu1 %v22928_v20 }
0x2600   : > { %17307 = vmatprep.subr.bf16.mxu0 %v22931_v19  ;;  %v17341_v19 = vld [vmem:[%s29117_s15] sm:$0xf] }
0x2601   : > { %v17438_v37 = vrot.slane %v17341_v19, %v26035_v30 }
0x2602   : > { %16980 = vmatpush1.bf16.msra.mxu1 %v22926_v35 }
0x2603   : > { %17308 = vmatpush1.bf16.msra.mxu0 %v22929_v24 }
0x2605   : > { %16982 = vmatmul.mubr.bf16.vlgmr.msra.gmra.mrb[168].mxu1 %v13566_v29 }
0x2606   : > { %17310 = vmatmul.mubr.bf16.vlgmr.msra.gmra.mrb[184].mxu0 %v13566_v29  ;;  %v17434_v29 = vrot.slane %v17341_v19, %v26029_v9 }
0x26d8   : > { %v16983_v15 = vpop.f32.mrb[168].mxu1 }
0x26d9   : > { %v21242_v40 = vadd.f32 %v16983_v15, %v14085_v36  ;;  %v17311_v54 = vpop.f32.mrb[184].mxu0  ;;  %v16985_v4 = vpop.f32.mrb[169].mxu1  ;;  %v17442_v36 = vrot.slane %v17341_v19, %v26042_v60  ;;  %v17478_v15 = vrot.slane %v17342_v1, %v26042_v60 }
0x26da   : > { %v21244_v62 = vadd.f32 %v17311_v54, %v14093_v47  ;;  %v21243_v22 = vadd.f32 %v16985_v4, %v14089_v50  ;;  %v17313_v41 = vpop.f32.mrb[185].mxu0  ;;  %v16987_v52 = vpop.f32.mrb[170].mxu1  ;;  %v17446_v47 = vrot.slane %v17341_v19, %v26045_v49  ;;  %v17470_v50 = vrot.slane %v17342_v1, %v26029_v9 }
0x26db   : > { %v21245_v61 = vadd.f32 %v17313_v41, %v14097_v51  ;;  %v17315_v56 = vpop.f32.mrb[186].mxu0  ;;  %v16988_v57 = vpop.f32.mrb[171].mxu1  ;;  %v17474_v51 = vrot.slane %v17342_v1, %v26035_v30  ;;  %v17447_v54 = vcombine.low %v17434_v29, %v17438_v37 }
0x26dc   : > { %v17322_v39 = vcombine.low %v21242_v40, %v21243_v22  ;;  %v17316_v25 = vpop.f32.mrb[187].mxu0  ;;  %v17482_v40 = vrot.slane %v17342_v1, %v26045_v49  ;;  %v17448_v4 = vcombine.low %v17442_v36, %v17446_v47 }
0x26dd   : > { %v17323_v16 = vcombine.low %v21244_v62, %v21245_v61  ;;  %v17483_v62 = vcombine.low %v17470_v50, %v17474_v51  ;;  %v17455_v41 = vrot.slane %v17447_v54, %v23186_v34 }
0x26de   : > { %v17330_v26 = vrot.slane %v17322_v39, %v23186_v34  ;;  %v17484_v22 = vcombine.low %v17478_v15, %v17482_v40  ;;  %v17462_v52 = vrot.slane %v17448_v4, %v23186_v34 }
0x26df   : > { %v17337_v33 = vrot.slane %v17323_v16, %v23186_v34  ;;  %v17491_v61 = vrot.slane %v17483_v62, %v23186_v34 }
0x26e0   : > { %v17498_v9 = vrot.slane %v17484_v22, %v23186_v34  ;;  %v17463_v30 = vcombine.low %v17455_v41, %v17462_v52 }
0x26e1   : > { %v17338_v45 = vcombine.low %v17330_v26, %v17337_v33 }
0x26e2   : > { %v17499_v49 = vcombine.low %v17491_v61, %v17498_v9 }
0x26e3   : > { %v17340_v3 = vadd.f32 %v17338_v45, %v26304_v2 }
0x26e5   : > { %v17344_v31 = vcombine.high %v17340_v3, %v17340_v3  ;;  %v17351_v5 = vrot.slane %v17340_v3, %v23186_v34 }
0x26e7   : > { %v17358_v48 = vrot.slane %v17344_v31, %v23186_v34  ;;  %v17359_v21 = vcombine.high %v17351_v5, %v17351_v5  ;;  %v17365_v7 = vsel %vm10131_vm6, %v17351_v5, 0.0 }
0x26e9   : > { %v17360_v6 = vcombine.high %v17358_v48, %v17358_v48  ;;  %v17366_v38 = vsel %vm10131_vm6, %v17359_v21, 0.0  ;;  %v17368_v53 = vsel %vm10131_vm6, %v17358_v48, 0.0 }
0x26ea   : > { %v17367_v32 = vadd.f32 %v17366_v38, %v17365_v7 }
0x26eb   : > { %v17370_v55 = vsel %vm10137_vm7, %v17360_v6, 0.0 }
0x26ec   : > { %v17369_v42 = vadd.f32 %v17368_v53, %v17367_v32 }
0x26ee   : > { %v17371_v46 = vadd.f32 %v17370_v55, %v17369_v42 }
0x26f0   : > { %17372 = vadd.xlane.f32.xlu0 %v17371_v46 }
0x277d   : > { %v17373_v2 = vpop.xlane.xlu0 %17372 }
0x277e   : > { %v17374_v8 = vmul.f32 0.0024038462, %v17373_v2 }
0x2780   : > { %v17382_v10 = vrot.slane %v17374_v8, %v26174_v28 }
0x2782   : > { %v17384_v11 = vsub.f32 %v17340_v3, %v17382_v10 }
0x2784   : > { %v17385_v12 = vmul.f32 %v17384_v11, %v17384_v11 }
0x2786   : > { %v17387_v13 = vcombine.high %v17385_v12, %v17385_v12  ;;  %v17394_v43 = vrot.slane %v17385_v12, %v23186_v34 }
0x2788   : > { %v17401_v58 = vrot.slane %v17387_v13, %v23186_v34  ;;  %v17402_v0 = vcombine.high %v17394_v43, %v17394_v43  ;;  %v17408_v17 = vsel %vm10131_vm6, %v17394_v43, 0.0 }
0x278a   : > { %v17403_v27 = vcombine.high %v17401_v58, %v17401_v58  ;;  %v17409_v63 = vsel %vm10131_vm6, %v17402_v0, 0.0  ;;  %v17411_v44 = vsel %vm10131_vm6, %v17401_v58, 0.0 }
0x278b   : > { %v17410_v59 = vadd.f32 %v17409_v63, %v17408_v17 }
0x278c   : > { %v17413_v14 = vsel %vm10137_vm7, %v17403_v27, 0.0 }
0x278d   : > { %v17412_v23 = vadd.f32 %v17411_v44, %v17410_v59 }
0x278f   : > { %v17414_v18 = vadd.f32 %v17413_v14, %v17412_v23 }
0x2791   : > { %17415 = vadd.xlane.f32.xlu1 %v17414_v18 }
0x281e   : > { %v17416_v20 = vpop.xlane.xlu1 %17415 }
0x281f   : > { %v17417_v35 = vmul.f32 0.0024038462, %v17416_v20 }
0x2821   : > { %v17418_v24 = vadd.f32 1e-05, %v17417_v35 }
0x2823   : > { %22966 = vrsqrt.f32 %v17418_v24 }
0x282d   : > { %v22967_v56 = vpop.eup %22966 }
0x282e   : > { %v17427_v60 = vrot.slane %v22967_v56, %v26174_v28 }
0x2830   : > { %v17429_v57 = vmul.f32 %v17427_v60, %v17384_v11 }
0x2832   : > { %v17465_v39 = vmul.f32 %v17463_v30, %v17429_v57 }
0x2834   : > { %v17501_v25 = vadd.f32 %v17499_v49, %v17465_v39 }
0x2836   : > { %17508 = vst.msk [vmem:[%s548_s1] sm:$0xff] %vm17507_vm13, %v17501_v25 }
0x2837 PF: > { %s27_s24 = sadd.s32 1, %s22977_s24  }
0x2838   : > { %p24_p4 = scmp.ge.s32.totalorder %s27_s24, 6  }
0x283a   :  { %26 = sbr.rel (!%p24_p4) target bundleno = 3 (0x3), region = 167 }

</bundles_post_ra>
